<compile_context>
chip_gen: v6e
topology: v6e:2x2x1
jax: 0.10.0
libtpu: 0.0.40
codegen_flags: <defaults>
</compile_context>

<pallas_src>
import functools

import jax
import jax.numpy as jnp
from jax.experimental import pallas as pl
from jax.experimental.pallas import tpu as pltpu

LANE = 128
VMEM_LIMIT = 48 * 1024 * 1024   # fits v7x (64 MiB/TC) as well as v5e/v6e (128 MiB)

# Matmul operand dtype for the MXU.  f32 keeps parity with the f32 reference in
# the self-test; switch to jnp.bfloat16 on v6e/v7x for ~2x MXU throughput and
# half the DMA bytes (accumulation stays f32 via preferred_element_type; loosen
# the test tolerance accordingly).
MATMUL_DTYPE = jnp.float32


def _silu(x):
    return x * (1.0 / (1.0 + jnp.exp(-x)))


def _round_up(x, m):
    return (x + m - 1) // m * m


def _pad2d(a, rows, cols):
    return jnp.pad(a, ((0, rows - a.shape[0]), (0, cols - a.shape[1])))


# --------------- fused cv1+cv2: 1x1 conv, one matmul, two outputs ------------

def _pw_dual_out_kernel(x_ref, w_ref, b_ref, oa_ref, ob_ref):
    acc = jnp.dot(x_ref[...].astype(MATMUL_DTYPE),
                  w_ref[...].astype(MATMUL_DTYPE),
                  preferred_element_type=jnp.float32)
    y = _silu(acc + b_ref[...])
    cp = oa_ref.shape[-1]
    oa_ref[...] = y[:, :cp].astype(oa_ref.dtype)
    ob_ref[...] = y[:, cp:].astype(ob_ref.dtype)


def pw_dual_out(x2d, w, b, cp, tile_m=512):
    """x2d: (M, Cin); w: (Cin, 2*cp); b: (1, 2*cp).  Returns two (M, cp) maps."""
    M, Cin = x2d.shape
    Cout2 = w.shape[1]
    Mp = _round_up(M, tile_m)
    if Mp != M:
        x2d = jnp.pad(x2d, ((0, Mp - M), (0, 0)))
    a, bk = pl.pallas_call(
        _pw_dual_out_kernel,
        out_shape=(jax.ShapeDtypeStruct((Mp, cp), x2d.dtype),
                   jax.ShapeDtypeStruct((Mp, cp), x2d.dtype)),
        grid_spec=pltpu.PrefetchScalarGridSpec(
            num_scalar_prefetch=0,
            grid=(Mp // tile_m,),
            in_specs=[
                pl.BlockSpec((tile_m, Cin), lambda i: (i, 0)),
                pl.BlockSpec((Cin, Cout2), lambda i: (0, 0)),
                pl.BlockSpec((1, Cout2), lambda i: (0, 0)),
            ],
            out_specs=(pl.BlockSpec((tile_m, cp), lambda i: (i, 0)),
                       pl.BlockSpec((tile_m, cp), lambda i: (i, 0))),
        ),
        compiler_params=pltpu.CompilerParams(
            dimension_semantics=("parallel",),
            vmem_limit_bytes=VMEM_LIMIT),
    )(x2d, w, b)
    if Mp != M:
        a, bk = a[:M], bk[:M]
    return a, bk


# --------------- fused concat+cv3: dual-input 1x1 conv -----------------------

def _pw_dual_in_kernel(a_ref, h_ref, wa_ref, wh_ref, b_ref, o_ref):
    acc = jnp.dot(a_ref[...].astype(MATMUL_DTYPE),
                  wa_ref[...].astype(MATMUL_DTYPE),
                  preferred_element_type=jnp.float32)
    acc = acc + jnp.dot(h_ref[...].astype(MATMUL_DTYPE),
                        wh_ref[...].astype(MATMUL_DTYPE),
                        preferred_element_type=jnp.float32)
    o_ref[...] = _silu(acc + b_ref[...]).astype(o_ref.dtype)


def pw_dual_in(a2d, h2d, wa, wh, b, tile_m=512):
    """silu(a2d @ wa + h2d @ wh + b)  ==  silu(concat([a,h]) @ [wa;wh] + b)."""
    M, Cin = a2d.shape
    Cout = wa.shape[1]
    Mp = _round_up(M, tile_m)
    if Mp != M:
        a2d = jnp.pad(a2d, ((0, Mp - M), (0, 0)))
        h2d = jnp.pad(h2d, ((0, Mp - M), (0, 0)))
    out = pl.pallas_call(
        _pw_dual_in_kernel,
        out_shape=jax.ShapeDtypeStruct((Mp, Cout), a2d.dtype),
        grid_spec=pltpu.PrefetchScalarGridSpec(
            num_scalar_prefetch=0,
            grid=(Mp // tile_m,),
            in_specs=[
                pl.BlockSpec((tile_m, Cin), lambda i: (i, 0)),
                pl.BlockSpec((tile_m, Cin), lambda i: (i, 0)),
                pl.BlockSpec((Cin, Cout), lambda i: (0, 0)),
                pl.BlockSpec((Cin, Cout), lambda i: (0, 0)),
                pl.BlockSpec((1, Cout), lambda i: (0, 0)),
            ],
            out_specs=pl.BlockSpec((tile_m, Cout), lambda i: (i, 0)),
        ),
        compiler_params=pltpu.CompilerParams(
            dimension_semantics=("parallel",),
            vmem_limit_bytes=VMEM_LIMIT),
    )(a2d, h2d, wa, wh, b)
    return out[:M] if Mp != M else out


# ----- 3x3 conv (pad=1) + bias + SiLU (+ residual), row-band spatial tiling --

def _conv3x3_body(xb_ref, w_ref, b_ref, *, th, W, Cin):
    band = xb_ref[0]                                  # (th+2, W+2, Cin)
    taps = []
    for dy in range(3):
        for dx in range(3):
            taps.append(band[dy:dy + th, dx:dx + W, :].reshape(th * W, Cin))
    patches = jnp.concatenate(taps, axis=-1)          # (th*W, 9*Cin) im2col
    acc = jnp.dot(patches.astype(MATMUL_DTYPE),
                  w_ref[...].astype(MATMUL_DTYPE),    # (9*Cin, Cout)
                  preferred_element_type=jnp.float32)
    return _silu(acc + b_ref[...])


def _conv3x3_kernel(xb_ref, w_ref, b_ref, o_ref, *, th, W, Cin):
    y = _conv3x3_body(xb_ref, w_ref, b_ref, th=th, W=W, Cin=Cin)
    o_ref[...] = y.astype(o_ref.dtype)


def _conv3x3_res_kernel(xb_ref, res_ref, w_ref, b_ref, o_ref, *, th, W, Cin):
    y = _conv3x3_body(xb_ref, w_ref, b_ref, th=th, W=W, Cin=Cin)
    o_ref[...] = (y + res_ref[...].astype(jnp.float32)).astype(o_ref.dtype)


def _pick_row_tile(H, W, Cin, target):
    th = max(1, min(H, target))
    # keep the f32 halo band small so double-buffered inputs + the in-VMEM
    # im2col intermediate stay well within the VMEM budget (v7x: 64 MiB total)
    while th > 1 and (th + 2) * (W + 2) * Cin * 4 > (2 << 20):
        th -= 1
    while H % th:
        th -= 1
    return th


def conv3x3_silu(x, w9, b, residual=None, row_tile=8):
    """x: (N,H,W,Cin); w9: (9*Cin, Cout); b: (1, Cout); residual: (N,H,W,Cout)|None."""
    N, H, W, Cin = x.shape
    Cout = w9.shape[1]
    th = _pick_row_tile(H, W, Cin, row_tile)
    nT = H // th
    M = N * H * W

    # Row bands with a 1-pixel halo (overlapping windows built at the wrapper).
    xp = jnp.pad(x, ((0, 0), (1, 1), (1, 1), (0, 0)))
    idx = jnp.arange(nT)[:, None] * th + jnp.arange(th + 2)[None, :]
    bands = xp[:, idx].reshape(N * nT, th + 2, W + 2, Cin)

    common = dict(th=th, W=W, Cin=Cin)
    in_specs = [pl.BlockSpec((1, th + 2, W + 2, Cin), lambda g: (g, 0, 0, 0))]
    args = [bands]
    if residual is None:
        kernel = functools.partial(_conv3x3_kernel, **common)
    else:
        kernel = functools.partial(_conv3x3_res_kernel, **common)
        in_specs.append(pl.BlockSpec((th * W, Cout), lambda g: (g, 0)))
        args.append(residual.reshape(M, Cout))
    in_specs += [
        pl.BlockSpec((9 * Cin, Cout), lambda g: (0, 0)),
        pl.BlockSpec((1, Cout), lambda g: (0, 0)),
    ]
    args += [w9, b]

    out = pl.pallas_call(
        kernel,
        out_shape=jax.ShapeDtypeStruct((M, Cout), x.dtype),
        grid_spec=pltpu.PrefetchScalarGridSpec(
            num_scalar_prefetch=0,
            grid=(N * nT,),
            in_specs=in_specs,
            out_specs=pl.BlockSpec((th * W, Cout), lambda g: (g, 0)),
        ),
        compiler_params=pltpu.CompilerParams(
            dimension_semantics=("parallel",),
            vmem_limit_bytes=VMEM_LIMIT),
    )(*args)
    return out.reshape(N, H, W, Cout)


# ---------------------- parameter init (BN folded) ---------------------------

def init_cbs(key, cin, cout, k):
    kw, kg, kb, km, kv = jax.random.split(key, 5)
    w = 0.1 * jax.random.normal(kw, (k, k, cin, cout), jnp.float32)
    gamma = 1.0 + 0.1 * jax.random.normal(kg, (cout,), jnp.float32)
    beta = 0.1 * jax.random.normal(kb, (cout,), jnp.float32)
    mean = 0.1 * jax.random.normal(km, (cout,), jnp.float32)
    var = 1.0 + 0.1 * jnp.abs(jax.random.normal(kv, (cout,), jnp.float32))
    scale = gamma / jnp.sqrt(var + 1e-5)          # BN(eval) folded into conv
    w_eff = w * scale                             # broadcast over Cout (last axis)
    b_eff = (beta - mean * scale).reshape(1, cout)
    return w_eff, b_eff


def init_params(key, c1, c2, n=1, e=0.5):
    c_ = int(c2 * e)
    keys = jax.random.split(key, 3 + 2 * n)
    params = {
        "cv1": init_cbs(keys[0], c1, c_, 1),
        "cv2": init_cbs(keys[1], c1, c_, 1),
        "cv3": init_cbs(keys[2], 2 * c_, c2, 1),
        "m": [],
    }
    for i in range(n):
        w1, b1 = init_cbs(keys[3 + 2 * i], c_, c_, 3)
        w2, b2 = init_cbs(keys[4 + 2 * i], c_, c_, 3)
        params["m"].append(dict(w1=w1, b1=b1, w2=w2, b2=b2))
    return params


def _prepare_params(params, c1):
    """Fuse cv1+cv2, split cv3, and zero-pad all channel dims to 128 lanes."""
    w1 = params["cv1"][0][0, 0]; b1 = params["cv1"][1]
    w2 = params["cv2"][0][0, 0]; b2 = params["cv2"][1]
    w3 = params["cv3"][0][0, 0]; b3 = params["cv3"][1]
    c_ = w1.shape[1]
    c2 = w3.shape[1]
    C1p = _round_up(c1, LANE)
    Cp = _round_up(c_, LANE)
    C2p = _round_up(c2, LANE)

    w12 = jnp.concatenate([_pad2d(w1, C1p, Cp), _pad2d(w2, C1p, Cp)], axis=1)
    b12 = jnp.concatenate([_pad2d(b1, 1, Cp), _pad2d(b2, 1, Cp)], axis=1)
    w3t = _pad2d(w3[:c_], Cp, C2p)
    w3b = _pad2d(w3[c_:], Cp, C2p)
    b3p = _pad2d(b3, 1, C2p)

    mblocks = []
    for blk in params["m"]:
        wA = jnp.pad(blk["w1"], ((0, 0), (0, 0), (0, Cp - c_), (0, Cp - c_)))
        wB = jnp.pad(blk["w2"], ((0, 0), (0, 0), (0, Cp - c_), (0, Cp - c_)))
        mblocks.append((wA.reshape(9 * Cp, Cp), _pad2d(blk["b1"], 1, Cp),
                        wB.reshape(9 * Cp, Cp), _pad2d(blk["b2"], 1, Cp)))
    return dict(c_=c_, c2=c2, C1p=C1p, Cp=Cp, C2p=C2p,
                w12=w12, b12=b12, w3t=w3t, w3b=w3b, b3=b3p, m=mblocks)


# ------------------------------ forward passes -------------------------------

def c3k_forward_pallas(x_nchw, params, row_tile=8, tile_m=512):
    x = jnp.transpose(x_nchw, (0, 2, 3, 1))           # NCHW -> NHWC
    N, H, W, c1 = x.shape
    pp = _prepare_params(params, c1)
    Cp, c2 = pp["Cp"], pp["c2"]
    M = N * H * W

    x2d = x.reshape(M, c1)
    if pp["C1p"] != c1:
        x2d = jnp.pad(x2d, ((0, 0), (0, pp["C1p"] - c1)))

    # cv1 (m-branch input) and cv2 (skip branch) in one fused matmul over x.
    a2d, b2d = pw_dual_out(x2d, pp["w12"], pp["b12"], Cp, tile_m=tile_m)

    h = a2d.reshape(N, H, W, Cp)
    for (wA, bA, wB, bB) in pp["m"]:                  # BottleNeck(k=(3,3), e=1.0)
        t = conv3x3_silu(h, wA, bA, row_tile=row_tile)
        h = conv3x3_silu(t, wB, bB, residual=h, row_tile=row_tile)  # shortcut add

    # cv3 on the (never-materialized) concat of skip branch and m-branch.
    y2d = pw_dual_in(b2d, h.reshape(M, Cp), pp["w3t"], pp["w3b"], pp["b3"],
                     tile_m=tile_m)
    y = y2d[:, :c2].reshape(N, H, W, c2)
    return jnp.transpose(y, (0, 3, 1, 2))             # NHWC -> NCHW


def _cbs_ref(x, w, b):
    y = jax.lax.conv_general_dilated(
        x, w, window_strides=(1, 1), padding="SAME",
        dimension_numbers=("NHWC", "HWIO", "NHWC"))
    y = y + b.reshape(1, 1, 1, -1)
    return y * jax.nn.sigmoid(y)


def c3k_forward_ref(x_nchw, params):
    x = jnp.transpose(x_nchw, (0, 2, 3, 1))
    a = _cbs_ref(x, *params["cv1"])
    b = _cbs_ref(x, *params["cv2"])
    h = a
    for blk in params["m"]:
        t = _cbs_ref(h, blk["w1"], blk["b1"])
        h = _cbs_ref(t, blk["w2"], blk["b2"]) + h
    cat = jnp.concatenate([b, h], axis=-1)
    y = _cbs_ref(cat, *params["cv3"])
    return jnp.transpose(y, (0, 3, 1, 2))


if __name__ == "__main__":
    key = jax.random.PRNGKey(0)
    kx, kp = jax.random.split(key)

    c1, c2, n = 4, 4, 1
    x = jax.random.normal(kx, (2, c1, 16, 16), jnp.float32)     # NCHW, like PyTorch
    params = init_params(kp, c1, c2, n=n, e=0.5)

    fwd = jax.jit(c3k_forward_pallas)
    out = jax.block_until_ready(fwd(x, params))
    ref = jax.block_until_ready(c3k_forward_ref(x, params))

    assert out.shape == (2, c2, 16, 16), out.shape
    assert jnp.allclose(out, ref, atol=2e-4, rtol=2e-4), \
        float(jnp.max(jnp.abs(out - ref)))
    print("KERNEL_OK")
</pallas_src>

<mosaic_0001>
module attributes {stable_mosaic.version = 11 : i64} {
  func.func @_pw_dual_out_kernel(%arg0: i32, %arg1: memref<512x128xf32, #tpu.memory_space<vmem>>, %arg2: memref<128x256xf32, #tpu.memory_space<vmem>>, %arg3: memref<1x256xf32, #tpu.memory_space<vmem>>, %arg4: memref<512x128xf32, #tpu.memory_space<vmem>>, %arg5: memref<512x128xf32, #tpu.memory_space<vmem>>) attributes {dimension_semantics = [#tpu.dimension_semantics<parallel>], iteration_bounds = array<i64: 1>, scalar_prefetch = 0 : i64, scratch_operands = 0 : i64, tpu.core_type = #tpu.core_type<tc>, window_params = [{transform_indices = @transform_0, window_bounds = array<i64: 512, 128>}, {pipeline_mode = #tpu.pipeline_mode<synchronous>, transform_indices = @transform_1, window_bounds = array<i64: 128, 256>}, {pipeline_mode = #tpu.pipeline_mode<synchronous>, transform_indices = @transform_2, window_bounds = array<i64: 1, 256>}, {transform_indices = @transform_3, window_bounds = array<i64: 512, 128>}, {transform_indices = @transform_4, window_bounds = array<i64: 512, 128>}]} {
    %c0 = arith.constant 0 : index
    %c0_0 = arith.constant 0 : index
    %0 = vector.load %arg1[%c0, %c0_0] : memref<512x128xf32, #tpu.memory_space<vmem>>, vector<512x128xf32>
    %c0_1 = arith.constant 0 : index
    %c0_2 = arith.constant 0 : index
    %1 = vector.load %arg2[%c0_1, %c0_2] : memref<128x256xf32, #tpu.memory_space<vmem>>, vector<128x256xf32>
    %cst = arith.constant dense<0.000000e+00> : vector<512x256xf32>
    %2 = tpu.matmul %0, %1, %cst {dimension_numbers = #tpu.dot_dimension_numbers<[1], [0], [0], [1], [0, 0, 1, 1], [], []>} : vector<512x128xf32>, vector<128x256xf32>, vector<512x256xf32> -> vector<512x256xf32>
    %c0_3 = arith.constant 0 : index
    %c0_4 = arith.constant 0 : index
    %3 = vector.load %arg3[%c0_3, %c0_4] : memref<1x256xf32, #tpu.memory_space<vmem>>, vector<1x256xf32>
    %4 = vector.broadcast %3 : vector<1x256xf32> to vector<512x256xf32>
    %5 = arith.addf %2, %4 : vector<512x256xf32>
    %cst_5 = arith.constant 0.000000e+00 : f32
    %6 = vector.broadcast %cst_5 : f32 to vector<512x256xf32>
    %7 = arith.subf %6, %5 : vector<512x256xf32>
    %8 = math.exp %7 : vector<512x256xf32>
    %cst_6 = arith.constant 1.000000e+00 : f32
    %9 = vector.broadcast %cst_6 : f32 to vector<512x256xf32>
    %10 = arith.addf %9, %8 : vector<512x256xf32>
    %cst_7 = arith.constant 1.000000e+00 : f32
    %11 = vector.broadcast %cst_7 : f32 to vector<512x256xf32>
    %12 = arith.divf %11, %10 : vector<512x256xf32>
    %13 = arith.mulf %5, %12 : vector<512x256xf32>
    %14 = vector.extract_strided_slice %13 {offsets = [0, 0], sizes = [512, 128], strides = [1, 1]} : vector<512x256xf32> to vector<512x128xf32>
    %c0_8 = arith.constant 0 : index
    %c0_9 = arith.constant 0 : index
    %15 = vector.load %arg4[%c0_8, %c0_9] : memref<512x128xf32, #tpu.memory_space<vmem>>, vector<512x128xf32>
    tpu.vector_store %arg4[%c0_8, %c0_9], %14 {strides = array<i32>} : memref<512x128xf32, #tpu.memory_space<vmem>>, vector<512x128xf32>,
    %16 = vector.extract_strided_slice %13 {offsets = [0, 128], sizes = [512, 128], strides = [1, 1]} : vector<512x256xf32> to vector<512x128xf32>
    %c0_10 = arith.constant 0 : index
    %c0_11 = arith.constant 0 : index
    %17 = vector.load %arg5[%c0_10, %c0_11] : memref<512x128xf32, #tpu.memory_space<vmem>>, vector<512x128xf32>
    tpu.vector_store %arg5[%c0_10, %c0_11], %16 {strides = array<i32>} : memref<512x128xf32, #tpu.memory_space<vmem>>, vector<512x128xf32>,
    return
  }
  func.func @transform_0(%arg0: i32) -> (i32, i32) {
    %c0_i32 = arith.constant 0 : i32
    %c0_i32_0 = arith.constant 0 : i32
    return %arg0, %c0_i32 : i32, i32
  }
  func.func @transform_1(%arg0: i32) -> (i32, i32) {
    %c0_i32 = arith.constant 0 : i32
    %c0_i32_0 = arith.constant 0 : i32
    %c0_i32_1 = arith.constant 0 : i32
    return %c0_i32, %c0_i32_0 : i32, i32
  }
  func.func @transform_2(%arg0: i32) -> (i32, i32) {
    %c0_i32 = arith.constant 0 : i32
    %c0_i32_0 = arith.constant 0 : i32
    %c0_i32_1 = arith.constant 0 : i32
    return %c0_i32, %c0_i32_0 : i32, i32
  }
  func.func @transform_3(%arg0: i32) -> (i32, i32) {
    %c0_i32 = arith.constant 0 : i32
    %c0_i32_0 = arith.constant 0 : i32
    return %arg0, %c0_i32 : i32, i32
  }
  func.func @transform_4(%arg0: i32) -> (i32, i32) {
    %c0_i32 = arith.constant 0 : i32
    %c0_i32_0 = arith.constant 0 : i32
    return %arg0, %c0_i32 : i32, i32
  }
}

module attributes {stable_mosaic.version = 11 : i64} {
  func.func @_conv3x3_res_kernel(%arg0: i32, %arg1: memref<1x10x18x128xf32, #tpu.memory_space<vmem>>, %arg2: memref<128x128xf32, #tpu.memory_space<vmem>>, %arg3: memref<1152x128xf32, #tpu.memory_space<vmem>>, %arg4: memref<1x128xf32, #tpu.memory_space<vmem>>, %arg5: memref<128x128xf32, #tpu.memory_space<vmem>>) attributes {dimension_semantics = [#tpu.dimension_semantics<parallel>], iteration_bounds = array<i64: 4>, scalar_prefetch = 0 : i64, scratch_operands = 0 : i64, tpu.core_type = #tpu.core_type<tc>, window_params = [{transform_indices = @transform_0, window_bounds = array<i64: 1, 10, 18, 128>}, {transform_indices = @transform_1, window_bounds = array<i64: 128, 128>}, {pipeline_mode = #tpu.pipeline_mode<synchronous>, transform_indices = @transform_2, window_bounds = array<i64: 1152, 128>}, {pipeline_mode = #tpu.pipeline_mode<synchronous>, transform_indices = @transform_3, window_bounds = array<i64: 1, 128>}, {transform_indices = @transform_4, window_bounds = array<i64: 128, 128>}]} {
    %c0 = arith.constant 0 : index
    %c0_0 = arith.constant 0 : index
    %c0_1 = arith.constant 0 : index
    %c0_2 = arith.constant 0 : index
    %0 = vector.load %arg1[%c0, %c0_0, %c0_1, %c0_2] : memref<1x10x18x128xf32, #tpu.memory_space<vmem>>, vector<1x10x18x128xf32>
    %1 = vector.shape_cast %0 : vector<1x10x18x128xf32> to vector<10x18x128xf32>
    %2 = vector.extract_strided_slice %1 {offsets = [0, 0, 0], sizes = [8, 16, 128], strides = [1, 1, 1]} : vector<10x18x128xf32> to vector<8x16x128xf32>
    %3 = vector.shape_cast %2 : vector<8x16x128xf32> to vector<128x128xf32>
    %4 = vector.extract_strided_slice %1 {offsets = [0, 1, 0], sizes = [8, 16, 128], strides = [1, 1, 1]} : vector<10x18x128xf32> to vector<8x16x128xf32>
    %5 = vector.shape_cast %4 : vector<8x16x128xf32> to vector<128x128xf32>
    %6 = vector.extract_strided_slice %1 {offsets = [0, 2, 0], sizes = [8, 16, 128], strides = [1, 1, 1]} : vector<10x18x128xf32> to vector<8x16x128xf32>
    %7 = vector.shape_cast %6 : vector<8x16x128xf32> to vector<128x128xf32>
    %8 = vector.extract_strided_slice %1 {offsets = [1, 0, 0], sizes = [8, 16, 128], strides = [1, 1, 1]} : vector<10x18x128xf32> to vector<8x16x128xf32>
    %9 = vector.shape_cast %8 : vector<8x16x128xf32> to vector<128x128xf32>
    %10 = vector.extract_strided_slice %1 {offsets = [1, 1, 0], sizes = [8, 16, 128], strides = [1, 1, 1]} : vector<10x18x128xf32> to vector<8x16x128xf32>
    %11 = vector.shape_cast %10 : vector<8x16x128xf32> to vector<128x128xf32>
    %12 = vector.extract_strided_slice %1 {offsets = [1, 2, 0], sizes = [8, 16, 128], strides = [1, 1, 1]} : vector<10x18x128xf32> to vector<8x16x128xf32>
    %13 = vector.shape_cast %12 : vector<8x16x128xf32> to vector<128x128xf32>
    %14 = vector.extract_strided_slice %1 {offsets = [2, 0, 0], sizes = [8, 16, 128], strides = [1, 1, 1]} : vector<10x18x128xf32> to vector<8x16x128xf32>
    %15 = vector.shape_cast %14 : vector<8x16x128xf32> to vector<128x128xf32>
    %16 = vector.extract_strided_slice %1 {offsets = [2, 1, 0], sizes = [8, 16, 128], strides = [1, 1, 1]} : vector<10x18x128xf32> to vector<8x16x128xf32>
    %17 = vector.shape_cast %16 : vector<8x16x128xf32> to vector<128x128xf32>
    %18 = vector.extract_strided_slice %1 {offsets = [2, 2, 0], sizes = [8, 16, 128], strides = [1, 1, 1]} : vector<10x18x128xf32> to vector<8x16x128xf32>
    %19 = vector.shape_cast %18 : vector<8x16x128xf32> to vector<128x128xf32>
    %20 = tpu.concatenate %3, %5, %7, %9, %11, %13, %15, %17, %19 in 1 : vector<128x128xf32>, vector<128x128xf32>, vector<128x128xf32>, vector<128x128xf32>, vector<128x128xf32>, vector<128x128xf32>, vector<128x128xf32>, vector<128x128xf32>, vector<128x128xf32> -> vector<128x1152xf32>
    %c0_3 = arith.constant 0 : index
    %c0_4 = arith.constant 0 : index
    %21 = vector.load %arg3[%c0_3, %c0_4] : memref<1152x128xf32, #tpu.memory_space<vmem>>, vector<1152x128xf32>
    %cst = arith.constant dense<0.000000e+00> : vector<128x128xf32>
    %22 = tpu.matmul %20, %21, %cst {dimension_numbers = #tpu.dot_dimension_numbers<[1], [0], [0], [1], [0, 0, 1, 1], [], []>} : vector<128x1152xf32>, vector<1152x128xf32>, vector<128x128xf32> -> vector<128x128xf32>
    %c0_5 = arith.constant 0 : index
    %c0_6 = arith.constant 0 : index
    %23 = vector.load %arg4[%c0_5, %c0_6] : memref<1x128xf32, #tpu.memory_space<vmem>>, vector<1x128xf32>
    %24 = vector.broadcast %23 : vector<1x128xf32> to vector<128x128xf32>
    %25 = arith.addf %22, %24 : vector<128x128xf32>
    %cst_7 = arith.constant 0.000000e+00 : f32
    %26 = vector.broadcast %cst_7 : f32 to vector<128x128xf32>
    %27 = arith.subf %26, %25 : vector<128x128xf32>
    %28 = math.exp %27 : vector<128x128xf32>
    %cst_8 = arith.constant 1.000000e+00 : f32
    %29 = vector.broadcast %cst_8 : f32 to vector<128x128xf32>
    %30 = arith.addf %29, %28 : vector<128x128xf32>
    %cst_9 = arith.constant 1.000000e+00 : f32
    %31 = vector.broadcast %cst_9 : f32 to vector<128x128xf32>
    %32 = arith.divf %31, %30 : vector<128x128xf32>
    %33 = arith.mulf %25, %32 : vector<128x128xf32>
    %c0_10 = arith.constant 0 : index
    %c0_11 = arith.constant 0 : index
    %34 = vector.load %arg2[%c0_10, %c0_11] : memref<128x128xf32, #tpu.memory_space<vmem>>, vector<128x128xf32>
    %35 = arith.addf %33, %34 : vector<128x128xf32>
    %c0_12 = arith.constant 0 : index
    %c0_13 = arith.constant 0 : index
    %36 = vector.load %arg5[%c0_12, %c0_13] : memref<128x128xf32, #tpu.memory_space<vmem>>, vector<128x128xf32>
    tpu.vector_store %arg5[%c0_12, %c0_13], %35 {strides = array<i32>} : memref<128x128xf32, #tpu.memory_space<vmem>>, vector<128x128xf32>,
    return
  }
  func.func @transform_0(%arg0: i32) -> (i32, i32, i32, i32) {
    %c0_i32 = arith.constant 0 : i32
    %c0_i32_0 = arith.constant 0 : i32
    %c0_i32_1 = arith.constant 0 : i32
    %c0_i32_2 = arith.constant 0 : i32
    return %arg0, %c0_i32, %c0_i32_0, %c0_i32_1 : i32, i32, i32, i32
  }
  func.func @transform_1(%arg0: i32) -> (i32, i32) {
    %c0_i32 = arith.constant 0 : i32
    %c0_i32_0 = arith.constant 0 : i32
    return %arg0, %c0_i32 : i32, i32
  }
  func.func @transform_2(%arg0: i32) -> (i32, i32) {
    %c0_i32 = arith.constant 0 : i32
    %c0_i32_0 = arith.constant 0 : i32
    %c0_i32_1 = arith.constant 0 : i32
    return %c0_i32, %c0_i32_0 : i32, i32
  }
  func.func @transform_3(%arg0: i32) -> (i32, i32) {
    %c0_i32 = arith.constant 0 : i32
    %c0_i32_0 = arith.constant 0 : i32
    %c0_i32_1 = arith.constant 0 : i32
    return %c0_i32, %c0_i32_0 : i32, i32
  }
  func.func @transform_4(%arg0: i32) -> (i32, i32) {
    %c0_i32 = arith.constant 0 : i32
    %c0_i32_0 = arith.constant 0 : i32
    return %arg0, %c0_i32 : i32, i32
  }
}

module attributes {stable_mosaic.version = 11 : i64} {
  func.func @_conv3x3_kernel(%arg0: i32, %arg1: memref<1x10x18x128xf32, #tpu.memory_space<vmem>>, %arg2: memref<1152x128xf32, #tpu.memory_space<vmem>>, %arg3: memref<1x128xf32, #tpu.memory_space<vmem>>, %arg4: memref<128x128xf32, #tpu.memory_space<vmem>>) attributes {dimension_semantics = [#tpu.dimension_semantics<parallel>], iteration_bounds = array<i64: 4>, scalar_prefetch = 0 : i64, scratch_operands = 0 : i64, tpu.core_type = #tpu.core_type<tc>, window_params = [{transform_indices = @transform_0, window_bounds = array<i64: 1, 10, 18, 128>}, {pipeline_mode = #tpu.pipeline_mode<synchronous>, transform_indices = @transform_1, window_bounds = array<i64: 1152, 128>}, {pipeline_mode = #tpu.pipeline_mode<synchronous>, transform_indices = @transform_2, window_bounds = array<i64: 1, 128>}, {transform_indices = @transform_3, window_bounds = array<i64: 128, 128>}]} {
    %c0 = arith.constant 0 : index
    %c0_0 = arith.constant 0 : index
    %c0_1 = arith.constant 0 : index
    %c0_2 = arith.constant 0 : index
    %0 = vector.load %arg1[%c0, %c0_0, %c0_1, %c0_2] : memref<1x10x18x128xf32, #tpu.memory_space<vmem>>, vector<1x10x18x128xf32>
    %1 = vector.shape_cast %0 : vector<1x10x18x128xf32> to vector<10x18x128xf32>
    %2 = vector.extract_strided_slice %1 {offsets = [0, 0, 0], sizes = [8, 16, 128], strides = [1, 1, 1]} : vector<10x18x128xf32> to vector<8x16x128xf32>
    %3 = vector.shape_cast %2 : vector<8x16x128xf32> to vector<128x128xf32>
    %4 = vector.extract_strided_slice %1 {offsets = [0, 1, 0], sizes = [8, 16, 128], strides = [1, 1, 1]} : vector<10x18x128xf32> to vector<8x16x128xf32>
    %5 = vector.shape_cast %4 : vector<8x16x128xf32> to vector<128x128xf32>
    %6 = vector.extract_strided_slice %1 {offsets = [0, 2, 0], sizes = [8, 16, 128], strides = [1, 1, 1]} : vector<10x18x128xf32> to vector<8x16x128xf32>
    %7 = vector.shape_cast %6 : vector<8x16x128xf32> to vector<128x128xf32>
    %8 = vector.extract_strided_slice %1 {offsets = [1, 0, 0], sizes = [8, 16, 128], strides = [1, 1, 1]} : vector<10x18x128xf32> to vector<8x16x128xf32>
    %9 = vector.shape_cast %8 : vector<8x16x128xf32> to vector<128x128xf32>
    %10 = vector.extract_strided_slice %1 {offsets = [1, 1, 0], sizes = [8, 16, 128], strides = [1, 1, 1]} : vector<10x18x128xf32> to vector<8x16x128xf32>
    %11 = vector.shape_cast %10 : vector<8x16x128xf32> to vector<128x128xf32>
    %12 = vector.extract_strided_slice %1 {offsets = [1, 2, 0], sizes = [8, 16, 128], strides = [1, 1, 1]} : vector<10x18x128xf32> to vector<8x16x128xf32>
    %13 = vector.shape_cast %12 : vector<8x16x128xf32> to vector<128x128xf32>
    %14 = vector.extract_strided_slice %1 {offsets = [2, 0, 0], sizes = [8, 16, 128], strides = [1, 1, 1]} : vector<10x18x128xf32> to vector<8x16x128xf32>
    %15 = vector.shape_cast %14 : vector<8x16x128xf32> to vector<128x128xf32>
    %16 = vector.extract_strided_slice %1 {offsets = [2, 1, 0], sizes = [8, 16, 128], strides = [1, 1, 1]} : vector<10x18x128xf32> to vector<8x16x128xf32>
    %17 = vector.shape_cast %16 : vector<8x16x128xf32> to vector<128x128xf32>
    %18 = vector.extract_strided_slice %1 {offsets = [2, 2, 0], sizes = [8, 16, 128], strides = [1, 1, 1]} : vector<10x18x128xf32> to vector<8x16x128xf32>
    %19 = vector.shape_cast %18 : vector<8x16x128xf32> to vector<128x128xf32>
    %20 = tpu.concatenate %3, %5, %7, %9, %11, %13, %15, %17, %19 in 1 : vector<128x128xf32>, vector<128x128xf32>, vector<128x128xf32>, vector<128x128xf32>, vector<128x128xf32>, vector<128x128xf32>, vector<128x128xf32>, vector<128x128xf32>, vector<128x128xf32> -> vector<128x1152xf32>
    %c0_3 = arith.constant 0 : index
    %c0_4 = arith.constant 0 : index
    %21 = vector.load %arg2[%c0_3, %c0_4] : memref<1152x128xf32, #tpu.memory_space<vmem>>, vector<1152x128xf32>
    %cst = arith.constant dense<0.000000e+00> : vector<128x128xf32>
    %22 = tpu.matmul %20, %21, %cst {dimension_numbers = #tpu.dot_dimension_numbers<[1], [0], [0], [1], [0, 0, 1, 1], [], []>} : vector<128x1152xf32>, vector<1152x128xf32>, vector<128x128xf32> -> vector<128x128xf32>
    %c0_5 = arith.constant 0 : index
    %c0_6 = arith.constant 0 : index
    %23 = vector.load %arg3[%c0_5, %c0_6] : memref<1x128xf32, #tpu.memory_space<vmem>>, vector<1x128xf32>
    %24 = vector.broadcast %23 : vector<1x128xf32> to vector<128x128xf32>
    %25 = arith.addf %22, %24 : vector<128x128xf32>
    %cst_7 = arith.constant 0.000000e+00 : f32
    %26 = vector.broadcast %cst_7 : f32 to vector<128x128xf32>
    %27 = arith.subf %26, %25 : vector<128x128xf32>
    %28 = math.exp %27 : vector<128x128xf32>
    %cst_8 = arith.constant 1.000000e+00 : f32
    %29 = vector.broadcast %cst_8 : f32 to vector<128x128xf32>
    %30 = arith.addf %29, %28 : vector<128x128xf32>
    %cst_9 = arith.constant 1.000000e+00 : f32
    %31 = vector.broadcast %cst_9 : f32 to vector<128x128xf32>
    %32 = arith.divf %31, %30 : vector<128x128xf32>
    %33 = arith.mulf %25, %32 : vector<128x128xf32>
    %c0_10 = arith.constant 0 : index
    %c0_11 = arith.constant 0 : index
    %34 = vector.load %arg4[%c0_10, %c0_11] : memref<128x128xf32, #tpu.memory_space<vmem>>, vector<128x128xf32>
    tpu.vector_store %arg4[%c0_10, %c0_11], %33 {strides = array<i32>} : memref<128x128xf32, #tpu.memory_space<vmem>>, vector<128x128xf32>,
    return
  }
  func.func @transform_0(%arg0: i32) -> (i32, i32, i32, i32) {
    %c0_i32 = arith.constant 0 : i32
    %c0_i32_0 = arith.constant 0 : i32
    %c0_i32_1 = arith.constant 0 : i32
    %c0_i32_2 = arith.constant 0 : i32
    return %arg0, %c0_i32, %c0_i32_0, %c0_i32_1 : i32, i32, i32, i32
  }
  func.func @transform_1(%arg0: i32) -> (i32, i32) {
    %c0_i32 = arith.constant 0 : i32
    %c0_i32_0 = arith.constant 0 : i32
    %c0_i32_1 = arith.constant 0 : i32
    return %c0_i32, %c0_i32_0 : i32, i32
  }
  func.func @transform_2(%arg0: i32) -> (i32, i32) {
    %c0_i32 = arith.constant 0 : i32
    %c0_i32_0 = arith.constant 0 : i32
    %c0_i32_1 = arith.constant 0 : i32
    return %c0_i32, %c0_i32_0 : i32, i32
  }
  func.func @transform_3(%arg0: i32) -> (i32, i32) {
    %c0_i32 = arith.constant 0 : i32
    %c0_i32_0 = arith.constant 0 : i32
    return %arg0, %c0_i32 : i32, i32
  }
}

module attributes {stable_mosaic.version = 11 : i64} {
  func.func @_pw_dual_in_kernel(%arg0: i32, %arg1: memref<512x128xf32, #tpu.memory_space<vmem>>, %arg2: memref<512x128xf32, #tpu.memory_space<vmem>>, %arg3: memref<128x128xf32, #tpu.memory_space<vmem>>, %arg4: memref<128x128xf32, #tpu.memory_space<vmem>>, %arg5: memref<1x128xf32, #tpu.memory_space<vmem>>, %arg6: memref<512x128xf32, #tpu.memory_space<vmem>>) attributes {dimension_semantics = [#tpu.dimension_semantics<parallel>], iteration_bounds = array<i64: 1>, scalar_prefetch = 0 : i64, scratch_operands = 0 : i64, tpu.core_type = #tpu.core_type<tc>, window_params = [{transform_indices = @transform_0, window_bounds = array<i64: 512, 128>}, {transform_indices = @transform_1, window_bounds = array<i64: 512, 128>}, {pipeline_mode = #tpu.pipeline_mode<synchronous>, transform_indices = @transform_2, window_bounds = array<i64: 128, 128>}, {pipeline_mode = #tpu.pipeline_mode<synchronous>, transform_indices = @transform_3, window_bounds = array<i64: 128, 128>}, {pipeline_mode = #tpu.pipeline_mode<synchronous>, transform_indices = @transform_4, window_bounds = array<i64: 1, 128>}, {transform_indices = @transform_5, window_bounds = array<i64: 512, 128>}]} {
    %c0 = arith.constant 0 : index
    %c0_0 = arith.constant 0 : index
    %0 = vector.load %arg1[%c0, %c0_0] : memref<512x128xf32, #tpu.memory_space<vmem>>, vector<512x128xf32>
    %c0_1 = arith.constant 0 : index
    %c0_2 = arith.constant 0 : index
    %1 = vector.load %arg3[%c0_1, %c0_2] : memref<128x128xf32, #tpu.memory_space<vmem>>, vector<128x128xf32>
    %cst = arith.constant dense<0.000000e+00> : vector<512x128xf32>
    %2 = tpu.matmul %0, %1, %cst {dimension_numbers = #tpu.dot_dimension_numbers<[1], [0], [0], [1], [0, 0, 1, 1], [], []>} : vector<512x128xf32>, vector<128x128xf32>, vector<512x128xf32> -> vector<512x128xf32>
    %c0_3 = arith.constant 0 : index
    %c0_4 = arith.constant 0 : index
    %3 = vector.load %arg2[%c0_3, %c0_4] : memref<512x128xf32, #tpu.memory_space<vmem>>, vector<512x128xf32>
    %c0_5 = arith.constant 0 : index
    %c0_6 = arith.constant 0 : index
    %4 = vector.load %arg4[%c0_5, %c0_6] : memref<128x128xf32, #tpu.memory_space<vmem>>, vector<128x128xf32>
    %cst_7 = arith.constant dense<0.000000e+00> : vector<512x128xf32>
    %5 = tpu.matmul %3, %4, %cst_7 {dimension_numbers = #tpu.dot_dimension_numbers<[1], [0], [0], [1], [0, 0, 1, 1], [], []>} : vector<512x128xf32>, vector<128x128xf32>, vector<512x128xf32> -> vector<512x128xf32>
    %6 = arith.addf %2, %5 : vector<512x128xf32>
    %c0_8 = arith.constant 0 : index
    %c0_9 = arith.constant 0 : index
    %7 = vector.load %arg5[%c0_8, %c0_9] : memref<1x128xf32, #tpu.memory_space<vmem>>, vector<1x128xf32>
    %8 = vector.broadcast %7 : vector<1x128xf32> to vector<512x128xf32>
    %9 = arith.addf %6, %8 : vector<512x128xf32>
    %cst_10 = arith.constant 0.000000e+00 : f32
    %10 = vector.broadcast %cst_10 : f32 to vector<512x128xf32>
    %11 = arith.subf %10, %9 : vector<512x128xf32>
    %12 = math.exp %11 : vector<512x128xf32>
    %cst_11 = arith.constant 1.000000e+00 : f32
    %13 = vector.broadcast %cst_11 : f32 to vector<512x128xf32>
    %14 = arith.addf %13, %12 : vector<512x128xf32>
    %cst_12 = arith.constant 1.000000e+00 : f32
    %15 = vector.broadcast %cst_12 : f32 to vector<512x128xf32>
    %16 = arith.divf %15, %14 : vector<512x128xf32>
    %17 = arith.mulf %9, %16 : vector<512x128xf32>
    %c0_13 = arith.constant 0 : index
    %c0_14 = arith.constant 0 : index
    %18 = vector.load %arg6[%c0_13, %c0_14] : memref<512x128xf32, #tpu.memory_space<vmem>>, vector<512x128xf32>
    tpu.vector_store %arg6[%c0_13, %c0_14], %17 {strides = array<i32>} : memref<512x128xf32, #tpu.memory_space<vmem>>, vector<512x128xf32>,
    return
  }
  func.func @transform_0(%arg0: i32) -> (i32, i32) {
    %c0_i32 = arith.constant 0 : i32
    %c0_i32_0 = arith.constant 0 : i32
    return %arg0, %c0_i32 : i32, i32
  }
  func.func @transform_1(%arg0: i32) -> (i32, i32) {
    %c0_i32 = arith.constant 0 : i32
    %c0_i32_0 = arith.constant 0 : i32
    return %arg0, %c0_i32 : i32, i32
  }
  func.func @transform_2(%arg0: i32) -> (i32, i32) {
    %c0_i32 = arith.constant 0 : i32
    %c0_i32_0 = arith.constant 0 : i32
    %c0_i32_1 = arith.constant 0 : i32
    return %c0_i32, %c0_i32_0 : i32, i32
  }
  func.func @transform_3(%arg0: i32) -> (i32, i32) {
    %c0_i32 = arith.constant 0 : i32
    %c0_i32_0 = arith.constant 0 : i32
    %c0_i32_1 = arith.constant 0 : i32
    return %c0_i32, %c0_i32_0 : i32, i32
  }
  func.func @transform_4(%arg0: i32) -> (i32, i32) {
    %c0_i32 = arith.constant 0 : i32
    %c0_i32_0 = arith.constant 0 : i32
    %c0_i32_1 = arith.constant 0 : i32
    return %c0_i32, %c0_i32_0 : i32, i32
  }
  func.func @transform_5(%arg0: i32) -> (i32, i32) {
    %c0_i32 = arith.constant 0 : i32
    %c0_i32_0 = arith.constant 0 : i32
    return %arg0, %c0_i32 : i32, i32
  }
}

</mosaic_0001>

<bundles_post_ra>
// kernel: c3k_forward_pallas.4
= control target key start
LH: loop header
LB: loop body
LE: loop exit
PB: predicated region body
PF: predicated region fallthrough
CT: control target
= control target key end

     0   :  { %v2150_v3 = vmov 0.0   ;;  %s3577_s1 = inlined_call_operand.vmem [shape: f32[128,256], index: 1, kind: input, shape index: {}]   ;;  %s3578_s0 = inlined_call_operand.vmem [shape: f32[512,128], index: 0, kind: input, shape index: {}]   ;;  %s3579_s2 = inlined_call_operand.vmem [shape: f32[1,256], index: 2, kind: input, shape index: {}]   ;;  %s3580_s3 = inlined_call_operand.vmem [shape: f32[512,128], index: 3, kind: output, shape index: {0}]   ;;  %s3581_s4 = inlined_call_operand.vmem [shape: f32[512,128], index: 4, kind: output, shape index: {1}]  }
   0x1   :  { %v111_v0 = vld [vmem:[%s3577_s1 + $0xf8] sm:$0xff]  ;;  %v110_v1 = vld [vmem:[%s3577_s1 + $0xf0] sm:$0xff]  ;;  %v109_v2 = vld [vmem:[%s3577_s1 + $0xe8] sm:$0xff]  ;;  %188 = vmatprep.mubr.f32.mxu0 %v2150_v3  ;;  %380 = vmatprep.mubr.f32.mxu1 %v2150_v3 }
   0x2   :  { %124 = vmatprep.subr.mxu0 %v111_v0  ;;  %1605 = vmatprep.subr.mxu1 %v111_v0  ;;  %v108_v4 = vld [vmem:[%s3577_s1 + $0xe0] sm:$0xff]  ;;  %v107_v5 = vld [vmem:[%s3577_s1 + $0xd8] sm:$0xff]  ;;  %v106_v6 = vld [vmem:[%s3577_s1 + $0xd0] sm:$0xff] }
   0x3   :  { %125 = vmatpush1.msra.mxu0 %v110_v1  ;;  %1621 = vmatpush1.msra.mxu1 %v110_v1  ;;  %v105_v7 = vld [vmem:[%s3577_s1 + $0xc8] sm:$0xff]  ;;  %v104_v8 = vld [vmem:[%s3577_s1 + $0xc0] sm:$0xff]  ;;  %v103_v9 = vld [vmem:[%s3577_s1 + $0xb8] sm:$0xff] }
   0x4   :  { %126 = vmatprep.subr.mxu0 %v109_v2  ;;  %1606 = vmatprep.subr.mxu1 %v109_v2  ;;  %v102_v10 = vld [vmem:[%s3577_s1 + $0xb0] sm:$0xff]  ;;  %v101_v11 = vld [vmem:[%s3577_s1 + $0xa8] sm:$0xff]  ;;  %v100_v12 = vld [vmem:[%s3577_s1 + $0xa0] sm:$0xff] }
   0x5   :  { %127 = vmatpush1.msra.mxu0 %v108_v4  ;;  %1622 = vmatpush1.msra.mxu1 %v108_v4  ;;  %v99_v13 = vld [vmem:[%s3577_s1 + $0x98] sm:$0xff]  ;;  %v98_v14 = vld [vmem:[%s3577_s1 + $0x90] sm:$0xff]  ;;  %v97_v15 = vld [vmem:[%s3577_s1 + $0x88] sm:$0xff] }
   0x6   :  { %128 = vmatprep.subr.mxu0 %v107_v5  ;;  %1607 = vmatprep.subr.mxu1 %v107_v5  ;;  %v96_v16 = vld [vmem:[%s3577_s1 + $0x80] sm:$0xff]  ;;  %v95_v17 = vld [vmem:[%s3577_s1 + $0x78] sm:$0xff]  ;;  %v94_v18 = vld [vmem:[%s3577_s1 + $0x70] sm:$0xff] }
   0x7   :  { %129 = vmatpush1.msra.mxu0 %v106_v6  ;;  %1623 = vmatpush1.msra.mxu1 %v106_v6  ;;  %v93_v19 = vld [vmem:[%s3577_s1 + $0x68] sm:$0xff]  ;;  %v92_v20 = vld [vmem:[%s3577_s1 + $0x60] sm:$0xff]  ;;  %v91_v21 = vld [vmem:[%s3577_s1 + $0x58] sm:$0xff] }
   0x8   :  { %130 = vmatprep.subr.mxu0 %v105_v7  ;;  %1608 = vmatprep.subr.mxu1 %v105_v7  ;;  %v90_v22 = vld [vmem:[%s3577_s1 + $0x50] sm:$0xff]  ;;  %v89_v23 = vld [vmem:[%s3577_s1 + $0x48] sm:$0xff]  ;;  %v88_v24 = vld [vmem:[%s3577_s1 + $0x40] sm:$0xff] }
   0x9   :  { %131 = vmatpush1.msra.mxu0 %v104_v8  ;;  %1624 = vmatpush1.msra.mxu1 %v104_v8  ;;  %v87_v25 = vld [vmem:[%s3577_s1 + $0x38] sm:$0xff]  ;;  %v86_v26 = vld [vmem:[%s3577_s1 + $0x30] sm:$0xff]  ;;  %v85_v27 = vld [vmem:[%s3577_s1 + $0x28] sm:$0xff] }
   0xa   :  { %132 = vmatprep.subr.mxu0 %v103_v9  ;;  %1609 = vmatprep.subr.mxu1 %v103_v9  ;;  %v84_v28 = vld [vmem:[%s3577_s1 + $0x20] sm:$0xff]  ;;  %v83_v29 = vld [vmem:[%s3577_s1 + $0x18] sm:$0xff]  ;;  %v82_v30 = vld [vmem:[%s3577_s1 + $0x10] sm:$0xff] }
   0xb   :  { %133 = vmatpush1.msra.mxu0 %v102_v10  ;;  %1625 = vmatpush1.msra.mxu1 %v102_v10  ;;  %v81_v31 = vld [vmem:[%s3577_s1 + $0x8] sm:$0xff]  ;;  %v80_v32 = vld [vmem:[%s3577_s1] sm:$0xff]  ;;  %v18_v37 = vld [vmem:[%s3578_s0 + $0x10] sm:$0xff] }
   0xc   :  { %134 = vmatprep.subr.mxu0 %v101_v11  ;;  %1610 = vmatprep.subr.mxu1 %v101_v11  ;;  %v16_v33 = vld [vmem:[%s3578_s0] sm:$0xff]  ;;  %v17_v35 = vld [vmem:[%s3578_s0 + $0x8] sm:$0xff]  ;;  %v50_v38 = vld [vmem:[%s3578_s0 + $0x110] sm:$0xff] }
   0xd   :  { %135 = vmatpush1.msra.mxu0 %v100_v12  ;;  %1626 = vmatpush1.msra.mxu1 %v100_v12  ;;  %v48_v34 = vld [vmem:[%s3578_s0 + $0x100] sm:$0xff]  ;;  %v49_v36 = vld [vmem:[%s3578_s0 + $0x108] sm:$0xff]  ;;  %v19_v39 = vld [vmem:[%s3578_s0 + $0x18] sm:$0xff] }
   0xe   :  { %136 = vmatprep.subr.mxu0 %v99_v13  ;;  %1611 = vmatprep.subr.mxu1 %v99_v13  ;;  %v51_v40 = vld [vmem:[%s3578_s0 + $0x118] sm:$0xff]  ;;  %v20_v41 = vld [vmem:[%s3578_s0 + $0x20] sm:$0xff]  ;;  %v21_v43 = vld [vmem:[%s3578_s0 + $0x28] sm:$0xff] }
   0xf   :  { %137 = vmatpush1.msra.mxu0 %v98_v14  ;;  %1627 = vmatpush1.msra.mxu1 %v98_v14  ;;  %v52_v42 = vld [vmem:[%s3578_s0 + $0x120] sm:$0xff]  ;;  %v53_v44 = vld [vmem:[%s3578_s0 + $0x128] sm:$0xff]  ;;  %v22_v45 = vld [vmem:[%s3578_s0 + $0x30] sm:$0xff] }
  0x10   :  { %138 = vmatprep.subr.mxu0 %v97_v15  ;;  %1612 = vmatprep.subr.mxu1 %v97_v15  ;;  %v54_v46 = vld [vmem:[%s3578_s0 + $0x130] sm:$0xff]  ;;  %v23_v47 = vld [vmem:[%s3578_s0 + $0x38] sm:$0xff]  ;;  %v24_v49 = vld [vmem:[%s3578_s0 + $0x40] sm:$0xff] }
  0x11   :  { %139 = vmatpush1.msra.mxu0 %v96_v16  ;;  %1628 = vmatpush1.msra.mxu1 %v96_v16  ;;  %v55_v48 = vld [vmem:[%s3578_s0 + $0x138] sm:$0xff]  ;;  %v56_v50 = vld [vmem:[%s3578_s0 + $0x140] sm:$0xff]  ;;  %v25_v51 = vld [vmem:[%s3578_s0 + $0x48] sm:$0xff] }
  0x12   :  { %140 = vmatprep.subr.mxu0 %v95_v17  ;;  %1613 = vmatprep.subr.mxu1 %v95_v17  ;;  %v57_v52 = vld [vmem:[%s3578_s0 + $0x148] sm:$0xff]  ;;  %v26_v53 = vld [vmem:[%s3578_s0 + $0x50] sm:$0xff]  ;;  %v27_v55 = vld [vmem:[%s3578_s0 + $0x58] sm:$0xff] }
  0x13   :  { %141 = vmatpush1.msra.mxu0 %v94_v18  ;;  %1629 = vmatpush1.msra.mxu1 %v94_v18  ;;  %v58_v54 = vld [vmem:[%s3578_s0 + $0x150] sm:$0xff]  ;;  %v59_v56 = vld [vmem:[%s3578_s0 + $0x158] sm:$0xff]  ;;  %v28_v57 = vld [vmem:[%s3578_s0 + $0x60] sm:$0xff] }
  0x14   :  { %142 = vmatprep.subr.mxu0 %v93_v19  ;;  %1614 = vmatprep.subr.mxu1 %v93_v19  ;;  %v60_v58 = vld [vmem:[%s3578_s0 + $0x160] sm:$0xff]  ;;  %v29_v59 = vld [vmem:[%s3578_s0 + $0x68] sm:$0xff]  ;;  %v30_v61 = vld [vmem:[%s3578_s0 + $0x70] sm:$0xff] }
  0x15   :  { %143 = vmatpush1.msra.mxu0 %v92_v20  ;;  %1630 = vmatpush1.msra.mxu1 %v92_v20  ;;  %v61_v60 = vld [vmem:[%s3578_s0 + $0x168] sm:$0xff]  ;;  %v62_v62 = vld [vmem:[%s3578_s0 + $0x170] sm:$0xff]  ;;  %v31_v63 = vld [vmem:[%s3578_s0 + $0x78] sm:$0xff] }
  0x16   :  { %144 = vmatprep.subr.mxu0 %v91_v21  ;;  %1615 = vmatprep.subr.mxu1 %v91_v21  ;;  %v63_v0 = vld [vmem:[%s3578_s0 + $0x178] sm:$0xff]  ;;  %v32_v1 = vld [vmem:[%s3578_s0 + $0x80] sm:$0xff]  ;;  %v33_v4 = vld [vmem:[%s3578_s0 + $0x88] sm:$0xff] }
  0x17   :  { %145 = vmatpush1.msra.mxu0 %v90_v22  ;;  %1631 = vmatpush1.msra.mxu1 %v90_v22  ;;  %v64_v2 = vld [vmem:[%s3578_s0 + $0x180] sm:$0xff]  ;;  %v65_v5 = vld [vmem:[%s3578_s0 + $0x188] sm:$0xff]  ;;  %v34_v6 = vld [vmem:[%s3578_s0 + $0x90] sm:$0xff] }
  0x18   :  { %146 = vmatprep.subr.mxu0 %v89_v23  ;;  %1616 = vmatprep.subr.mxu1 %v89_v23  ;;  %v66_v7 = vld [vmem:[%s3578_s0 + $0x190] sm:$0xff]  ;;  %v35_v8 = vld [vmem:[%s3578_s0 + $0x98] sm:$0xff]  ;;  %v36_v10 = vld [vmem:[%s3578_s0 + $0xa0] sm:$0xff] }
  0x19   :  { %147 = vmatpush1.msra.mxu0 %v88_v24  ;;  %1632 = vmatpush1.msra.mxu1 %v88_v24  ;;  %v67_v9 = vld [vmem:[%s3578_s0 + $0x198] sm:$0xff]  ;;  %v68_v11 = vld [vmem:[%s3578_s0 + $0x1a0] sm:$0xff]  ;;  %v37_v12 = vld [vmem:[%s3578_s0 + $0xa8] sm:$0xff] }
  0x1a   :  { %148 = vmatprep.subr.mxu0 %v87_v25  ;;  %1617 = vmatprep.subr.mxu1 %v87_v25  ;;  %v69_v13 = vld [vmem:[%s3578_s0 + $0x1a8] sm:$0xff]  ;;  %v38_v14 = vld [vmem:[%s3578_s0 + $0xb0] sm:$0xff]  ;;  %v39_v16 = vld [vmem:[%s3578_s0 + $0xb8] sm:$0xff] }
  0x1b   :  { %149 = vmatpush1.msra.mxu0 %v86_v26  ;;  %1633 = vmatpush1.msra.mxu1 %v86_v26  ;;  %v70_v15 = vld [vmem:[%s3578_s0 + $0x1b0] sm:$0xff]  ;;  %v71_v17 = vld [vmem:[%s3578_s0 + $0x1b8] sm:$0xff]  ;;  %v40_v18 = vld [vmem:[%s3578_s0 + $0xc0] sm:$0xff] }
  0x1c   :  { %150 = vmatprep.subr.mxu0 %v85_v27  ;;  %1618 = vmatprep.subr.mxu1 %v85_v27  ;;  %v72_v19 = vld [vmem:[%s3578_s0 + $0x1c0] sm:$0xff]  ;;  %v41_v20 = vld [vmem:[%s3578_s0 + $0xc8] sm:$0xff]  ;;  %v42_v22 = vld [vmem:[%s3578_s0 + $0xd0] sm:$0xff] }
  0x1d   :  { %151 = vmatpush1.msra.mxu0 %v84_v28  ;;  %1634 = vmatpush1.msra.mxu1 %v84_v28  ;;  %v73_v21 = vld [vmem:[%s3578_s0 + $0x1c8] sm:$0xff]  ;;  %v74_v23 = vld [vmem:[%s3578_s0 + $0x1d0] sm:$0xff]  ;;  %v43_v24 = vld [vmem:[%s3578_s0 + $0xd8] sm:$0xff] }
  0x1e   :  { %152 = vmatprep.subr.mxu0 %v83_v29  ;;  %1619 = vmatprep.subr.mxu1 %v83_v29  ;;  %v75_v25 = vld [vmem:[%s3578_s0 + $0x1d8] sm:$0xff]  ;;  %v44_v26 = vld [vmem:[%s3578_s0 + $0xe0] sm:$0xff]  ;;  %v45_v28 = vld [vmem:[%s3578_s0 + $0xe8] sm:$0xff] }
  0x1f   :  { %153 = vmatpush1.msra.mxu0 %v82_v30  ;;  %1635 = vmatpush1.msra.mxu1 %v82_v30  ;;  %v76_v27 = vld [vmem:[%s3578_s0 + $0x1e0] sm:$0xff]  ;;  %v77_v29 = vld [vmem:[%s3578_s0 + $0x1e8] sm:$0xff]  ;;  %v46_v30 = vld [vmem:[%s3578_s0 + $0xf0] sm:$0xff] }
  0x20   :  { %154 = vmatprep.subr.mxu0 %v81_v31  ;;  %1620 = vmatprep.subr.mxu1 %v81_v31  ;;  %v78_v31 = vld [vmem:[%s3578_s0 + $0x1f0] sm:$0xff] }
  0x21   :  { %155 = vmatpush1.msra.mxu0 %v80_v32  ;;  %1636 = vmatpush1.msra.mxu1 %v80_v32  ;;  %v47_v32 = vld [vmem:[%s3578_s0 + $0xf8] sm:$0xff] }
  0x22   :  { %189 = vmatmul.mubr.f32.vlgmr.msra.gmra.mxu0 %v16_v33  ;;  %381 = vmatmul.mubr.f32.vlgmr.msra.gmra.mxu1 %v48_v34  ;;  %v79_v33 = vld [vmem:[%s3578_s0 + $0x1f8] sm:$0xff]  ;;  %v114_v34 = vlaneseq }
  0x23   :  { %194 = vmatprep.mubr.f32.mxu0 %v2150_v3  ;;  %386 = vmatprep.mubr.f32.mxu1 %v2150_v3 }
  0x26   :  { %195 = vmatmul.mubr.f32.gmra.mxu0 %v17_v35  ;;  %387 = vmatmul.mubr.f32.gmra.mxu1 %v49_v36  ;;  %v115_v35 = vshrl.u32 %v114_v34, 7 }
  0x27   :  { %200 = vmatprep.mubr.f32.mxu0 %v2150_v3  ;;  %392 = vmatprep.mubr.f32.mxu1 %v2150_v3 }
  0x28   :  { %v116_v36 = vsub.s32 0, %v115_v35 }
  0x2a   :  { %201 = vmatmul.mubr.f32.gmra.mxu0 %v18_v37  ;;  %393 = vmatmul.mubr.f32.gmra.mxu1 %v50_v38  ;;  %v112_v37 = vld [vmem:[%s3579_s2] sm:$0x3]  ;;  %v120_v38 = vsub.s32 1, %v115_v35 }
  0x2b   :  { %206 = vmatprep.mubr.f32.mxu0 %v2150_v3  ;;  %398 = vmatprep.mubr.f32.mxu1 %v2150_v3 }
  0x2e   :  { %207 = vmatmul.mubr.f32.gmra.mxu0 %v19_v39  ;;  %399 = vmatmul.mubr.f32.gmra.mxu1 %v51_v40  ;;  %v2531_v39 = vrot.slane %v112_v37, %v116_v36 }
  0x2f   :  { %212 = vmatprep.mubr.f32.mxu0 %v2150_v3  ;;  %404 = vmatprep.mubr.f32.mxu1 %v2150_v3 }
  0x32   :  { %213 = vmatmul.mubr.f32.gmra.mxu0 %v20_v41  ;;  %405 = vmatmul.mubr.f32.gmra.mxu1 %v52_v42 }
  0x33   :  { %218 = vmatprep.mubr.f32.mxu0 %v2150_v3  ;;  %410 = vmatprep.mubr.f32.mxu1 %v2150_v3 }
  0x36   :  { %219 = vmatmul.mubr.f32.gmra.mxu0 %v21_v43  ;;  %411 = vmatmul.mubr.f32.gmra.mxu1 %v53_v44 }
  0x37   :  { %224 = vmatprep.mubr.f32.mxu0 %v2150_v3  ;;  %416 = vmatprep.mubr.f32.mxu1 %v2150_v3 }
  0x3a   :  { %225 = vmatmul.mubr.f32.gmra.mxu0 %v22_v45  ;;  %417 = vmatmul.mubr.f32.gmra.mxu1 %v54_v46 }
  0x3b   :  { %230 = vmatprep.mubr.f32.mxu0 %v2150_v3  ;;  %422 = vmatprep.mubr.f32.mxu1 %v2150_v3 }
  0x3e   :  { %231 = vmatmul.mubr.f32.gmra.mxu0 %v23_v47  ;;  %423 = vmatmul.mubr.f32.gmra.mxu1 %v55_v48 }
  0x3f   :  { %236 = vmatprep.mubr.f32.mxu0 %v2150_v3  ;;  %428 = vmatprep.mubr.f32.mxu1 %v2150_v3 }
  0x42   :  { %237 = vmatmul.mubr.f32.gmra.mxu0 %v24_v49  ;;  %429 = vmatmul.mubr.f32.gmra.mxu1 %v56_v50 }
  0x43   :  { %242 = vmatprep.mubr.f32.mxu0 %v2150_v3  ;;  %434 = vmatprep.mubr.f32.mxu1 %v2150_v3 }
  0x46   :  { %243 = vmatmul.mubr.f32.gmra.mxu0 %v25_v51  ;;  %435 = vmatmul.mubr.f32.gmra.mxu1 %v57_v52 }
  0x47   :  { %248 = vmatprep.mubr.f32.mxu0 %v2150_v3  ;;  %440 = vmatprep.mubr.f32.mxu1 %v2150_v3 }
  0x4a   :  { %249 = vmatmul.mubr.f32.gmra.mxu0 %v26_v53  ;;  %441 = vmatmul.mubr.f32.gmra.mxu1 %v58_v54 }
  0x4b   :  { %254 = vmatprep.mubr.f32.mxu0 %v2150_v3  ;;  %446 = vmatprep.mubr.f32.mxu1 %v2150_v3 }
  0x4e   :  { %255 = vmatmul.mubr.f32.gmra.mxu0 %v27_v55  ;;  %447 = vmatmul.mubr.f32.gmra.mxu1 %v59_v56 }
  0x4f   :  { %260 = vmatprep.mubr.f32.mxu0 %v2150_v3  ;;  %452 = vmatprep.mubr.f32.mxu1 %v2150_v3 }
  0x52   :  { %261 = vmatmul.mubr.f32.gmra.mxu0 %v28_v57  ;;  %453 = vmatmul.mubr.f32.gmra.mxu1 %v60_v58 }
  0x53   :  { %266 = vmatprep.mubr.f32.mxu0 %v2150_v3  ;;  %458 = vmatprep.mubr.f32.mxu1 %v2150_v3 }
  0x56   :  { %267 = vmatmul.mubr.f32.gmra.mxu0 %v29_v59  ;;  %459 = vmatmul.mubr.f32.gmra.mxu1 %v61_v60 }
  0x57   :  { %272 = vmatprep.mubr.f32.mxu0 %v2150_v3  ;;  %464 = vmatprep.mubr.f32.mxu1 %v2150_v3 }
  0x5a   :  { %273 = vmatmul.mubr.f32.gmra.mxu0 %v30_v61  ;;  %465 = vmatmul.mubr.f32.gmra.mxu1 %v62_v62 }
  0x5b   :  { %278 = vmatprep.mubr.f32.mxu0 %v2150_v3  ;;  %470 = vmatprep.mubr.f32.mxu1 %v2150_v3 }
  0x5e   :  { %279 = vmatmul.mubr.f32.gmra.mxu0 %v31_v63  ;;  %471 = vmatmul.mubr.f32.gmra.mxu1 %v63_v0 }
  0x5f   :  { %284 = vmatprep.mubr.f32.mxu0 %v2150_v3  ;;  %476 = vmatprep.mubr.f32.mxu1 %v2150_v3 }
  0x62   :  { %285 = vmatmul.mubr.f32.gmra.mxu0 %v32_v1  ;;  %477 = vmatmul.mubr.f32.gmra.mxu1 %v64_v2 }
  0x63   :  { %290 = vmatprep.mubr.f32.mxu0 %v2150_v3  ;;  %482 = vmatprep.mubr.f32.mxu1 %v2150_v3 }
  0x66   :  { %291 = vmatmul.mubr.f32.gmra.mxu0 %v33_v4  ;;  %483 = vmatmul.mubr.f32.gmra.mxu1 %v65_v5 }
  0x67   :  { %296 = vmatprep.mubr.f32.mxu0 %v2150_v3  ;;  %488 = vmatprep.mubr.f32.mxu1 %v2150_v3 }
  0x6a   :  { %297 = vmatmul.mubr.f32.gmra.mxu0 %v34_v6  ;;  %489 = vmatmul.mubr.f32.gmra.mxu1 %v66_v7 }
  0x6b   :  { %302 = vmatprep.mubr.f32.mxu0 %v2150_v3  ;;  %494 = vmatprep.mubr.f32.mxu1 %v2150_v3 }
  0x6e   :  { %303 = vmatmul.mubr.f32.gmra.mxu0 %v35_v8  ;;  %495 = vmatmul.mubr.f32.gmra.mxu1 %v67_v9 }
  0x6f   :  { %308 = vmatprep.mubr.f32.mxu0 %v2150_v3  ;;  %500 = vmatprep.mubr.f32.mxu1 %v2150_v3 }
  0x72   :  { %309 = vmatmul.mubr.f32.gmra.mxu0 %v36_v10  ;;  %501 = vmatmul.mubr.f32.gmra.mxu1 %v68_v11 }
  0x73   :  { %314 = vmatprep.mubr.f32.mxu0 %v2150_v3  ;;  %506 = vmatprep.mubr.f32.mxu1 %v2150_v3 }
  0x76   :  { %315 = vmatmul.mubr.f32.gmra.mxu0 %v37_v12  ;;  %507 = vmatmul.mubr.f32.gmra.mxu1 %v69_v13 }
  0x77   :  { %320 = vmatprep.mubr.f32.mxu0 %v2150_v3  ;;  %512 = vmatprep.mubr.f32.mxu1 %v2150_v3 }
  0x7a   :  { %321 = vmatmul.mubr.f32.gmra.mxu0 %v38_v14  ;;  %513 = vmatmul.mubr.f32.gmra.mxu1 %v70_v15 }
  0x7b   :  { %326 = vmatprep.mubr.f32.mxu0 %v2150_v3  ;;  %518 = vmatprep.mubr.f32.mxu1 %v2150_v3 }
  0x7e   :  { %327 = vmatmul.mubr.f32.gmra.mxu0 %v39_v16  ;;  %519 = vmatmul.mubr.f32.gmra.mxu1 %v71_v17 }
  0x7f   :  { %332 = vmatprep.mubr.f32.mxu0 %v2150_v3  ;;  %524 = vmatprep.mubr.f32.mxu1 %v2150_v3 }
  0x82   :  { %333 = vmatmul.mubr.f32.gmra.mxu0 %v40_v18  ;;  %525 = vmatmul.mubr.f32.gmra.mxu1 %v72_v19 }
  0x83   :  { %338 = vmatprep.mubr.f32.mxu0 %v2150_v3  ;;  %530 = vmatprep.mubr.f32.mxu1 %v2150_v3 }
  0x86   :  { %339 = vmatmul.mubr.f32.gmra.mxu0 %v41_v20  ;;  %531 = vmatmul.mubr.f32.gmra.mxu1 %v73_v21 }
  0x87   :  { %344 = vmatprep.mubr.f32.mxu0 %v2150_v3  ;;  %536 = vmatprep.mubr.f32.mxu1 %v2150_v3 }
  0x8a   :  { %345 = vmatmul.mubr.f32.gmra.mxu0 %v42_v22  ;;  %537 = vmatmul.mubr.f32.gmra.mxu1 %v74_v23 }
  0x8b   :  { %350 = vmatprep.mubr.f32.mxu0 %v2150_v3  ;;  %542 = vmatprep.mubr.f32.mxu1 %v2150_v3 }
  0x8e   :  { %351 = vmatmul.mubr.f32.gmra.mxu0 %v43_v24  ;;  %543 = vmatmul.mubr.f32.gmra.mxu1 %v75_v25 }
  0x8f   :  { %356 = vmatprep.mubr.f32.mxu0 %v2150_v3  ;;  %548 = vmatprep.mubr.f32.mxu1 %v2150_v3 }
  0x92   :  { %357 = vmatmul.mubr.f32.gmra.mxu0 %v44_v26  ;;  %549 = vmatmul.mubr.f32.gmra.mxu1 %v76_v27 }
  0x93   :  { %362 = vmatprep.mubr.f32.mxu0 %v2150_v3  ;;  %554 = vmatprep.mubr.f32.mxu1 %v2150_v3 }
  0x96   :  { %363 = vmatmul.mubr.f32.gmra.mxu0 %v45_v28  ;;  %555 = vmatmul.mubr.f32.gmra.mxu1 %v77_v29 }
  0x97   :  { %368 = vmatprep.mubr.f32.mxu0 %v2150_v3  ;;  %560 = vmatprep.mubr.f32.mxu1 %v2150_v3 }
  0x9a   :  { %369 = vmatmul.mubr.f32.gmra.mxu0 %v46_v30  ;;  %561 = vmatmul.mubr.f32.gmra.mxu1 %v78_v31 }
  0x9b   :  { %374 = vmatprep.mubr.f32.mxu0 %v2150_v3  ;;  %566 = vmatprep.mubr.f32.mxu1 %v2150_v3  ;;  %v2533_v3 = vrot.slane %v112_v37, %v120_v38 }
  0x9e   :  { %375 = vmatmul.mubr.f32.gmra.mxu0 %v47_v32  ;;  %567 = vmatmul.mubr.f32.gmra.mxu1 %v79_v33 }
  0xe2   :  { %v190_v40 = vpop.f32.mrf.mxu0  ;;  %v382_v41 = vpop.f32.mrf.mxu1 }
  0xe3   :  { %v2536_v42 = vadd.f32 %v190_v40, %v2531_v39  ;;  %v2539_v43 = vadd.f32 %v382_v41, %v2531_v39 }
  0xe4   :  { %v192_v44 = vpop.f32.mrf.mxu0  ;;  %v384_v45 = vpop.f32.mrf.mxu1 }
  0xe5   :  { %v573_v46 = vsub.f32 0.0, %v2536_v42  ;;  %v637_v47 = vsub.f32 0.0, %v2539_v43  ;;  %v2544_v48 = vadd.f32 %v192_v44, %v2533_v3  ;;  %v2547_v49 = vadd.f32 %v384_v45, %v2533_v3 }
  0xe6   :  { %v196_v50 = vpop.f32.mrf.mxu0  ;;  %v388_v51 = vpop.f32.mrf.mxu1 }
  0xe7   :  { %v701_v52 = vmul.f32 1.442695, %v573_v46  ;;  %v829_v53 = vmul.f32 1.442695, %v637_v47  ;;  %v574_v54 = vsub.f32 0.0, %v2544_v48  ;;  %v638_v55 = vsub.f32 0.0, %v2547_v49 }
  0xe8   :  { %v2552_v56 = vadd.f32 %v196_v50, %v2531_v39  ;;  %v2555_v57 = vadd.f32 %v388_v51, %v2531_v39  ;;  %v198_v58 = vpop.f32.mrf.mxu0  ;;  %v390_v59 = vpop.f32.mrf.mxu1 }
  0xe9   :  { %1638 = vpow2.f32 %v701_v52  ;;  %v703_v60 = vmul.f32 1.442695, %v574_v54  ;;  %v831_v61 = vmul.f32 1.442695, %v638_v55  ;;  %v2558_v62 = vadd.f32 %v198_v58, %v2533_v3 }
  0xea   :  { %1640 = vpow2.f32 %v829_v53  ;;  %v575_v63 = vsub.f32 0.0, %v2552_v56  ;;  %v639_v0 = vsub.f32 0.0, %v2555_v57  ;;  %v2563_v1 = vadd.f32 %v390_v59, %v2533_v3  ;;  %v202_v2 = vpop.f32.mrf.mxu0  ;;  %v394_v4 = vpop.f32.mrf.mxu1 }
  0xeb   :  { %1642 = vpow2.f32 %v703_v60  ;;  %v576_v5 = vsub.f32 0.0, %v2558_v62  ;;  %v2567_v6 = vadd.f32 %v202_v2, %v2531_v39  ;;  %v2570_v7 = vadd.f32 %v394_v4, %v2531_v39 }
  0xec   :  { %1644 = vpow2.f32 %v831_v61  ;;  %v705_v8 = vmul.f32 1.442695, %v575_v63  ;;  %v833_v9 = vmul.f32 1.442695, %v639_v0  ;;  %v640_v10 = vsub.f32 0.0, %v2563_v1  ;;  %v204_v11 = vpop.f32.mrf.mxu0  ;;  %v396_v12 = vpop.f32.mrf.mxu1 }
  0xed   :  { %v707_v13 = vmul.f32 1.442695, %v576_v5  ;;  %v577_v14 = vsub.f32 0.0, %v2567_v6  ;;  %v641_v15 = vsub.f32 0.0, %v2570_v7  ;;  %v2576_v16 = vadd.f32 %v204_v11, %v2533_v3 }
  0xee   :  { %1646 = vpow2.f32 %v705_v8  ;;  %v835_v17 = vmul.f32 1.442695, %v640_v10  ;;  %v2579_v18 = vadd.f32 %v396_v12, %v2533_v3  ;;  %v208_v19 = vpop.f32.mrf.mxu0  ;;  %v400_v20 = vpop.f32.mrf.mxu1 }
  0xef   :  { %1648 = vpow2.f32 %v833_v9  ;;  %v709_v21 = vmul.f32 1.442695, %v577_v14  ;;  %v837_v22 = vmul.f32 1.442695, %v641_v15  ;;  %v578_v23 = vsub.f32 0.0, %v2576_v16 }
  0xf0   :  { %1650 = vpow2.f32 %v707_v13  ;;  %v642_v24 = vsub.f32 0.0, %v2579_v18  ;;  %v2584_v25 = vadd.f32 %v208_v19, %v2531_v39  ;;  %v2587_v26 = vadd.f32 %v400_v20, %v2531_v39  ;;  %v210_v27 = vpop.f32.mrf.mxu0  ;;  %v402_v28 = vpop.f32.mrf.mxu1 }
  0xf1   :  { %1652 = vpow2.f32 %v835_v17  ;;  %v711_v29 = vmul.f32 1.442695, %v578_v23  ;;  %v2590_v30 = vadd.f32 %v210_v27, %v2533_v3  ;;  %v2593_v31 = vadd.f32 %v402_v28, %v2533_v3 }
  0xf2   :  { %1654 = vpow2.f32 %v709_v21  ;;  %v839_v32 = vmul.f32 1.442695, %v642_v24  ;;  %v579_v33 = vsub.f32 0.0, %v2584_v25  ;;  %v643_v34 = vsub.f32 0.0, %v2587_v26  ;;  %v214_v35 = vpop.f32.mrf.mxu0  ;;  %v406_v36 = vpop.f32.mrf.mxu1 }
  0xf3   :  { %1656 = vpow2.f32 %v837_v22  ;;  %v580_v37 = vsub.f32 0.0, %v2590_v30  ;;  %v644_v46 = vsub.f32 0.0, %v2593_v31  ;;  %v2600_v0 = vadd.f32 %v214_v35, %v2531_v39 }
  0xf4   :  { %1658 = vpow2.f32 %v711_v29  ;;  %v713_v38 = vmul.f32 1.442695, %v579_v33  ;;  %v841_v40 = vmul.f32 1.442695, %v643_v34  ;;  %v216_v41 = vpop.f32.mrf.mxu0  ;;  %v408_v44 = vpop.f32.mrf.mxu1  ;;  %v2603_v4 = vadd.f32 %v406_v36, %v2531_v39 }
  0xf5   :  { %1660 = vpow2.f32 %v839_v32  ;;  %v715_v45 = vmul.f32 1.442695, %v580_v37  ;;  %v843_v60 = vmul.f32 1.442695, %v644_v46  ;;  %v2606_v9 = vadd.f32 %v216_v41, %v2533_v3 }
  0xf6   :  { %v1639_v47 = vpop.eup %1638  ;;  %1662 = vpow2.f32 %v713_v38  ;;  %v220_v50 = vpop.f32.mrf.mxu0  ;;  %v2609_v13 = vadd.f32 %v408_v44, %v2533_v3  ;;  %v581_v19 = vsub.f32 0.0, %v2600_v0  ;;  %v645_v23 = vsub.f32 0.0, %v2603_v4 }
  0xf7   :  { %v1641_v51 = vpop.eup %1640  ;;  %v957_v52 = vadd.f32 1.0, %v1639_v47  ;;  %1664 = vpow2.f32 %v841_v40  ;;  %v412_v55 = vpop.f32.mrf.mxu1  ;;  %v2613_v20 = vadd.f32 %v220_v50, %v2531_v39  ;;  %v582_v29 = vsub.f32 0.0, %v2606_v9 }
  0xf8   :  { %v1643_v53 = vpop.eup %1642  ;;  %v1021_v54 = vadd.f32 1.0, %v1641_v51  ;;  %1666 = vpow2.f32 %v715_v45  ;;  %v222_v61 = vpop.f32.mrf.mxu0  ;;  %v2617_v24 = vadd.f32 %v412_v55, %v2531_v39  ;;  %v646_v35 = vsub.f32 0.0, %v2609_v13 }
  0xf9   :  { %v1645_v58 = vpop.eup %1644  ;;  %1668 = vrcp.f32 %v957_v52  ;;  %v958_v59 = vadd.f32 1.0, %v1643_v53  ;;  %v414_v10 = vpop.f32.mrf.mxu1  ;;  %v2622_v36 = vadd.f32 %v222_v61, %v2533_v3  ;;  %v717_v41 = vmul.f32 1.442695, %v581_v19 }
  0xfa   :  { %1670 = vrcp.f32 %v1021_v54  ;;  %v1022_v63 = vadd.f32 1.0, %v1645_v58  ;;  %v226_v14 = vpop.f32.mrf.mxu0  ;;  %v583_v44 = vsub.f32 0.0, %v2613_v20  ;;  %v845_v47 = vmul.f32 1.442695, %v645_v23 }
  0xfb   :  { %v1647_v2 = vpop.eup %1646  ;;  %1672 = vrcp.f32 %v958_v59  ;;  %v418_v32 = vpop.f32.mrf.mxu1  ;;  %v647_v50 = vsub.f32 0.0, %v2617_v24  ;;  %v719_v53 = vmul.f32 1.442695, %v582_v29  ;;  %v2627_v54 = vadd.f32 %v414_v10, %v2533_v3 }
  0xfc   :  { %v1649_v5 = vpop.eup %1648  ;;  %1674 = vrcp.f32 %v1022_v63  ;;  %v959_v8 = vadd.f32 1.0, %v1647_v2  ;;  %v228_v37 = vpop.f32.mrf.mxu0  ;;  %v584_v61 = vsub.f32 0.0, %v2622_v36 }
  0xfd   :  { %v1651_v11 = vpop.eup %1650  ;;  %v1023_v12 = vadd.f32 1.0, %v1649_v5  ;;  %1676 = vpow2.f32 %v843_v60  ;;  %v420_v55 = vpop.f32.mrf.mxu1  ;;  %v847_v60 = vmul.f32 1.442695, %v646_v35  ;;  %v849_v10 = vmul.f32 1.442695, %v647_v50 }
  0xfe   :  { %v1653_v15 = vpop.eup %1652  ;;  %1678 = vrcp.f32 %v959_v8  ;;  %v960_v17 = vadd.f32 1.0, %v1651_v11  ;;  %v232_v63 = vpop.f32.mrf.mxu0  ;;  %v721_v8 = vmul.f32 1.442695, %v583_v44  ;;  %v2631_v11 = vadd.f32 %v226_v14, %v2531_v39 }
  0xff   :  { %v1655_v21 = vpop.eup %1654  ;;  %1680 = vrcp.f32 %v1023_v12  ;;  %v1024_v22 = vadd.f32 1.0, %v1653_v15  ;;  %v2640_v23 = vadd.f32 %v228_v37, %v2533_v3  ;;  %v2647_v29 = vadd.f32 %v420_v55, %v2533_v3 }
 0x100   :  { %v1657_v27 = vpop.eup %1656  ;;  %1682 = vrcp.f32 %v960_v17  ;;  %v961_v28 = vadd.f32 1.0, %v1655_v21  ;;  %v2635_v17 = vadd.f32 %v418_v32, %v2531_v39  ;;  %v2655_v35 = vadd.f32 %v232_v63, %v2531_v39 }
 0x101   :  { %v1659_v33 = vpop.eup %1658  ;;  %1684 = vrcp.f32 %v1024_v22  ;;  %v1025_v34 = vadd.f32 1.0, %v1657_v27  ;;  %v648_v22 = vsub.f32 0.0, %v2627_v54  ;;  %v424_v27 = vpop.f32.mrf.mxu1  ;;  %v586_v44 = vsub.f32 0.0, %v2640_v23 }
 0x102   :  { %v1661_v38 = vpop.eup %1660  ;;  %1686 = vrcp.f32 %v961_v28  ;;  %v962_v40 = vadd.f32 1.0, %v1659_v33  ;;  %v723_v28 = vmul.f32 1.442695, %v584_v61 }
 0x103   :  { %v1663_v45 = vpop.eup %1662  ;;  %1688 = vrcp.f32 %v1025_v34  ;;  %v1026_v46 = vadd.f32 1.0, %v1661_v38  ;;  %v585_v34 = vsub.f32 0.0, %v2631_v11  ;;  %v649_v38 = vsub.f32 0.0, %v2635_v17 }
 0x104   :  { %v1665_v51 = vpop.eup %1664  ;;  %1690 = vrcp.f32 %v962_v40  ;;  %v963_v52 = vadd.f32 1.0, %v1663_v45  ;;  %v2662_v40 = vadd.f32 %v424_v27, %v2531_v39 }
 0x105   :  { %v1667_v58 = vpop.eup %1666  ;;  %1692 = vrcp.f32 %v1026_v46  ;;  %v1027_v59 = vadd.f32 1.0, %v1665_v51  ;;  %v426_v46 = vpop.f32.mrf.mxu1  ;;  %v851_v51 = vmul.f32 1.442695, %v648_v22  ;;  %v853_v61 = vmul.f32 1.442695, %v649_v38 }
 0x106   :  { %v1669_v2 = vpop.eup %1668  ;;  %1694 = vrcp.f32 %v963_v52  ;;  %v964_v5 = vadd.f32 1.0, %v1667_v58  ;;  %v650_v52 = vsub.f32 0.0, %v2647_v29  ;;  %v725_v58 = vmul.f32 1.442695, %v585_v34 }
 0x107   :  { %v1671_v12 = vpop.eup %1670  ;;  %v1341_v15 = vmul.f32 %v1669_v2, %v2536_v42  ;;  %1696 = vrcp.f32 %v1027_v59  ;;  %v587_v59 = vsub.f32 0.0, %v2655_v35  ;;  %v651_v63 = vsub.f32 0.0, %v2662_v40 }
 0x108   :  { %v1673_v19 = vpop.eup %1672  ;;  %v1405_v21 = vmul.f32 %v1671_v12, %v2539_v43  ;;  %1698 = vrcp.f32 %v964_v5  ;;  %v234_v43 = vpop.f32.mrf.mxu0  ;;  %v727_v5 = vmul.f32 1.442695, %v586_v44 }
 0x109   :  { %v1675_v14 = vpop.eup %1674  ;;  %1469 = vst [vmem:[%s3580_s3] sm:$0xff] %v1341_v15  ;;  %v1342_v42 = vmul.f32 %v1673_v19, %v2544_v48  ;;  %1700 = vpow2.f32 %v717_v41  ;;  %v2670_v45 = vadd.f32 %v234_v43, %v2533_v3  ;;  %v430_v12 = vpop.f32.mrf.mxu1  ;;  %v2696_v19 = vadd.f32 %v426_v46, %v2533_v3 }
 0x10a   :  { %v1677_v32 = vpop.eup %1676  ;;  %1501 = vst [vmem:[%s3580_s3 + $0x100] sm:$0xff] %v1405_v21  ;;  %v1406_v33 = vmul.f32 %v1675_v14, %v2547_v49  ;;  %1702 = vpow2.f32 %v845_v47  ;;  %v729_v27 = vmul.f32 1.442695, %v587_v59  ;;  %v2731_v59 = vadd.f32 %v430_v12, %v2531_v39 }
 0x10b   :  { %v1679_v48 = vpop.eup %1678  ;;  %1533 = vst [vmem:[%s3581_s4] sm:$0xff] %v1342_v42  ;;  %v1028_v37 = vadd.f32 1.0, %v1677_v32  ;;  %1704 = vpow2.f32 %v719_v53  ;;  %v2674_v53 = vpop.f32.mrf.mxu0  ;;  %v857_v42 = vmul.f32 1.442695, %v651_v63 }
 0x10c   :  { %v1681_v41 = vpop.eup %1680  ;;  %1565 = vst [vmem:[%s3581_s4 + $0x100] sm:$0xff] %v1406_v33  ;;  %v1343_v49 = vmul.f32 %v1679_v48, %v2552_v56  ;;  %1706 = vpow2.f32 %v847_v60  ;;  %v432_v32 = vpop.f32.mrf.mxu1 }
 0x10d   :  { %v1683_v47 = vpop.eup %1682  ;;  %v1407_v50 = vmul.f32 %v1681_v41, %v2555_v57  ;;  %1708 = vrcp.f32 %v1028_v37  ;;  %v240_v21 = vpop.f32.mrf.mxu0 }
 0x10e   :  { %v1685_v55 = vpop.eup %1684  ;;  %1470 = vst [vmem:[%s3580_s3 + $0x8] sm:$0xff] %v1343_v49  ;;  %v1344_v56 = vmul.f32 %v1683_v47, %v2558_v62  ;;  %1710 = vpow2.f32 %v721_v8  ;;  %v588_v8 = vsub.f32 0.0, %v2670_v45  ;;  %v436_v44 = vpop.f32.mrf.mxu1 }
 0x10f   :  { %v1687_v60 = vpop.eup %1686  ;;  %1502 = vst [vmem:[%s3580_s3 + $0x108] sm:$0xff] %v1407_v50  ;;  %v1408_v57 = vmul.f32 %v1685_v55, %v2563_v1  ;;  %1712 = vpow2.f32 %v849_v10  ;;  %v855_v10 = vmul.f32 1.442695, %v650_v52  ;;  %v244_v48 = vpop.f32.mrf.mxu0  ;;  %v2727_v55 = vadd.f32 %v2674_v53, %v2531_v39 }
 0x110   :  { %v1689_v2 = vpop.eup %1688  ;;  %1534 = vst [vmem:[%s3581_s4 + $0x8] sm:$0xff] %v1344_v56  ;;  %v1345_v62 = vmul.f32 %v1687_v60, %v2567_v6  ;;  %1714 = vpow2.f32 %v723_v28  ;;  %v438_v63 = vpop.f32.mrf.mxu1 }
 0x111   :  { %v1691_v15 = vpop.eup %1690  ;;  %1566 = vst [vmem:[%s3581_s4 + $0x108] sm:$0xff] %v1408_v57  ;;  %v1409_v1 = vmul.f32 %v1689_v2, %v2570_v7  ;;  %1716 = vpow2.f32 %v851_v51  ;;  %v246_v50 = vpop.f32.mrf.mxu0  ;;  %v589_v12 = vsub.f32 0.0, %v2727_v55 }
 0x112   :  { %v1693_v22 = vpop.eup %1692  ;;  %1471 = vst [vmem:[%s3580_s3 + $0x10] sm:$0xff] %v1345_v62  ;;  %v1346_v6 = vmul.f32 %v1691_v15, %v2576_v16  ;;  %1718 = vpow2.f32 %v725_v58  ;;  %v731_v16 = vmul.f32 1.442695, %v588_v8  ;;  %v2744_v15 = vadd.f32 %v244_v48, %v2531_v39 }
 0x113   :  { %v1695_v14 = vpop.eup %1694  ;;  %1503 = vst [vmem:[%s3580_s3 + $0x110] sm:$0xff] %v1409_v1  ;;  %v1410_v7 = vmul.f32 %v1693_v22, %v2579_v18  ;;  %1720 = vpow2.f32 %v853_v61  ;;  %v652_v18 = vsub.f32 0.0, %v2696_v19  ;;  %v2734_v61 = vadd.f32 %v240_v21, %v2533_v3  ;;  %v250_v62 = vpop.f32.mrf.mxu0 }
 0x114   :  { %v1697_v28 = vpop.eup %1696  ;;  %1535 = vst [vmem:[%s3581_s4 + $0x10] sm:$0xff] %v1346_v6  ;;  %v1347_v43 = vmul.f32 %v1695_v14, %v2584_v25  ;;  %1722 = vpow2.f32 %v727_v5  ;;  %v653_v21 = vsub.f32 0.0, %v2731_v59  ;;  %v2748_v22 = vadd.f32 %v436_v44, %v2531_v39 }
 0x115   :  { %v1699_v33 = vpop.eup %1698  ;;  %1567 = vst [vmem:[%s3581_s4 + $0x110] sm:$0xff] %v1410_v7  ;;  %v1411_v34 = vmul.f32 %v1697_v28, %v2587_v26  ;;  %1724 = vpow2.f32 %v855_v10  ;;  %v590_v14 = vsub.f32 0.0, %v2734_v61  ;;  %v442_v7 = vpop.f32.mrf.mxu1  ;;  %v591_v48 = vsub.f32 0.0, %v2744_v15 }
 0x116   :  { %v1701_v37 = vpop.eup %1700  ;;  %1472 = vst [vmem:[%s3580_s3 + $0x18] sm:$0xff] %v1347_v43  ;;  %v1348_v25 = vmul.f32 %v1699_v33, %v2590_v30  ;;  %1726 = vpow2.f32 %v729_v27  ;;  %v859_v30 = vmul.f32 1.442695, %v652_v18  ;;  %v733_v18 = vmul.f32 1.442695, %v589_v12 }
 0x117   :  { %v1703_v38 = vpop.eup %1702  ;;  %1504 = vst [vmem:[%s3580_s3 + $0x118] sm:$0xff] %v1411_v34  ;;  %v965_v41 = vadd.f32 1.0, %v1701_v37  ;;  %1728 = vpow2.f32 %v857_v42  ;;  %v735_v44 = vmul.f32 1.442695, %v590_v14 }
 0x118   :  { %v1705_v26 = vpop.eup %1704  ;;  %1536 = vst [vmem:[%s3581_s4 + $0x18] sm:$0xff] %v1348_v25  ;;  %v1029_v49 = vadd.f32 1.0, %v1703_v38  ;;  %1730 = vpow2.f32 %v731_v16  ;;  %v2753_v16 = vadd.f32 %v246_v50, %v2533_v3  ;;  %v861_v38 = vmul.f32 1.442695, %v653_v21 }
 0x119   :  { %v1707_v46 = vpop.eup %1706  ;;  %1732 = vrcp.f32 %v965_v41  ;;  %v966_v47 = vadd.f32 1.0, %v1705_v26  ;;  %v655_v41 = vsub.f32 0.0, %v2748_v22 }
 0x11a   :  { %v1709_v51 = vpop.eup %1708  ;;  %1734 = vrcp.f32 %v1029_v49  ;;  %v1030_v52 = vadd.f32 1.0, %v1707_v46  ;;  %v2758_v46 = vadd.f32 %v438_v63, %v2533_v3 }
 0x11b   :  { %v1711_v56 = vpop.eup %1710  ;;  %v1412_v58 = vmul.f32 %v1709_v51, %v2593_v31  ;;  %1736 = vrcp.f32 %v966_v47  ;;  %v2740_v31 = vadd.f32 %v432_v32, %v2533_v3  ;;  %v252_v32 = vpop.f32.mrf.mxu0  ;;  %v865_v63 = vmul.f32 1.442695, %v655_v41 }
 0x11c   :  { %v1713_v60 = vpop.eup %1712  ;;  %1738 = vrcp.f32 %v1030_v52  ;;  %v967_v57 = vadd.f32 1.0, %v1711_v56  ;;  %v444_v47 = vpop.f32.mrf.mxu1  ;;  %v592_v52 = vsub.f32 0.0, %v2753_v16  ;;  %v2771_v21 = vadd.f32 %v252_v32, %v2533_v3 }
 0x11d   :  { %v1715_v2 = vpop.eup %1714  ;;  %1568 = vst [vmem:[%s3581_s4 + $0x118] sm:$0xff] %v1412_v58  ;;  %v1031_v53 = vadd.f32 1.0, %v1713_v60  ;;  %1740 = vpow2.f32 %v859_v30  ;;  %v654_v43 = vsub.f32 0.0, %v2740_v31  ;;  %v256_v56 = vpop.f32.mrf.mxu0  ;;  %v2778_v14 = vadd.f32 %v444_v47, %v2533_v3 }
 0x11e   :  { %v1717_v5 = vpop.eup %1716  ;;  %1742 = vrcp.f32 %v967_v57  ;;  %v968_v8 = vadd.f32 1.0, %v1715_v2  ;;  %v737_v57 = vmul.f32 1.442695, %v591_v48  ;;  %v2762_v2 = vadd.f32 %v250_v62, %v2531_v39 }
 0x11f   :  { %v1719_v1 = vpop.eup %1718  ;;  %1744 = vrcp.f32 %v1031_v53  ;;  %v1032_v10 = vadd.f32 1.0, %v1717_v5  ;;  %v863_v51 = vmul.f32 1.442695, %v654_v43  ;;  %v2786_v43 = vadd.f32 %v256_v56, %v2531_v39 }
 0x120   :  { %v1721_v6 = vpop.eup %1720  ;;  %1746 = vrcp.f32 %v968_v8  ;;  %v969_v27 = vadd.f32 1.0, %v1719_v1  ;;  %v2766_v8 = vadd.f32 %v442_v7, %v2531_v39  ;;  %v594_v48 = vsub.f32 0.0, %v2771_v21 }
 0x121   :  { %v1723_v42 = vpop.eup %1722  ;;  %1748 = vrcp.f32 %v1032_v10  ;;  %v1033_v28 = vadd.f32 1.0, %v1721_v6  ;;  %v656_v10 = vsub.f32 0.0, %v2758_v46  ;;  %v448_v6 = vpop.f32.mrf.mxu1 }
 0x122   :  { %v1725_v33 = vpop.eup %1724  ;;  %1750 = vrcp.f32 %v969_v27  ;;  %v970_v34 = vadd.f32 1.0, %v1723_v42  ;;  %v739_v27 = vmul.f32 1.442695, %v592_v52 }
 0x123   :  { %v1727_v37 = vpop.eup %1726  ;;  %1752 = vrcp.f32 %v1033_v28  ;;  %v1034_v25 = vadd.f32 1.0, %v1725_v33  ;;  %v593_v28 = vsub.f32 0.0, %v2762_v2  ;;  %v657_v33 = vsub.f32 0.0, %v2766_v8 }
 0x124   :  { %v1729_v26 = vpop.eup %1728  ;;  %1754 = vrcp.f32 %v970_v34  ;;  %v971_v49 = vadd.f32 1.0, %v1727_v37  ;;  %v2793_v34 = vadd.f32 %v448_v6, %v2531_v39 }
 0x125   :  { %v1731_v30 = vpop.eup %1730  ;;  %1756 = vrcp.f32 %v1034_v25  ;;  %v1035_v50 = vadd.f32 1.0, %v1729_v26  ;;  %v450_v25 = vpop.f32.mrf.mxu1  ;;  %v867_v26 = vmul.f32 1.442695, %v656_v10  ;;  %v869_v52 = vmul.f32 1.442695, %v657_v33 }
 0x126   :  { %v1733_v58 = vpop.eup %1732  ;;  %1758 = vrcp.f32 %v971_v49  ;;  %v972_v60 = vadd.f32 1.0, %v1731_v30  ;;  %v658_v49 = vsub.f32 0.0, %v2778_v14  ;;  %v741_v30 = vmul.f32 1.442695, %v593_v28 }
 0x127   :  { %v1735_v53 = vpop.eup %1734  ;;  %v1349_v5 = vmul.f32 %v1733_v58, %v2600_v0  ;;  %1760 = vrcp.f32 %v1035_v50  ;;  %v595_v50 = vsub.f32 0.0, %v2786_v43  ;;  %v659_v56 = vsub.f32 0.0, %v2793_v34 }
 0x128   :  { %v1737_v12 = vpop.eup %1736  ;;  %v1413_v1 = vmul.f32 %v1735_v53, %v2603_v4  ;;  %1762 = vrcp.f32 %v972_v60  ;;  %v258_v4 = vpop.f32.mrf.mxu0  ;;  %v743_v60 = vmul.f32 1.442695, %v594_v48 }
 0x129   :  { %v1739_v62 = vpop.eup %1738  ;;  %1473 = vst [vmem:[%s3580_s3 + $0x20] sm:$0xff] %v1349_v5  ;;  %v1350_v0 = vmul.f32 %v1737_v12, %v2606_v9  ;;  %1764 = vpow2.f32 %v733_v18  ;;  %v2801_v37 = vadd.f32 %v258_v4, %v2533_v3  ;;  %v454_v53 = vpop.f32.mrf.mxu1  ;;  %v2827_v12 = vadd.f32 %v450_v25, %v2533_v3 }
 0x12a   :  { %v1741_v7 = vpop.eup %1740  ;;  %1505 = vst [vmem:[%s3580_s3 + $0x120] sm:$0xff] %v1413_v1  ;;  %v1414_v42 = vmul.f32 %v1739_v62, %v2609_v13  ;;  %1766 = vpow2.f32 %v861_v38  ;;  %v745_v6 = vmul.f32 1.442695, %v595_v50  ;;  %v2862_v50 = vadd.f32 %v454_v53, %v2531_v39 }
 0x12b   :  { %v1743_v9 = vpop.eup %1742  ;;  %1537 = vst [vmem:[%s3581_s4 + $0x20] sm:$0xff] %v1350_v0  ;;  %v1036_v32 = vadd.f32 1.0, %v1741_v7  ;;  %1768 = vpow2.f32 %v735_v44  ;;  %v2805_v44 = vpop.f32.mrf.mxu0  ;;  %v873_v0 = vmul.f32 1.442695, %v659_v56 }
 0x12c   :  { %v1745_v18 = vpop.eup %1744  ;;  %1569 = vst [vmem:[%s3581_s4 + $0x120] sm:$0xff] %v1414_v42  ;;  %v1351_v13 = vmul.f32 %v1743_v9, %v2613_v20  ;;  %1770 = vpow2.f32 %v863_v51  ;;  %v456_v7 = vpop.f32.mrf.mxu1 }
 0x12d   :  { %v1747_v38 = vpop.eup %1746  ;;  %v1415_v41 = vmul.f32 %v1745_v18, %v2617_v24  ;;  %1772 = vrcp.f32 %v1036_v32  ;;  %v264_v1 = vpop.f32.mrf.mxu0 }
 0x12e   :  { %v1749_v47 = vpop.eup %1748  ;;  %1474 = vst [vmem:[%s3580_s3 + $0x28] sm:$0xff] %v1351_v13  ;;  %v1352_v20 = vmul.f32 %v1747_v38, %v2622_v36  ;;  %1774 = vpow2.f32 %v737_v57  ;;  %v596_v57 = vsub.f32 0.0, %v2801_v37  ;;  %v460_v48 = vpop.f32.mrf.mxu1 }
 0x12f   :  { %v1751_v51 = vpop.eup %1750  ;;  %1506 = vst [vmem:[%s3580_s3 + $0x128] sm:$0xff] %v1415_v41  ;;  %v1416_v24 = vmul.f32 %v1749_v47, %v2627_v54  ;;  %1776 = vpow2.f32 %v865_v63  ;;  %v871_v63 = vmul.f32 1.442695, %v658_v49  ;;  %v268_v9 = vpop.f32.mrf.mxu0  ;;  %v2858_v47 = vadd.f32 %v2805_v44, %v2531_v39 }
 0x130   :  { %v1753_v58 = vpop.eup %1752  ;;  %1538 = vst [vmem:[%s3581_s4 + $0x28] sm:$0xff] %v1352_v20  ;;  %v1353_v36 = vmul.f32 %v1751_v51, %v2631_v11  ;;  %1778 = vpow2.f32 %v739_v27  ;;  %v462_v56 = vpop.f32.mrf.mxu1 }
 0x131   :  { %v1755_v5 = vpop.eup %1754  ;;  %1570 = vst [vmem:[%s3581_s4 + $0x128] sm:$0xff] %v1416_v24  ;;  %v1417_v54 = vmul.f32 %v1753_v58, %v2635_v17  ;;  %1780 = vpow2.f32 %v867_v26  ;;  %v270_v41 = vpop.f32.mrf.mxu0  ;;  %v597_v53 = vsub.f32 0.0, %v2858_v47 }
 0x132   :  { %v1757_v10 = vpop.eup %1756  ;;  %1475 = vst [vmem:[%s3580_s3 + $0x30] sm:$0xff] %v1353_v36  ;;  %v1354_v11 = vmul.f32 %v1755_v5, %v2640_v23  ;;  %1782 = vpow2.f32 %v741_v30  ;;  %v747_v23 = vmul.f32 1.442695, %v596_v57  ;;  %v2875_v5 = vadd.f32 %v268_v9, %v2531_v39 }
 0x133   :  { %v1759_v62 = vpop.eup %1758  ;;  %1507 = vst [vmem:[%s3580_s3 + $0x130] sm:$0xff] %v1417_v54  ;;  %v1418_v17 = vmul.f32 %v1757_v10, %v2647_v29  ;;  %1784 = vpow2.f32 %v869_v52  ;;  %v660_v29 = vsub.f32 0.0, %v2827_v12  ;;  %v2865_v52 = vadd.f32 %v264_v1, %v2533_v3  ;;  %v274_v36 = vpop.f32.mrf.mxu0 }
 0x134   :  { %v1761_v27 = vpop.eup %1760  ;;  %1539 = vst [vmem:[%s3581_s4 + $0x30] sm:$0xff] %v1354_v11  ;;  %v1355_v4 = vmul.f32 %v1759_v62, %v2655_v35  ;;  %1786 = vpow2.f32 %v743_v60  ;;  %v661_v1 = vsub.f32 0.0, %v2862_v50  ;;  %v2879_v10 = vadd.f32 %v460_v48, %v2531_v39 }
 0x135   :  { %v1763_v42 = vpop.eup %1762  ;;  %1571 = vst [vmem:[%s3581_s4 + $0x130] sm:$0xff] %v1418_v17  ;;  %v1419_v28 = vmul.f32 %v1761_v27, %v2662_v40  ;;  %1788 = vpow2.f32 %v871_v63  ;;  %v598_v62 = vsub.f32 0.0, %v2865_v52  ;;  %v466_v17 = vpop.f32.mrf.mxu1  ;;  %v599_v9 = vsub.f32 0.0, %v2875_v5 }
 0x136   :  { %v1765_v32 = vpop.eup %1764  ;;  %1476 = vst [vmem:[%s3580_s3 + $0x38] sm:$0xff] %v1355_v4  ;;  %v1356_v35 = vmul.f32 %v1763_v42, %v2670_v45  ;;  %1790 = vpow2.f32 %v745_v6  ;;  %v875_v45 = vmul.f32 1.442695, %v660_v29  ;;  %v749_v29 = vmul.f32 1.442695, %v597_v53 }
 0x137   :  { %v1767_v33 = vpop.eup %1766  ;;  %1508 = vst [vmem:[%s3580_s3 + $0x138] sm:$0xff] %v1419_v28  ;;  %v973_v18 = vadd.f32 1.0, %v1765_v32  ;;  %1792 = vpow2.f32 %v873_v0  ;;  %v751_v48 = vmul.f32 1.442695, %v598_v62 }
 0x138   :  { %v1769_v40 = vpop.eup %1768  ;;  %1540 = vst [vmem:[%s3581_s4 + $0x38] sm:$0xff] %v1356_v35  ;;  %v1037_v13 = vadd.f32 1.0, %v1767_v33  ;;  %1794 = vpow2.f32 %v747_v23  ;;  %v2884_v23 = vadd.f32 %v270_v41, %v2533_v3  ;;  %v877_v33 = vmul.f32 1.442695, %v661_v1 }
 0x139   :  { %v1771_v25 = vpop.eup %1770  ;;  %1796 = vrcp.f32 %v973_v18  ;;  %v974_v38 = vadd.f32 1.0, %v1769_v40  ;;  %v663_v18 = vsub.f32 0.0, %v2879_v10 }
 0x13a   :  { %v1773_v26 = vpop.eup %1772  ;;  %1798 = vrcp.f32 %v1037_v13  ;;  %v1038_v49 = vadd.f32 1.0, %v1771_v25  ;;  %v2889_v25 = vadd.f32 %v462_v56, %v2533_v3 }
 0x13b   :  { %v1775_v20 = vpop.eup %1774  ;;  %v1420_v30 = vmul.f32 %v1773_v26, %v2696_v19  ;;  %1800 = vrcp.f32 %v974_v38  ;;  %v2871_v19 = vadd.f32 %v456_v7, %v2533_v3  ;;  %v276_v7 = vpop.f32.mrf.mxu0  ;;  %v881_v56 = vmul.f32 1.442695, %v663_v18 }
 0x13c   :  { %v1777_v51 = vpop.eup %1776  ;;  %1802 = vrcp.f32 %v1038_v49  ;;  %v975_v24 = vadd.f32 1.0, %v1775_v20  ;;  %v468_v38 = vpop.f32.mrf.mxu1  ;;  %v600_v49 = vsub.f32 0.0, %v2884_v23  ;;  %v2902_v1 = vadd.f32 %v276_v7, %v2533_v3 }
 0x13d   :  { %v1779_v58 = vpop.eup %1778  ;;  %1572 = vst [vmem:[%s3581_s4 + $0x138] sm:$0xff] %v1420_v30  ;;  %v1039_v44 = vadd.f32 1.0, %v1777_v51  ;;  %1804 = vpow2.f32 %v875_v45  ;;  %v662_v4 = vsub.f32 0.0, %v2871_v19  ;;  %v280_v20 = vpop.f32.mrf.mxu0  ;;  %v2909_v62 = vadd.f32 %v468_v38, %v2533_v3 }
 0x13e   :  { %v1781_v60 = vpop.eup %1780  ;;  %1806 = vrcp.f32 %v975_v24  ;;  %v976_v57 = vadd.f32 1.0, %v1779_v58  ;;  %v753_v24 = vmul.f32 1.442695, %v599_v9  ;;  %v2893_v58 = vadd.f32 %v274_v36, %v2531_v39 }
 0x13f   :  { %v1783_v54 = vpop.eup %1782  ;;  %1808 = vrcp.f32 %v1039_v44  ;;  %v1040_v63 = vadd.f32 1.0, %v1781_v60  ;;  %v879_v26 = vmul.f32 1.442695, %v662_v4  ;;  %v2917_v4 = vadd.f32 %v280_v20, %v2531_v39 }
 0x140   :  { %v1785_v11 = vpop.eup %1784  ;;  %1810 = vrcp.f32 %v976_v57  ;;  %v977_v6 = vadd.f32 1.0, %v1783_v54  ;;  %v2897_v57 = vadd.f32 %v466_v17, %v2531_v39  ;;  %v602_v9 = vsub.f32 0.0, %v2902_v1 }
 0x141   :  { %v1787_v0 = vpop.eup %1786  ;;  %1812 = vrcp.f32 %v1040_v63  ;;  %v1041_v27 = vadd.f32 1.0, %v1785_v11  ;;  %v664_v63 = vsub.f32 0.0, %v2889_v25  ;;  %v472_v11 = vpop.f32.mrf.mxu1 }
 0x142   :  { %v1789_v42 = vpop.eup %1788  ;;  %1814 = vrcp.f32 %v977_v6  ;;  %v978_v28 = vadd.f32 1.0, %v1787_v0  ;;  %v755_v6 = vmul.f32 1.442695, %v600_v49 }
 0x143   :  { %v1791_v32 = vpop.eup %1790  ;;  %1816 = vrcp.f32 %v1041_v27  ;;  %v1042_v35 = vadd.f32 1.0, %v1789_v42  ;;  %v601_v27 = vsub.f32 0.0, %v2893_v58  ;;  %v665_v42 = vsub.f32 0.0, %v2897_v57 }
 0x144   :  { %v1793_v40 = vpop.eup %1792  ;;  %1818 = vrcp.f32 %v978_v28  ;;  %v979_v13 = vadd.f32 1.0, %v1791_v32  ;;  %v2924_v28 = vadd.f32 %v472_v11, %v2531_v39 }
 0x145   :  { %v1795_v45 = vpop.eup %1794  ;;  %1820 = vrcp.f32 %v1042_v35  ;;  %v1043_v41 = vadd.f32 1.0, %v1793_v40  ;;  %v474_v35 = vpop.f32.mrf.mxu1  ;;  %v883_v40 = vmul.f32 1.442695, %v664_v63  ;;  %v885_v49 = vmul.f32 1.442695, %v665_v42 }
 0x146   :  { %v1797_v30 = vpop.eup %1796  ;;  %1822 = vrcp.f32 %v979_v13  ;;  %v980_v51 = vadd.f32 1.0, %v1795_v45  ;;  %v666_v13 = vsub.f32 0.0, %v2909_v62  ;;  %v757_v45 = vmul.f32 1.442695, %v601_v27 }
 0x147   :  { %v1799_v44 = vpop.eup %1798  ;;  %v1357_v60 = vmul.f32 %v1797_v30, %v2727_v55  ;;  %1824 = vrcp.f32 %v1043_v41  ;;  %v603_v41 = vsub.f32 0.0, %v2917_v4  ;;  %v667_v20 = vsub.f32 0.0, %v2924_v28 }
 0x148   :  { %v1801_v53 = vpop.eup %1800  ;;  %v1421_v54 = vmul.f32 %v1799_v44, %v2731_v59  ;;  %1826 = vrcp.f32 %v980_v51  ;;  %v282_v59 = vpop.f32.mrf.mxu0  ;;  %v759_v51 = vmul.f32 1.442695, %v602_v9 }
 0x149   :  { %v1803_v36 = vpop.eup %1802  ;;  %1477 = vst [vmem:[%s3580_s3 + $0x40] sm:$0xff] %v1357_v60  ;;  %v1358_v55 = vmul.f32 %v1801_v53, %v2734_v61  ;;  %1828 = vpow2.f32 %v749_v29  ;;  %v2932_v32 = vadd.f32 %v282_v59, %v2533_v3  ;;  %v478_v44 = vpop.f32.mrf.mxu1  ;;  %v2958_v53 = vadd.f32 %v474_v35, %v2533_v3 }
 0x14a   :  { %v1805_v17 = vpop.eup %1804  ;;  %1509 = vst [vmem:[%s3580_s3 + $0x140] sm:$0xff] %v1421_v54  ;;  %v1422_v0 = vmul.f32 %v1803_v36, %v2740_v31  ;;  %1830 = vpow2.f32 %v877_v33  ;;  %v761_v11 = vmul.f32 1.442695, %v603_v41  ;;  %v2993_v41 = vadd.f32 %v478_v44, %v2531_v39 }
 0x14b   :  { %v1807_v61 = vpop.eup %1806  ;;  %1541 = vst [vmem:[%s3581_s4 + $0x40] sm:$0xff] %v1358_v55  ;;  %v1044_v7 = vadd.f32 1.0, %v1805_v17  ;;  %1832 = vpow2.f32 %v751_v48  ;;  %v2936_v48 = vpop.f32.mrf.mxu0  ;;  %v889_v55 = vmul.f32 1.442695, %v667_v20 }
 0x14c   :  { %v1809_v29 = vpop.eup %1808  ;;  %1573 = vst [vmem:[%s3581_s4 + $0x140] sm:$0xff] %v1422_v0  ;;  %v1359_v31 = vmul.f32 %v1807_v61, %v2744_v15  ;;  %1834 = vpow2.f32 %v879_v26  ;;  %v480_v17 = vpop.f32.mrf.mxu1 }
 0x14d   :  { %v1811_v33 = vpop.eup %1810  ;;  %v1423_v18 = vmul.f32 %v1809_v29, %v2748_v22  ;;  %1836 = vrcp.f32 %v1044_v7  ;;  %v288_v54 = vpop.f32.mrf.mxu0 }
 0x14e   :  { %v1813_v38 = vpop.eup %1812  ;;  %1478 = vst [vmem:[%s3580_s3 + $0x48] sm:$0xff] %v1359_v31  ;;  %v1360_v15 = vmul.f32 %v1811_v33, %v2753_v16  ;;  %1838 = vpow2.f32 %v753_v24  ;;  %v604_v24 = vsub.f32 0.0, %v2932_v32  ;;  %v484_v9 = vpop.f32.mrf.mxu1 }
 0x14f   :  { %v1815_v26 = vpop.eup %1814  ;;  %1510 = vst [vmem:[%s3580_s3 + $0x148] sm:$0xff] %v1423_v18  ;;  %v1424_v22 = vmul.f32 %v1813_v38, %v2758_v46  ;;  %1840 = vpow2.f32 %v881_v56  ;;  %v887_v56 = vmul.f32 1.442695, %v666_v13  ;;  %v292_v61 = vpop.f32.mrf.mxu0  ;;  %v2989_v38 = vadd.f32 %v2936_v48, %v2531_v39 }
 0x150   :  { %v1817_v30 = vpop.eup %1816  ;;  %1542 = vst [vmem:[%s3581_s4 + $0x48] sm:$0xff] %v1360_v15  ;;  %v1361_v16 = vmul.f32 %v1815_v26, %v2762_v2  ;;  %1842 = vpow2.f32 %v755_v6  ;;  %v486_v20 = vpop.f32.mrf.mxu1 }
 0x151   :  { %v1819_v60 = vpop.eup %1818  ;;  %1574 = vst [vmem:[%s3581_s4 + $0x148] sm:$0xff] %v1424_v22  ;;  %v1425_v46 = vmul.f32 %v1817_v30, %v2766_v8  ;;  %1844 = vpow2.f32 %v883_v40  ;;  %v294_v18 = vpop.f32.mrf.mxu0  ;;  %v605_v44 = vsub.f32 0.0, %v2989_v38 }
 0x152   :  { %v1821_v63 = vpop.eup %1820  ;;  %1479 = vst [vmem:[%s3580_s3 + $0x50] sm:$0xff] %v1361_v16  ;;  %v1362_v2 = vmul.f32 %v1819_v60, %v2771_v21  ;;  %1846 = vpow2.f32 %v757_v45  ;;  %v763_v21 = vmul.f32 1.442695, %v604_v24  ;;  %v3006_v60 = vadd.f32 %v292_v61, %v2531_v39 }
 0x153   :  { %v1823_v36 = vpop.eup %1822  ;;  %1511 = vst [vmem:[%s3580_s3 + $0x150] sm:$0xff] %v1425_v46  ;;  %v1426_v8 = vmul.f32 %v1821_v63, %v2778_v14  ;;  %1848 = vpow2.f32 %v885_v49  ;;  %v668_v14 = vsub.f32 0.0, %v2958_v53  ;;  %v2996_v49 = vadd.f32 %v288_v54, %v2533_v3  ;;  %v298_v16 = vpop.f32.mrf.mxu0 }
 0x154   :  { %v1825_v6 = vpop.eup %1824  ;;  %1543 = vst [vmem:[%s3581_s4 + $0x50] sm:$0xff] %v1362_v2  ;;  %v1363_v59 = vmul.f32 %v1823_v36, %v2786_v43  ;;  %1850 = vpow2.f32 %v759_v51  ;;  %v669_v54 = vsub.f32 0.0, %v2993_v41  ;;  %v3010_v63 = vadd.f32 %v484_v9, %v2531_v39 }
 0x155   :  { %v1827_v0 = vpop.eup %1826  ;;  %1575 = vst [vmem:[%s3581_s4 + $0x150] sm:$0xff] %v1426_v8  ;;  %v1427_v27 = vmul.f32 %v1825_v6, %v2793_v34  ;;  %1852 = vpow2.f32 %v887_v56  ;;  %v606_v36 = vsub.f32 0.0, %v2996_v49  ;;  %v490_v8 = vpop.f32.mrf.mxu1  ;;  %v607_v61 = vsub.f32 0.0, %v3006_v60 }
 0x156   :  { %v1829_v7 = vpop.eup %1828  ;;  %1480 = vst [vmem:[%s3580_s3 + $0x58] sm:$0xff] %v1363_v59  ;;  %v1364_v43 = vmul.f32 %v1827_v0, %v2801_v37  ;;  %1854 = vpow2.f32 %v761_v11  ;;  %v891_v37 = vmul.f32 1.442695, %v668_v14  ;;  %v765_v14 = vmul.f32 1.442695, %v605_v44 }
 0x157   :  { %v1831_v42 = vpop.eup %1830  ;;  %1512 = vst [vmem:[%s3580_s3 + $0x158] sm:$0xff] %v1427_v27  ;;  %v981_v29 = vadd.f32 1.0, %v1829_v7  ;;  %1856 = vpow2.f32 %v889_v55  ;;  %v767_v9 = vmul.f32 1.442695, %v606_v36 }
 0x158   :  { %v1833_v34 = vpop.eup %1832  ;;  %1544 = vst [vmem:[%s3581_s4 + $0x58] sm:$0xff] %v1364_v43  ;;  %v1045_v31 = vadd.f32 1.0, %v1831_v42  ;;  %1858 = vpow2.f32 %v763_v21  ;;  %v3015_v21 = vadd.f32 %v294_v18, %v2533_v3  ;;  %v893_v42 = vmul.f32 1.442695, %v669_v54 }
 0x159   :  { %v1835_v35 = vpop.eup %1834  ;;  %1860 = vrcp.f32 %v981_v29  ;;  %v982_v33 = vadd.f32 1.0, %v1833_v34  ;;  %v671_v29 = vsub.f32 0.0, %v3010_v63 }
 0x15a   :  { %v1837_v40 = vpop.eup %1836  ;;  %1862 = vrcp.f32 %v1045_v31  ;;  %v1046_v13 = vadd.f32 1.0, %v1835_v35  ;;  %v3020_v35 = vadd.f32 %v486_v20, %v2533_v3 }
 0x15b   :  { %v1839_v15 = vpop.eup %1838  ;;  %v1428_v45 = vmul.f32 %v1837_v40, %v2827_v12  ;;  %1864 = vrcp.f32 %v982_v33  ;;  %v3002_v12 = vadd.f32 %v480_v17, %v2533_v3  ;;  %v300_v17 = vpop.f32.mrf.mxu0  ;;  %v897_v20 = vmul.f32 1.442695, %v671_v29 }
 0x15c   :  { %v1841_v26 = vpop.eup %1840  ;;  %1866 = vrcp.f32 %v1046_v13  ;;  %v983_v22 = vadd.f32 1.0, %v1839_v15  ;;  %v492_v33 = vpop.f32.mrf.mxu1  ;;  %v608_v13 = vsub.f32 0.0, %v3015_v21  ;;  %v3033_v54 = vadd.f32 %v300_v17, %v2533_v3 }
 0x15d   :  { %v1843_v30 = vpop.eup %1842  ;;  %1576 = vst [vmem:[%s3581_s4 + $0x158] sm:$0xff] %v1428_v45  ;;  %v1047_v48 = vadd.f32 1.0, %v1841_v26  ;;  %1868 = vpow2.f32 %v891_v37  ;;  %v670_v59 = vsub.f32 0.0, %v3002_v12  ;;  %v304_v15 = vpop.f32.mrf.mxu0  ;;  %v3040_v36 = vadd.f32 %v492_v33, %v2533_v3 }
 0x15e   :  { %v1845_v51 = vpop.eup %1844  ;;  %1870 = vrcp.f32 %v983_v22  ;;  %v984_v24 = vadd.f32 1.0, %v1843_v30  ;;  %v769_v22 = vmul.f32 1.442695, %v607_v61  ;;  %v3024_v30 = vadd.f32 %v298_v16, %v2531_v39 }
 0x15f   :  { %v1847_v46 = vpop.eup %1846  ;;  %1872 = vrcp.f32 %v1047_v48  ;;  %v1048_v56 = vadd.f32 1.0, %v1845_v51  ;;  %v895_v40 = vmul.f32 1.442695, %v670_v59  ;;  %v3048_v59 = vadd.f32 %v304_v15, %v2531_v39 }
 0x160   :  { %v1849_v2 = vpop.eup %1848  ;;  %1874 = vrcp.f32 %v984_v24  ;;  %v985_v11 = vadd.f32 1.0, %v1847_v46  ;;  %v3028_v24 = vadd.f32 %v490_v8, %v2531_v39  ;;  %v610_v61 = vsub.f32 0.0, %v3033_v54 }
 0x161   :  { %v1851_v55 = vpop.eup %1850  ;;  %1876 = vrcp.f32 %v1048_v56  ;;  %v1049_v6 = vadd.f32 1.0, %v1849_v2  ;;  %v672_v56 = vsub.f32 0.0, %v3020_v35  ;;  %v496_v2 = vpop.f32.mrf.mxu1 }
 0x162   :  { %v1853_v0 = vpop.eup %1852  ;;  %1878 = vrcp.f32 %v985_v11  ;;  %v986_v27 = vadd.f32 1.0, %v1851_v55  ;;  %v771_v11 = vmul.f32 1.442695, %v608_v13 }
 0x163   :  { %v1855_v7 = vpop.eup %1854  ;;  %1880 = vrcp.f32 %v1049_v6  ;;  %v1050_v43 = vadd.f32 1.0, %v1853_v0  ;;  %v609_v6 = vsub.f32 0.0, %v3024_v30  ;;  %v673_v0 = vsub.f32 0.0, %v3028_v24 }
 0x164   :  { %v1857_v34 = vpop.eup %1856  ;;  %1882 = vrcp.f32 %v986_v27  ;;  %v987_v31 = vadd.f32 1.0, %v1855_v7  ;;  %v3055_v27 = vadd.f32 %v496_v2, %v2531_v39 }
 0x165   :  { %v1859_v37 = vpop.eup %1858  ;;  %1884 = vrcp.f32 %v1050_v43  ;;  %v1051_v18 = vadd.f32 1.0, %v1857_v34  ;;  %v498_v43 = vpop.f32.mrf.mxu1  ;;  %v899_v34 = vmul.f32 1.442695, %v672_v56  ;;  %v901_v13 = vmul.f32 1.442695, %v673_v0 }
 0x166   :  { %v1861_v45 = vpop.eup %1860  ;;  %1886 = vrcp.f32 %v987_v31  ;;  %v988_v26 = vadd.f32 1.0, %v1859_v37  ;;  %v674_v31 = vsub.f32 0.0, %v3040_v36  ;;  %v773_v37 = vmul.f32 1.442695, %v609_v6 }
 0x167   :  { %v1863_v48 = vpop.eup %1862  ;;  %v1365_v51 = vmul.f32 %v1861_v45, %v2858_v47  ;;  %1888 = vrcp.f32 %v1051_v18  ;;  %v611_v18 = vsub.f32 0.0, %v3048_v59  ;;  %v675_v15 = vsub.f32 0.0, %v3055_v27 }
 0x168   :  { %v1865_v44 = vpop.eup %1864  ;;  %v1429_v46 = vmul.f32 %v1863_v48, %v2862_v50  ;;  %1890 = vrcp.f32 %v988_v26  ;;  %v306_v50 = vpop.f32.mrf.mxu0  ;;  %v775_v26 = vmul.f32 1.442695, %v610_v61 }
 0x169   :  { %v1867_v16 = vpop.eup %1866  ;;  %1481 = vst [vmem:[%s3580_s3 + $0x60] sm:$0xff] %v1365_v51  ;;  %v1366_v47 = vmul.f32 %v1865_v44, %v2865_v52  ;;  %1892 = vpow2.f32 %v765_v14  ;;  %v3063_v7 = vadd.f32 %v306_v50, %v2533_v3  ;;  %v502_v48 = vpop.f32.mrf.mxu1  ;;  %v3089_v44 = vadd.f32 %v498_v43, %v2533_v3 }
 0x16a   :  { %v1869_v8 = vpop.eup %1868  ;;  %1513 = vst [vmem:[%s3580_s3 + $0x160] sm:$0xff] %v1429_v46  ;;  %v1430_v55 = vmul.f32 %v1867_v16, %v2871_v19  ;;  %1894 = vpow2.f32 %v893_v42  ;;  %v777_v2 = vmul.f32 1.442695, %v611_v18  ;;  %v3124_v18 = vadd.f32 %v502_v48, %v2531_v39 }
 0x16b   :  { %v1871_v52 = vpop.eup %1870  ;;  %1545 = vst [vmem:[%s3581_s4 + $0x60] sm:$0xff] %v1366_v47  ;;  %v1052_v17 = vadd.f32 1.0, %v1869_v8  ;;  %1896 = vpow2.f32 %v767_v9  ;;  %v3067_v9 = vpop.f32.mrf.mxu0  ;;  %v905_v47 = vmul.f32 1.442695, %v675_v15 }
 0x16c   :  { %v1873_v14 = vpop.eup %1872  ;;  %1577 = vst [vmem:[%s3581_s4 + $0x160] sm:$0xff] %v1430_v55  ;;  %v1367_v19 = vmul.f32 %v1871_v52, %v2875_v5  ;;  %1898 = vpow2.f32 %v895_v40  ;;  %v504_v8 = vpop.f32.mrf.mxu1 }
 0x16d   :  { %v1875_v42 = vpop.eup %1874  ;;  %v1431_v29 = vmul.f32 %v1873_v14, %v2879_v10  ;;  %1900 = vrcp.f32 %v1052_v17  ;;  %v312_v46 = vpop.f32.mrf.mxu0 }
 0x16e   :  { %v1877_v33 = vpop.eup %1876  ;;  %1482 = vst [vmem:[%s3580_s3 + $0x68] sm:$0xff] %v1367_v19  ;;  %v1368_v5 = vmul.f32 %v1875_v42, %v2884_v23  ;;  %1902 = vpow2.f32 %v769_v22  ;;  %v612_v22 = vsub.f32 0.0, %v3063_v7  ;;  %v508_v61 = vpop.f32.mrf.mxu1 }
 0x16f   :  { %v1879_v40 = vpop.eup %1878  ;;  %1514 = vst [vmem:[%s3580_s3 + $0x168] sm:$0xff] %v1431_v29  ;;  %v1432_v10 = vmul.f32 %v1877_v33, %v2889_v25  ;;  %1904 = vpow2.f32 %v897_v20  ;;  %v903_v20 = vmul.f32 1.442695, %v674_v31  ;;  %v316_v52 = vpop.f32.mrf.mxu0  ;;  %v3120_v33 = vadd.f32 %v3067_v9, %v2531_v39 }
 0x170   :  { %v1881_v45 = vpop.eup %1880  ;;  %1546 = vst [vmem:[%s3581_s4 + $0x68] sm:$0xff] %v1368_v5  ;;  %v1369_v23 = vmul.f32 %v1879_v40, %v2893_v58  ;;  %1906 = vpow2.f32 %v771_v11  ;;  %v510_v15 = vpop.f32.mrf.mxu1 }
 0x171   :  { %v1883_v51 = vpop.eup %1882  ;;  %1578 = vst [vmem:[%s3581_s4 + $0x168] sm:$0xff] %v1432_v10  ;;  %v1433_v25 = vmul.f32 %v1881_v45, %v2897_v57  ;;  %1908 = vpow2.f32 %v899_v34  ;;  %v318_v29 = vpop.f32.mrf.mxu0  ;;  %v613_v48 = vsub.f32 0.0, %v3120_v33 }
 0x172   :  { %v1885_v56 = vpop.eup %1884  ;;  %1483 = vst [vmem:[%s3580_s3 + $0x70] sm:$0xff] %v1369_v23  ;;  %v1370_v58 = vmul.f32 %v1883_v51, %v2902_v1  ;;  %1910 = vpow2.f32 %v773_v37  ;;  %v779_v1 = vmul.f32 1.442695, %v612_v22  ;;  %v3137_v51 = vadd.f32 %v316_v52, %v2531_v39 }
 0x173   :  { %v1887_v16 = vpop.eup %1886  ;;  %1515 = vst [vmem:[%s3580_s3 + $0x170] sm:$0xff] %v1433_v25  ;;  %v1434_v57 = vmul.f32 %v1885_v56, %v2909_v62  ;;  %1912 = vpow2.f32 %v901_v13  ;;  %v676_v62 = vsub.f32 0.0, %v3089_v44  ;;  %v3127_v13 = vadd.f32 %v312_v46, %v2533_v3  ;;  %v322_v23 = vpop.f32.mrf.mxu0 }
 0x174   :  { %v1889_v11 = vpop.eup %1888  ;;  %1547 = vst [vmem:[%s3581_s4 + $0x70] sm:$0xff] %v1370_v58  ;;  %v1371_v50 = vmul.f32 %v1887_v16, %v2917_v4  ;;  %1914 = vpow2.f32 %v775_v26  ;;  %v677_v46 = vsub.f32 0.0, %v3124_v18  ;;  %v3141_v56 = vadd.f32 %v508_v61, %v2531_v39 }
 0x175   :  { %v1891_v55 = vpop.eup %1890  ;;  %1579 = vst [vmem:[%s3581_s4 + $0x170] sm:$0xff] %v1434_v57  ;;  %v1435_v6 = vmul.f32 %v1889_v11, %v2924_v28  ;;  %1916 = vpow2.f32 %v903_v20  ;;  %v614_v16 = vsub.f32 0.0, %v3127_v13  ;;  %v514_v57 = vpop.f32.mrf.mxu1  ;;  %v615_v52 = vsub.f32 0.0, %v3137_v51 }
 0x176   :  { %v1893_v17 = vpop.eup %1892  ;;  %1484 = vst [vmem:[%s3580_s3 + $0x78] sm:$0xff] %v1371_v50  ;;  %v1372_v4 = vmul.f32 %v1891_v55, %v2932_v32  ;;  %1918 = vpow2.f32 %v777_v2  ;;  %v907_v32 = vmul.f32 1.442695, %v676_v62  ;;  %v781_v62 = vmul.f32 1.442695, %v613_v48 }
 0x177   :  { %v1895_v0 = vpop.eup %1894  ;;  %1516 = vst [vmem:[%s3580_s3 + $0x178] sm:$0xff] %v1435_v6  ;;  %v989_v14 = vadd.f32 1.0, %v1893_v17  ;;  %1920 = vpow2.f32 %v905_v47  ;;  %v783_v61 = vmul.f32 1.442695, %v614_v16 }
 0x178   :  { %v1897_v28 = vpop.eup %1896  ;;  %1548 = vst [vmem:[%s3581_s4 + $0x78] sm:$0xff] %v1372_v4  ;;  %v1053_v19 = vadd.f32 1.0, %v1895_v0  ;;  %1922 = vpow2.f32 %v779_v1  ;;  %v3146_v1 = vadd.f32 %v318_v29, %v2533_v3  ;;  %v909_v0 = vmul.f32 1.442695, %v677_v46 }
 0x179   :  { %v1899_v43 = vpop.eup %1898  ;;  %1924 = vrcp.f32 %v989_v14  ;;  %v990_v42 = vadd.f32 1.0, %v1897_v28  ;;  %v679_v14 = vsub.f32 0.0, %v3141_v56 }
 0x17a   :  { %v1901_v34 = vpop.eup %1900  ;;  %1926 = vrcp.f32 %v1053_v19  ;;  %v1054_v31 = vadd.f32 1.0, %v1899_v43  ;;  %v3151_v43 = vadd.f32 %v510_v15, %v2533_v3 }
 0x17b   :  { %v1903_v5 = vpop.eup %1902  ;;  %v1436_v37 = vmul.f32 %v1901_v34, %v2958_v53  ;;  %1928 = vrcp.f32 %v990_v42  ;;  %v3133_v53 = vadd.f32 %v504_v8, %v2533_v3  ;;  %v324_v8 = vpop.f32.mrf.mxu0  ;;  %v913_v15 = vmul.f32 1.442695, %v679_v14 }
 0x17c   :  { %v1905_v40 = vpop.eup %1904  ;;  %1930 = vrcp.f32 %v1054_v31  ;;  %v991_v10 = vadd.f32 1.0, %v1903_v5  ;;  %v516_v42 = vpop.f32.mrf.mxu1  ;;  %v616_v31 = vsub.f32 0.0, %v3146_v1  ;;  %v3164_v46 = vadd.f32 %v324_v8, %v2533_v3 }
 0x17d   :  { %v1907_v45 = vpop.eup %1906  ;;  %1580 = vst [vmem:[%s3581_s4 + $0x178] sm:$0xff] %v1436_v37  ;;  %v1055_v9 = vadd.f32 1.0, %v1905_v40  ;;  %1932 = vpow2.f32 %v907_v32  ;;  %v678_v50 = vsub.f32 0.0, %v3133_v53  ;;  %v328_v5 = vpop.f32.mrf.mxu0  ;;  %v3171_v16 = vadd.f32 %v516_v42, %v2533_v3 }
 0x17e   :  { %v1909_v26 = vpop.eup %1908  ;;  %1934 = vrcp.f32 %v991_v10  ;;  %v992_v22 = vadd.f32 1.0, %v1907_v45  ;;  %v785_v10 = vmul.f32 1.442695, %v615_v52  ;;  %v3155_v45 = vadd.f32 %v322_v23, %v2531_v39 }
 0x17f   :  { %v1911_v25 = vpop.eup %1910  ;;  %1936 = vrcp.f32 %v1055_v9  ;;  %v1056_v20 = vadd.f32 1.0, %v1909_v26  ;;  %v911_v34 = vmul.f32 1.442695, %v678_v50  ;;  %v3179_v50 = vadd.f32 %v328_v5, %v2531_v39 }
 0x180   :  { %v1913_v58 = vpop.eup %1912  ;;  %1938 = vrcp.f32 %v992_v22  ;;  %v993_v2 = vadd.f32 1.0, %v1911_v25  ;;  %v3159_v22 = vadd.f32 %v514_v57, %v2531_v39  ;;  %v618_v52 = vsub.f32 0.0, %v3164_v46 }
 0x181   :  { %v1915_v47 = vpop.eup %1914  ;;  %1940 = vrcp.f32 %v1056_v20  ;;  %v1057_v11 = vadd.f32 1.0, %v1913_v58  ;;  %v680_v20 = vsub.f32 0.0, %v3151_v43  ;;  %v520_v58 = vpop.f32.mrf.mxu1 }
 0x182   :  { %v1917_v55 = vpop.eup %1916  ;;  %1942 = vrcp.f32 %v993_v2  ;;  %v994_v6 = vadd.f32 1.0, %v1915_v47  ;;  %v787_v2 = vmul.f32 1.442695, %v616_v31 }
 0x183   :  { %v1919_v17 = vpop.eup %1918  ;;  %1944 = vrcp.f32 %v1057_v11  ;;  %v1058_v4 = vadd.f32 1.0, %v1917_v55  ;;  %v617_v11 = vsub.f32 0.0, %v3155_v45  ;;  %v681_v55 = vsub.f32 0.0, %v3159_v22 }
 0x184   :  { %v1921_v28 = vpop.eup %1920  ;;  %1946 = vrcp.f32 %v994_v6  ;;  %v995_v19 = vadd.f32 1.0, %v1919_v17  ;;  %v3186_v6 = vadd.f32 %v520_v58, %v2531_v39 }
 0x185   :  { %v1923_v32 = vpop.eup %1922  ;;  %1948 = vrcp.f32 %v1058_v4  ;;  %v1059_v29 = vadd.f32 1.0, %v1921_v28  ;;  %v522_v4 = vpop.f32.mrf.mxu1  ;;  %v915_v28 = vmul.f32 1.442695, %v680_v20  ;;  %v917_v31 = vmul.f32 1.442695, %v681_v55 }
 0x186   :  { %v1925_v37 = vpop.eup %1924  ;;  %1950 = vrcp.f32 %v995_v19  ;;  %v996_v40 = vadd.f32 1.0, %v1923_v32  ;;  %v682_v19 = vsub.f32 0.0, %v3171_v16  ;;  %v789_v32 = vmul.f32 1.442695, %v617_v11 }
 0x187   :  { %v1927_v9 = vpop.eup %1926  ;;  %v1373_v26 = vmul.f32 %v1925_v37, %v2989_v38  ;;  %1952 = vrcp.f32 %v1059_v29  ;;  %v619_v29 = vsub.f32 0.0, %v3179_v50  ;;  %v683_v5 = vsub.f32 0.0, %v3186_v6 }
 0x188   :  { %v1929_v48 = vpop.eup %1928  ;;  %v1437_v25 = vmul.f32 %v1927_v9, %v2993_v41  ;;  %1954 = vrcp.f32 %v996_v40  ;;  %v330_v41 = vpop.f32.mrf.mxu0  ;;  %v791_v40 = vmul.f32 1.442695, %v618_v52 }
 0x189   :  { %v1931_v23 = vpop.eup %1930  ;;  %1485 = vst [vmem:[%s3580_s3 + $0x80] sm:$0xff] %v1373_v26  ;;  %v1374_v38 = vmul.f32 %v1929_v48, %v2996_v49  ;;  %1956 = vpow2.f32 %v781_v62  ;;  %v3194_v17 = vadd.f32 %v330_v41, %v2533_v3  ;;  %v526_v9 = vpop.f32.mrf.mxu1  ;;  %v3220_v48 = vadd.f32 %v522_v4, %v2533_v3 }
 0x18a   :  { %v1933_v57 = vpop.eup %1932  ;;  %1517 = vst [vmem:[%s3580_s3 + $0x180] sm:$0xff] %v1437_v25  ;;  %v1438_v47 = vmul.f32 %v1931_v23, %v3002_v12  ;;  %1958 = vpow2.f32 %v909_v0  ;;  %v793_v58 = vmul.f32 1.442695, %v619_v29  ;;  %v3255_v29 = vadd.f32 %v526_v9, %v2531_v39 }
 0x18b   :  { %v1935_v49 = vpop.eup %1934  ;;  %1549 = vst [vmem:[%s3581_s4 + $0x80] sm:$0xff] %v1374_v38  ;;  %v1060_v8 = vadd.f32 1.0, %v1933_v57  ;;  %1960 = vpow2.f32 %v783_v61  ;;  %v3198_v61 = vpop.f32.mrf.mxu0  ;;  %v921_v38 = vmul.f32 1.442695, %v683_v5 }
 0x18c   :  { %v1937_v62 = vpop.eup %1936  ;;  %1581 = vst [vmem:[%s3581_s4 + $0x180] sm:$0xff] %v1438_v47  ;;  %v1375_v12 = vmul.f32 %v1935_v49, %v3006_v60  ;;  %1962 = vpow2.f32 %v911_v34  ;;  %v528_v57 = vpop.f32.mrf.mxu1 }
 0x18d   :  { %v1939_v0 = vpop.eup %1938  ;;  %v1439_v14 = vmul.f32 %v1937_v62, %v3010_v63  ;;  %1964 = vrcp.f32 %v1060_v8  ;;  %v336_v25 = vpop.f32.mrf.mxu0 }
 0x18e   :  { %v1941_v42 = vpop.eup %1940  ;;  %1486 = vst [vmem:[%s3580_s3 + $0x88] sm:$0xff] %v1375_v12  ;;  %v1376_v60 = vmul.f32 %v1939_v0, %v3015_v21  ;;  %1966 = vpow2.f32 %v785_v10  ;;  %v620_v10 = vsub.f32 0.0, %v3194_v17  ;;  %v532_v52 = vpop.f32.mrf.mxu1 }
 0x18f   :  { %v1943_v34 = vpop.eup %1942  ;;  %1518 = vst [vmem:[%s3580_s3 + $0x188] sm:$0xff] %v1439_v14  ;;  %v1440_v63 = vmul.f32 %v1941_v42, %v3020_v35  ;;  %1968 = vpow2.f32 %v913_v15  ;;  %v919_v15 = vmul.f32 1.442695, %v682_v19  ;;  %v340_v49 = vpop.f32.mrf.mxu0  ;;  %v3251_v42 = vadd.f32 %v3198_v61, %v2531_v39 }
 0x190   :  { %v1945_v37 = vpop.eup %1944  ;;  %1550 = vst [vmem:[%s3581_s4 + $0x88] sm:$0xff] %v1376_v60  ;;  %v1377_v21 = vmul.f32 %v1943_v34, %v3024_v30  ;;  %1970 = vpow2.f32 %v787_v2  ;;  %v534_v5 = vpop.f32.mrf.mxu1 }
 0x191   :  { %v1947_v26 = vpop.eup %1946  ;;  %1582 = vst [vmem:[%s3581_s4 + $0x188] sm:$0xff] %v1440_v63  ;;  %v1441_v35 = vmul.f32 %v1945_v37, %v3028_v24  ;;  %1972 = vpow2.f32 %v915_v28  ;;  %v342_v14 = vpop.f32.mrf.mxu0  ;;  %v621_v9 = vsub.f32 0.0, %v3251_v42 }
 0x192   :  { %v1949_v20 = vpop.eup %1948  ;;  %1487 = vst [vmem:[%s3580_s3 + $0x90] sm:$0xff] %v1377_v21  ;;  %v1378_v30 = vmul.f32 %v1947_v26, %v3033_v54  ;;  %1974 = vpow2.f32 %v789_v32  ;;  %v795_v54 = vmul.f32 1.442695, %v620_v10  ;;  %v3268_v26 = vadd.f32 %v340_v49, %v2531_v39 }
 0x193   :  { %v1951_v23 = vpop.eup %1950  ;;  %1519 = vst [vmem:[%s3580_s3 + $0x190] sm:$0xff] %v1441_v35  ;;  %v1442_v24 = vmul.f32 %v1949_v20, %v3040_v36  ;;  %1976 = vpow2.f32 %v917_v31  ;;  %v684_v36 = vsub.f32 0.0, %v3220_v48  ;;  %v3258_v31 = vadd.f32 %v336_v25, %v2533_v3  ;;  %v346_v21 = vpop.f32.mrf.mxu0 }
 0x194   :  { %v1953_v2 = vpop.eup %1952  ;;  %1551 = vst [vmem:[%s3581_s4 + $0x90] sm:$0xff] %v1378_v30  ;;  %v1379_v41 = vmul.f32 %v1951_v23, %v3048_v59  ;;  %1978 = vpow2.f32 %v791_v40  ;;  %v685_v25 = vsub.f32 0.0, %v3255_v29  ;;  %v3272_v20 = vadd.f32 %v532_v52, %v2531_v39 }
 0x195   :  { %v1955_v47 = vpop.eup %1954  ;;  %1583 = vst [vmem:[%s3581_s4 + $0x190] sm:$0xff] %v1442_v24  ;;  %v1443_v11 = vmul.f32 %v1953_v2, %v3055_v27  ;;  %1980 = vpow2.f32 %v919_v15  ;;  %v622_v23 = vsub.f32 0.0, %v3258_v31  ;;  %v538_v24 = vpop.f32.mrf.mxu1  ;;  %v623_v49 = vsub.f32 0.0, %v3268_v26 }
 0x196   :  { %v1957_v8 = vpop.eup %1956  ;;  %1488 = vst [vmem:[%s3580_s3 + $0x98] sm:$0xff] %v1379_v41  ;;  %v1380_v59 = vmul.f32 %v1955_v47, %v3063_v7  ;;  %1982 = vpow2.f32 %v793_v58  ;;  %v923_v7 = vmul.f32 1.442695, %v684_v36  ;;  %v797_v36 = vmul.f32 1.442695, %v621_v9 }
 0x197   :  { %v1959_v55 = vpop.eup %1958  ;;  %1520 = vst [vmem:[%s3580_s3 + $0x198] sm:$0xff] %v1443_v11  ;;  %v997_v62 = vadd.f32 1.0, %v1957_v8  ;;  %1984 = vpow2.f32 %v921_v38  ;;  %v799_v52 = vmul.f32 1.442695, %v622_v23 }
 0x198   :  { %v1961_v27 = vpop.eup %1960  ;;  %1552 = vst [vmem:[%s3581_s4 + $0x98] sm:$0xff] %v1380_v59  ;;  %v1061_v12 = vadd.f32 1.0, %v1959_v55  ;;  %1986 = vpow2.f32 %v795_v54  ;;  %v3277_v54 = vadd.f32 %v342_v14, %v2533_v3  ;;  %v925_v55 = vmul.f32 1.442695, %v685_v25 }
 0x199   :  { %v1963_v4 = vpop.eup %1962  ;;  %1988 = vrcp.f32 %v997_v62  ;;  %v998_v0 = vadd.f32 1.0, %v1961_v27  ;;  %v687_v62 = vsub.f32 0.0, %v3272_v20 }
 0x19a   :  { %v1965_v28 = vpop.eup %1964  ;;  %1990 = vrcp.f32 %v1061_v12  ;;  %v1062_v19 = vadd.f32 1.0, %v1963_v4  ;;  %v3282_v4 = vadd.f32 %v534_v5, %v2533_v3 }
 0x19b   :  { %v1967_v60 = vpop.eup %1966  ;;  %v1444_v32 = vmul.f32 %v1965_v28, %v3089_v44  ;;  %1992 = vrcp.f32 %v998_v0  ;;  %v3264_v44 = vadd.f32 %v528_v57, %v2533_v3  ;;  %v348_v57 = vpop.f32.mrf.mxu0  ;;  %v929_v5 = vmul.f32 1.442695, %v687_v62 }
 0x19c   :  { %v1969_v34 = vpop.eup %1968  ;;  %1994 = vrcp.f32 %v1062_v19  ;;  %v999_v63 = vadd.f32 1.0, %v1967_v60  ;;  %v540_v0 = vpop.f32.mrf.mxu1  ;;  %v624_v19 = vsub.f32 0.0, %v3277_v54  ;;  %v3295_v25 = vadd.f32 %v348_v57, %v2533_v3 }
 0x19d   :  { %v1971_v37 = vpop.eup %1970  ;;  %1584 = vst [vmem:[%s3581_s4 + $0x198] sm:$0xff] %v1444_v32  ;;  %v1063_v61 = vadd.f32 1.0, %v1969_v34  ;;  %1996 = vpow2.f32 %v923_v7  ;;  %v686_v41 = vsub.f32 0.0, %v3264_v44  ;;  %v352_v60 = vpop.f32.mrf.mxu0  ;;  %v3302_v23 = vadd.f32 %v540_v0, %v2533_v3 }
 0x19e   :  { %v1973_v40 = vpop.eup %1972  ;;  %1998 = vrcp.f32 %v999_v63  ;;  %v1000_v10 = vadd.f32 1.0, %v1971_v37  ;;  %v801_v63 = vmul.f32 1.442695, %v623_v49  ;;  %v3286_v37 = vadd.f32 %v346_v21, %v2531_v39 }
 0x19f   :  { %v1975_v35 = vpop.eup %1974  ;;  %2000 = vrcp.f32 %v1063_v61  ;;  %v1064_v15 = vadd.f32 1.0, %v1973_v40  ;;  %v927_v28 = vmul.f32 1.442695, %v686_v41  ;;  %v3310_v41 = vadd.f32 %v352_v60, %v2531_v39 }
 0x1a0   :  { %v1977_v30 = vpop.eup %1976  ;;  %2002 = vrcp.f32 %v1000_v10  ;;  %v1001_v58 = vadd.f32 1.0, %v1975_v35  ;;  %v3290_v10 = vadd.f32 %v538_v24, %v2531_v39  ;;  %v626_v49 = vsub.f32 0.0, %v3295_v25 }
 0x1a1   :  { %v1979_v38 = vpop.eup %1978  ;;  %2004 = vrcp.f32 %v1064_v15  ;;  %v1065_v2 = vadd.f32 1.0, %v1977_v30  ;;  %v688_v15 = vsub.f32 0.0, %v3282_v4  ;;  %v544_v30 = vpop.f32.mrf.mxu1 }
 0x1a2   :  { %v1981_v47 = vpop.eup %1980  ;;  %2006 = vrcp.f32 %v1001_v58  ;;  %v1002_v11 = vadd.f32 1.0, %v1979_v38  ;;  %v803_v58 = vmul.f32 1.442695, %v624_v19 }
 0x1a3   :  { %v1983_v8 = vpop.eup %1982  ;;  %2008 = vrcp.f32 %v1065_v2  ;;  %v1066_v59 = vadd.f32 1.0, %v1981_v47  ;;  %v625_v2 = vsub.f32 0.0, %v3286_v37  ;;  %v689_v47 = vsub.f32 0.0, %v3290_v10 }
 0x1a4   :  { %v1985_v27 = vpop.eup %1984  ;;  %2010 = vrcp.f32 %v1002_v11  ;;  %v1003_v12 = vadd.f32 1.0, %v1983_v8  ;;  %v3317_v11 = vadd.f32 %v544_v30, %v2531_v39 }
 0x1a5   :  { %v1987_v7 = vpop.eup %1986  ;;  %2012 = vrcp.f32 %v1066_v59  ;;  %v1067_v14 = vadd.f32 1.0, %v1985_v27  ;;  %v546_v59 = vpop.f32.mrf.mxu1  ;;  %v931_v27 = vmul.f32 1.442695, %v688_v15  ;;  %v933_v19 = vmul.f32 1.442695, %v689_v47 }
 0x1a6   :  { %v1989_v32 = vpop.eup %1988  ;;  %2014 = vrcp.f32 %v1003_v12  ;;  %v1004_v34 = vadd.f32 1.0, %v1987_v7  ;;  %v690_v12 = vsub.f32 0.0, %v3302_v23  ;;  %v805_v7 = vmul.f32 1.442695, %v625_v2 }
 0x1a7   :  { %v1991_v61 = vpop.eup %1990  ;;  %v1381_v40 = vmul.f32 %v1989_v32, %v3120_v33  ;;  %2016 = vrcp.f32 %v1067_v14  ;;  %v627_v14 = vsub.f32 0.0, %v3310_v41  ;;  %v691_v60 = vsub.f32 0.0, %v3317_v11 }
 0x1a8   :  { %v1993_v9 = vpop.eup %1992  ;;  %v1445_v35 = vmul.f32 %v1991_v61, %v3124_v18  ;;  %2018 = vrcp.f32 %v1004_v34  ;;  %v354_v18 = vpop.f32.mrf.mxu0  ;;  %v807_v34 = vmul.f32 1.442695, %v626_v49 }
 0x1a9   :  { %v1995_v21 = vpop.eup %1994  ;;  %1489 = vst [vmem:[%s3580_s3 + $0xa0] sm:$0xff] %v1381_v40  ;;  %v1382_v33 = vmul.f32 %v1993_v9, %v3127_v13  ;;  %2020 = vpow2.f32 %v797_v36  ;;  %v3325_v8 = vadd.f32 %v354_v18, %v2533_v3  ;;  %v550_v61 = vpop.f32.mrf.mxu1  ;;  %v3351_v9 = vadd.f32 %v546_v59, %v2533_v3 }
 0x1aa   :  { %v1997_v24 = vpop.eup %1996  ;;  %1521 = vst [vmem:[%s3580_s3 + $0x1a0] sm:$0xff] %v1445_v35  ;;  %v1446_v38 = vmul.f32 %v1995_v21, %v3133_v53  ;;  %2022 = vpow2.f32 %v925_v55  ;;  %v809_v30 = vmul.f32 1.442695, %v627_v14  ;;  %v3386_v14 = vadd.f32 %v550_v61, %v2531_v39 }
 0x1ab   :  { %v1999_v13 = vpop.eup %1998  ;;  %1553 = vst [vmem:[%s3581_s4 + $0xa0] sm:$0xff] %v1382_v33  ;;  %v1068_v57 = vadd.f32 1.0, %v1997_v24  ;;  %2024 = vpow2.f32 %v799_v52  ;;  %v3329_v52 = vpop.f32.mrf.mxu0  ;;  %v937_v33 = vmul.f32 1.442695, %v691_v60 }
 0x1ac   :  { %v2001_v36 = vpop.eup %2000  ;;  %1585 = vst [vmem:[%s3581_s4 + $0x1a0] sm:$0xff] %v1446_v38  ;;  %v1383_v53 = vmul.f32 %v1999_v13, %v3137_v51  ;;  %2026 = vpow2.f32 %v927_v28  ;;  %v552_v24 = vpop.f32.mrf.mxu1 }
 0x1ad   :  { %v2003_v55 = vpop.eup %2002  ;;  %v1447_v62 = vmul.f32 %v2001_v36, %v3141_v56  ;;  %2028 = vrcp.f32 %v1068_v57  ;;  %v360_v35 = vpop.f32.mrf.mxu0 }
 0x1ae   :  { %v2005_v0 = vpop.eup %2004  ;;  %1490 = vst [vmem:[%s3580_s3 + $0xa8] sm:$0xff] %v1383_v53  ;;  %v1384_v51 = vmul.f32 %v2003_v55, %v3146_v1  ;;  %2030 = vpow2.f32 %v801_v63  ;;  %v628_v63 = vsub.f32 0.0, %v3325_v8  ;;  %v556_v49 = vpop.f32.mrf.mxu1 }
 0x1af   :  { %v2007_v28 = vpop.eup %2006  ;;  %1522 = vst [vmem:[%s3580_s3 + $0x1a8] sm:$0xff] %v1447_v62  ;;  %v1448_v56 = vmul.f32 %v2005_v0, %v3151_v43  ;;  %2032 = vpow2.f32 %v929_v5  ;;  %v935_v5 = vmul.f32 1.442695, %v690_v12  ;;  %v364_v13 = vpop.f32.mrf.mxu0  ;;  %v3382_v0 = vadd.f32 %v3329_v52, %v2531_v39 }
 0x1b0   :  { %v2009_v32 = vpop.eup %2008  ;;  %1554 = vst [vmem:[%s3581_s4 + $0xa8] sm:$0xff] %v1384_v51  ;;  %v1385_v1 = vmul.f32 %v2007_v28, %v3155_v45  ;;  %2034 = vpow2.f32 %v803_v58  ;;  %v558_v60 = vpop.f32.mrf.mxu1 }
 0x1b1   :  { %v2011_v40 = vpop.eup %2010  ;;  %1586 = vst [vmem:[%s3581_s4 + $0x1a8] sm:$0xff] %v1448_v56  ;;  %v1449_v43 = vmul.f32 %v2009_v32, %v3159_v22  ;;  %2036 = vpow2.f32 %v931_v27  ;;  %v366_v62 = vpop.f32.mrf.mxu0  ;;  %v629_v61 = vsub.f32 0.0, %v3382_v0 }
 0x1b2   :  { %v2013_v15 = vpop.eup %2012  ;;  %1491 = vst [vmem:[%s3580_s3 + $0xb0] sm:$0xff] %v1385_v1  ;;  %v1386_v45 = vmul.f32 %v2011_v40, %v3164_v46  ;;  %2038 = vpow2.f32 %v805_v7  ;;  %v811_v46 = vmul.f32 1.442695, %v628_v63  ;;  %v3399_v40 = vadd.f32 %v364_v13, %v2531_v39 }
 0x1b3   :  { %v2015_v21 = vpop.eup %2014  ;;  %1523 = vst [vmem:[%s3580_s3 + $0x1b0] sm:$0xff] %v1449_v43  ;;  %v1450_v22 = vmul.f32 %v2013_v15, %v3171_v16  ;;  %2040 = vpow2.f32 %v933_v19  ;;  %v692_v16 = vsub.f32 0.0, %v3351_v9  ;;  %v3389_v19 = vadd.f32 %v360_v35, %v2533_v3  ;;  %v370_v1 = vpop.f32.mrf.mxu0 }
 0x1b4   :  { %v2017_v58 = vpop.eup %2016  ;;  %1555 = vst [vmem:[%s3581_s4 + $0xb0] sm:$0xff] %v1386_v45  ;;  %v1387_v18 = vmul.f32 %v2015_v21, %v3179_v50  ;;  %2042 = vpow2.f32 %v807_v34  ;;  %v693_v35 = vsub.f32 0.0, %v3386_v14  ;;  %v3403_v15 = vadd.f32 %v556_v49, %v2531_v39 }
 0x1b5   :  { %v2019_v38 = vpop.eup %2018  ;;  %1587 = vst [vmem:[%s3581_s4 + $0x1b0] sm:$0xff] %v1450_v22  ;;  %v1451_v2 = vmul.f32 %v2017_v58, %v3186_v6  ;;  %2044 = vpow2.f32 %v935_v5  ;;  %v630_v21 = vsub.f32 0.0, %v3389_v19  ;;  %v562_v22 = vpop.f32.mrf.mxu1  ;;  %v631_v13 = vsub.f32 0.0, %v3399_v40 }
 0x1b6   :  { %v2021_v57 = vpop.eup %2020  ;;  %1492 = vst [vmem:[%s3580_s3 + $0xb8] sm:$0xff] %v1387_v18  ;;  %v1388_v50 = vmul.f32 %v2019_v38, %v3194_v17  ;;  %2046 = vpow2.f32 %v809_v30  ;;  %v939_v17 = vmul.f32 1.442695, %v692_v16  ;;  %v813_v16 = vmul.f32 1.442695, %v629_v61 }
 0x1b7   :  { %v2023_v47 = vpop.eup %2022  ;;  %1524 = vst [vmem:[%s3580_s3 + $0x1b8] sm:$0xff] %v1451_v2  ;;  %v1005_v36 = vadd.f32 1.0, %v2021_v57  ;;  %2048 = vpow2.f32 %v937_v33  ;;  %v815_v49 = vmul.f32 1.442695, %v630_v21 }
 0x1b8   :  { %v2025_v6 = vpop.eup %2024  ;;  %1556 = vst [vmem:[%s3581_s4 + $0xb8] sm:$0xff] %v1388_v50  ;;  %v1069_v53 = vadd.f32 1.0, %v2023_v47  ;;  %2050 = vpow2.f32 %v811_v46  ;;  %v3408_v46 = vadd.f32 %v366_v62, %v2533_v3  ;;  %v941_v47 = vmul.f32 1.442695, %v693_v35 }
 0x1b9   :  { %v2027_v59 = vpop.eup %2026  ;;  %2052 = vrcp.f32 %v1005_v36  ;;  %v1006_v55 = vadd.f32 1.0, %v2025_v6  ;;  %v695_v36 = vsub.f32 0.0, %v3403_v15 }
 0x1ba   :  { %v2029_v27 = vpop.eup %2028  ;;  %2054 = vrcp.f32 %v1069_v53  ;;  %v1070_v12 = vadd.f32 1.0, %v2027_v59  ;;  %v3413_v59 = vadd.f32 %v558_v60, %v2533_v3 }
 0x1bb   :  { %v2031_v51 = vpop.eup %2030  ;;  %v1452_v7 = vmul.f32 %v2029_v27, %v3220_v48  ;;  %2056 = vrcp.f32 %v1006_v55  ;;  %v3395_v48 = vadd.f32 %v552_v24, %v2533_v3  ;;  %v372_v24 = vpop.f32.mrf.mxu0  ;;  %v945_v60 = vmul.f32 1.442695, %v695_v36 }
 0x1bc   :  { %v2033_v28 = vpop.eup %2032  ;;  %2058 = vrcp.f32 %v1070_v12  ;;  %v1007_v56 = vadd.f32 1.0, %v2031_v51  ;;  %v564_v55 = vpop.f32.mrf.mxu1  ;;  %v632_v12 = vsub.f32 0.0, %v3408_v46  ;;  %v3426_v35 = vadd.f32 %v372_v24, %v2533_v3 }
 0x1bd   :  { %v2035_v32 = vpop.eup %2034  ;;  %1588 = vst [vmem:[%s3581_s4 + $0x1b8] sm:$0xff] %v1452_v7  ;;  %v1071_v52 = vadd.f32 1.0, %v2033_v28  ;;  %2060 = vpow2.f32 %v939_v17  ;;  %v694_v18 = vsub.f32 0.0, %v3395_v48  ;;  %v376_v51 = vpop.f32.mrf.mxu0  ;;  %v3433_v21 = vadd.f32 %v564_v55, %v2533_v3 }
 0x1be   :  { %v2037_v34 = vpop.eup %2036  ;;  %2062 = vrcp.f32 %v1007_v56  ;;  %v1008_v63 = vadd.f32 1.0, %v2035_v32  ;;  %v817_v56 = vmul.f32 1.442695, %v631_v13  ;;  %v3417_v32 = vadd.f32 %v370_v1, %v2531_v39 }
 0x1bf   :  { %v2039_v43 = vpop.eup %2038  ;;  %2064 = vrcp.f32 %v1071_v52  ;;  %v1072_v5 = vadd.f32 1.0, %v2037_v34  ;;  %v943_v27 = vmul.f32 1.442695, %v694_v18  ;;  %v3441_v18 = vadd.f32 %v376_v51, %v2531_v39 }
 0x1c0   :  { %v2041_v45 = vpop.eup %2040  ;;  %2066 = vrcp.f32 %v1008_v63  ;;  %v1009_v30 = vadd.f32 1.0, %v2039_v43  ;;  %v3421_v63 = vadd.f32 %v562_v22, %v2531_v39  ;;  %v634_v13 = vsub.f32 0.0, %v3426_v35 }
 0x1c1   :  { %v2043_v33 = vpop.eup %2042  ;;  %2068 = vrcp.f32 %v1072_v5  ;;  %v1073_v58 = vadd.f32 1.0, %v2041_v45  ;;  %v696_v5 = vsub.f32 0.0, %v3413_v59  ;;  %v568_v45 = vpop.f32.mrf.mxu1 }
 0x1c2   :  { %v2045_v38 = vpop.eup %2044  ;;  %2070 = vrcp.f32 %v1009_v30  ;;  %v1010_v2 = vadd.f32 1.0, %v2043_v33  ;;  %v819_v30 = vmul.f32 1.442695, %v632_v12  ;;  %v823_v51 = vmul.f32 1.442695, %v634_v13 }
 0x1c3   :  { %v2047_v57 = vpop.eup %2046  ;;  %2072 = vrcp.f32 %v1073_v58  ;;  %v1074_v50 = vadd.f32 1.0, %v2045_v38  ;;  %v633_v58 = vsub.f32 0.0, %v3417_v32  ;;  %v697_v38 = vsub.f32 0.0, %v3421_v63  ;;  %v570_v55 = vpop.f32.mrf.mxu1 }
 0x1c4   :  { %v2049_v6 = vpop.eup %2048  ;;  %2074 = vrcp.f32 %v1010_v2  ;;  %v1011_v53 = vadd.f32 1.0, %v2047_v57  ;;  %v3448_v2 = vadd.f32 %v568_v45, %v2531_v39  ;;  %v947_v36 = vmul.f32 1.442695, %v696_v5 }
 0x1c5   :  { %v2051_v17 = vpop.eup %2050  ;;  %2076 = vrcp.f32 %v1074_v50  ;;  %v1075_v62 = vadd.f32 1.0, %v2049_v6  ;;  %v698_v39 = vsub.f32 0.0, %v3433_v21 }
 0x1c6   :  { %v2053_v7 = vpop.eup %2052  ;;  %2078 = vrcp.f32 %v1011_v53  ;;  %v1012_v28 = vadd.f32 1.0, %v2051_v17  ;;  %v821_v53 = vmul.f32 1.442695, %v633_v58 }
 0x1c7   :  { %v2055_v52 = vpop.eup %2054  ;;  %v1389_v34 = vmul.f32 %v2053_v7, %v3251_v42  ;;  %2080 = vrcp.f32 %v1075_v62  ;;  %v949_v62 = vmul.f32 1.442695, %v697_v38 }
 0x1c8   :  { %v2057_v61 = vpop.eup %2056  ;;  %v1453_v43 = vmul.f32 %v2055_v52, %v3255_v29  ;;  %2082 = vrcp.f32 %v1012_v28  ;;  %v378_v29 = vpop.f32.mrf.mxu0  ;;  %v3480_v52 = vadd.f32 %v570_v55, %v2533_v3 }
 0x1c9   :  { %v2059_v1 = vpop.eup %2058  ;;  %1493 = vst [vmem:[%s3580_s3 + $0xc0] sm:$0xff] %v1389_v34  ;;  %v1390_v42 = vmul.f32 %v2057_v61, %v3258_v31  ;;  %2084 = vpow2.f32 %v813_v16  ;;  %v3456_v57 = vadd.f32 %v378_v29, %v2533_v3 }
 0x1ca   :  { %v2061_v22 = vpop.eup %2060  ;;  %1525 = vst [vmem:[%s3580_s3 + $0x1c0] sm:$0xff] %v1453_v43  ;;  %v1454_v33 = vmul.f32 %v2059_v1, %v3264_v44  ;;  %2086 = vpow2.f32 %v941_v47 }
 0x1cb   :  { %v2063_v31 = vpop.eup %2062  ;;  %1557 = vst [vmem:[%s3581_s4 + $0xc0] sm:$0xff] %v1390_v42  ;;  %v1076_v24 = vadd.f32 1.0, %v2061_v22  ;;  %2088 = vpow2.f32 %v815_v49  ;;  %v635_v49 = vsub.f32 0.0, %v3441_v18  ;;  %v636_v7 = vsub.f32 0.0, %v3456_v57 }
 0x1cc   :  { %v2065_v16 = vpop.eup %2064  ;;  %1589 = vst [vmem:[%s3581_s4 + $0x1c0] sm:$0xff] %v1454_v33  ;;  %v1391_v44 = vmul.f32 %v2063_v31, %v3268_v26  ;;  %2090 = vpow2.f32 %v943_v27  ;;  %v699_v27 = vsub.f32 0.0, %v3448_v2 }
 0x1cd   :  { %v2067_v50 = vpop.eup %2066  ;;  %v1455_v47 = vmul.f32 %v2065_v16, %v3272_v20  ;;  %2092 = vrcp.f32 %v1076_v24 }
 0x1ce   :  { %v2069_v6 = vpop.eup %2068  ;;  %1494 = vst [vmem:[%s3580_s3 + $0xc8] sm:$0xff] %v1391_v44  ;;  %v1392_v26 = vmul.f32 %v2067_v50, %v3277_v54  ;;  %2094 = vpow2.f32 %v817_v56  ;;  %v951_v56 = vmul.f32 1.442695, %v698_v39  ;;  %v953_v43 = vmul.f32 1.442695, %v699_v27 }
 0x1cf   :  { %v2071_v17 = vpop.eup %2070  ;;  %1526 = vst [vmem:[%s3580_s3 + $0x1c8] sm:$0xff] %v1455_v47  ;;  %v1456_v20 = vmul.f32 %v2069_v6, %v3282_v4  ;;  %2096 = vpow2.f32 %v945_v60  ;;  %v825_v60 = vmul.f32 1.442695, %v635_v49 }
 0x1d0   :  { %v2073_v12 = vpop.eup %2072  ;;  %1558 = vst [vmem:[%s3581_s4 + $0xc8] sm:$0xff] %v1392_v26  ;;  %v1393_v54 = vmul.f32 %v2071_v17, %v3286_v37  ;;  %2098 = vpow2.f32 %v819_v30 }
 0x1d1   :  { %v2075_v28 = vpop.eup %2074  ;;  %1590 = vst [vmem:[%s3581_s4 + $0x1c8] sm:$0xff] %v1456_v20  ;;  %v1457_v4 = vmul.f32 %v2073_v12, %v3290_v10  ;;  %2100 = vpow2.f32 %v947_v36 }
 0x1d2   :  { %v2077_v34 = vpop.eup %2076  ;;  %1495 = vst [vmem:[%s3580_s3 + $0xd0] sm:$0xff] %v1393_v54  ;;  %v1394_v37 = vmul.f32 %v2075_v28, %v3295_v25  ;;  %2102 = vpow2.f32 %v821_v53  ;;  %v827_v25 = vmul.f32 1.442695, %v636_v7 }
 0x1d3   :  { %v2079_v61 = vpop.eup %2078  ;;  %1527 = vst [vmem:[%s3580_s3 + $0x1d0] sm:$0xff] %v1457_v4  ;;  %v1458_v10 = vmul.f32 %v2077_v34, %v3302_v23  ;;  %2104 = vpow2.f32 %v949_v62  ;;  %v700_v23 = vsub.f32 0.0, %v3480_v52 }
 0x1d4   :  { %v2081_v3 = vpop.eup %2080  ;;  %1559 = vst [vmem:[%s3581_s4 + $0xd0] sm:$0xff] %v1394_v37  ;;  %v1395_v5 = vmul.f32 %v2079_v61, %v3310_v41  ;;  %2106 = vpow2.f32 %v823_v51 }
 0x1d5   :  { %v2083_v45 = vpop.eup %2082  ;;  %1591 = vst [vmem:[%s3581_s4 + $0x1d0] sm:$0xff] %v1458_v10  ;;  %v1459_v1 = vmul.f32 %v2081_v3, %v3317_v11  ;;  %2108 = vpow2.f32 %v951_v56  ;;  %v955_v31 = vmul.f32 1.442695, %v700_v23 }
 0x1d6   :  { %v2085_v42 = vpop.eup %2084  ;;  %1496 = vst [vmem:[%s3580_s3 + $0xd8] sm:$0xff] %v1395_v5  ;;  %v1396_v30 = vmul.f32 %v2083_v45, %v3325_v8  ;;  %2110 = vpow2.f32 %v825_v60 }
 0x1d7   :  { %v2087_v41 = vpop.eup %2086  ;;  %1528 = vst [vmem:[%s3580_s3 + $0x1d8] sm:$0xff] %v1459_v1  ;;  %v1013_v29 = vadd.f32 1.0, %v2085_v42  ;;  %2112 = vpow2.f32 %v953_v43 }
 0x1d8   :  { %v2089_v22 = vpop.eup %2088  ;;  %1560 = vst [vmem:[%s3581_s4 + $0xd8] sm:$0xff] %v1396_v30  ;;  %v1077_v11 = vadd.f32 1.0, %v2087_v41  ;;  %2114 = vpow2.f32 %v827_v25 }
 0x1d9   :  { %v2091_v33 = vpop.eup %2090  ;;  %2116 = vrcp.f32 %v1013_v29  ;;  %v1014_v58 = vadd.f32 1.0, %v2089_v22 }
 0x1da   :  { %v2093_v8 = vpop.eup %2092  ;;  %2118 = vrcp.f32 %v1077_v11  ;;  %v1078_v24 = vadd.f32 1.0, %v2091_v33 }
 0x1db   :  { %v2095_v38 = vpop.eup %2094  ;;  %v1460_v16 = vmul.f32 %v2093_v8, %v3351_v9  ;;  %2120 = vrcp.f32 %v1014_v58 }
 0x1dc   :  { %v2097_v44 = vpop.eup %2096  ;;  %2122 = vrcp.f32 %v1078_v24  ;;  %v1015_v13 = vadd.f32 1.0, %v2095_v38 }
 0x1dd   :  { %v2099_v50 = vpop.eup %2098  ;;  %1592 = vst [vmem:[%s3581_s4 + $0x1d8] sm:$0xff] %v1460_v16  ;;  %v1079_v47 = vadd.f32 1.0, %v2097_v44  ;;  %2124 = vpow2.f32 %v955_v31 }
 0x1de   :  { %v2101_v36 = vpop.eup %2100  ;;  %2126 = vrcp.f32 %v1015_v13  ;;  %v1016_v39 = vadd.f32 1.0, %v2099_v50 }
 0x1df   :  { %v2103_v6 = vpop.eup %2102  ;;  %2128 = vrcp.f32 %v1079_v47  ;;  %v1080_v26 = vadd.f32 1.0, %v2101_v36 }
 0x1e0   :  { %v2105_v53 = vpop.eup %2104  ;;  %2130 = vrcp.f32 %v1016_v39  ;;  %v1017_v9 = vadd.f32 1.0, %v2103_v6 }
 0x1e1   :  { %v2107_v49 = vpop.eup %2106  ;;  %2132 = vrcp.f32 %v1080_v26  ;;  %v1081_v55 = vadd.f32 1.0, %v2105_v53 }
 0x1e2   :  { %v2109_v17 = vpop.eup %2108  ;;  %2134 = vrcp.f32 %v1017_v9  ;;  %v1018_v20 = vadd.f32 1.0, %v2107_v49 }
 0x1e3   :  { %v2111_v62 = vpop.eup %2110  ;;  %2136 = vrcp.f32 %v1081_v55  ;;  %v1082_v27 = vadd.f32 1.0, %v2109_v17 }
 0x1e4   :  { %v2113_v12 = vpop.eup %2112  ;;  %2138 = vrcp.f32 %v1018_v20  ;;  %v1019_v54 = vadd.f32 1.0, %v2111_v62 }
 0x1e5   :  { %v2115_v51 = vpop.eup %2114  ;;  %2140 = vrcp.f32 %v1082_v27  ;;  %v1083_v7 = vadd.f32 1.0, %v2113_v12 }
 0x1e6   :  { %v2117_v28 = vpop.eup %2116  ;;  %2142 = vrcp.f32 %v1019_v54  ;;  %v1020_v4 = vadd.f32 1.0, %v2115_v51 }
 0x1e7   :  { %v2119_v56 = vpop.eup %2118  ;;  %v1397_v34 = vmul.f32 %v2117_v28, %v3382_v0  ;;  %2144 = vrcp.f32 %v1083_v7 }
 0x1e8   :  { %v2121_v37 = vpop.eup %2120  ;;  %v1461_v60 = vmul.f32 %v2119_v56, %v3386_v14  ;;  %2146 = vrcp.f32 %v1020_v4 }
 0x1e9   :  { %v2123_v61 = vpop.eup %2122  ;;  %1497 = vst [vmem:[%s3580_s3 + $0xe0] sm:$0xff] %v1397_v34  ;;  %v1398_v10 = vmul.f32 %v2121_v37, %v3389_v19 }
 0x1ea   :  { %v2125_v43 = vpop.eup %2124  ;;  %1529 = vst [vmem:[%s3580_s3 + $0x1e0] sm:$0xff] %v1461_v60  ;;  %v1462_v3 = vmul.f32 %v2123_v61, %v3395_v48 }
 0x1eb   :  { %v2127_v0 = vpop.eup %2126  ;;  %1561 = vst [vmem:[%s3581_s4 + $0xe0] sm:$0xff] %v1398_v10  ;;  %v1084_v14 = vadd.f32 1.0, %v2125_v43 }
 0x1ec   :  { %v2129_v5 = vpop.eup %2128  ;;  %1593 = vst [vmem:[%s3581_s4 + $0x1e0] sm:$0xff] %v1462_v3  ;;  %v1399_v19 = vmul.f32 %v2127_v0, %v3399_v40 }
 0x1ed   :  { %v2131_v25 = vpop.eup %2130  ;;  %v1463_v45 = vmul.f32 %v2129_v5, %v3403_v15  ;;  %2148 = vrcp.f32 %v1084_v14 }
 0x1ee   :  { %v2133_v1 = vpop.eup %2132  ;;  %1498 = vst [vmem:[%s3580_s3 + $0xe8] sm:$0xff] %v1399_v19  ;;  %v1400_v48 = vmul.f32 %v2131_v25, %v3408_v46 }
 0x1ef   :  { %v2135_v23 = vpop.eup %2134  ;;  %1530 = vst [vmem:[%s3580_s3 + $0x1e8] sm:$0xff] %v1463_v45  ;;  %v1464_v42 = vmul.f32 %v2133_v1, %v3413_v59 }
 0x1f0   :  { %v2137_v30 = vpop.eup %2136  ;;  %1562 = vst [vmem:[%s3581_s4 + $0xe8] sm:$0xff] %v1400_v48  ;;  %v1401_v40 = vmul.f32 %v2135_v23, %v3417_v32 }
 0x1f1   :  { %v2139_v15 = vpop.eup %2138  ;;  %1594 = vst [vmem:[%s3581_s4 + $0x1e8] sm:$0xff] %v1464_v42  ;;  %v1465_v46 = vmul.f32 %v2137_v30, %v3421_v63 }
 0x1f2   :  { %v2141_v41 = vpop.eup %2140  ;;  %1499 = vst [vmem:[%s3580_s3 + $0xf0] sm:$0xff] %v1401_v40  ;;  %v1402_v59 = vmul.f32 %v2139_v15, %v3426_v35 }
 0x1f3   :  { %v2143_v29 = vpop.eup %2142  ;;  %1531 = vst [vmem:[%s3580_s3 + $0x1f0] sm:$0xff] %v1465_v46  ;;  %v1466_v32 = vmul.f32 %v2141_v41, %v3433_v21 }
 0x1f4   :  { %v2145_v22 = vpop.eup %2144  ;;  %1563 = vst [vmem:[%s3581_s4 + $0xf0] sm:$0xff] %v1402_v59  ;;  %v1403_v63 = vmul.f32 %v2143_v29, %v3441_v18 }
 0x1f5   :  { %v2147_v11 = vpop.eup %2146  ;;  %1595 = vst [vmem:[%s3581_s4 + $0x1f0] sm:$0xff] %v1466_v32  ;;  %v1467_v35 = vmul.f32 %v2145_v22, %v3448_v2 }
 0x1f6   :  { %1500 = vst [vmem:[%s3580_s3 + $0xf8] sm:$0xff] %v1403_v63  ;;  %v1404_v21 = vmul.f32 %v2147_v11, %v3456_v57 }
 0x1f7   :  { %1532 = vst [vmem:[%s3580_s3 + $0x1f8] sm:$0xff] %v1467_v35 }
 0x1f8   :  { %1564 = vst [vmem:[%s3581_s4 + $0xf8] sm:$0xff] %v1404_v21 }
 0x1fa   :  { %v2149_v18 = vpop.eup %2148 }
 0x1fb   :  { %v1468_v33 = vmul.f32 %v2149_v18, %v3480_v52 }
 0x1fd   :  { %1596 = vst [vmem:[%s3581_s4 + $0x1f8] sm:$0xff] %v1468_v33 }

// kernel: c3k_forward_pallas.6
= control target key start
LH: loop header
LB: loop body
LE: loop exit
PB: predicated region body
PF: predicated region fallthrough
CT: control target
= control target key end

     0   :  { %s2086_s15 = smov 0   ;;  %s3137_s0 = inlined_call_operand.vmem [shape: f32[4,10,18,128], index: 0, kind: input, shape index: {}]   ;;  %s3138_s1 = inlined_call_operand.vmem [shape: f32[512,128], index: 1, kind: input, shape index: {}]   ;;  %s3139_s2 = inlined_call_operand.vmem [shape: f32[1152,128], index: 2, kind: input, shape index: {}]   ;;  %s3140_s3 = inlined_call_operand.vmem [shape: f32[1,128], index: 3, kind: input, shape index: {}]   ;;  %s3141_s4 = inlined_call_operand.vmem [shape: f32[512,128], index: 4, kind: output, shape index: {}]  }
   0x1 LB: > { %s2092_s16 = sadd.s32 4294967295, %s2059_s15   ;;  %p1531_p0 = scmp.ge.s32.totalorder %s2059_s15, 1  ;;  %s2059_s15 = sphi %s2086_s15, %s14_s15  }
   0x2   : > { %p173_p1 = scmp.lt.s32.totalorder %s2059_s15, 5 }
   0x4   : > { %p174_p2 = pnand %p1531_p0, %p173_p1 }
   0x6   : > { %177 = sbr.rel (%p174_p2) target bundleno = 428 (0x1ac), region = 36 }
   0xb   : > { %v454_v0 = vld [vmem:[%s3139_s2 + $0xf8] sm:$0xff]  ;;  %v453_v4 = vld [vmem:[%s3139_s2 + $0xf0] sm:$0xff]  ;;  %v452_v8 = vld [vmem:[%s3139_s2 + $0xe8] sm:$0xff]  ;;  %p204_p3 = scmp.lt.s32.totalorder %s2092_s16, 3  ;;  %vm275_vm0 = vcmask 1046528   ;;  %vm332_vm1 = vcmask 1045504  }
   0xc   : > { %v486_v1 = vld [vmem:[%s3139_s2 + $0x1f8] sm:$0xff]  ;;  %1540 = vmatprep.subr.mxu0 %v454_v0  ;;  %v485_v5 = vld [vmem:[%s3139_s2 + $0x1f0] sm:$0xff]  ;;  %v484_v9 = vld [vmem:[%s3139_s2 + $0x1e8] sm:$0xff]  ;;  %s1533_s29 = sshll.u32 %s2092_s16, 4 }
   0xd   : > { %v438_v2 = vld [vmem:[%s3139_s2 + $0x78] sm:$0xff]  ;;  %1620 = vmatprep.subr.mxu1 %v486_v1  ;;  %v437_v6 = vld [vmem:[%s3139_s2 + $0x70] sm:$0xff]  ;;  %v436_v10 = vld [vmem:[%s3139_s2 + $0x68] sm:$0xff]  ;;  %s2184_s25 = scalar_select %p204_p3, %s2092_s16, 3 }
   0xe   : > { %v470_v3 = vld [vmem:[%s3139_s2 + $0x178] sm:$0xff]  ;;  %1541 = vmatpush3.msra.mxu0 %v438_v2  ;;  %v469_v7 = vld [vmem:[%s3139_s2 + $0x170] sm:$0xff]  ;;  %v468_v11 = vld [vmem:[%s3139_s2 + $0x168] sm:$0xff]  ;;  %p210_p4 = scmp.lt.s32.totalorder %s1533_s29, 63 }
   0xf   : > { %1621 = vmatpush3.msra.mxu1 %v470_v3  ;;  %1542 = vmatprep.subr.mxu0 %v453_v4  ;;  %v451_v12 = vld [vmem:[%s3139_s2 + $0xe0] sm:$0xff]  ;;  %v450_v16 = vld [vmem:[%s3139_s2 + $0xd8] sm:$0xff]  ;;  %v449_v20 = vld [vmem:[%s3139_s2 + $0xd0] sm:$0xff]  ;;  %s1980_s18 = smul.u32 240, %s2184_s25 }
  0x10   : > { %1622 = vmatprep.subr.mxu1 %v485_v5  ;;  %1543 = vmatpush3.msra.mxu0 %v437_v6  ;;  %v483_v13 = vld [vmem:[%s3139_s2 + $0x1e0] sm:$0xff]  ;;  %v482_v17 = vld [vmem:[%s3139_s2 + $0x1d8] sm:$0xff]  ;;  %v481_v21 = vld [vmem:[%s3139_s2 + $0x1d0] sm:$0xff]  ;;  %s3175_s29 = smov (!%p210_p4, %s1533_s29), 63 }
  0x11   : > { %1623 = vmatpush3.msra.mxu1 %v469_v7  ;;  %1544 = vmatprep.subr.mxu0 %v452_v8  ;;  %v435_v14 = vld [vmem:[%s3139_s2 + $0x60] sm:$0xff]  ;;  %v434_v18 = vld [vmem:[%s3139_s2 + $0x58] sm:$0xff]  ;;  %v433_v22 = vld [vmem:[%s3139_s2 + $0x50] sm:$0xff]  ;;  %s2238_s11 = scalar_lea.vmem %s3137_s0, %s1980_s18  ;;  %s1534_s16 = sshll.u32 %s3175_s29, 3 }
  0x12   : > { %1624 = vmatprep.subr.mxu1 %v484_v9  ;;  %v467_v15 = vld [vmem:[%s3139_s2 + $0x160] sm:$0xff]  ;;  %1545 = vmatpush3.msra.mxu0 %v436_v10  ;;  %v466_v19 = vld [vmem:[%s3139_s2 + $0x158] sm:$0xff]  ;;  %v465_v23 = vld [vmem:[%s3139_s2 + $0x150] sm:$0xff]  ;;  %s3079_s6 = scalar_lea.vmem %s3138_s1, %s1534_s16  ;;  %s3087_s9 = scalar_lea.vmem %s3141_s4, %s1534_s16 }
  0x13   : > { %1625 = vmatpush3.msra.mxu1 %v468_v11  ;;  %1546 = vmatprep.subr.mxu0 %v451_v12  ;;  %v448_v24 = vld [vmem:[%s3139_s2 + $0xc8] sm:$0xff]  ;;  %v447_v28 = vld [vmem:[%s3139_s2 + $0xc0] sm:$0xff]  ;;  %v446_v32 = vld [vmem:[%s3139_s2 + $0xb8] sm:$0xff] }
  0x14   : > { %1626 = vmatprep.subr.mxu1 %v483_v13  ;;  %1547 = vmatpush3.msra.mxu0 %v435_v14  ;;  %v480_v25 = vld [vmem:[%s3139_s2 + $0x1c8] sm:$0xff]  ;;  %v479_v29 = vld [vmem:[%s3139_s2 + $0x1c0] sm:$0xff]  ;;  %v478_v33 = vld [vmem:[%s3139_s2 + $0x1b8] sm:$0xff] }
  0x15   : > { %1627 = vmatpush3.msra.mxu1 %v467_v15  ;;  %1548 = vmatprep.subr.mxu0 %v450_v16  ;;  %v432_v26 = vld [vmem:[%s3139_s2 + $0x48] sm:$0xff]  ;;  %v431_v30 = vld [vmem:[%s3139_s2 + $0x40] sm:$0xff]  ;;  %v430_v34 = vld [vmem:[%s3139_s2 + $0x38] sm:$0xff] }
  0x16   : > { %1628 = vmatprep.subr.mxu1 %v482_v17  ;;  %1549 = vmatpush3.msra.mxu0 %v434_v18  ;;  %v464_v27 = vld [vmem:[%s3139_s2 + $0x148] sm:$0xff]  ;;  %v463_v31 = vld [vmem:[%s3139_s2 + $0x140] sm:$0xff]  ;;  %v462_v35 = vld [vmem:[%s3139_s2 + $0x138] sm:$0xff] }
  0x17   : > { %1629 = vmatpush3.msra.mxu1 %v466_v19  ;;  %1550 = vmatprep.subr.mxu0 %v449_v20  ;;  %v445_v36 = vld [vmem:[%s3139_s2 + $0xb0] sm:$0xff]  ;;  %v444_v40 = vld [vmem:[%s3139_s2 + $0xa8] sm:$0xff]  ;;  %v443_v44 = vld [vmem:[%s3139_s2 + $0xa0] sm:$0xff] }
  0x18   : > { %1630 = vmatprep.subr.mxu1 %v481_v21  ;;  %1551 = vmatpush3.msra.mxu0 %v433_v22  ;;  %v477_v37 = vld [vmem:[%s3139_s2 + $0x1b0] sm:$0xff]  ;;  %v476_v41 = vld [vmem:[%s3139_s2 + $0x1a8] sm:$0xff]  ;;  %v475_v45 = vld [vmem:[%s3139_s2 + $0x1a0] sm:$0xff] }
  0x19   : > { %1631 = vmatpush3.msra.mxu1 %v465_v23  ;;  %1552 = vmatprep.subr.mxu0 %v448_v24  ;;  %v429_v38 = vld [vmem:[%s3139_s2 + $0x30] sm:$0xff]  ;;  %v428_v42 = vld [vmem:[%s3139_s2 + $0x28] sm:$0xff]  ;;  %v427_v46 = vld [vmem:[%s3139_s2 + $0x20] sm:$0xff] }
  0x1a   : > { %1632 = vmatprep.subr.mxu1 %v480_v25  ;;  %1553 = vmatpush3.msra.mxu0 %v432_v26  ;;  %v461_v39 = vld [vmem:[%s3139_s2 + $0x130] sm:$0xff]  ;;  %v460_v43 = vld [vmem:[%s3139_s2 + $0x128] sm:$0xff]  ;;  %v459_v47 = vld [vmem:[%s3139_s2 + $0x120] sm:$0xff] }
  0x1b   : > { %1633 = vmatpush3.msra.mxu1 %v464_v27  ;;  %1554 = vmatprep.subr.mxu0 %v447_v28  ;;  %v442_v48 = vld [vmem:[%s3139_s2 + $0x98] sm:$0xff]  ;;  %v221_v50 = vld [vmem:[%s2238_s11] sm:$0xff]  ;;  %v2260_v51 = vld [vmem:[%s2238_s11 + $0x8] sm:$0xff] }
  0x1c   : > { %1634 = vmatprep.subr.mxu1 %v479_v29  ;;  %1555 = vmatpush3.msra.mxu0 %v431_v30  ;;  %v474_v49 = vld [vmem:[%s3139_s2 + $0x198] sm:$0xff]  ;;  %v441_v54 = vld [vmem:[%s3139_s2 + $0x90] sm:$0xff]  ;;  %v276_v58 = vrot.slane %v221_v50, 1  ;;  %v277_v59 = vrot.slane %v2260_v51, 1  ;;  %v440_v60 = vld [vmem:[%s3139_s2 + $0x88] sm:$0xff]  ;;  %v333_v0 = vrot.slane %v221_v50, 2 }
  0x1d   : > { %1635 = vmatpush3.msra.mxu1 %v463_v31  ;;  %1556 = vmatprep.subr.mxu0 %v446_v32  ;;  %v426_v52 = vld [vmem:[%s3139_s2 + $0x18] sm:$0xff]  ;;  %v473_v55 = vld [vmem:[%s3139_s2 + $0x190] sm:$0xff]  ;;  %v472_v61 = vld [vmem:[%s3139_s2 + $0x188] sm:$0xff]  ;;  %v334_v1 = vrot.slane %v2260_v51, 2 }
  0x1e   : > { %1636 = vmatprep.subr.mxu1 %v478_v33  ;;  %1557 = vmatpush3.msra.mxu0 %v430_v34  ;;  %v458_v53 = vld [vmem:[%s3139_s2 + $0x118] sm:$0xff]  ;;  %v425_v56 = vld [vmem:[%s3139_s2 + $0x10] sm:$0xff]  ;;  %v424_v62 = vld [vmem:[%s3139_s2 + $0x8] sm:$0xff]  ;;  %v278_v6 = vsel %vm275_vm0, %v276_v58, %v277_v59 }
  0x1f   : > { %1637 = vmatpush3.msra.mxu1 %v462_v35  ;;  %1558 = vmatprep.subr.mxu0 %v445_v36  ;;  %v457_v57 = vld [vmem:[%s3139_s2 + $0x110] sm:$0xff]  ;;  %v456_v63 = vld [vmem:[%s3139_s2 + $0x108] sm:$0xff]  ;;  %v439_v3 = vld [vmem:[%s3139_s2 + $0x80] sm:$0xff]  ;;  %v335_v10 = vsel %vm332_vm1, %v333_v0, %v334_v1 }
  0x20   : > { %1638 = vmatprep.subr.mxu1 %v477_v37  ;;  %1559 = vmatpush3.msra.mxu0 %v429_v38  ;;  %v223_v2 = vld [vmem:[%s2238_s11 + $0x10] sm:$0x3]  ;;  %v471_v4 = vld [vmem:[%s3139_s2 + $0x180] sm:$0xff]  ;;  %v224_v8 = vld [vmem:[%s2238_s11 + $0x18] sm:$0xff] }
  0x21   : > { %1639 = vmatpush3.msra.mxu1 %v461_v39  ;;  %1560 = vmatprep.subr.mxu0 %v444_v40  ;;  %v423_v5 = vld [vmem:[%s3139_s2] sm:$0xff]  ;;  %v279_v9 = vrot.slane %v223_v2, 1  ;;  %v336_v12 = vrot.slane %v223_v2, 2  ;;  %v518_v13 = vld [vmem:[%s3139_s2 + $0x2f8] sm:$0xff]  ;;  %v281_v18 = vrot.slane %v224_v8, 1  ;;  %v338_v21 = vrot.slane %v224_v8, 2 }
  0x22   : > { %1640 = vmatprep.subr.mxu1 %v476_v41  ;;  %1561 = vmatpush3.msra.mxu0 %v428_v42  ;;  %v455_v7 = vld [vmem:[%s3139_s2 + $0x100] sm:$0xff]  ;;  %v550_v14 = vld [vmem:[%s3139_s2 + $0x3f8] sm:$0xff]  ;;  %v226_v23 = vld [vmem:[%s2238_s11 + $0x28] sm:$0x3] }
  0x23   : > { %1641 = vmatpush3.msra.mxu1 %v460_v43  ;;  %1562 = vmatprep.subr.mxu0 %v443_v44  ;;  %v2311_v11 = vld [vmem:[%s2238_s11 + $0x20] sm:$0xff]  ;;  %v502_v15 = vld [vmem:[%s3139_s2 + $0x278] sm:$0xff]  ;;  %v280_v17 = vsel %vm275_vm0, %v277_v59, %v279_v9  ;;  %v337_v20 = vsel %vm332_vm1, %v334_v1, %v336_v12  ;;  %v517_v24 = vld [vmem:[%s3139_s2 + $0x2f0] sm:$0xff]  ;;  %v284_v30 = vrot.slane %v226_v23, 1  ;;  %v341_v33 = vrot.slane %v226_v23, 2 }
  0x24   : > { %1642 = vmatprep.subr.mxu1 %v475_v45  ;;  %1563 = vmatpush3.msra.mxu0 %v427_v46  ;;  %v534_v16 = vld [vmem:[%s3139_s2 + $0x378] sm:$0xff]  ;;  %v282_v19 = vrot.slane %v2311_v11, 1  ;;  %v339_v22 = vrot.slane %v2311_v11, 2  ;;  %v549_v25 = vld [vmem:[%s3139_s2 + $0x3f0] sm:$0xff]  ;;  %v516_v34 = vld [vmem:[%s3139_s2 + $0x2e8] sm:$0xff] }
  0x25   : > { %1643 = vmatpush3.msra.mxu1 %v459_v47  ;;  %1564 = vmatprep.subr.mxu0 %v442_v48  ;;  %v501_v26 = vld [vmem:[%s3139_s2 + $0x270] sm:$0xff]  ;;  %v2354_v32 = vld [vmem:[%s2238_s11 + $0x38] sm:$0xff]  ;;  %v548_v35 = vld [vmem:[%s3139_s2 + $0x3e8] sm:$0xff] }
  0x26   : > { %1644 = vmatprep.subr.mxu1 %v474_v49  ;;  %1565 = vmatpush3.msra.mxu0 %v426_v52  ;;  %v533_v27 = vld [vmem:[%s3139_s2 + $0x370] sm:$0xff]  ;;  %v2345_v28 = vsel %vm275_vm0, %v281_v18, %v282_v19  ;;  %v2351_v31 = vsel %vm332_vm1, %v338_v21, %v339_v22  ;;  %v500_v36 = vld [vmem:[%s3139_s2 + $0x268] sm:$0xff]  ;;  %v2372_v38 = vsel %vm275_vm0, %v282_v19, %v284_v30  ;;  %v287_v40 = vrot.slane %v2354_v32, 1  ;;  %v229_v44 = vld [vmem:[%s2238_s11 + $0x40] sm:$0x3] }
  0x27   : > { %1645 = vmatpush3.msra.mxu1 %v458_v53  ;;  %1566 = vmatprep.subr.mxu0 %v441_v54  ;;  %v2348_v29 = vld [vmem:[%s2238_s11 + $0x30] sm:$0xff]  ;;  %v532_v37 = vld [vmem:[%s3139_s2 + $0x368] sm:$0xff]  ;;  %v2377_v41 = vsel %vm332_vm1, %v339_v22, %v341_v33  ;;  %v344_v43 = vrot.slane %v2354_v32, 2  ;;  %v515_v45 = vld [vmem:[%s3139_s2 + $0x2e0] sm:$0xff]  ;;  %v346_v54 = vrot.slane %v229_v44, 2 }
  0x28   : > { %1646 = vmatprep.subr.mxu1 %v473_v55  ;;  %1567 = vmatpush3.msra.mxu0 %v425_v56  ;;  %v286_v39 = vrot.slane %v2348_v29, 1  ;;  %v343_v42 = vrot.slane %v2348_v29, 2  ;;  %v547_v46 = vld [vmem:[%s3139_s2 + $0x3e0] sm:$0xff]  ;;  %v2408_v53 = vld [vmem:[%s2238_s11 + $0x50] sm:$0xff]  ;;  %v514_v55 = vld [vmem:[%s3139_s2 + $0x2d8] sm:$0xff] }
  0x29   : > { %1647 = vmatpush3.msra.mxu1 %v457_v57  ;;  %1568 = vmatprep.subr.mxu0 %v440_v60  ;;  %v499_v47 = vld [vmem:[%s3139_s2 + $0x260] sm:$0xff]  ;;  %v546_v56 = vld [vmem:[%s3139_s2 + $0x3d8] sm:$0xff]  ;;  %v2438_v2 = vld [vmem:[%s2238_s11 + $0xc8] sm:$0xff] }
  0x2a   : > { %1648 = vmatprep.subr.mxu1 %v472_v61  ;;  %1569 = vmatpush3.msra.mxu0 %v424_v62  ;;  %v531_v48 = vld [vmem:[%s3139_s2 + $0x360] sm:$0xff]  ;;  %v2399_v49 = vsel %vm275_vm0, %v286_v39, %v287_v40  ;;  %v2405_v52 = vsel %vm332_vm1, %v343_v42, %v344_v43  ;;  %v498_v58 = vld [vmem:[%s3139_s2 + $0x258] sm:$0xff]  ;;  %v545_v9 = vld [vmem:[%s3139_s2 + $0x3d0] sm:$0xff] }
  0x2b   : > { %1649 = vmatpush3.msra.mxu1 %v456_v63  ;;  %1570 = vmatprep.subr.mxu0 %v439_v3  ;;  %v2417_v57 = vld [vmem:[%s2238_s11 + $0xc0] sm:$0xff]  ;;  %v530_v59 = vld [vmem:[%s3139_s2 + $0x358] sm:$0xff]  ;;  %v292_v63 = vrot.slane %v2408_v53, 1  ;;  %v544_v21 = vld [vmem:[%s3139_s2 + $0x3c8] sm:$0xff] }
  0x2c   : > { %1650 = vmatprep.subr.mxu1 %v471_v4  ;;  %1571 = vmatpush3.msra.mxu0 %v423_v5  ;;  %v392_v61 = vrot.slane %v2417_v57, 1  ;;  %v232_v1 = vld [vmem:[%s2238_s11 + $0x58] sm:$0x3]  ;;  %v399_v3 = vrot.slane %v2417_v57, 2  ;;  %v2442_v4 = vsel %vm332_vm1, %v344_v43, %v346_v54  ;;  %v349_v5 = vrot.slane %v2408_v53, 2  ;;  %v496_v30 = vld [vmem:[%s3139_s2 + $0x248] sm:$0xff] }
  0x2d   : > { %638 = vmatprep.mubr.f32.mxu0 %v278_v6  ;;  %1651 = vmatpush3.msra.mxu1 %v455_v7  ;;  %v393_v6 = vrot.slane %v2438_v2, 1  ;;  %v400_v7 = vrot.slane %v2438_v2, 2  ;;  %v294_v12 = vrot.slane %v232_v1, 1  ;;  %v351_v18 = vrot.slane %v232_v1, 2  ;;  %v528_v33 = vld [vmem:[%s3139_s2 + $0x348] sm:$0xff] }
  0x2e   : > { %783 = vmatprep.mubr.f32.mxu1 %v224_v8  ;;  %639 = vmatmul.mubr.f32.vlgmr.msra.gmra.mxu0 %v221_v50  ;;  %v2402_v50 = vld [vmem:[%s2238_s11 + $0x48] sm:$0xff] }
  0x2f   : > { %784 = vmatmul.mubr.f32.vlgmr.msra.gmra.mxu1 %v335_v10  ;;  %1700 = vmatprep.subr.mxu0 %v518_v13  ;;  %v291_v60 = vrot.slane %v2402_v50, 1  ;;  %v348_v0 = vrot.slane %v2402_v50, 2  ;;  %v497_v10 = vld [vmem:[%s3139_s2 + $0x250] sm:$0xff]  ;;  %v2462_v13 = vld [vmem:[%s2238_s11 + $0x68] sm:$0xff] }
  0x30   : > { %1780 = vmatprep.subr.mxu1 %v550_v14  ;;  %1701 = vmatpush3.msra.mxu0 %v502_v15  ;;  %v2465_v14 = vsel %vm275_vm0, %v392_v61, %v393_v6  ;;  %v2468_v15 = vsel %vm332_vm1, %v399_v3, %v400_v7  ;;  %v297_v23 = vrot.slane %v2462_v13, 1  ;;  %v250_v43 = vld [vmem:[%s2238_s11 + $0xe8] sm:$0x3]  ;;  %v527_v61 = vld [vmem:[%s3139_s2 + $0x340] sm:$0xff]  ;;  %v2558_v3 = vld [vmem:[%s2238_s11 + $0x78] sm:$0xff] }
  0x31   : > { %1781 = vmatpush3.msra.mxu1 %v534_v16  ;;  %643 = vmatprep.mubr.f32.mxu0 %v280_v17  ;;  %v2473_v16 = vsel %vm275_vm0, %v291_v60, %v292_v63  ;;  %v2476_v17 = vld [vmem:[%s2238_s11 + $0x60] sm:$0xff]  ;;  %v2479_v19 = vsel %vm332_vm1, %v348_v0, %v349_v5  ;;  %v419_v54 = vrot.slane %v250_v43, 2 }
  0x32   : > { %788 = vmatprep.mubr.f32.mxu1 %v2311_v11  ;;  %644 = vmatmul.mubr.f32.gmra.mxu0 %v2260_v51  ;;  %v289_v51 = vrot.slane %v229_v44, 1  ;;  %v296_v22 = vrot.slane %v2476_v17, 1  ;;  %v495_v60 = vld [vmem:[%s3139_s2 + $0x240] sm:$0xff] }
  0x33   : > { %789 = vmatmul.mubr.f32.gmra.mxu1 %v337_v20  ;;  %1702 = vmatprep.subr.mxu0 %v517_v24  ;;  %v512_v20 = vld [vmem:[%s3139_s2 + $0x2c8] sm:$0xff]  ;;  %v353_v24 = vrot.slane %v2476_v17, 2 }
  0x34   : > { %1782 = vmatprep.subr.mxu1 %v549_v25  ;;  %1703 = vmatpush3.msra.mxu0 %v501_v26  ;;  %v2432_v62 = vsel %vm275_vm0, %v287_v40, %v289_v51  ;;  %v354_v25 = vrot.slane %v2462_v13, 2  ;;  %v247_v26 = vld [vmem:[%s2238_s11 + $0xd0] sm:$0x3]  ;;  %v2513_v40 = vsel %vm332_vm1, %v349_v5, %v351_v18  ;;  %v412_v51 = vrot.slane %v250_v43, 1 }
  0x35   : > { %1783 = vmatpush3.msra.mxu1 %v533_v27  ;;  %648 = vmatprep.mubr.f32.mxu0 %v2345_v28  ;;  %v2493_v27 = vld [vmem:[%s2238_s11 + $0xd8] sm:$0xff]  ;;  %v402_v39 = vrot.slane %v247_v26, 2  ;;  %v2555_v1 = vsel %vm275_vm0, %v296_v22, %v297_v23 }
  0x36   : > { %793 = vmatprep.mubr.f32.mxu1 %v2348_v29  ;;  %649 = vmatmul.mubr.f32.gmra.mxu0 %v224_v8  ;;  %v513_v8 = vld [vmem:[%s3139_s2 + $0x2d0] sm:$0xff]  ;;  %v416_v44 = vrot.slane %v2493_v27, 2 }
  0x37   : > { %794 = vmatmul.mubr.f32.gmra.mxu1 %v2351_v31  ;;  %1704 = vmatprep.subr.mxu0 %v516_v34  ;;  %v2504_v34 = vsel %vm275_vm0, %v292_v63, %v294_v12  ;;  %v526_v12 = vld [vmem:[%s3139_s2 + $0x338] sm:$0xff] }
  0x38   : > { %1784 = vmatprep.subr.mxu1 %v548_v35  ;;  %1705 = vmatpush3.msra.mxu0 %v500_v36  ;;  %v395_v35 = vrot.slane %v247_v26, 1  ;;  %v2507_v36 = vld [vmem:[%s2238_s11 + $0xe0] sm:$0xff] }
  0x39   : > { %1785 = vmatpush3.msra.mxu1 %v532_v37  ;;  %653 = vmatprep.mubr.f32.mxu0 %v2372_v38  ;;  %v409_v37 = vrot.slane %v2493_v27, 1  ;;  %v410_v42 = vrot.slane %v2507_v36, 1 }
  0x3a   : > { %798 = vmatprep.mubr.f32.mxu1 %v2354_v32  ;;  %654 = vmatmul.mubr.f32.gmra.mxu0 %v2311_v11  ;;  %v529_v11 = vld [vmem:[%s3139_s2 + $0x350] sm:$0xff] }
  0x3b   : > { %799 = vmatmul.mubr.f32.gmra.mxu1 %v2377_v41  ;;  %1706 = vmatprep.subr.mxu0 %v515_v45  ;;  %v417_v45 = vrot.slane %v2507_v36, 2  ;;  %v2547_v63 = vsel %vm275_vm0, %v410_v42, %v412_v51  ;;  %v540_v51 = vld [vmem:[%s3139_s2 + $0x3a8] sm:$0xff] }
  0x3c   : > { %1786 = vmatprep.subr.mxu1 %v547_v46  ;;  %1707 = vmatpush3.msra.mxu0 %v499_v47  ;;  %v235_v46 = vld [vmem:[%s2238_s11 + $0x70] sm:$0x3]  ;;  %v2521_v47 = vsel %vm275_vm0, %v393_v6, %v395_v35  ;;  %v2563_v6 = vsel %vm332_vm1, %v353_v24, %v354_v25  ;;  %v358_v24 = vrot.slane %v2558_v3, 2 }
  0x3d   : > { %1787 = vmatpush3.msra.mxu1 %v531_v48  ;;  %658 = vmatprep.mubr.f32.mxu0 %v2399_v49  ;;  %v2524_v48 = vsel %vm332_vm1, %v400_v7, %v402_v39  ;;  %v2550_v0 = vsel %vm332_vm1, %v417_v45, %v419_v54  ;;  %v299_v5 = vrot.slane %v235_v46, 1  ;;  %v2566_v7 = vld [vmem:[%s2238_s11 + $0x80] sm:$0xff]  ;;  %v525_v35 = vld [vmem:[%s3139_s2 + $0x330] sm:$0xff]  ;;  %v492_v54 = vld [vmem:[%s3139_s2 + $0x228] sm:$0xff] }
  0x3e   : > { %803 = vmatprep.mubr.f32.mxu1 %v2402_v50  ;;  %659 = vmatmul.mubr.f32.gmra.mxu0 %v2348_v29  ;;  %v359_v26 = vrot.slane %v2566_v7, 2  ;;  %v2617_v39 = vld [vmem:[%s2238_s11 + $0x90] sm:$0xff] }
  0x3f   : > { %804 = vmatmul.mubr.f32.gmra.mxu1 %v2405_v52  ;;  %1708 = vmatprep.subr.mxu0 %v514_v55  ;;  %v511_v55 = vld [vmem:[%s3139_s2 + $0x2c0] sm:$0xff]  ;;  %v2585_v18 = vsel %vm275_vm0, %v297_v23, %v299_v5  ;;  %v509_v23 = vld [vmem:[%s3139_s2 + $0x2b0] sm:$0xff] }
  0x40   : > { %1788 = vmatprep.subr.mxu1 %v546_v56  ;;  %1709 = vmatpush3.msra.mxu0 %v498_v58  ;;  %v543_v56 = vld [vmem:[%s3139_s2 + $0x3c0] sm:$0xff]  ;;  %v2533_v58 = vsel %vm275_vm0, %v409_v37, %v410_v42  ;;  %v2620_v43 = vsel %vm332_vm1, %v358_v24, %v359_v26 }
  0x41   : > { %1789 = vmatpush3.msra.mxu1 %v530_v59  ;;  %663 = vmatprep.mubr.f32.mxu0 %v2432_v62  ;;  %v2536_v59 = vsel %vm332_vm1, %v416_v44, %v417_v45  ;;  %v2623_v44 = vld [vmem:[%s2238_s11 + $0x98] sm:$0xff] }
  0x42   : > { %808 = vmatprep.mubr.f32.mxu1 %v2408_v53  ;;  %664 = vmatmul.mubr.f32.gmra.mxu0 %v2354_v32 }
  0x43   : > { %809 = vmatmul.mubr.f32.gmra.mxu1 %v2442_v4  ;;  %1710 = vmatprep.subr.mxu0 %v513_v8  ;;  %v356_v8 = vrot.slane %v235_v46, 2  ;;  %v508_v46 = vld [vmem:[%s3139_s2 + $0x2a8] sm:$0xff] }
  0x44   : > { %1790 = vmatprep.subr.mxu1 %v545_v9  ;;  %1711 = vmatpush3.msra.mxu0 %v497_v10  ;;  %v510_v9 = vld [vmem:[%s3139_s2 + $0x2b8] sm:$0xff] }
  0x45   : > { %1791 = vmatpush3.msra.mxu1 %v529_v11  ;;  %668 = vmatprep.mubr.f32.mxu0 %v2473_v16  ;;  %v542_v10 = vld [vmem:[%s3139_s2 + $0x3b8] sm:$0xff]  ;;  %v2592_v22 = vsel %vm332_vm1, %v354_v25, %v356_v8  ;;  %v493_v25 = vld [vmem:[%s3139_s2 + $0x230] sm:$0xff]  ;;  %v363_v8 = vrot.slane %v2617_v39, 2 }
  0x46   : > { %813 = vmatprep.mubr.f32.mxu1 %v2476_v17  ;;  %669 = vmatmul.mubr.f32.gmra.mxu0 %v2402_v50  ;;  %v494_v11 = vld [vmem:[%s3139_s2 + $0x238] sm:$0xff] }
  0x47   : > { %814 = vmatmul.mubr.f32.gmra.mxu1 %v2479_v19  ;;  %1712 = vmatprep.subr.mxu0 %v512_v20  ;;  %v301_v20 = vrot.slane %v2558_v3, 1 }
  0x48   : > { %1792 = vmatprep.subr.mxu1 %v544_v21  ;;  %1713 = vmatpush3.msra.mxu0 %v496_v30  ;;  %v302_v21 = vrot.slane %v2566_v7, 1  ;;  %v238_v30 = vld [vmem:[%s2238_s11 + $0x88] sm:$0x3] }
  0x49   : > { %1793 = vmatpush3.msra.mxu1 %v528_v33  ;;  %673 = vmatprep.mubr.f32.mxu0 %v2504_v34  ;;  %v541_v33 = vld [vmem:[%s3139_s2 + $0x3b0] sm:$0xff]  ;;  %v304_v42 = vrot.slane %v238_v30, 1  ;;  %v361_v45 = vrot.slane %v238_v30, 2 }
  0x4a   : > { %818 = vmatprep.mubr.f32.mxu1 %v2462_v13  ;;  %674 = vmatmul.mubr.f32.gmra.mxu0 %v2408_v53  ;;  %v2614_v37 = vsel %vm275_vm0, %v301_v20, %v302_v21  ;;  %v491_v20 = vld [vmem:[%s3139_s2 + $0x220] sm:$0xff] }
  0x4b   : > { %819 = vmatmul.mubr.f32.gmra.mxu1 %v2513_v40  ;;  %1714 = vmatprep.subr.mxu0 %v511_v55  ;;  %v524_v55 = vld [vmem:[%s3139_s2 + $0x328] sm:$0xff]  ;;  %v2647_v5 = vsel %vm332_vm1, %v359_v26, %v361_v45  ;;  %v490_v45 = vld [vmem:[%s3139_s2 + $0x218] sm:$0xff] }
  0x4c   : > { %1794 = vmatprep.subr.mxu1 %v543_v56  ;;  %1715 = vmatpush3.msra.mxu0 %v495_v60  ;;  %v2642_v56 = vsel %vm275_vm0, %v302_v21, %v304_v42  ;;  %v306_v60 = vrot.slane %v2617_v39, 1  ;;  %v523_v21 = vld [vmem:[%s3139_s2 + $0x320] sm:$0xff]  ;;  %v2672_v26 = vld [vmem:[%s2238_s11 + $0xa8] sm:$0xff]  ;;  %v538_v42 = vld [vmem:[%s3139_s2 + $0x398] sm:$0xff] }
  0x4d   : > { %1795 = vmatpush3.msra.mxu1 %v527_v61  ;;  %678 = vmatprep.mubr.f32.mxu0 %v2555_v1  ;;  %v307_v61 = vrot.slane %v2623_v44, 1 }
  0x4e   : > { %823 = vmatprep.mubr.f32.mxu1 %v2558_v3  ;;  %679 = vmatmul.mubr.f32.gmra.mxu0 %v2476_v17 }
  0x4f   : > { %824 = vmatmul.mubr.f32.gmra.mxu1 %v2563_v6  ;;  %1716 = vmatprep.subr.mxu0 %v510_v9  ;;  %v364_v9 = vrot.slane %v2623_v44, 2  ;;  %v2669_v24 = vsel %vm275_vm0, %v306_v60, %v307_v61 }
  0x50   : > { %1796 = vmatprep.subr.mxu1 %v542_v10  ;;  %1717 = vmatpush3.msra.mxu0 %v494_v11  ;;  %v241_v10 = vld [vmem:[%s2238_s11 + $0xa0] sm:$0x3] }
  0x51   : > { %1797 = vmatpush3.msra.mxu1 %v526_v12  ;;  %683 = vmatprep.mubr.f32.mxu0 %v2585_v18  ;;  %v507_v11 = vld [vmem:[%s3139_s2 + $0x2a0] sm:$0xff]  ;;  %v309_v30 = vrot.slane %v241_v10, 1 }
  0x52   : > { %828 = vmatprep.mubr.f32.mxu1 %v2566_v7  ;;  %684 = vmatmul.mubr.f32.gmra.mxu0 %v2462_v13  ;;  %v539_v12 = vld [vmem:[%s3139_s2 + $0x3a0] sm:$0xff] }
  0x53   : > { %829 = vmatmul.mubr.f32.gmra.mxu1 %v2592_v22  ;;  %1718 = vmatprep.subr.mxu0 %v509_v23  ;;  %v2675_v23 = vsel %vm332_vm1, %v363_v8, %v364_v9  ;;  %v368_v8 = vrot.slane %v2672_v26, 2 }
  0x54   : > { %1798 = vmatprep.subr.mxu1 %v541_v33  ;;  %1719 = vmatpush3.msra.mxu0 %v493_v25  ;;  %v2678_v33 = vld [vmem:[%s2238_s11 + $0xb0] sm:$0xff]  ;;  %v366_v25 = vrot.slane %v241_v10, 2 }
  0x55   : > { %1799 = vmatpush3.msra.mxu1 %v525_v35  ;;  %688 = vmatprep.mubr.f32.mxu0 %v2614_v37  ;;  %v506_v35 = vld [vmem:[%s3139_s2 + $0x298] sm:$0xff]  ;;  %v369_v10 = vrot.slane %v2678_v33, 2 }
  0x56   : > { %833 = vmatprep.mubr.f32.mxu1 %v2617_v39  ;;  %689 = vmatmul.mubr.f32.gmra.mxu0 %v2558_v3  ;;  %v2702_v60 = vsel %vm332_vm1, %v364_v9, %v366_v25  ;;  %v489_v9 = vld [vmem:[%s3139_s2 + $0x210] sm:$0xff] }
  0x57   : > { %834 = vmatmul.mubr.f32.gmra.mxu1 %v2620_v43  ;;  %1720 = vmatprep.subr.mxu0 %v508_v46  ;;  %v522_v46 = vld [vmem:[%s3139_s2 + $0x318] sm:$0xff]  ;;  %v2727_v25 = vsel %vm332_vm1, %v368_v8, %v369_v10 }
  0x58   : > { %1800 = vmatprep.subr.mxu1 %v540_v51  ;;  %1721 = vmatpush3.msra.mxu0 %v492_v54  ;;  %v2697_v51 = vsel %vm275_vm0, %v307_v61, %v309_v30  ;;  %v311_v54 = vrot.slane %v2672_v26, 1  ;;  %v505_v61 = vld [vmem:[%s3139_s2 + $0x290] sm:$0xff] }
  0x59   : > { %1801 = vmatpush3.msra.mxu1 %v524_v55  ;;  %693 = vmatprep.mubr.f32.mxu0 %v2642_v56  ;;  %v312_v55 = vrot.slane %v2678_v33, 1 }
  0x5a   : > { %838 = vmatprep.mubr.f32.mxu1 %v2623_v44  ;;  %694 = vmatmul.mubr.f32.gmra.mxu0 %v2566_v7 }
  0x5b   : > { %839 = vmatmul.mubr.f32.gmra.mxu1 %v2647_v5  ;;  %1722 = vmatprep.subr.mxu0 %v507_v11  ;;  %v244_v11 = vld [vmem:[%s2238_s11 + $0xb8] sm:$0x3] }
  0x5c   : > { %1802 = vmatprep.subr.mxu1 %v539_v12  ;;  %1723 = vmatpush3.msra.mxu0 %v491_v20  ;;  %v537_v12 = vld [vmem:[%s3139_s2 + $0x390] sm:$0xff]  ;;  %v314_v30 = vrot.slane %v244_v11, 1 }
  0x5d   : > { %1803 = vmatpush3.msra.mxu1 %v523_v21  ;;  %698 = vmatprep.mubr.f32.mxu0 %v2669_v24  ;;  %v521_v20 = vld [vmem:[%s3139_s2 + $0x310] sm:$0xff]  ;;  %v2724_v21 = vsel %vm275_vm0, %v311_v54, %v312_v55  ;;  %v520_v54 = vld [vmem:[%s3139_s2 + $0x308] sm:$0xff] }
  0x5e   : > { %843 = vmatprep.mubr.f32.mxu1 %v2672_v26  ;;  %699 = vmatmul.mubr.f32.gmra.mxu0 %v2617_v39  ;;  %v2746_v8 = vsel %vm275_vm0, %v312_v55, %v314_v30  ;;  %v487_v55 = vld [vmem:[%s3139_s2 + $0x200] sm:$0xff] }
  0x5f   : > { %844 = vmatmul.mubr.f32.gmra.mxu1 %v2675_v23  ;;  %1724 = vmatprep.subr.mxu0 %v506_v35  ;;  %v371_v35 = vrot.slane %v244_v11, 2 }
  0x60   : > { %1804 = vmatprep.subr.mxu1 %v538_v42  ;;  %1725 = vmatpush3.msra.mxu0 %v490_v45  ;;  %v504_v42 = vld [vmem:[%s3139_s2 + $0x288] sm:$0xff] }
  0x61   : > { %1805 = vmatpush3.msra.mxu1 %v522_v46  ;;  %703 = vmatprep.mubr.f32.mxu0 %v2697_v51  ;;  %v536_v45 = vld [vmem:[%s3139_s2 + $0x388] sm:$0xff]  ;;  %v2749_v11 = vsel %vm332_vm1, %v369_v10, %v371_v35  ;;  %v519_v10 = vld [vmem:[%s3139_s2 + $0x300] sm:$0xff] }
  0x62   : > { %848 = vmatprep.mubr.f32.mxu1 %v2678_v33  ;;  %704 = vmatmul.mubr.f32.gmra.mxu0 %v2623_v44  ;;  %v488_v46 = vld [vmem:[%s3139_s2 + $0x208] sm:$0xff] }
  0x63   : > { %849 = vmatmul.mubr.f32.gmra.mxu1 %v2702_v60  ;;  %1726 = vmatprep.subr.mxu0 %v505_v61  ;;  %v503_v61 = vld [vmem:[%s3139_s2 + $0x280] sm:$0xff] }
  0x64   : > { %1806 = vmatprep.subr.mxu1 %v537_v12  ;;  %1727 = vmatpush3.msra.mxu0 %v489_v9  ;;  %v535_v12 = vld [vmem:[%s3139_s2 + $0x380] sm:$0xff]  ;;  %v566_v9 = vld [vmem:[%s3139_s2 + $0x478] sm:$0xff] }
  0x65   : > { %1807 = vmatpush3.msra.mxu1 %v521_v20  ;;  %708 = vmatprep.mubr.f32.mxu0 %v2724_v21  ;;  %v565_v20 = vld [vmem:[%s3139_s2 + $0x470] sm:$0xff] }
  0x66   : > { %853 = vmatprep.mubr.f32.mxu1 %v2417_v57  ;;  %709 = vmatmul.mubr.f32.gmra.mxu0 %v2672_v26 }
  0x67   : > { %854 = vmatmul.mubr.f32.gmra.mxu1 %v2727_v25  ;;  %1728 = vmatprep.subr.mxu0 %v504_v42 }
  0x68   : > { %1808 = vmatprep.subr.mxu1 %v536_v45  ;;  %1729 = vmatpush3.msra.mxu0 %v488_v46 }
  0x69   : > { %1809 = vmatpush3.msra.mxu1 %v520_v54  ;;  %713 = vmatprep.mubr.f32.mxu0 %v2746_v8 }
  0x6a   : > { %858 = vmatprep.mubr.f32.mxu1 %v2438_v2  ;;  %714 = vmatmul.mubr.f32.gmra.mxu0 %v2678_v33 }
  0x6b   : > { %859 = vmatmul.mubr.f32.gmra.mxu1 %v2749_v11  ;;  %1730 = vmatprep.subr.mxu0 %v503_v61 }
  0x6c   : > { %1810 = vmatprep.subr.mxu1 %v535_v12  ;;  %1731 = vmatpush3.msra.mxu0 %v487_v55 }
  0x6d   : > { %1811 = vmatpush3.msra.mxu1 %v519_v10  ;;  %928 = vmatprep.mubr.f32.mxu0 %v2351_v31  ;;  %v562_v31 = vld [vmem:[%s3139_s2 + $0x458] sm:$0xff] }
  0x6e   : > { %1073 = vmatprep.mubr.f32.mxu1 %v2399_v49  ;;  %929 = vmatmul.mubr.f32.vlgmr.msra.gmra.mxu0 %v2345_v28  ;;  %v564_v28 = vld [vmem:[%s3139_s2 + $0x468] sm:$0xff] }
  0x6f   : > { %1074 = vmatmul.mubr.f32.vlgmr.msra.gmra.mxu1 %v2348_v29  ;;  %1892 = vmatprep.subr.mxu0 %v566_v9  ;;  %v563_v29 = vld [vmem:[%s3139_s2 + $0x460] sm:$0xff] }
  0x70   : > { %1948 = vmatprep.subr.mxu1 %v566_v9  ;;  %1893 = vmatpush3.msra.mxu0 %v566_v9 }
  0x71   : > { %1964 = vmatpush3.msra.mxu1 %v566_v9  ;;  %933 = vmatprep.mubr.f32.mxu0 %v2377_v41  ;;  %v559_v41 = vld [vmem:[%s3139_s2 + $0x440] sm:$0xff] }
  0x72   : > { %1078 = vmatprep.mubr.f32.mxu1 %v2432_v62  ;;  %934 = vmatmul.mubr.f32.gmra.mxu0 %v2372_v38  ;;  %v560_v38 = vld [vmem:[%s3139_s2 + $0x448] sm:$0xff] }
  0x73   : > { %1079 = vmatmul.mubr.f32.gmra.mxu1 %v2354_v32  ;;  %1894 = vmatprep.subr.mxu0 %v565_v20  ;;  %v561_v32 = vld [vmem:[%s3139_s2 + $0x450] sm:$0xff] }
  0x74   : > { %1949 = vmatprep.subr.mxu1 %v565_v20  ;;  %1895 = vmatpush3.msra.mxu0 %v565_v20 }
  0x75   : > { %1965 = vmatpush3.msra.mxu1 %v565_v20  ;;  %938 = vmatprep.mubr.f32.mxu0 %v2405_v52 }
  0x76   : > { %1083 = vmatprep.mubr.f32.mxu1 %v2473_v16  ;;  %939 = vmatmul.mubr.f32.gmra.mxu0 %v2399_v49  ;;  %v558_v49 = vld [vmem:[%s3139_s2 + $0x438] sm:$0xff] }
  0x77   : > { %1084 = vmatmul.mubr.f32.gmra.mxu1 %v2402_v50  ;;  %1896 = vmatprep.subr.mxu0 %v564_v28  ;;  %v557_v50 = vld [vmem:[%s3139_s2 + $0x430] sm:$0xff] }
  0x78   : > { %1950 = vmatprep.subr.mxu1 %v564_v28  ;;  %1897 = vmatpush3.msra.mxu0 %v564_v28 }
  0x79   : > { %1966 = vmatpush3.msra.mxu1 %v564_v28  ;;  %943 = vmatprep.mubr.f32.mxu0 %v2442_v4 }
  0x7a   : > { %1088 = vmatprep.mubr.f32.mxu1 %v2504_v34  ;;  %944 = vmatmul.mubr.f32.gmra.mxu0 %v2432_v62  ;;  %v555_v62 = vld [vmem:[%s3139_s2 + $0x420] sm:$0xff] }
  0x7b   : > { %1089 = vmatmul.mubr.f32.gmra.mxu1 %v2408_v53  ;;  %1898 = vmatprep.subr.mxu0 %v563_v29  ;;  %v556_v53 = vld [vmem:[%s3139_s2 + $0x428] sm:$0xff] }
  0x7c   : > { %1951 = vmatprep.subr.mxu1 %v563_v29  ;;  %1899 = vmatpush3.msra.mxu0 %v563_v29 }
  0x7d   : > { %1967 = vmatpush3.msra.mxu1 %v563_v29  ;;  %948 = vmatprep.mubr.f32.mxu0 %v2479_v19 }
  0x7e   : > { %1093 = vmatprep.mubr.f32.mxu1 %v2555_v1  ;;  %949 = vmatmul.mubr.f32.gmra.mxu0 %v2473_v16  ;;  %v553_v16 = vld [vmem:[%s3139_s2 + $0x410] sm:$0xff] }
  0x7f   : > { %1094 = vmatmul.mubr.f32.gmra.mxu1 %v2476_v17  ;;  %1900 = vmatprep.subr.mxu0 %v562_v31 }
  0x80   : > { %1952 = vmatprep.subr.mxu1 %v562_v31  ;;  %1901 = vmatpush3.msra.mxu0 %v562_v31 }
  0x81   : > { %1968 = vmatpush3.msra.mxu1 %v562_v31  ;;  %953 = vmatprep.mubr.f32.mxu0 %v2513_v40 }
  0x82   : > { %1098 = vmatprep.mubr.f32.mxu1 %v2585_v18  ;;  %954 = vmatmul.mubr.f32.gmra.mxu0 %v2504_v34 }
  0x83   : > { %1099 = vmatmul.mubr.f32.gmra.mxu1 %v2462_v13  ;;  %1902 = vmatprep.subr.mxu0 %v561_v32  ;;  %v554_v13 = vld [vmem:[%s3139_s2 + $0x418] sm:$0xff] }
  0x84   : > { %1953 = vmatprep.subr.mxu1 %v561_v32  ;;  %1903 = vmatpush3.msra.mxu0 %v561_v32 }
  0x85   : > { %1969 = vmatpush3.msra.mxu1 %v561_v32  ;;  %958 = vmatprep.mubr.f32.mxu0 %v2563_v6 }
  0x86   : > { %1103 = vmatprep.mubr.f32.mxu1 %v2614_v37  ;;  %959 = vmatmul.mubr.f32.gmra.mxu0 %v2555_v1 }
  0x87   : > { %1104 = vmatmul.mubr.f32.gmra.mxu1 %v2558_v3  ;;  %1904 = vmatprep.subr.mxu0 %v560_v38 }
  0x88   : > { %1954 = vmatprep.subr.mxu1 %v560_v38  ;;  %1905 = vmatpush3.msra.mxu0 %v560_v38 }
  0x89   : > { %1970 = vmatpush3.msra.mxu1 %v560_v38  ;;  %963 = vmatprep.mubr.f32.mxu0 %v2592_v22 }
  0x8a   : > { %1108 = vmatprep.mubr.f32.mxu1 %v2642_v56  ;;  %964 = vmatmul.mubr.f32.gmra.mxu0 %v2585_v18 }
  0x8b   : > { %1109 = vmatmul.mubr.f32.gmra.mxu1 %v2566_v7  ;;  %1906 = vmatprep.subr.mxu0 %v559_v41 }
  0x8c   : > { %1955 = vmatprep.subr.mxu1 %v559_v41  ;;  %1907 = vmatpush3.msra.mxu0 %v559_v41 }
  0x8d   : > { %1971 = vmatpush3.msra.mxu1 %v559_v41  ;;  %968 = vmatprep.mubr.f32.mxu0 %v2620_v43 }
  0x8e   : > { %1113 = vmatprep.mubr.f32.mxu1 %v2669_v24  ;;  %969 = vmatmul.mubr.f32.gmra.mxu0 %v2614_v37 }
  0x8f   : > { %1114 = vmatmul.mubr.f32.gmra.mxu1 %v2617_v39  ;;  %1908 = vmatprep.subr.mxu0 %v558_v49 }
  0x90   : > { %1956 = vmatprep.subr.mxu1 %v558_v49  ;;  %1909 = vmatpush3.msra.mxu0 %v558_v49 }
  0x91   : > { %1972 = vmatpush3.msra.mxu1 %v558_v49  ;;  %973 = vmatprep.mubr.f32.mxu0 %v2647_v5 }
  0x92   : > { %1118 = vmatprep.mubr.f32.mxu1 %v2697_v51  ;;  %974 = vmatmul.mubr.f32.gmra.mxu0 %v2642_v56 }
  0x93   : > { %1119 = vmatmul.mubr.f32.gmra.mxu1 %v2623_v44  ;;  %1910 = vmatprep.subr.mxu0 %v557_v50 }
  0x94   : > { %1957 = vmatprep.subr.mxu1 %v557_v50  ;;  %1911 = vmatpush3.msra.mxu0 %v557_v50 }
  0x95   : > { %1973 = vmatpush3.msra.mxu1 %v557_v50  ;;  %978 = vmatprep.mubr.f32.mxu0 %v2675_v23 }
  0x96   : > { %1123 = vmatprep.mubr.f32.mxu1 %v2724_v21  ;;  %979 = vmatmul.mubr.f32.gmra.mxu0 %v2669_v24 }
  0x97   : > { %1124 = vmatmul.mubr.f32.gmra.mxu1 %v2672_v26  ;;  %1912 = vmatprep.subr.mxu0 %v556_v53 }
  0x98   : > { %1958 = vmatprep.subr.mxu1 %v556_v53  ;;  %1913 = vmatpush3.msra.mxu0 %v556_v53 }
  0x99   : > { %1974 = vmatpush3.msra.mxu1 %v556_v53  ;;  %983 = vmatprep.mubr.f32.mxu0 %v2702_v60 }
  0x9a   : > { %1128 = vmatprep.mubr.f32.mxu1 %v2746_v8  ;;  %984 = vmatmul.mubr.f32.gmra.mxu0 %v2697_v51 }
  0x9b   : > { %1129 = vmatmul.mubr.f32.gmra.mxu1 %v2678_v33  ;;  %1914 = vmatprep.subr.mxu0 %v555_v62 }
  0x9c   : > { %1959 = vmatprep.subr.mxu1 %v555_v62  ;;  %1915 = vmatpush3.msra.mxu0 %v555_v62 }
  0x9d   : > { %1975 = vmatpush3.msra.mxu1 %v555_v62  ;;  %988 = vmatprep.mubr.f32.mxu0 %v2727_v25 }
  0x9e   : > { %1133 = vmatprep.mubr.f32.mxu1 %v2465_v14  ;;  %989 = vmatmul.mubr.f32.gmra.mxu0 %v2724_v21 }
  0x9f   : > { %1134 = vmatmul.mubr.f32.gmra.mxu1 %v2417_v57  ;;  %1916 = vmatprep.subr.mxu0 %v554_v13  ;;  %v552_v57 = vld [vmem:[%s3139_s2 + $0x408] sm:$0xff] }
  0xa0   : > { %1960 = vmatprep.subr.mxu1 %v554_v13  ;;  %1917 = vmatpush3.msra.mxu0 %v554_v13 }
  0xa1   : > { %1976 = vmatpush3.msra.mxu1 %v554_v13  ;;  %993 = vmatprep.mubr.f32.mxu0 %v2749_v11 }
  0xa2   : > { %1138 = vmatprep.mubr.f32.mxu1 %v2521_v47  ;;  %994 = vmatmul.mubr.f32.gmra.mxu0 %v2746_v8 }
  0xa3   : > { %1139 = vmatmul.mubr.f32.gmra.mxu1 %v2438_v2  ;;  %1918 = vmatprep.subr.mxu0 %v553_v16  ;;  %v551_v2 = vld [vmem:[%s3139_s2 + $0x400] sm:$0xff] }
  0xa4   : > { %1961 = vmatprep.subr.mxu1 %v553_v16  ;;  %1919 = vmatpush3.msra.mxu0 %v553_v16 }
  0xa5   : > { %1977 = vmatpush3.msra.mxu1 %v553_v16  ;;  %998 = vmatprep.mubr.f32.mxu0 %v2468_v15 }
  0xa6   : > { %1143 = vmatprep.mubr.f32.mxu1 %v2533_v58  ;;  %999 = vmatmul.mubr.f32.gmra.mxu0 %v2465_v14  ;;  %v2898_v14 = vld [vmem:[%s3140_s3] ss:$0 sm:$0xff] }
  0xa7   : > { %1144 = vmatmul.mubr.f32.gmra.mxu1 %v2493_v27  ;;  %1920 = vmatprep.subr.mxu0 %v552_v57 }
  0xa8   : > { %1962 = vmatprep.subr.mxu1 %v552_v57  ;;  %1921 = vmatpush3.msra.mxu0 %v552_v57 }
  0xa9   : > { %1978 = vmatpush3.msra.mxu1 %v552_v57  ;;  %1003 = vmatprep.mubr.f32.mxu0 %v2524_v48 }
  0xaa   : > { %1148 = vmatprep.mubr.f32.mxu1 %v2547_v63  ;;  %1004 = vmatmul.mubr.f32.gmra.mxu0 %v2521_v47 }
  0xab   : > { %1149 = vmatmul.mubr.f32.gmra.mxu1 %v2507_v36  ;;  %1922 = vmatprep.subr.mxu0 %v551_v2 }
  0xac   : > { %1963 = vmatprep.subr.mxu1 %v551_v2  ;;  %1923 = vmatpush3.msra.mxu0 %v551_v2 }
  0xad   : > { %1979 = vmatpush3.msra.mxu1 %v551_v2  ;;  %1924 = vmatprep.mubr.f32.mxu0 %v2405_v52 }
  0xae   : > { %1936 = vmatprep.mubr.f32.mxu1 %v2675_v23  ;;  %1925 = vmatmul.mubr.f32.vlgmr.msra.gmra.mxu0 %v2442_v4 }
  0xaf   : > { %1937 = vmatmul.mubr.f32.vlgmr.msra.gmra.mxu1 %v2702_v60  ;;  %1927 = vmatprep.mubr.f32.mxu0 %v2479_v19 }
  0xb0   : > { %1939 = vmatprep.mubr.f32.mxu1 %v2727_v25 }
  0xb2   : > { %1928 = vmatmul.mubr.f32.gmra.mxu0 %v2513_v40 }
  0xb3   : > { %1940 = vmatmul.mubr.f32.gmra.mxu1 %v2749_v11  ;;  %1930 = vmatprep.mubr.f32.mxu0 %v2563_v6 }
  0xb4   : > { %1942 = vmatprep.mubr.f32.mxu1 %v2468_v15 }
  0xb6   : > { %1931 = vmatmul.mubr.f32.gmra.mxu0 %v2592_v22 }
  0xb7   : > { %1943 = vmatmul.mubr.f32.gmra.mxu1 %v2524_v48  ;;  %1933 = vmatprep.mubr.f32.mxu0 %v2620_v43 }
  0xb8   : > { %1945 = vmatprep.mubr.f32.mxu1 %v2536_v59 }
  0xba   : > { %1934 = vmatmul.mubr.f32.gmra.mxu0 %v2647_v5 }
  0xbb   : > { %1946 = vmatmul.mubr.f32.gmra.mxu1 %v2550_v0 }
  0xee   : > { %v1572_v52 = vpop.f32.mrf.mxu0 }
  0xef   : > { %v1652_v4 = vpop.f32.mrf.mxu1 }
  0xf0   : > { %v1573_v15 = vpop.f32.mrf.mxu0 }
  0xf1   : > { %v1653_v17 = vpop.f32.mrf.mxu1  ;;  %v1574_v19 = vadd.f32 %v1573_v15, %v1572_v52 }
  0xf2   : > { %v1654_v27 = vadd.f32 %v1653_v17, %v1652_v4  ;;  %v1575_v34 = vpop.f32.mrf.mxu0 }
  0xf3   : > { %v1655_v36 = vpop.f32.mrf.mxu1  ;;  %v641_v40 = vadd.f32 %v1574_v19, %v2898_v14 }
  0xf4   : > { %v1576_v47 = vpop.f32.mrf.mxu0 }
  0xf5   : > { %v1656_v48 = vpop.f32.mrf.mxu1  ;;  %v2901_v58 = vadd.f32 %v1654_v27, %v641_v40  ;;  %v1577_v59 = vadd.f32 %v1576_v47, %v1575_v34 }
  0xf6   : > { %v1657_v63 = vadd.f32 %v1656_v48, %v1655_v36  ;;  %v1578_v0 = vpop.f32.mrf.mxu0 }
  0xf7   : > { %v1658_v1 = vpop.f32.mrf.mxu1  ;;  %v646_v3 = vadd.f32 %v1577_v59, %v2898_v14 }
  0xf8   : > { %v1579_v6 = vpop.f32.mrf.mxu0 }
  0xf9   : > { %v1659_v7 = vpop.f32.mrf.mxu1  ;;  %v2904_v18 = vadd.f32 %v1657_v63, %v646_v3  ;;  %v1580_v22 = vadd.f32 %v1579_v6, %v1578_v0 }
  0xfa   : > { %v1660_v37 = vadd.f32 %v1659_v7, %v1658_v1  ;;  %v1581_v39 = vpop.f32.mrf.mxu0 }
  0xfb   : > { %v1661_v43 = vpop.f32.mrf.mxu1  ;;  %v651_v44 = vadd.f32 %v1580_v22, %v2898_v14 }
  0xfc   : > { %v1582_v56 = vpop.f32.mrf.mxu0 }
  0xfd   : > { %v1662_v5 = vpop.f32.mrf.mxu1  ;;  %v2907_v24 = vadd.f32 %v1660_v37, %v651_v44  ;;  %v1583_v26 = vadd.f32 %v1582_v56, %v1581_v39 }
  0xfe   : > { %v1663_v23 = vadd.f32 %v1662_v5, %v1661_v43  ;;  %v1584_v33 = vpop.f32.mrf.mxu0 }
  0xff   : > { %v1664_v51 = vpop.f32.mrf.mxu1  ;;  %v656_v60 = vadd.f32 %v1583_v26, %v2898_v14 }
 0x100   : > { %v1585_v21 = vpop.f32.mrf.mxu0 }
 0x101   : > { %v1665_v30 = vpop.f32.mrf.mxu1  ;;  %v2910_v25 = vadd.f32 %v1663_v23, %v656_v60  ;;  %v1586_v35 = vadd.f32 %v1585_v21, %v1584_v33 }
 0x102   : > { %v1666_v42 = vadd.f32 %v1665_v30, %v1664_v51  ;;  %v1587_v45 = vpop.f32.mrf.mxu0 }
 0x103   : > { %v1667_v46 = vpop.f32.mrf.mxu1  ;;  %v661_v54 = vadd.f32 %v1586_v35, %v2898_v14 }
 0x104   : > { %v1588_v8 = vpop.f32.mrf.mxu0 }
 0x105   : > { %v1668_v11 = vpop.f32.mrf.mxu1  ;;  %v2913_v61 = vadd.f32 %v1666_v42, %v661_v54  ;;  %v1589_v12 = vadd.f32 %v1588_v8, %v1587_v45 }
 0x106   : > { %v1669_v55 = vadd.f32 %v1668_v11, %v1667_v46  ;;  %v1590_v10 = vpop.f32.mrf.mxu0 }
 0x107   : > { %v1670_v9 = vpop.f32.mrf.mxu1  ;;  %v666_v20 = vadd.f32 %v1589_v12, %v2898_v14 }
 0x108   : > { %v1591_v28 = vpop.f32.mrf.mxu0 }
 0x109   : > { %v1671_v29 = vpop.f32.mrf.mxu1  ;;  %v2916_v31 = vadd.f32 %v1669_v55, %v666_v20  ;;  %v1592_v32 = vadd.f32 %v1591_v28, %v1590_v10 }
 0x10a   : > { %v1672_v38 = vadd.f32 %v1671_v29, %v1670_v9  ;;  %v1593_v41 = vpop.f32.mrf.mxu0 }
 0x10b   : > { %v1673_v49 = vpop.f32.mrf.mxu1  ;;  %v671_v50 = vadd.f32 %v1592_v32, %v2898_v14 }
 0x10c   : > { %v1594_v53 = vpop.f32.mrf.mxu0 }
 0x10d   : > { %v1674_v62 = vpop.f32.mrf.mxu1  ;;  %v2919_v13 = vadd.f32 %v1672_v38, %v671_v50  ;;  %v1595_v16 = vadd.f32 %v1594_v53, %v1593_v41 }
 0x10e   : > { %v1675_v57 = vadd.f32 %v1674_v62, %v1673_v49  ;;  %v1596_v2 = vpop.f32.mrf.mxu0 }
 0x10f   : > { %v1676_v52 = vpop.f32.mrf.mxu1  ;;  %v676_v4 = vadd.f32 %v1595_v16, %v2898_v14 }
 0x110   : > { %v1597_v15 = vpop.f32.mrf.mxu0 }
 0x111   : > { %v1677_v17 = vpop.f32.mrf.mxu1  ;;  %v2922_v19 = vadd.f32 %v1675_v57, %v676_v4  ;;  %v1598_v27 = vadd.f32 %v1597_v15, %v1596_v2 }
 0x112   : > { %v1678_v34 = vadd.f32 %v1677_v17, %v1676_v52  ;;  %v1599_v36 = vpop.f32.mrf.mxu0 }
 0x113   : > { %v1679_v40 = vpop.f32.mrf.mxu1  ;;  %v681_v47 = vadd.f32 %v1598_v27, %v2898_v14 }
 0x114   : > { %v1600_v48 = vpop.f32.mrf.mxu0 }
 0x115   : > { %v1680_v59 = vpop.f32.mrf.mxu1  ;;  %v2925_v63 = vadd.f32 %v1678_v34, %v681_v47  ;;  %v1601_v0 = vadd.f32 %v1600_v48, %v1599_v36 }
 0x116   : > { %v1681_v1 = vadd.f32 %v1680_v59, %v1679_v40  ;;  %v1602_v3 = vpop.f32.mrf.mxu0 }
 0x117   : > { %v1682_v6 = vpop.f32.mrf.mxu1  ;;  %v686_v7 = vadd.f32 %v1601_v0, %v2898_v14 }
 0x118   : > { %v1603_v22 = vpop.f32.mrf.mxu0 }
 0x119   : > { %v1683_v37 = vpop.f32.mrf.mxu1  ;;  %v2928_v39 = vadd.f32 %v1681_v1, %v686_v7  ;;  %v1604_v43 = vadd.f32 %v1603_v22, %v1602_v3 }
 0x11a   : > { %v1684_v44 = vadd.f32 %v1683_v37, %v1682_v6  ;;  %v1605_v56 = vpop.f32.mrf.mxu0 }
 0x11b   : > { %v1685_v5 = vpop.f32.mrf.mxu1  ;;  %v691_v26 = vadd.f32 %v1604_v43, %v2898_v14 }
 0x11c   : > { %v1606_v23 = vpop.f32.mrf.mxu0 }
 0x11d   : > { %v1686_v33 = vpop.f32.mrf.mxu1  ;;  %v2931_v51 = vadd.f32 %v1684_v44, %v691_v26  ;;  %v1607_v60 = vadd.f32 %v1606_v23, %v1605_v56 }
 0x11e   : > { %v1687_v21 = vadd.f32 %v1686_v33, %v1685_v5  ;;  %v1608_v30 = vpop.f32.mrf.mxu0 }
 0x11f   : > { %3142 = vst [vmem:[#allocation2_spill] sm:$0xff] %v2931_v51  ;;  %v1688_v35 = vpop.f32.mrf.mxu1  ;;  %v696_v42 = vadd.f32 %v1607_v60, %v2898_v14 }
 0x120   : > { %v1609_v45 = vpop.f32.mrf.mxu0 }
 0x121   : > { %v1689_v46 = vpop.f32.mrf.mxu1  ;;  %v2934_v54 = vadd.f32 %v1687_v21, %v696_v42  ;;  %v1610_v8 = vadd.f32 %v1609_v45, %v1608_v30 }
 0x122   : > { %v1690_v11 = vadd.f32 %v1689_v46, %v1688_v35  ;;  %v1611_v12 = vpop.f32.mrf.mxu0 }
 0x123   : > { %3143 = vst [vmem:[#allocation3_spill] sm:$0xff] %v2934_v54  ;;  %v1691_v55 = vpop.f32.mrf.mxu1  ;;  %v701_v10 = vadd.f32 %v1610_v8, %v2898_v14 }
 0x124   : > { %v1612_v9 = vpop.f32.mrf.mxu0 }
 0x125   : > { %v1692_v20 = vpop.f32.mrf.mxu1  ;;  %v2937_v28 = vadd.f32 %v1690_v11, %v701_v10  ;;  %v1613_v29 = vadd.f32 %v1612_v9, %v1611_v12 }
 0x126   : > { %v1693_v32 = vadd.f32 %v1692_v20, %v1691_v55  ;;  %v1614_v38 = vpop.f32.mrf.mxu0 }
 0x127   : > { %3144 = vst [vmem:[#allocation4_spill] sm:$0xff] %v2937_v28  ;;  %v1694_v41 = vpop.f32.mrf.mxu1  ;;  %v706_v49 = vadd.f32 %v1613_v29, %v2898_v14 }
 0x128   : > { %v1615_v50 = vpop.f32.mrf.mxu0 }
 0x129   : > { %v1695_v53 = vpop.f32.mrf.mxu1  ;;  %v2940_v62 = vadd.f32 %v1693_v32, %v706_v49  ;;  %v1616_v16 = vadd.f32 %v1615_v50, %v1614_v38 }
 0x12a   : > { %v1696_v57 = vadd.f32 %v1695_v53, %v1694_v41  ;;  %v1617_v2 = vpop.f32.mrf.mxu0 }
 0x12b   : > { %3145 = vst [vmem:[#allocation5_spill] sm:$0xff] %v2940_v62  ;;  %v1697_v52 = vpop.f32.mrf.mxu1  ;;  %v711_v4 = vadd.f32 %v1616_v16, %v2898_v14 }
 0x12c   : > { %v1618_v15 = vpop.f32.mrf.mxu0 }
 0x12d   : > { %v1698_v17 = vpop.f32.mrf.mxu1  ;;  %v2943_v27 = vadd.f32 %v1696_v57, %v711_v4  ;;  %v1619_v34 = vadd.f32 %v1618_v15, %v1617_v2 }
 0x12e   : > { %v1699_v36 = vadd.f32 %v1698_v17, %v1697_v52  ;;  %v1732_v40 = vpop.f32.mrf.mxu0 }
 0x12f   : > { %3146 = vst [vmem:[#allocation6_spill] sm:$0xff] %v2943_v27  ;;  %v2945_v47 = vpop.f32.mrf.mxu1  ;;  %v716_v48 = vadd.f32 %v1619_v34, %v2898_v14 }
 0x130   : > { %v1733_v59 = vpop.f32.mrf.mxu0 }
 0x131   : > { %v1813_v0 = vpop.f32.mrf.mxu1  ;;  %v2948_v1 = vadd.f32 %v1699_v36, %v716_v48  ;;  %v1734_v62 = vadd.f32 %v1733_v59, %v1732_v40 }
 0x132   : > { %v1735_v3 = vpop.f32.mrf.mxu0 }
 0x133   : > { %3147 = vst [vmem:[#allocation7_spill] sm:$0xff] %v2948_v1  ;;  %v1815_v6 = vpop.f32.mrf.mxu1 }
 0x134   : > { %v1736_v7 = vpop.f32.mrf.mxu0 }
 0x135   : > { %v1816_v22 = vpop.f32.mrf.mxu1  ;;  %v1737_v28 = vadd.f32 %v1736_v7, %v1735_v3 }
 0x136   : > { %v1738_v37 = vpop.f32.mrf.mxu0 }
 0x137   : > { %v1818_v43 = vpop.f32.mrf.mxu1 }
 0x138   : > { %v1739_v44 = vpop.f32.mrf.mxu0 }
 0x139   : > { %v1819_v56 = vpop.f32.mrf.mxu1  ;;  %v1740_v54 = vadd.f32 %v1739_v44, %v1738_v37 }
 0x13a   : > { %v1741_v5 = vpop.f32.mrf.mxu0  ;;  %v1820_v37 = vadd.f32 %v1819_v56, %v1818_v43 }
 0x13b   : > { %v1821_v26 = vpop.f32.mrf.mxu1 }
 0x13c   : > { %v1742_v23 = vpop.f32.mrf.mxu0 }
 0x13d   : > { %v1822_v33 = vpop.f32.mrf.mxu1 }
 0x13e   : > { %v1744_v60 = vpop.f32.mrf.mxu0 }
 0x13f   : > { %v2950_v21 = vpop.f32.mrf.mxu1 }
 0x140   : > { %v1745_v14 = vpop.f32.mrf.mxu0 }
 0x141   : > { %v1825_v30 = vpop.f32.mrf.mxu1 }
 0x142   : > { %v1747_v35 = vpop.f32.mrf.mxu0 }
 0x143   : > { %v2952_v42 = vpop.f32.mrf.mxu1 }
 0x144   : > { %v1748_v45 = vpop.f32.mrf.mxu0 }
 0x145   : > { %v2954_v46 = vpop.f32.mrf.mxu1  ;;  %v1749_v59 = vadd.f32 %v1748_v45, %v1747_v35 }
 0x146   : > { %v1750_v8 = vpop.f32.mrf.mxu0 }
 0x147   : > { %v2956_v11 = vpop.f32.mrf.mxu1 }
 0x148   : > { %3148 = vst [vmem:[#allocation8_spill] sm:$0xff] %v2956_v11  ;;  %v1751_v12 = vpop.f32.mrf.mxu0  ;;  %v1817_v11 = vadd.f32 %v1816_v22, %v1815_v6 }
 0x149   : > { %v2958_v55 = vpop.f32.mrf.mxu1  ;;  %v1752_v44 = vadd.f32 %v1751_v12, %v1750_v8 }
 0x14a   : > { %3149 = vst [vmem:[#allocation9_spill] sm:$0xff] %v2958_v55  ;;  %v1753_v10 = vpop.f32.mrf.mxu0  ;;  %v941_v55 = vadd.f32 %v1740_v54, %v2907_v24 }
 0x14b   : > { %v2960_v9 = vpop.f32.mrf.mxu1 }
 0x14c   : > { %3150 = vst [vmem:[#allocation10_spill] sm:$0xff] %v2960_v9  ;;  %v1754_v20 = vpop.f32.mrf.mxu0 }
 0x14d   : > { %v2962_v29 = vpop.f32.mrf.mxu1 }
 0x14e   : > { %3151 = vst [vmem:[#allocation11_spill] sm:$0xff] %v2962_v29  ;;  %v1756_v32 = vpop.f32.mrf.mxu0  ;;  %v1746_v29 = vadd.f32 %v1745_v14, %v1744_v60  ;;  %v1823_v60 = vadd.f32 %v1822_v33, %v1821_v26  ;;  %v1829_v26 = vadd.f32 %v2954_v46, %v2952_v42 }
 0x14f   : > { %v2964_v38 = vpop.f32.mrf.mxu1  ;;  %v3158_v12 = vld [vmem:[#allocation8_spill] sm:$0xff] }
 0x150   : > { %3152 = vst [vmem:[#allocation12_spill] sm:$0xff] %v2964_v38  ;;  %v1757_v41 = vpop.f32.mrf.mxu0  ;;  %v951_v14 = vadd.f32 %v1746_v29, %v2913_v61  ;;  %v961_v61 = vadd.f32 %v1752_v44, %v2919_v13  ;;  %v3162_v13 = vld [vmem:[#allocation2_spill] sm:$0xff] }
 0x151   : > { %v2966_v49 = vpop.f32.mrf.mxu1 }
 0x152   : > { %3153 = vst [vmem:[#allocation13_spill] sm:$0xff] %v2966_v49  ;;  %v1759_v50 = vpop.f32.mrf.mxu0  ;;  %v1743_v49 = vadd.f32 %v1742_v23, %v1741_v5  ;;  %v1755_v5 = vadd.f32 %v1754_v20, %v1753_v10 }
 0x153   : > { %v1839_v53 = vpop.f32.mrf.mxu1  ;;  %v3160_v20 = vld [vmem:[#allocation10_spill] sm:$0xff] }
 0x154   : > { %v1760_v16 = vpop.f32.mrf.mxu0  ;;  %v946_v40 = vadd.f32 %v1743_v49, %v2910_v25  ;;  %v1826_v25 = vadd.f32 %v1825_v30, %v2950_v21  ;;  %v966_v33 = vadd.f32 %v1755_v5, %v2922_v19  ;;  %v3165_v49 = vld [vmem:[#allocation3_spill] sm:$0xff] }
 0x155   : > { %v1840_v57 = vpop.f32.mrf.mxu1  ;;  %v1761_v23 = vadd.f32 %v1760_v16, %v1759_v50  ;;  %v3161_v29 = vld [vmem:[#allocation11_spill] sm:$0xff] }
 0x156   : > { %v1762_v2 = vpop.f32.mrf.mxu0  ;;  %v1091_v56 = vadd.f32 %v1823_v60, %v946_v40  ;;  %v1835_v42 = vadd.f32 %v3161_v29, %v3160_v20  ;;  %v1841_v46 = vadd.f32 %v1840_v57, %v1839_v53 }
 0x157   : > { %v2968_v52 = vpop.f32.mrf.mxu1  ;;  %v976_v35 = vadd.f32 %v1761_v23, %v2928_v39  ;;  %v3163_v19 = vld [vmem:[#allocation12_spill] sm:$0xff] }
 0x158   : > { %3154 = vst [vmem:[#allocation14_spill] sm:$0xff] %v2968_v52  ;;  %v1763_v4 = vpop.f32.mrf.mxu0 }
 0x159   : > { %v2970_v15 = vpop.f32.mrf.mxu1 }
 0x15a   : > { %3155 = vst [vmem:[#allocation15_spill] sm:$0xff] %v2970_v15  ;;  %v1765_v17 = vpop.f32.mrf.mxu0  ;;  %v931_v15 = vadd.f32 %v1734_v62, %v2901_v58  ;;  %v1758_v58 = vadd.f32 %v1757_v41, %v1756_v32  ;;  %v3164_v41 = vld [vmem:[#allocation13_spill] sm:$0xff] }
 0x15b   : > { %v2972_v34 = vpop.f32.mrf.mxu1  ;;  %v1838_v39 = vadd.f32 %v3164_v41, %v3163_v19 }
 0x15c   : > { %3156 = vst [vmem:[#allocation16_spill] sm:$0xff] %v2972_v34  ;;  %v1766_v36 = vpop.f32.mrf.mxu0  ;;  %v936_v34 = vadd.f32 %v1737_v28, %v2904_v18  ;;  %v1764_v28 = vadd.f32 %v1763_v4, %v1762_v2  ;;  %v971_v45 = vadd.f32 %v1758_v58, %v2925_v63 }
 0x15d   : > { %v2974_v48 = vpop.f32.mrf.mxu1  ;;  %v1767_v6 = vadd.f32 %v1766_v36, %v1765_v17  ;;  %v3008_v17 = vadd.f32 %v1835_v42, %v966_v33 }
 0x15e   : > { %3157 = vst [vmem:[#allocation17_spill] sm:$0xff] %v2974_v48  ;;  %v1768_v1 = vpop.f32.mrf.mxu0  ;;  %v1814_v48 = vadd.f32 %v1813_v0, %v2945_v47  ;;  %v1081_v24 = vadd.f32 %v1817_v11, %v936_v34  ;;  %v2986_v47 = vadd.f32 %v1820_v37, %v941_v55  ;;  %v956_v0 = vadd.f32 %v1749_v59, %v2916_v31  ;;  %v3159_v55 = vld [vmem:[#allocation9_spill] sm:$0xff] }
 0x15f   : > { %v2976_v27 = vpop.f32.mrf.mxu1  ;;  %v2996_v31 = vadd.f32 %v1826_v25, %v951_v14  ;;  %v1832_v10 = vadd.f32 %v3159_v55, %v3158_v12  ;;  %v981_v32 = vadd.f32 %v1764_v28, %v3162_v13  ;;  %v986_v63 = vadd.f32 %v1767_v6, %v3165_v49  ;;  %v3166_v2 = vld [vmem:[#allocation14_spill] sm:$0xff]  ;;  %v3171_v59 = vld [vmem:[#allocation5_spill] sm:$0xff] }
 0x160   : > { %v1769_v38 = vpop.f32.mrf.mxu0  ;;  %v1076_v54 = vadd.f32 %v1814_v48, %v931_v15  ;;  %v1101_v16 = vadd.f32 %v1829_v26, %v956_v0  ;;  %v1121_v15 = vadd.f32 %v1841_v46, %v976_v35  ;;  %v3170_v48 = vld [vmem:[#allocation4_spill] sm:$0xff]  ;;  %v1116_v5 = vadd.f32 %v1838_v39, %v971_v45  ;;  %v3172_v28 = vld [vmem:[#allocation6_spill] sm:$0xff] }
 0x161   : > { %v1849_v51 = vpop.f32.mrf.mxu1  ;;  %v1770_v8 = vadd.f32 %v1769_v38, %v1768_v1  ;;  %v3010_v34 = vadd.f32 %v1832_v10, %v961_v61  ;;  %v3173_v10 = vld [vmem:[#allocation7_spill] sm:$0xff] }
 0x162   : > { %v1771_v52 = vpop.f32.mrf.mxu0  ;;  %v1850_v23 = vadd.f32 %v1849_v51, %v2976_v27 }
 0x163   : > { %v2978_v9 = vpop.f32.mrf.mxu1  ;;  %v3168_v53 = vld [vmem:[#allocation16_spill] sm:$0xff]  ;;  %v991_v40 = vadd.f32 %v1770_v8, %v3170_v48 }
 0x164   : > { %v1772_v3 = vpop.f32.mrf.mxu0 }
 0x165   : > { %v1852_v7 = vpop.f32.mrf.mxu1  ;;  %v1773_v11 = vadd.f32 %v1772_v3, %v1771_v52  ;;  %v3167_v52 = vld [vmem:[#allocation15_spill] sm:$0xff]  ;;  %v3169_v57 = vld [vmem:[#allocation17_spill] sm:$0xff] }
 0x166   : > { %v1774_v62 = vpop.f32.mrf.mxu0  ;;  %v1844_v4 = vadd.f32 %v3167_v52, %v3166_v2  ;;  %v1847_v36 = vadd.f32 %v3169_v57, %v3168_v53 }
 0x167   : > { %v1854_v18 = vpop.f32.mrf.mxu1  ;;  %v996_v3 = vadd.f32 %v1773_v11, %v3171_v59 }
 0x168   : > { %v1775_v22 = vpop.f32.mrf.mxu0  ;;  %v1126_v58 = vadd.f32 %v1844_v4, %v981_v32  ;;  %v1131_v26 = vadd.f32 %v1847_v36, %v986_v63 }
 0x169   : > { %v1855_v43 = vpop.f32.mrf.mxu1  ;;  %v1776_v1 = vadd.f32 %v1775_v22, %v1774_v62  ;;  %v1853_v62 = vadd.f32 %v1852_v7, %v2978_v9  ;;  %v1136_v9 = vadd.f32 %v1850_v23, %v991_v40 }
 0x16a   : > { %v1777_v21 = vpop.f32.mrf.mxu0  ;;  %v1856_v27 = vadd.f32 %v1855_v43, %v1854_v18 }
 0x16b   : > { %v1857_v30 = vpop.f32.mrf.mxu1  ;;  %v1001_v25 = vadd.f32 %v1776_v1, %v3172_v28  ;;  %v1141_v11 = vadd.f32 %v1853_v62, %v996_v3 }
 0x16c   : > { %v1778_v38 = vpop.f32.mrf.mxu0 }
 0x16d   : > { %v1858_v50 = vpop.f32.mrf.mxu1  ;;  %v1779_v0 = vadd.f32 %v1778_v38, %v1777_v21  ;;  %v1146_v18 = vadd.f32 %v1856_v27, %v1001_v25 }
 0x16e   : > { %v1926_v37 = vpop.f32.mrf.mxu0 }
 0x16f   : > { %v1938_v44 = vpop.f32.mrf.mxu1  ;;  %v3017_v60 = vadd.f32 %v1926_v37, %v1081_v24  ;;  %v1859_v24 = vadd.f32 %v1858_v50, %v1857_v30  ;;  %v1006_v20 = vadd.f32 %v1779_v0, %v3173_v10 }
 0x170   : > { %v3019_v14 = vadd.f32 %v1938_v44, %v1121_v15  ;;  %v1220_v6 = vpop.f32.mrf.mxu0 }
 0x171   : > { %v1260_v22 = vpop.f32.mrf.mxu1  ;;  %v1300_v61 = vsub.f32 0.0, %v3017_v60  ;;  %v3025_v35 = vadd.f32 %v1220_v6, %v1076_v54  ;;  %v1151_v40 = vadd.f32 %v1859_v24, %v1006_v20 }
 0x172   : > { %v1308_v33 = vsub.f32 0.0, %v3019_v14  ;;  %v3027_v51 = vadd.f32 %v1260_v22, %v1116_v5  ;;  %v1929_v45 = vpop.f32.mrf.mxu0 }
 0x173   : > { %v1941_v8 = vpop.f32.mrf.mxu1  ;;  %v1317_v7 = vmul.f32 1.442695, %v1300_v61  ;;  %v1299_v21 = vsub.f32 0.0, %v3025_v35  ;;  %v3032_v29 = vadd.f32 %v1929_v45, %v1091_v56 }
 0x174   : > { %v1333_v12 = vmul.f32 1.442695, %v1308_v33  ;;  %v1307_v55 = vsub.f32 0.0, %v3027_v51  ;;  %v3034_v54 = vadd.f32 %v1941_v8, %v1131_v26  ;;  %v1230_v42 = vpop.f32.mrf.mxu0 }
 0x175   : > { %v1270_v46 = vpop.f32.mrf.mxu1  ;;  %1989 = vpow2.f32 %v1317_v7  ;;  %v1315_v43 = vmul.f32 1.442695, %v1299_v21  ;;  %v3037_v13 = vadd.f32 %v1230_v42, %v2986_v47  ;;  %v1302_v32 = vsub.f32 0.0, %v3032_v29 }
 0x176   : > { %v1331_v30 = vmul.f32 1.442695, %v1307_v55  ;;  %1991 = vpow2.f32 %v1333_v12  ;;  %v1310_v19 = vsub.f32 0.0, %v3034_v54  ;;  %v3041_v41 = vadd.f32 %v1270_v46, %v1126_v58  ;;  %v1932_v56 = vpop.f32.mrf.mxu0 }
 0x177   : > { %v1944_v39 = vpop.f32.mrf.mxu1  ;;  %1993 = vpow2.f32 %v1315_v43  ;;  %v1301_v49 = vsub.f32 0.0, %v3037_v13  ;;  %v3044_v63 = vadd.f32 %v1932_v56, %v1101_v16  ;;  %v1321_v38 = vmul.f32 1.442695, %v1302_v32 }
 0x178   : > { %v3046_v1 = vadd.f32 %v1944_v39, %v1141_v11  ;;  %1995 = vpow2.f32 %v1331_v30  ;;  %v1337_v47 = vmul.f32 1.442695, %v1310_v19  ;;  %v1309_v50 = vsub.f32 0.0, %v3041_v41  ;;  %v1240_v2 = vpop.f32.mrf.mxu0 }
 0x179   : > { %v1280_v52 = vpop.f32.mrf.mxu1  ;;  %v1319_v4 = vmul.f32 1.442695, %v1301_v49  ;;  %v1304_v15 = vsub.f32 0.0, %v3044_v63  ;;  %v3052_v57 = vadd.f32 %v1240_v2, %v2996_v31  ;;  %1997 = vpow2.f32 %v1321_v38 }
 0x17a   : > { %v1312_v53 = vsub.f32 0.0, %v3046_v1  ;;  %v1335_v16 = vmul.f32 1.442695, %v1309_v50  ;;  %v3054_v36 = vadd.f32 %v1280_v52, %v1136_v9  ;;  %v1935_v48 = vpop.f32.mrf.mxu0  ;;  %1999 = vpow2.f32 %v1337_v47 }
 0x17b   : > { %v1947_v59 = vpop.f32.mrf.mxu1  ;;  %v1325_v3 = vmul.f32 1.442695, %v1304_v15  ;;  %v1303_v44 = vsub.f32 0.0, %v3052_v57  ;;  %2001 = vpow2.f32 %v1319_v4  ;;  %v3059_v23 = vadd.f32 %v1935_v48, %v3008_v17 }
 0x17c   : > { %v1341_v37 = vmul.f32 1.442695, %v1312_v53  ;;  %v1311_v5 = vsub.f32 0.0, %v3054_v36  ;;  %v3061_v31 = vadd.f32 %v1947_v59, %v1151_v40  ;;  %v1250_v58 = vpop.f32.mrf.mxu0  ;;  %2003 = vpow2.f32 %v1335_v16  ;;  %v1412_v40 = vld [vmem:[%s3079_s6 + $0x8] sm:$0xff] }
 0x17d   : > { %v1290_v62 = vpop.f32.mrf.mxu1  ;;  %v1323_v28 = vmul.f32 1.442695, %v1303_v44  ;;  %v3064_v25 = vadd.f32 %v1250_v58, %v3010_v34  ;;  %2005 = vpow2.f32 %v1325_v3  ;;  %v1306_v22 = vsub.f32 0.0, %v3059_v23  ;;  %v1420_v44 = vld [vmem:[%s3079_s6 + $0x48] sm:$0xff] }
 0x17e   : > { %v3066_v0 = vadd.f32 %v1290_v62, %v1146_v18  ;;  %v1339_v6 = vmul.f32 1.442695, %v1311_v5  ;;  %v1314_v26 = vsub.f32 0.0, %v3061_v31  ;;  %2007 = vpow2.f32 %v1341_v37  ;;  %v1411_v62 = vld [vmem:[%s3079_s6] sm:$0xff] }
 0x17f   : > { %v1305_v17 = vsub.f32 0.0, %v3064_v25  ;;  %2009 = vpow2.f32 %v1323_v28  ;;  %v1329_v61 = vmul.f32 1.442695, %v1306_v22  ;;  %v1419_v22 = vld [vmem:[%s3079_s6 + $0x40] sm:$0xff] }
 0x180   : > { %v1345_v33 = vmul.f32 1.442695, %v1314_v26  ;;  %2011 = vpow2.f32 %v1339_v6  ;;  %v1313_v34 = vsub.f32 0.0, %v3066_v0 }
 0x181   : > { %v1327_v27 = vmul.f32 1.442695, %v1305_v17  ;;  %2013 = vpow2.f32 %v1329_v61 }
 0x182   : > { %v1990_v24 = vpop.eup %1989  ;;  %2015 = vpow2.f32 %v1345_v33  ;;  %v1343_v21 = vmul.f32 1.442695, %v1313_v34 }
 0x183   : > { %v1992_v45 = vpop.eup %1991  ;;  %v1348_v8 = vadd.f32 1.0, %v1990_v24  ;;  %2017 = vpow2.f32 %v1327_v27 }
 0x184   : > { %v1994_v11 = vpop.eup %1993  ;;  %v1356_v9 = vadd.f32 1.0, %v1992_v45 }
 0x185   : > { %v1996_v7 = vpop.eup %1995  ;;  %2019 = vrcp.f32 %v1348_v8  ;;  %v1347_v12 = vadd.f32 1.0, %v1994_v11  ;;  %v1422_v8 = vld [vmem:[%s3079_s6 + $0x58] sm:$0xff] }
 0x186   : > { %2021 = vrcp.f32 %v1356_v9  ;;  %v1355_v55 = vadd.f32 1.0, %v1996_v7  ;;  %v1998_v10 = vpop.eup %1997 }
 0x187   : > { %2023 = vrcp.f32 %v1347_v12  ;;  %v2000_v20 = vpop.eup %1999  ;;  %v1350_v42 = vadd.f32 1.0, %v1998_v10 }
 0x188   : > { %2025 = vrcp.f32 %v1355_v55  ;;  %v2002_v46 = vpop.eup %2001  ;;  %v1358_v18 = vadd.f32 1.0, %v2000_v20  ;;  %v1421_v55 = vld [vmem:[%s3079_s6 + $0x50] sm:$0xff] }
 0x189   : > { %2027 = vpow2.f32 %v1343_v21  ;;  %v2004_v43 = vpop.eup %2003  ;;  %v1349_v30 = vadd.f32 1.0, %v2002_v46 }
 0x18a   : > { %2029 = vrcp.f32 %v1350_v42  ;;  %v2006_v32 = vpop.eup %2005  ;;  %v1357_v19 = vadd.f32 1.0, %v2004_v43  ;;  %v1416_v42 = vld [vmem:[%s3079_s6 + $0x28] sm:$0xff] }
 0x18b   : > { %2031 = vrcp.f32 %v1358_v18  ;;  %v2008_v56 = vpop.eup %2007  ;;  %v1352_v39 = vadd.f32 1.0, %v2006_v32  ;;  %v1424_v43 = vld [vmem:[%s3079_s6 + $0x68] sm:$0xff] }
 0x18c   : > { %2033 = vrcp.f32 %v1349_v30  ;;  %v2010_v49 = vpop.eup %2009  ;;  %v1360_v38 = vadd.f32 1.0, %v2008_v56 }
 0x18d   : > { %2035 = vrcp.f32 %v1357_v19  ;;  %v2012_v47 = vpop.eup %2011  ;;  %v1351_v50 = vadd.f32 1.0, %v2010_v49  ;;  %v1415_v19 = vld [vmem:[%s3079_s6 + $0x20] sm:$0xff] }
 0x18e   : > { %2037 = vrcp.f32 %v1352_v39  ;;  %v2014_v2 = vpop.eup %2013  ;;  %v1359_v52 = vadd.f32 1.0, %v2012_v47  ;;  %v1423_v49 = vld [vmem:[%s3079_s6 + $0x60] sm:$0xff] }
 0x18f   : > { %2039 = vrcp.f32 %v1360_v38  ;;  %v2016_v4 = vpop.eup %2015  ;;  %v1354_v15 = vadd.f32 1.0, %v2014_v2 }
 0x190   : > { %2041 = vrcp.f32 %v1351_v50  ;;  %v2018_v53 = vpop.eup %2017  ;;  %v1362_v16 = vadd.f32 1.0, %v2016_v4  ;;  %v1418_v50 = vld [vmem:[%s3079_s6 + $0x38] sm:$0xff] }
 0x191   : > { %2043 = vrcp.f32 %v1359_v52  ;;  %v1353_v59 = vadd.f32 1.0, %v2018_v53  ;;  %v1426_v4 = vld [vmem:[%s3079_s6 + $0x78] sm:$0xff] }
 0x192   : > { %v2020_v48 = vpop.eup %2019  ;;  %2045 = vrcp.f32 %v1354_v15 }
 0x193   : > { %v2022_v3 = vpop.eup %2021  ;;  %v1396_v37 = vmul.f32 %v2020_v48, %v3017_v60  ;;  %2047 = vrcp.f32 %v1362_v16  ;;  %v1417_v16 = vld [vmem:[%s3079_s6 + $0x30] sm:$0xff] }
 0x194   : > { %v2024_v5 = vpop.eup %2023  ;;  %v1404_v58 = vmul.f32 %v2022_v3, %v3019_v14  ;;  %2049 = vrcp.f32 %v1353_v59  ;;  %v1414_v14 = vld [vmem:[%s3079_s6 + $0x18] sm:$0xff]  ;;  %v1425_v3 = vld [vmem:[%s3079_s6 + $0x70] sm:$0xff] }
 0x195   : > { %v2026_v28 = vpop.eup %2025  ;;  %v1428_v6 = vadd.f32 %v1412_v40, %v1396_v37  ;;  %v1395_v60 = vmul.f32 %v2024_v5, %v3025_v35 }
 0x196   : > { %v2028_v26 = vpop.eup %2027  ;;  %v1436_v17 = vadd.f32 %v1420_v44, %v1404_v58  ;;  %v1403_v61 = vmul.f32 %v2026_v28, %v3027_v51  ;;  %v1413_v51 = vld [vmem:[%s3079_s6 + $0x10] sm:$0xff] }
 0x197   : > { %v2030_v33 = vpop.eup %2029  ;;  %1444 = vst [vmem:[%s3087_s9 + $0x8] sm:$0xff] %v1428_v6  ;;  %v1427_v27 = vadd.f32 %v1411_v62, %v1395_v60  ;;  %v1361_v34 = vadd.f32 1.0, %v2028_v26 }
 0x198   : > { %v2032_v24 = vpop.eup %2031  ;;  %1452 = vst [vmem:[%s3087_s9 + $0x48] sm:$0xff] %v1436_v17  ;;  %v1435_v45 = vadd.f32 %v1419_v22, %v1403_v61  ;;  %v1398_v35 = vmul.f32 %v2030_v33, %v3032_v29 }
 0x199   : > { %v2034_v11 = vpop.eup %2033  ;;  %1443 = vst [vmem:[%s3087_s9] sm:$0xff] %v1427_v27  ;;  %v1406_v9 = vmul.f32 %v2032_v24, %v3034_v54  ;;  %2051 = vrcp.f32 %v1361_v34 }
 0x19a   : > { %v2036_v7 = vpop.eup %2035  ;;  %1451 = vst [vmem:[%s3087_s9 + $0x40] sm:$0xff] %v1435_v45  ;;  %v1430_v12 = vadd.f32 %v1414_v14, %v1398_v35  ;;  %v1397_v21 = vmul.f32 %v2034_v11, %v3037_v13 }
 0x19b   : > { %v2038_v10 = vpop.eup %2037  ;;  %v1438_v29 = vadd.f32 %v1422_v8, %v1406_v9  ;;  %v1405_v20 = vmul.f32 %v2036_v7, %v3041_v41 }
 0x19c   : > { %v2040_v46 = vpop.eup %2039  ;;  %1446 = vst [vmem:[%s3087_s9 + $0x18] sm:$0xff] %v1430_v12  ;;  %v1429_v54 = vadd.f32 %v1413_v51, %v1397_v21  ;;  %v1400_v18 = vmul.f32 %v2038_v10, %v3044_v63 }
 0x19d   : > { %v2042_v30 = vpop.eup %2041  ;;  %1454 = vst [vmem:[%s3087_s9 + $0x58] sm:$0xff] %v1438_v29  ;;  %v1437_v13 = vadd.f32 %v1421_v55, %v1405_v20  ;;  %v1408_v32 = vmul.f32 %v2040_v46, %v3046_v1 }
 0x19e   : > { %v2044_v56 = vpop.eup %2043  ;;  %1445 = vst [vmem:[%s3087_s9 + $0x10] sm:$0xff] %v1429_v54  ;;  %v1432_v41 = vadd.f32 %v1416_v42, %v1400_v18  ;;  %v1399_v39 = vmul.f32 %v2042_v30, %v3052_v57 }
 0x19f   : > { %v2046_v63 = vpop.eup %2045  ;;  %1453 = vst [vmem:[%s3087_s9 + $0x50] sm:$0xff] %v1437_v13  ;;  %v1440_v38 = vadd.f32 %v1424_v43, %v1408_v32  ;;  %v1407_v47 = vmul.f32 %v2044_v56, %v3054_v36 }
 0x1a0   : > { %v2048_v1 = vpop.eup %2047  ;;  %1448 = vst [vmem:[%s3087_s9 + $0x28] sm:$0xff] %v1432_v41  ;;  %v1431_v2 = vadd.f32 %v1415_v19, %v1399_v39  ;;  %v1402_v52 = vmul.f32 %v2046_v63, %v3059_v23 }
 0x1a1   : > { %v2050_v57 = vpop.eup %2049  ;;  %1456 = vst [vmem:[%s3087_s9 + $0x68] sm:$0xff] %v1440_v38  ;;  %v1439_v15 = vadd.f32 %v1423_v49, %v1407_v47  ;;  %v1410_v53 = vmul.f32 %v2048_v1, %v3061_v31 }
 0x1a2   : > { %1447 = vst [vmem:[%s3087_s9 + $0x20] sm:$0xff] %v1431_v2  ;;  %v1434_v36 = vadd.f32 %v1418_v50, %v1402_v52  ;;  %v1401_v48 = vmul.f32 %v2050_v57, %v3064_v25 }
 0x1a3   : > { %1455 = vst [vmem:[%s3087_s9 + $0x60] sm:$0xff] %v1439_v15  ;;  %v1442_v40 = vadd.f32 %v1426_v4, %v1410_v53 }
 0x1a4   : > { %1450 = vst [vmem:[%s3087_s9 + $0x38] sm:$0xff] %v1434_v36  ;;  %v1433_v59 = vadd.f32 %v1417_v16, %v1401_v48 }
 0x1a5   : > { %1458 = vst [vmem:[%s3087_s9 + $0x78] sm:$0xff] %v1442_v40 }
 0x1a6   : > { %v2052_v23 = vpop.eup %2051  ;;  %1449 = vst [vmem:[%s3087_s9 + $0x30] sm:$0xff] %v1433_v59 }
 0x1a7   : > { %v1409_v37 = vmul.f32 %v2052_v23, %v3066_v0 }
 0x1a9   : > { %v1441_v44 = vadd.f32 %v1425_v3, %v1409_v37 }
 0x1ab   : > { %1457 = vst [vmem:[%s3087_s9 + $0x70] sm:$0xff] %v1441_v44 }
 0x1ac PF: > { %s14_s15 = sadd.s32 1, %s2059_s15  }
 0x1ad   : > { %p11_p5 = scmp.ge.s32.totalorder %s14_s15, 6  }
 0x1af   :  { %13 = sbr.rel (!%p11_p5) target bundleno = 1 (0x1), region = 69 }

// kernel: c3k_forward_pallas.5
= control target key start
LH: loop header
LB: loop body
LE: loop exit
PB: predicated region body
PF: predicated region fallthrough
CT: control target
= control target key end

     0   :  { %s1986_s12 = smov 0   ;;  %s3013_s0 = inlined_call_operand.vmem [shape: f32[4,10,18,128], index: 0, kind: input, shape index: {}]   ;;  %s3014_s1 = inlined_call_operand.vmem [shape: f32[1152,128], index: 1, kind: input, shape index: {}]   ;;  %s3015_s2 = inlined_call_operand.vmem [shape: f32[1,128], index: 2, kind: input, shape index: {}]   ;;  %s3016_s3 = inlined_call_operand.vmem [shape: f32[512,128], index: 3, kind: output, shape index: {}]  }
   0x1 LB: > { %s1992_s13 = sadd.s32 4294967295, %s1964_s12   ;;  %p1438_p0 = scmp.ge.s32.totalorder %s1964_s12, 1  ;;  %s1964_s12 = sphi %s1986_s12, %s13_s12  }
   0x2   : > { %p137_p1 = scmp.lt.s32.totalorder %s1964_s12, 5 }
   0x4   : > { %p138_p2 = pnand %p1438_p0, %p137_p1 }
   0x6   : > { %141 = sbr.rel (%p138_p2) target bundleno = 426 (0x1aa), region = 32 }
   0xb   : > { %v405_v0 = vld [vmem:[%s3014_s1 + $0xf8] sm:$0xff]  ;;  %v404_v4 = vld [vmem:[%s3014_s1 + $0xf0] sm:$0xff]  ;;  %v403_v8 = vld [vmem:[%s3014_s1 + $0xe8] sm:$0xff]  ;;  %p161_p3 = scmp.lt.s32.totalorder %s1992_s13, 3  ;;  %vm226_vm0 = vcmask 1046528   ;;  %vm283_vm1 = vcmask 1045504  }
   0xc   : > { %v437_v1 = vld [vmem:[%s3014_s1 + $0x1f8] sm:$0xff]  ;;  %1445 = vmatprep.subr.mxu0 %v405_v0  ;;  %v436_v5 = vld [vmem:[%s3014_s1 + $0x1f0] sm:$0xff]  ;;  %v435_v9 = vld [vmem:[%s3014_s1 + $0x1e8] sm:$0xff]  ;;  %s1440_s14 = sshll.u32 %s1992_s13, 4 }
   0xd   : > { %v389_v2 = vld [vmem:[%s3014_s1 + $0x78] sm:$0xff]  ;;  %1525 = vmatprep.subr.mxu1 %v437_v1  ;;  %v388_v6 = vld [vmem:[%s3014_s1 + $0x70] sm:$0xff]  ;;  %v387_v10 = vld [vmem:[%s3014_s1 + $0x68] sm:$0xff]  ;;  %s2084_s20 = scalar_select %p161_p3, %s1992_s13, 3 }
   0xe   : > { %v421_v3 = vld [vmem:[%s3014_s1 + $0x178] sm:$0xff]  ;;  %1446 = vmatpush3.msra.mxu0 %v389_v2  ;;  %v420_v7 = vld [vmem:[%s3014_s1 + $0x170] sm:$0xff]  ;;  %v419_v11 = vld [vmem:[%s3014_s1 + $0x168] sm:$0xff]  ;;  %p167_p4 = scmp.lt.s32.totalorder %s1440_s14, 63 }
   0xf   : > { %1526 = vmatpush3.msra.mxu1 %v421_v3  ;;  %1447 = vmatprep.subr.mxu0 %v404_v4  ;;  %v402_v12 = vld [vmem:[%s3014_s1 + $0xe0] sm:$0xff]  ;;  %v401_v16 = vld [vmem:[%s3014_s1 + $0xd8] sm:$0xff]  ;;  %v400_v20 = vld [vmem:[%s3014_s1 + $0xd0] sm:$0xff]  ;;  %s1885_s10 = smul.u32 240, %s2084_s20 }
  0x10   : > { %1527 = vmatprep.subr.mxu1 %v436_v5  ;;  %1448 = vmatpush3.msra.mxu0 %v388_v6  ;;  %v434_v13 = vld [vmem:[%s3014_s1 + $0x1e0] sm:$0xff]  ;;  %v433_v17 = vld [vmem:[%s3014_s1 + $0x1d8] sm:$0xff]  ;;  %v432_v21 = vld [vmem:[%s3014_s1 + $0x1d0] sm:$0xff]  ;;  %s3050_s14 = smov (!%p167_p4, %s1440_s14), 63 }
  0x11   : > { %1528 = vmatpush3.msra.mxu1 %v420_v7  ;;  %1449 = vmatprep.subr.mxu0 %v403_v8  ;;  %v386_v14 = vld [vmem:[%s3014_s1 + $0x60] sm:$0xff]  ;;  %v385_v18 = vld [vmem:[%s3014_s1 + $0x58] sm:$0xff]  ;;  %v384_v22 = vld [vmem:[%s3014_s1 + $0x50] sm:$0xff]  ;;  %s2138_s4 = scalar_lea.vmem %s3013_s0, %s1885_s10  ;;  %s1441_s13 = sshll.u32 %s3050_s14, 3 }
  0x12   : > { %1529 = vmatprep.subr.mxu1 %v435_v9  ;;  %v418_v15 = vld [vmem:[%s3014_s1 + $0x160] sm:$0xff]  ;;  %1450 = vmatpush3.msra.mxu0 %v387_v10  ;;  %v417_v19 = vld [vmem:[%s3014_s1 + $0x158] sm:$0xff]  ;;  %v416_v23 = vld [vmem:[%s3014_s1 + $0x150] sm:$0xff]  ;;  %s2976_s17 = scalar_lea.vmem %s3016_s3, %s1441_s13 }
  0x13   : > { %1530 = vmatpush3.msra.mxu1 %v419_v11  ;;  %1451 = vmatprep.subr.mxu0 %v402_v12  ;;  %v399_v24 = vld [vmem:[%s3014_s1 + $0xc8] sm:$0xff]  ;;  %v398_v28 = vld [vmem:[%s3014_s1 + $0xc0] sm:$0xff]  ;;  %v397_v32 = vld [vmem:[%s3014_s1 + $0xb8] sm:$0xff] }
  0x14   : > { %1531 = vmatprep.subr.mxu1 %v434_v13  ;;  %1452 = vmatpush3.msra.mxu0 %v386_v14  ;;  %v431_v25 = vld [vmem:[%s3014_s1 + $0x1c8] sm:$0xff]  ;;  %v430_v29 = vld [vmem:[%s3014_s1 + $0x1c0] sm:$0xff]  ;;  %v429_v33 = vld [vmem:[%s3014_s1 + $0x1b8] sm:$0xff] }
  0x15   : > { %1532 = vmatpush3.msra.mxu1 %v418_v15  ;;  %1453 = vmatprep.subr.mxu0 %v401_v16  ;;  %v383_v26 = vld [vmem:[%s3014_s1 + $0x48] sm:$0xff]  ;;  %v382_v30 = vld [vmem:[%s3014_s1 + $0x40] sm:$0xff]  ;;  %v381_v34 = vld [vmem:[%s3014_s1 + $0x38] sm:$0xff] }
  0x16   : > { %1533 = vmatprep.subr.mxu1 %v433_v17  ;;  %1454 = vmatpush3.msra.mxu0 %v385_v18  ;;  %v415_v27 = vld [vmem:[%s3014_s1 + $0x148] sm:$0xff]  ;;  %v414_v31 = vld [vmem:[%s3014_s1 + $0x140] sm:$0xff]  ;;  %v413_v35 = vld [vmem:[%s3014_s1 + $0x138] sm:$0xff] }
  0x17   : > { %1534 = vmatpush3.msra.mxu1 %v417_v19  ;;  %1455 = vmatprep.subr.mxu0 %v400_v20  ;;  %v396_v36 = vld [vmem:[%s3014_s1 + $0xb0] sm:$0xff]  ;;  %v395_v40 = vld [vmem:[%s3014_s1 + $0xa8] sm:$0xff]  ;;  %v394_v44 = vld [vmem:[%s3014_s1 + $0xa0] sm:$0xff] }
  0x18   : > { %1535 = vmatprep.subr.mxu1 %v432_v21  ;;  %1456 = vmatpush3.msra.mxu0 %v384_v22  ;;  %v428_v37 = vld [vmem:[%s3014_s1 + $0x1b0] sm:$0xff]  ;;  %v427_v41 = vld [vmem:[%s3014_s1 + $0x1a8] sm:$0xff]  ;;  %v426_v45 = vld [vmem:[%s3014_s1 + $0x1a0] sm:$0xff] }
  0x19   : > { %1536 = vmatpush3.msra.mxu1 %v416_v23  ;;  %1457 = vmatprep.subr.mxu0 %v399_v24  ;;  %v380_v38 = vld [vmem:[%s3014_s1 + $0x30] sm:$0xff]  ;;  %v379_v42 = vld [vmem:[%s3014_s1 + $0x28] sm:$0xff]  ;;  %v378_v46 = vld [vmem:[%s3014_s1 + $0x20] sm:$0xff] }
  0x1a   : > { %1537 = vmatprep.subr.mxu1 %v431_v25  ;;  %1458 = vmatpush3.msra.mxu0 %v383_v26  ;;  %v412_v39 = vld [vmem:[%s3014_s1 + $0x130] sm:$0xff]  ;;  %v411_v43 = vld [vmem:[%s3014_s1 + $0x128] sm:$0xff]  ;;  %v410_v47 = vld [vmem:[%s3014_s1 + $0x120] sm:$0xff] }
  0x1b   : > { %1538 = vmatpush3.msra.mxu1 %v415_v27  ;;  %1459 = vmatprep.subr.mxu0 %v398_v28  ;;  %v393_v48 = vld [vmem:[%s3014_s1 + $0x98] sm:$0xff]  ;;  %v172_v50 = vld [vmem:[%s2138_s4] sm:$0xff]  ;;  %v2160_v51 = vld [vmem:[%s2138_s4 + $0x8] sm:$0xff] }
  0x1c   : > { %1539 = vmatprep.subr.mxu1 %v430_v29  ;;  %1460 = vmatpush3.msra.mxu0 %v382_v30  ;;  %v425_v49 = vld [vmem:[%s3014_s1 + $0x198] sm:$0xff]  ;;  %v392_v54 = vld [vmem:[%s3014_s1 + $0x90] sm:$0xff]  ;;  %v227_v58 = vrot.slane %v172_v50, 1  ;;  %v228_v59 = vrot.slane %v2160_v51, 1  ;;  %v391_v60 = vld [vmem:[%s3014_s1 + $0x88] sm:$0xff]  ;;  %v284_v0 = vrot.slane %v172_v50, 2 }
  0x1d   : > { %1540 = vmatpush3.msra.mxu1 %v414_v31  ;;  %1461 = vmatprep.subr.mxu0 %v397_v32  ;;  %v377_v52 = vld [vmem:[%s3014_s1 + $0x18] sm:$0xff]  ;;  %v424_v55 = vld [vmem:[%s3014_s1 + $0x190] sm:$0xff]  ;;  %v423_v61 = vld [vmem:[%s3014_s1 + $0x188] sm:$0xff]  ;;  %v285_v1 = vrot.slane %v2160_v51, 2 }
  0x1e   : > { %1541 = vmatprep.subr.mxu1 %v429_v33  ;;  %1462 = vmatpush3.msra.mxu0 %v381_v34  ;;  %v409_v53 = vld [vmem:[%s3014_s1 + $0x118] sm:$0xff]  ;;  %v376_v56 = vld [vmem:[%s3014_s1 + $0x10] sm:$0xff]  ;;  %v375_v62 = vld [vmem:[%s3014_s1 + $0x8] sm:$0xff]  ;;  %v229_v6 = vsel %vm226_vm0, %v227_v58, %v228_v59 }
  0x1f   : > { %1542 = vmatpush3.msra.mxu1 %v413_v35  ;;  %1463 = vmatprep.subr.mxu0 %v396_v36  ;;  %v408_v57 = vld [vmem:[%s3014_s1 + $0x110] sm:$0xff]  ;;  %v407_v63 = vld [vmem:[%s3014_s1 + $0x108] sm:$0xff]  ;;  %v390_v3 = vld [vmem:[%s3014_s1 + $0x80] sm:$0xff]  ;;  %v286_v10 = vsel %vm283_vm1, %v284_v0, %v285_v1 }
  0x20   : > { %1543 = vmatprep.subr.mxu1 %v428_v37  ;;  %1464 = vmatpush3.msra.mxu0 %v380_v38  ;;  %v174_v2 = vld [vmem:[%s2138_s4 + $0x10] sm:$0x3]  ;;  %v422_v4 = vld [vmem:[%s3014_s1 + $0x180] sm:$0xff]  ;;  %v175_v8 = vld [vmem:[%s2138_s4 + $0x18] sm:$0xff] }
  0x21   : > { %1544 = vmatpush3.msra.mxu1 %v412_v39  ;;  %1465 = vmatprep.subr.mxu0 %v395_v40  ;;  %v374_v5 = vld [vmem:[%s3014_s1] sm:$0xff]  ;;  %v230_v9 = vrot.slane %v174_v2, 1  ;;  %v287_v12 = vrot.slane %v174_v2, 2  ;;  %v469_v13 = vld [vmem:[%s3014_s1 + $0x2f8] sm:$0xff]  ;;  %v232_v18 = vrot.slane %v175_v8, 1  ;;  %v289_v21 = vrot.slane %v175_v8, 2 }
  0x22   : > { %1545 = vmatprep.subr.mxu1 %v427_v41  ;;  %1466 = vmatpush3.msra.mxu0 %v379_v42  ;;  %v406_v7 = vld [vmem:[%s3014_s1 + $0x100] sm:$0xff]  ;;  %v501_v14 = vld [vmem:[%s3014_s1 + $0x3f8] sm:$0xff]  ;;  %v177_v23 = vld [vmem:[%s2138_s4 + $0x28] sm:$0x3] }
  0x23   : > { %1546 = vmatpush3.msra.mxu1 %v411_v43  ;;  %1467 = vmatprep.subr.mxu0 %v394_v44  ;;  %v2211_v11 = vld [vmem:[%s2138_s4 + $0x20] sm:$0xff]  ;;  %v453_v15 = vld [vmem:[%s3014_s1 + $0x278] sm:$0xff]  ;;  %v231_v17 = vsel %vm226_vm0, %v228_v59, %v230_v9  ;;  %v288_v20 = vsel %vm283_vm1, %v285_v1, %v287_v12  ;;  %v468_v24 = vld [vmem:[%s3014_s1 + $0x2f0] sm:$0xff]  ;;  %v235_v30 = vrot.slane %v177_v23, 1  ;;  %v292_v33 = vrot.slane %v177_v23, 2 }
  0x24   : > { %1547 = vmatprep.subr.mxu1 %v426_v45  ;;  %1468 = vmatpush3.msra.mxu0 %v378_v46  ;;  %v485_v16 = vld [vmem:[%s3014_s1 + $0x378] sm:$0xff]  ;;  %v233_v19 = vrot.slane %v2211_v11, 1  ;;  %v290_v22 = vrot.slane %v2211_v11, 2  ;;  %v500_v25 = vld [vmem:[%s3014_s1 + $0x3f0] sm:$0xff]  ;;  %v467_v34 = vld [vmem:[%s3014_s1 + $0x2e8] sm:$0xff] }
  0x25   : > { %1548 = vmatpush3.msra.mxu1 %v410_v47  ;;  %1469 = vmatprep.subr.mxu0 %v393_v48  ;;  %v452_v26 = vld [vmem:[%s3014_s1 + $0x270] sm:$0xff]  ;;  %v2254_v32 = vld [vmem:[%s2138_s4 + $0x38] sm:$0xff]  ;;  %v499_v35 = vld [vmem:[%s3014_s1 + $0x3e8] sm:$0xff] }
  0x26   : > { %1549 = vmatprep.subr.mxu1 %v425_v49  ;;  %1470 = vmatpush3.msra.mxu0 %v377_v52  ;;  %v484_v27 = vld [vmem:[%s3014_s1 + $0x370] sm:$0xff]  ;;  %v2245_v28 = vsel %vm226_vm0, %v232_v18, %v233_v19  ;;  %v2251_v31 = vsel %vm283_vm1, %v289_v21, %v290_v22  ;;  %v451_v36 = vld [vmem:[%s3014_s1 + $0x268] sm:$0xff]  ;;  %v2272_v38 = vsel %vm226_vm0, %v233_v19, %v235_v30  ;;  %v238_v40 = vrot.slane %v2254_v32, 1  ;;  %v180_v44 = vld [vmem:[%s2138_s4 + $0x40] sm:$0x3] }
  0x27   : > { %1550 = vmatpush3.msra.mxu1 %v409_v53  ;;  %1471 = vmatprep.subr.mxu0 %v392_v54  ;;  %v2248_v29 = vld [vmem:[%s2138_s4 + $0x30] sm:$0xff]  ;;  %v483_v37 = vld [vmem:[%s3014_s1 + $0x368] sm:$0xff]  ;;  %v2277_v41 = vsel %vm283_vm1, %v290_v22, %v292_v33  ;;  %v295_v43 = vrot.slane %v2254_v32, 2  ;;  %v466_v45 = vld [vmem:[%s3014_s1 + $0x2e0] sm:$0xff]  ;;  %v297_v54 = vrot.slane %v180_v44, 2 }
  0x28   : > { %1551 = vmatprep.subr.mxu1 %v424_v55  ;;  %1472 = vmatpush3.msra.mxu0 %v376_v56  ;;  %v237_v39 = vrot.slane %v2248_v29, 1  ;;  %v294_v42 = vrot.slane %v2248_v29, 2  ;;  %v498_v46 = vld [vmem:[%s3014_s1 + $0x3e0] sm:$0xff]  ;;  %v2308_v53 = vld [vmem:[%s2138_s4 + $0x50] sm:$0xff]  ;;  %v465_v55 = vld [vmem:[%s3014_s1 + $0x2d8] sm:$0xff] }
  0x29   : > { %1552 = vmatpush3.msra.mxu1 %v408_v57  ;;  %1473 = vmatprep.subr.mxu0 %v391_v60  ;;  %v450_v47 = vld [vmem:[%s3014_s1 + $0x260] sm:$0xff]  ;;  %v497_v56 = vld [vmem:[%s3014_s1 + $0x3d8] sm:$0xff]  ;;  %v2338_v2 = vld [vmem:[%s2138_s4 + $0xc8] sm:$0xff] }
  0x2a   : > { %1553 = vmatprep.subr.mxu1 %v423_v61  ;;  %1474 = vmatpush3.msra.mxu0 %v375_v62  ;;  %v482_v48 = vld [vmem:[%s3014_s1 + $0x360] sm:$0xff]  ;;  %v2299_v49 = vsel %vm226_vm0, %v237_v39, %v238_v40  ;;  %v2305_v52 = vsel %vm283_vm1, %v294_v42, %v295_v43  ;;  %v449_v58 = vld [vmem:[%s3014_s1 + $0x258] sm:$0xff]  ;;  %v496_v9 = vld [vmem:[%s3014_s1 + $0x3d0] sm:$0xff] }
  0x2b   : > { %1554 = vmatpush3.msra.mxu1 %v407_v63  ;;  %1475 = vmatprep.subr.mxu0 %v390_v3  ;;  %v2317_v57 = vld [vmem:[%s2138_s4 + $0xc0] sm:$0xff]  ;;  %v481_v59 = vld [vmem:[%s3014_s1 + $0x358] sm:$0xff]  ;;  %v243_v63 = vrot.slane %v2308_v53, 1  ;;  %v495_v21 = vld [vmem:[%s3014_s1 + $0x3c8] sm:$0xff] }
  0x2c   : > { %1555 = vmatprep.subr.mxu1 %v422_v4  ;;  %1476 = vmatpush3.msra.mxu0 %v374_v5  ;;  %v343_v61 = vrot.slane %v2317_v57, 1  ;;  %v183_v1 = vld [vmem:[%s2138_s4 + $0x58] sm:$0x3]  ;;  %v350_v3 = vrot.slane %v2317_v57, 2  ;;  %v2342_v4 = vsel %vm283_vm1, %v295_v43, %v297_v54  ;;  %v300_v5 = vrot.slane %v2308_v53, 2  ;;  %v447_v30 = vld [vmem:[%s3014_s1 + $0x248] sm:$0xff] }
  0x2d   : > { %589 = vmatprep.mubr.f32.mxu0 %v229_v6  ;;  %1556 = vmatpush3.msra.mxu1 %v406_v7  ;;  %v344_v6 = vrot.slane %v2338_v2, 1  ;;  %v351_v7 = vrot.slane %v2338_v2, 2  ;;  %v245_v12 = vrot.slane %v183_v1, 1  ;;  %v302_v18 = vrot.slane %v183_v1, 2  ;;  %v479_v33 = vld [vmem:[%s3014_s1 + $0x348] sm:$0xff] }
  0x2e   : > { %734 = vmatprep.mubr.f32.mxu1 %v175_v8  ;;  %590 = vmatmul.mubr.f32.vlgmr.msra.gmra.mxu0 %v172_v50  ;;  %v2302_v50 = vld [vmem:[%s2138_s4 + $0x48] sm:$0xff] }
  0x2f   : > { %735 = vmatmul.mubr.f32.vlgmr.msra.gmra.mxu1 %v286_v10  ;;  %1605 = vmatprep.subr.mxu0 %v469_v13  ;;  %v242_v60 = vrot.slane %v2302_v50, 1  ;;  %v299_v0 = vrot.slane %v2302_v50, 2  ;;  %v448_v10 = vld [vmem:[%s3014_s1 + $0x250] sm:$0xff]  ;;  %v2362_v13 = vld [vmem:[%s2138_s4 + $0x68] sm:$0xff] }
  0x30   : > { %1685 = vmatprep.subr.mxu1 %v501_v14  ;;  %1606 = vmatpush3.msra.mxu0 %v453_v15  ;;  %v2365_v14 = vsel %vm226_vm0, %v343_v61, %v344_v6  ;;  %v2368_v15 = vsel %vm283_vm1, %v350_v3, %v351_v7  ;;  %v248_v23 = vrot.slane %v2362_v13, 1  ;;  %v201_v43 = vld [vmem:[%s2138_s4 + $0xe8] sm:$0x3]  ;;  %v478_v61 = vld [vmem:[%s3014_s1 + $0x340] sm:$0xff]  ;;  %v2458_v3 = vld [vmem:[%s2138_s4 + $0x78] sm:$0xff] }
  0x31   : > { %1686 = vmatpush3.msra.mxu1 %v485_v16  ;;  %594 = vmatprep.mubr.f32.mxu0 %v231_v17  ;;  %v2373_v16 = vsel %vm226_vm0, %v242_v60, %v243_v63  ;;  %v2376_v17 = vld [vmem:[%s2138_s4 + $0x60] sm:$0xff]  ;;  %v2379_v19 = vsel %vm283_vm1, %v299_v0, %v300_v5  ;;  %v370_v54 = vrot.slane %v201_v43, 2 }
  0x32   : > { %739 = vmatprep.mubr.f32.mxu1 %v2211_v11  ;;  %595 = vmatmul.mubr.f32.gmra.mxu0 %v2160_v51  ;;  %v240_v51 = vrot.slane %v180_v44, 1  ;;  %v247_v22 = vrot.slane %v2376_v17, 1  ;;  %v446_v60 = vld [vmem:[%s3014_s1 + $0x240] sm:$0xff] }
  0x33   : > { %740 = vmatmul.mubr.f32.gmra.mxu1 %v288_v20  ;;  %1607 = vmatprep.subr.mxu0 %v468_v24  ;;  %v463_v20 = vld [vmem:[%s3014_s1 + $0x2c8] sm:$0xff]  ;;  %v304_v24 = vrot.slane %v2376_v17, 2 }
  0x34   : > { %1687 = vmatprep.subr.mxu1 %v500_v25  ;;  %1608 = vmatpush3.msra.mxu0 %v452_v26  ;;  %v2332_v62 = vsel %vm226_vm0, %v238_v40, %v240_v51  ;;  %v305_v25 = vrot.slane %v2362_v13, 2  ;;  %v198_v26 = vld [vmem:[%s2138_s4 + $0xd0] sm:$0x3]  ;;  %v2413_v40 = vsel %vm283_vm1, %v300_v5, %v302_v18  ;;  %v363_v51 = vrot.slane %v201_v43, 1 }
  0x35   : > { %1688 = vmatpush3.msra.mxu1 %v484_v27  ;;  %599 = vmatprep.mubr.f32.mxu0 %v2245_v28  ;;  %v2393_v27 = vld [vmem:[%s2138_s4 + $0xd8] sm:$0xff]  ;;  %v353_v39 = vrot.slane %v198_v26, 2  ;;  %v2455_v1 = vsel %vm226_vm0, %v247_v22, %v248_v23 }
  0x36   : > { %744 = vmatprep.mubr.f32.mxu1 %v2248_v29  ;;  %600 = vmatmul.mubr.f32.gmra.mxu0 %v175_v8  ;;  %v464_v8 = vld [vmem:[%s3014_s1 + $0x2d0] sm:$0xff]  ;;  %v367_v44 = vrot.slane %v2393_v27, 2 }
  0x37   : > { %745 = vmatmul.mubr.f32.gmra.mxu1 %v2251_v31  ;;  %1609 = vmatprep.subr.mxu0 %v467_v34  ;;  %v2404_v34 = vsel %vm226_vm0, %v243_v63, %v245_v12  ;;  %v477_v12 = vld [vmem:[%s3014_s1 + $0x338] sm:$0xff] }
  0x38   : > { %1689 = vmatprep.subr.mxu1 %v499_v35  ;;  %1610 = vmatpush3.msra.mxu0 %v451_v36  ;;  %v346_v35 = vrot.slane %v198_v26, 1  ;;  %v2407_v36 = vld [vmem:[%s2138_s4 + $0xe0] sm:$0xff] }
  0x39   : > { %1690 = vmatpush3.msra.mxu1 %v483_v37  ;;  %604 = vmatprep.mubr.f32.mxu0 %v2272_v38  ;;  %v360_v37 = vrot.slane %v2393_v27, 1  ;;  %v361_v42 = vrot.slane %v2407_v36, 1 }
  0x3a   : > { %749 = vmatprep.mubr.f32.mxu1 %v2254_v32  ;;  %605 = vmatmul.mubr.f32.gmra.mxu0 %v2211_v11  ;;  %v480_v11 = vld [vmem:[%s3014_s1 + $0x350] sm:$0xff] }
  0x3b   : > { %750 = vmatmul.mubr.f32.gmra.mxu1 %v2277_v41  ;;  %1611 = vmatprep.subr.mxu0 %v466_v45  ;;  %v368_v45 = vrot.slane %v2407_v36, 2  ;;  %v2447_v63 = vsel %vm226_vm0, %v361_v42, %v363_v51  ;;  %v491_v51 = vld [vmem:[%s3014_s1 + $0x3a8] sm:$0xff] }
  0x3c   : > { %1691 = vmatprep.subr.mxu1 %v498_v46  ;;  %1612 = vmatpush3.msra.mxu0 %v450_v47  ;;  %v186_v46 = vld [vmem:[%s2138_s4 + $0x70] sm:$0x3]  ;;  %v2421_v47 = vsel %vm226_vm0, %v344_v6, %v346_v35  ;;  %v2463_v6 = vsel %vm283_vm1, %v304_v24, %v305_v25  ;;  %v309_v24 = vrot.slane %v2458_v3, 2 }
  0x3d   : > { %1692 = vmatpush3.msra.mxu1 %v482_v48  ;;  %609 = vmatprep.mubr.f32.mxu0 %v2299_v49  ;;  %v2424_v48 = vsel %vm283_vm1, %v351_v7, %v353_v39  ;;  %v2450_v0 = vsel %vm283_vm1, %v368_v45, %v370_v54  ;;  %v250_v5 = vrot.slane %v186_v46, 1  ;;  %v2466_v7 = vld [vmem:[%s2138_s4 + $0x80] sm:$0xff]  ;;  %v476_v35 = vld [vmem:[%s3014_s1 + $0x330] sm:$0xff]  ;;  %v443_v54 = vld [vmem:[%s3014_s1 + $0x228] sm:$0xff] }
  0x3e   : > { %754 = vmatprep.mubr.f32.mxu1 %v2302_v50  ;;  %610 = vmatmul.mubr.f32.gmra.mxu0 %v2248_v29  ;;  %v310_v26 = vrot.slane %v2466_v7, 2  ;;  %v2517_v39 = vld [vmem:[%s2138_s4 + $0x90] sm:$0xff] }
  0x3f   : > { %755 = vmatmul.mubr.f32.gmra.mxu1 %v2305_v52  ;;  %1613 = vmatprep.subr.mxu0 %v465_v55  ;;  %v462_v55 = vld [vmem:[%s3014_s1 + $0x2c0] sm:$0xff]  ;;  %v2485_v18 = vsel %vm226_vm0, %v248_v23, %v250_v5  ;;  %v460_v23 = vld [vmem:[%s3014_s1 + $0x2b0] sm:$0xff] }
  0x40   : > { %1693 = vmatprep.subr.mxu1 %v497_v56  ;;  %1614 = vmatpush3.msra.mxu0 %v449_v58  ;;  %v494_v56 = vld [vmem:[%s3014_s1 + $0x3c0] sm:$0xff]  ;;  %v2433_v58 = vsel %vm226_vm0, %v360_v37, %v361_v42  ;;  %v2520_v43 = vsel %vm283_vm1, %v309_v24, %v310_v26 }
  0x41   : > { %1694 = vmatpush3.msra.mxu1 %v481_v59  ;;  %614 = vmatprep.mubr.f32.mxu0 %v2332_v62  ;;  %v2436_v59 = vsel %vm283_vm1, %v367_v44, %v368_v45  ;;  %v2523_v44 = vld [vmem:[%s2138_s4 + $0x98] sm:$0xff] }
  0x42   : > { %759 = vmatprep.mubr.f32.mxu1 %v2308_v53  ;;  %615 = vmatmul.mubr.f32.gmra.mxu0 %v2254_v32 }
  0x43   : > { %760 = vmatmul.mubr.f32.gmra.mxu1 %v2342_v4  ;;  %1615 = vmatprep.subr.mxu0 %v464_v8  ;;  %v307_v8 = vrot.slane %v186_v46, 2  ;;  %v459_v46 = vld [vmem:[%s3014_s1 + $0x2a8] sm:$0xff] }
  0x44   : > { %1695 = vmatprep.subr.mxu1 %v496_v9  ;;  %1616 = vmatpush3.msra.mxu0 %v448_v10  ;;  %v461_v9 = vld [vmem:[%s3014_s1 + $0x2b8] sm:$0xff] }
  0x45   : > { %1696 = vmatpush3.msra.mxu1 %v480_v11  ;;  %619 = vmatprep.mubr.f32.mxu0 %v2373_v16  ;;  %v493_v10 = vld [vmem:[%s3014_s1 + $0x3b8] sm:$0xff]  ;;  %v2492_v22 = vsel %vm283_vm1, %v305_v25, %v307_v8  ;;  %v444_v25 = vld [vmem:[%s3014_s1 + $0x230] sm:$0xff]  ;;  %v314_v8 = vrot.slane %v2517_v39, 2 }
  0x46   : > { %764 = vmatprep.mubr.f32.mxu1 %v2376_v17  ;;  %620 = vmatmul.mubr.f32.gmra.mxu0 %v2302_v50  ;;  %v445_v11 = vld [vmem:[%s3014_s1 + $0x238] sm:$0xff] }
  0x47   : > { %765 = vmatmul.mubr.f32.gmra.mxu1 %v2379_v19  ;;  %1617 = vmatprep.subr.mxu0 %v463_v20  ;;  %v252_v20 = vrot.slane %v2458_v3, 1 }
  0x48   : > { %1697 = vmatprep.subr.mxu1 %v495_v21  ;;  %1618 = vmatpush3.msra.mxu0 %v447_v30  ;;  %v253_v21 = vrot.slane %v2466_v7, 1  ;;  %v189_v30 = vld [vmem:[%s2138_s4 + $0x88] sm:$0x3] }
  0x49   : > { %1698 = vmatpush3.msra.mxu1 %v479_v33  ;;  %624 = vmatprep.mubr.f32.mxu0 %v2404_v34  ;;  %v492_v33 = vld [vmem:[%s3014_s1 + $0x3b0] sm:$0xff]  ;;  %v255_v42 = vrot.slane %v189_v30, 1  ;;  %v312_v45 = vrot.slane %v189_v30, 2 }
  0x4a   : > { %769 = vmatprep.mubr.f32.mxu1 %v2362_v13  ;;  %625 = vmatmul.mubr.f32.gmra.mxu0 %v2308_v53  ;;  %v2514_v37 = vsel %vm226_vm0, %v252_v20, %v253_v21  ;;  %v442_v20 = vld [vmem:[%s3014_s1 + $0x220] sm:$0xff] }
  0x4b   : > { %770 = vmatmul.mubr.f32.gmra.mxu1 %v2413_v40  ;;  %1619 = vmatprep.subr.mxu0 %v462_v55  ;;  %v475_v55 = vld [vmem:[%s3014_s1 + $0x328] sm:$0xff]  ;;  %v2547_v5 = vsel %vm283_vm1, %v310_v26, %v312_v45  ;;  %v441_v45 = vld [vmem:[%s3014_s1 + $0x218] sm:$0xff] }
  0x4c   : > { %1699 = vmatprep.subr.mxu1 %v494_v56  ;;  %1620 = vmatpush3.msra.mxu0 %v446_v60  ;;  %v2542_v56 = vsel %vm226_vm0, %v253_v21, %v255_v42  ;;  %v257_v60 = vrot.slane %v2517_v39, 1  ;;  %v474_v21 = vld [vmem:[%s3014_s1 + $0x320] sm:$0xff]  ;;  %v2572_v26 = vld [vmem:[%s2138_s4 + $0xa8] sm:$0xff]  ;;  %v489_v42 = vld [vmem:[%s3014_s1 + $0x398] sm:$0xff] }
  0x4d   : > { %1700 = vmatpush3.msra.mxu1 %v478_v61  ;;  %629 = vmatprep.mubr.f32.mxu0 %v2455_v1  ;;  %v258_v61 = vrot.slane %v2523_v44, 1 }
  0x4e   : > { %774 = vmatprep.mubr.f32.mxu1 %v2458_v3  ;;  %630 = vmatmul.mubr.f32.gmra.mxu0 %v2376_v17 }
  0x4f   : > { %775 = vmatmul.mubr.f32.gmra.mxu1 %v2463_v6  ;;  %1621 = vmatprep.subr.mxu0 %v461_v9  ;;  %v315_v9 = vrot.slane %v2523_v44, 2  ;;  %v2569_v24 = vsel %vm226_vm0, %v257_v60, %v258_v61 }
  0x50   : > { %1701 = vmatprep.subr.mxu1 %v493_v10  ;;  %1622 = vmatpush3.msra.mxu0 %v445_v11  ;;  %v192_v10 = vld [vmem:[%s2138_s4 + $0xa0] sm:$0x3] }
  0x51   : > { %1702 = vmatpush3.msra.mxu1 %v477_v12  ;;  %634 = vmatprep.mubr.f32.mxu0 %v2485_v18  ;;  %v458_v11 = vld [vmem:[%s3014_s1 + $0x2a0] sm:$0xff]  ;;  %v260_v30 = vrot.slane %v192_v10, 1 }
  0x52   : > { %779 = vmatprep.mubr.f32.mxu1 %v2466_v7  ;;  %635 = vmatmul.mubr.f32.gmra.mxu0 %v2362_v13  ;;  %v490_v12 = vld [vmem:[%s3014_s1 + $0x3a0] sm:$0xff] }
  0x53   : > { %780 = vmatmul.mubr.f32.gmra.mxu1 %v2492_v22  ;;  %1623 = vmatprep.subr.mxu0 %v460_v23  ;;  %v2575_v23 = vsel %vm283_vm1, %v314_v8, %v315_v9  ;;  %v319_v8 = vrot.slane %v2572_v26, 2 }
  0x54   : > { %1703 = vmatprep.subr.mxu1 %v492_v33  ;;  %1624 = vmatpush3.msra.mxu0 %v444_v25  ;;  %v2578_v33 = vld [vmem:[%s2138_s4 + $0xb0] sm:$0xff]  ;;  %v317_v25 = vrot.slane %v192_v10, 2 }
  0x55   : > { %1704 = vmatpush3.msra.mxu1 %v476_v35  ;;  %639 = vmatprep.mubr.f32.mxu0 %v2514_v37  ;;  %v457_v35 = vld [vmem:[%s3014_s1 + $0x298] sm:$0xff]  ;;  %v320_v10 = vrot.slane %v2578_v33, 2 }
  0x56   : > { %784 = vmatprep.mubr.f32.mxu1 %v2517_v39  ;;  %640 = vmatmul.mubr.f32.gmra.mxu0 %v2458_v3  ;;  %v2602_v60 = vsel %vm283_vm1, %v315_v9, %v317_v25  ;;  %v440_v9 = vld [vmem:[%s3014_s1 + $0x210] sm:$0xff] }
  0x57   : > { %785 = vmatmul.mubr.f32.gmra.mxu1 %v2520_v43  ;;  %1625 = vmatprep.subr.mxu0 %v459_v46  ;;  %v473_v46 = vld [vmem:[%s3014_s1 + $0x318] sm:$0xff]  ;;  %v2627_v25 = vsel %vm283_vm1, %v319_v8, %v320_v10 }
  0x58   : > { %1705 = vmatprep.subr.mxu1 %v491_v51  ;;  %1626 = vmatpush3.msra.mxu0 %v443_v54  ;;  %v2597_v51 = vsel %vm226_vm0, %v258_v61, %v260_v30  ;;  %v262_v54 = vrot.slane %v2572_v26, 1  ;;  %v456_v61 = vld [vmem:[%s3014_s1 + $0x290] sm:$0xff] }
  0x59   : > { %1706 = vmatpush3.msra.mxu1 %v475_v55  ;;  %644 = vmatprep.mubr.f32.mxu0 %v2542_v56  ;;  %v263_v55 = vrot.slane %v2578_v33, 1 }
  0x5a   : > { %789 = vmatprep.mubr.f32.mxu1 %v2523_v44  ;;  %645 = vmatmul.mubr.f32.gmra.mxu0 %v2466_v7 }
  0x5b   : > { %790 = vmatmul.mubr.f32.gmra.mxu1 %v2547_v5  ;;  %1627 = vmatprep.subr.mxu0 %v458_v11  ;;  %v195_v11 = vld [vmem:[%s2138_s4 + $0xb8] sm:$0x3] }
  0x5c   : > { %1707 = vmatprep.subr.mxu1 %v490_v12  ;;  %1628 = vmatpush3.msra.mxu0 %v442_v20  ;;  %v488_v12 = vld [vmem:[%s3014_s1 + $0x390] sm:$0xff]  ;;  %v265_v30 = vrot.slane %v195_v11, 1 }
  0x5d   : > { %1708 = vmatpush3.msra.mxu1 %v474_v21  ;;  %649 = vmatprep.mubr.f32.mxu0 %v2569_v24  ;;  %v472_v20 = vld [vmem:[%s3014_s1 + $0x310] sm:$0xff]  ;;  %v2624_v21 = vsel %vm226_vm0, %v262_v54, %v263_v55  ;;  %v471_v54 = vld [vmem:[%s3014_s1 + $0x308] sm:$0xff] }
  0x5e   : > { %794 = vmatprep.mubr.f32.mxu1 %v2572_v26  ;;  %650 = vmatmul.mubr.f32.gmra.mxu0 %v2517_v39  ;;  %v2646_v8 = vsel %vm226_vm0, %v263_v55, %v265_v30  ;;  %v438_v55 = vld [vmem:[%s3014_s1 + $0x200] sm:$0xff] }
  0x5f   : > { %795 = vmatmul.mubr.f32.gmra.mxu1 %v2575_v23  ;;  %1629 = vmatprep.subr.mxu0 %v457_v35  ;;  %v322_v35 = vrot.slane %v195_v11, 2 }
  0x60   : > { %1709 = vmatprep.subr.mxu1 %v489_v42  ;;  %1630 = vmatpush3.msra.mxu0 %v441_v45  ;;  %v455_v42 = vld [vmem:[%s3014_s1 + $0x288] sm:$0xff] }
  0x61   : > { %1710 = vmatpush3.msra.mxu1 %v473_v46  ;;  %654 = vmatprep.mubr.f32.mxu0 %v2597_v51  ;;  %v487_v45 = vld [vmem:[%s3014_s1 + $0x388] sm:$0xff]  ;;  %v2649_v11 = vsel %vm283_vm1, %v320_v10, %v322_v35  ;;  %v470_v10 = vld [vmem:[%s3014_s1 + $0x300] sm:$0xff] }
  0x62   : > { %799 = vmatprep.mubr.f32.mxu1 %v2578_v33  ;;  %655 = vmatmul.mubr.f32.gmra.mxu0 %v2523_v44  ;;  %v439_v46 = vld [vmem:[%s3014_s1 + $0x208] sm:$0xff] }
  0x63   : > { %800 = vmatmul.mubr.f32.gmra.mxu1 %v2602_v60  ;;  %1631 = vmatprep.subr.mxu0 %v456_v61  ;;  %v454_v61 = vld [vmem:[%s3014_s1 + $0x280] sm:$0xff] }
  0x64   : > { %1711 = vmatprep.subr.mxu1 %v488_v12  ;;  %1632 = vmatpush3.msra.mxu0 %v440_v9  ;;  %v486_v12 = vld [vmem:[%s3014_s1 + $0x380] sm:$0xff]  ;;  %v517_v9 = vld [vmem:[%s3014_s1 + $0x478] sm:$0xff] }
  0x65   : > { %1712 = vmatpush3.msra.mxu1 %v472_v20  ;;  %659 = vmatprep.mubr.f32.mxu0 %v2624_v21  ;;  %v516_v20 = vld [vmem:[%s3014_s1 + $0x470] sm:$0xff] }
  0x66   : > { %804 = vmatprep.mubr.f32.mxu1 %v2317_v57  ;;  %660 = vmatmul.mubr.f32.gmra.mxu0 %v2572_v26 }
  0x67   : > { %805 = vmatmul.mubr.f32.gmra.mxu1 %v2627_v25  ;;  %1633 = vmatprep.subr.mxu0 %v455_v42 }
  0x68   : > { %1713 = vmatprep.subr.mxu1 %v487_v45  ;;  %1634 = vmatpush3.msra.mxu0 %v439_v46 }
  0x69   : > { %1714 = vmatpush3.msra.mxu1 %v471_v54  ;;  %664 = vmatprep.mubr.f32.mxu0 %v2646_v8 }
  0x6a   : > { %809 = vmatprep.mubr.f32.mxu1 %v2338_v2  ;;  %665 = vmatmul.mubr.f32.gmra.mxu0 %v2578_v33 }
  0x6b   : > { %810 = vmatmul.mubr.f32.gmra.mxu1 %v2649_v11  ;;  %1635 = vmatprep.subr.mxu0 %v454_v61 }
  0x6c   : > { %1715 = vmatprep.subr.mxu1 %v486_v12  ;;  %1636 = vmatpush3.msra.mxu0 %v438_v55 }
  0x6d   : > { %1716 = vmatpush3.msra.mxu1 %v470_v10  ;;  %879 = vmatprep.mubr.f32.mxu0 %v2251_v31  ;;  %v513_v31 = vld [vmem:[%s3014_s1 + $0x458] sm:$0xff] }
  0x6e   : > { %1024 = vmatprep.mubr.f32.mxu1 %v2299_v49  ;;  %880 = vmatmul.mubr.f32.vlgmr.msra.gmra.mxu0 %v2245_v28  ;;  %v515_v28 = vld [vmem:[%s3014_s1 + $0x468] sm:$0xff] }
  0x6f   : > { %1025 = vmatmul.mubr.f32.vlgmr.msra.gmra.mxu1 %v2248_v29  ;;  %1797 = vmatprep.subr.mxu0 %v517_v9  ;;  %v514_v29 = vld [vmem:[%s3014_s1 + $0x460] sm:$0xff] }
  0x70   : > { %1853 = vmatprep.subr.mxu1 %v517_v9  ;;  %1798 = vmatpush3.msra.mxu0 %v517_v9 }
  0x71   : > { %1869 = vmatpush3.msra.mxu1 %v517_v9  ;;  %884 = vmatprep.mubr.f32.mxu0 %v2277_v41  ;;  %v510_v41 = vld [vmem:[%s3014_s1 + $0x440] sm:$0xff] }
  0x72   : > { %1029 = vmatprep.mubr.f32.mxu1 %v2332_v62  ;;  %885 = vmatmul.mubr.f32.gmra.mxu0 %v2272_v38  ;;  %v511_v38 = vld [vmem:[%s3014_s1 + $0x448] sm:$0xff] }
  0x73   : > { %1030 = vmatmul.mubr.f32.gmra.mxu1 %v2254_v32  ;;  %1799 = vmatprep.subr.mxu0 %v516_v20  ;;  %v512_v32 = vld [vmem:[%s3014_s1 + $0x450] sm:$0xff] }
  0x74   : > { %1854 = vmatprep.subr.mxu1 %v516_v20  ;;  %1800 = vmatpush3.msra.mxu0 %v516_v20 }
  0x75   : > { %1870 = vmatpush3.msra.mxu1 %v516_v20  ;;  %889 = vmatprep.mubr.f32.mxu0 %v2305_v52 }
  0x76   : > { %1034 = vmatprep.mubr.f32.mxu1 %v2373_v16  ;;  %890 = vmatmul.mubr.f32.gmra.mxu0 %v2299_v49  ;;  %v509_v49 = vld [vmem:[%s3014_s1 + $0x438] sm:$0xff] }
  0x77   : > { %1035 = vmatmul.mubr.f32.gmra.mxu1 %v2302_v50  ;;  %1801 = vmatprep.subr.mxu0 %v515_v28  ;;  %v508_v50 = vld [vmem:[%s3014_s1 + $0x430] sm:$0xff] }
  0x78   : > { %1855 = vmatprep.subr.mxu1 %v515_v28  ;;  %1802 = vmatpush3.msra.mxu0 %v515_v28 }
  0x79   : > { %1871 = vmatpush3.msra.mxu1 %v515_v28  ;;  %894 = vmatprep.mubr.f32.mxu0 %v2342_v4 }
  0x7a   : > { %1039 = vmatprep.mubr.f32.mxu1 %v2404_v34  ;;  %895 = vmatmul.mubr.f32.gmra.mxu0 %v2332_v62  ;;  %v506_v62 = vld [vmem:[%s3014_s1 + $0x420] sm:$0xff] }
  0x7b   : > { %1040 = vmatmul.mubr.f32.gmra.mxu1 %v2308_v53  ;;  %1803 = vmatprep.subr.mxu0 %v514_v29  ;;  %v507_v53 = vld [vmem:[%s3014_s1 + $0x428] sm:$0xff] }
  0x7c   : > { %1856 = vmatprep.subr.mxu1 %v514_v29  ;;  %1804 = vmatpush3.msra.mxu0 %v514_v29 }
  0x7d   : > { %1872 = vmatpush3.msra.mxu1 %v514_v29  ;;  %899 = vmatprep.mubr.f32.mxu0 %v2379_v19 }
  0x7e   : > { %1044 = vmatprep.mubr.f32.mxu1 %v2455_v1  ;;  %900 = vmatmul.mubr.f32.gmra.mxu0 %v2373_v16  ;;  %v504_v16 = vld [vmem:[%s3014_s1 + $0x410] sm:$0xff] }
  0x7f   : > { %1045 = vmatmul.mubr.f32.gmra.mxu1 %v2376_v17  ;;  %1805 = vmatprep.subr.mxu0 %v513_v31 }
  0x80   : > { %1857 = vmatprep.subr.mxu1 %v513_v31  ;;  %1806 = vmatpush3.msra.mxu0 %v513_v31 }
  0x81   : > { %1873 = vmatpush3.msra.mxu1 %v513_v31  ;;  %904 = vmatprep.mubr.f32.mxu0 %v2413_v40 }
  0x82   : > { %1049 = vmatprep.mubr.f32.mxu1 %v2485_v18  ;;  %905 = vmatmul.mubr.f32.gmra.mxu0 %v2404_v34 }
  0x83   : > { %1050 = vmatmul.mubr.f32.gmra.mxu1 %v2362_v13  ;;  %1807 = vmatprep.subr.mxu0 %v512_v32  ;;  %v505_v13 = vld [vmem:[%s3014_s1 + $0x418] sm:$0xff] }
  0x84   : > { %1858 = vmatprep.subr.mxu1 %v512_v32  ;;  %1808 = vmatpush3.msra.mxu0 %v512_v32 }
  0x85   : > { %1874 = vmatpush3.msra.mxu1 %v512_v32  ;;  %909 = vmatprep.mubr.f32.mxu0 %v2463_v6 }
  0x86   : > { %1054 = vmatprep.mubr.f32.mxu1 %v2514_v37  ;;  %910 = vmatmul.mubr.f32.gmra.mxu0 %v2455_v1 }
  0x87   : > { %1055 = vmatmul.mubr.f32.gmra.mxu1 %v2458_v3  ;;  %1809 = vmatprep.subr.mxu0 %v511_v38 }
  0x88   : > { %1859 = vmatprep.subr.mxu1 %v511_v38  ;;  %1810 = vmatpush3.msra.mxu0 %v511_v38 }
  0x89   : > { %1875 = vmatpush3.msra.mxu1 %v511_v38  ;;  %914 = vmatprep.mubr.f32.mxu0 %v2492_v22 }
  0x8a   : > { %1059 = vmatprep.mubr.f32.mxu1 %v2542_v56  ;;  %915 = vmatmul.mubr.f32.gmra.mxu0 %v2485_v18 }
  0x8b   : > { %1060 = vmatmul.mubr.f32.gmra.mxu1 %v2466_v7  ;;  %1811 = vmatprep.subr.mxu0 %v510_v41 }
  0x8c   : > { %1860 = vmatprep.subr.mxu1 %v510_v41  ;;  %1812 = vmatpush3.msra.mxu0 %v510_v41 }
  0x8d   : > { %1876 = vmatpush3.msra.mxu1 %v510_v41  ;;  %919 = vmatprep.mubr.f32.mxu0 %v2520_v43 }
  0x8e   : > { %1064 = vmatprep.mubr.f32.mxu1 %v2569_v24  ;;  %920 = vmatmul.mubr.f32.gmra.mxu0 %v2514_v37 }
  0x8f   : > { %1065 = vmatmul.mubr.f32.gmra.mxu1 %v2517_v39  ;;  %1813 = vmatprep.subr.mxu0 %v509_v49 }
  0x90   : > { %1861 = vmatprep.subr.mxu1 %v509_v49  ;;  %1814 = vmatpush3.msra.mxu0 %v509_v49 }
  0x91   : > { %1877 = vmatpush3.msra.mxu1 %v509_v49  ;;  %924 = vmatprep.mubr.f32.mxu0 %v2547_v5 }
  0x92   : > { %1069 = vmatprep.mubr.f32.mxu1 %v2597_v51  ;;  %925 = vmatmul.mubr.f32.gmra.mxu0 %v2542_v56 }
  0x93   : > { %1070 = vmatmul.mubr.f32.gmra.mxu1 %v2523_v44  ;;  %1815 = vmatprep.subr.mxu0 %v508_v50 }
  0x94   : > { %1862 = vmatprep.subr.mxu1 %v508_v50  ;;  %1816 = vmatpush3.msra.mxu0 %v508_v50 }
  0x95   : > { %1878 = vmatpush3.msra.mxu1 %v508_v50  ;;  %929 = vmatprep.mubr.f32.mxu0 %v2575_v23 }
  0x96   : > { %1074 = vmatprep.mubr.f32.mxu1 %v2624_v21  ;;  %930 = vmatmul.mubr.f32.gmra.mxu0 %v2569_v24 }
  0x97   : > { %1075 = vmatmul.mubr.f32.gmra.mxu1 %v2572_v26  ;;  %1817 = vmatprep.subr.mxu0 %v507_v53 }
  0x98   : > { %1863 = vmatprep.subr.mxu1 %v507_v53  ;;  %1818 = vmatpush3.msra.mxu0 %v507_v53 }
  0x99   : > { %1879 = vmatpush3.msra.mxu1 %v507_v53  ;;  %934 = vmatprep.mubr.f32.mxu0 %v2602_v60 }
  0x9a   : > { %1079 = vmatprep.mubr.f32.mxu1 %v2646_v8  ;;  %935 = vmatmul.mubr.f32.gmra.mxu0 %v2597_v51 }
  0x9b   : > { %1080 = vmatmul.mubr.f32.gmra.mxu1 %v2578_v33  ;;  %1819 = vmatprep.subr.mxu0 %v506_v62 }
  0x9c   : > { %1864 = vmatprep.subr.mxu1 %v506_v62  ;;  %1820 = vmatpush3.msra.mxu0 %v506_v62 }
  0x9d   : > { %1880 = vmatpush3.msra.mxu1 %v506_v62  ;;  %939 = vmatprep.mubr.f32.mxu0 %v2627_v25 }
  0x9e   : > { %1084 = vmatprep.mubr.f32.mxu1 %v2365_v14  ;;  %940 = vmatmul.mubr.f32.gmra.mxu0 %v2624_v21 }
  0x9f   : > { %1085 = vmatmul.mubr.f32.gmra.mxu1 %v2317_v57  ;;  %1821 = vmatprep.subr.mxu0 %v505_v13  ;;  %v503_v57 = vld [vmem:[%s3014_s1 + $0x408] sm:$0xff] }
  0xa0   : > { %1865 = vmatprep.subr.mxu1 %v505_v13  ;;  %1822 = vmatpush3.msra.mxu0 %v505_v13 }
  0xa1   : > { %1881 = vmatpush3.msra.mxu1 %v505_v13  ;;  %944 = vmatprep.mubr.f32.mxu0 %v2649_v11 }
  0xa2   : > { %1089 = vmatprep.mubr.f32.mxu1 %v2421_v47  ;;  %945 = vmatmul.mubr.f32.gmra.mxu0 %v2646_v8 }
  0xa3   : > { %1090 = vmatmul.mubr.f32.gmra.mxu1 %v2338_v2  ;;  %1823 = vmatprep.subr.mxu0 %v504_v16  ;;  %v502_v2 = vld [vmem:[%s3014_s1 + $0x400] sm:$0xff] }
  0xa4   : > { %1866 = vmatprep.subr.mxu1 %v504_v16  ;;  %1824 = vmatpush3.msra.mxu0 %v504_v16 }
  0xa5   : > { %1882 = vmatpush3.msra.mxu1 %v504_v16  ;;  %949 = vmatprep.mubr.f32.mxu0 %v2368_v15 }
  0xa6   : > { %1094 = vmatprep.mubr.f32.mxu1 %v2433_v58  ;;  %950 = vmatmul.mubr.f32.gmra.mxu0 %v2365_v14  ;;  %v2798_v14 = vld [vmem:[%s3015_s2] ss:$0 sm:$0xff] }
  0xa7   : > { %1095 = vmatmul.mubr.f32.gmra.mxu1 %v2393_v27  ;;  %1825 = vmatprep.subr.mxu0 %v503_v57 }
  0xa8   : > { %1867 = vmatprep.subr.mxu1 %v503_v57  ;;  %1826 = vmatpush3.msra.mxu0 %v503_v57 }
  0xa9   : > { %1883 = vmatpush3.msra.mxu1 %v503_v57  ;;  %954 = vmatprep.mubr.f32.mxu0 %v2424_v48 }
  0xaa   : > { %1099 = vmatprep.mubr.f32.mxu1 %v2447_v63  ;;  %955 = vmatmul.mubr.f32.gmra.mxu0 %v2421_v47 }
  0xab   : > { %1100 = vmatmul.mubr.f32.gmra.mxu1 %v2407_v36  ;;  %1827 = vmatprep.subr.mxu0 %v502_v2 }
  0xac   : > { %1868 = vmatprep.subr.mxu1 %v502_v2  ;;  %1828 = vmatpush3.msra.mxu0 %v502_v2 }
  0xad   : > { %1884 = vmatpush3.msra.mxu1 %v502_v2  ;;  %1829 = vmatprep.mubr.f32.mxu0 %v2305_v52 }
  0xae   : > { %1841 = vmatprep.mubr.f32.mxu1 %v2575_v23  ;;  %1830 = vmatmul.mubr.f32.vlgmr.msra.gmra.mxu0 %v2342_v4 }
  0xaf   : > { %1842 = vmatmul.mubr.f32.vlgmr.msra.gmra.mxu1 %v2602_v60  ;;  %1832 = vmatprep.mubr.f32.mxu0 %v2379_v19 }
  0xb0   : > { %1844 = vmatprep.mubr.f32.mxu1 %v2627_v25 }
  0xb2   : > { %1833 = vmatmul.mubr.f32.gmra.mxu0 %v2413_v40 }
  0xb3   : > { %1845 = vmatmul.mubr.f32.gmra.mxu1 %v2649_v11  ;;  %1835 = vmatprep.mubr.f32.mxu0 %v2463_v6 }
  0xb4   : > { %1847 = vmatprep.mubr.f32.mxu1 %v2368_v15 }
  0xb6   : > { %1836 = vmatmul.mubr.f32.gmra.mxu0 %v2492_v22 }
  0xb7   : > { %1848 = vmatmul.mubr.f32.gmra.mxu1 %v2424_v48  ;;  %1838 = vmatprep.mubr.f32.mxu0 %v2520_v43 }
  0xb8   : > { %1850 = vmatprep.mubr.f32.mxu1 %v2436_v59 }
  0xba   : > { %1839 = vmatmul.mubr.f32.gmra.mxu0 %v2547_v5 }
  0xbb   : > { %1851 = vmatmul.mubr.f32.gmra.mxu1 %v2450_v0 }
  0xee   : > { %v1477_v52 = vpop.f32.mrf.mxu0 }
  0xef   : > { %v1557_v4 = vpop.f32.mrf.mxu1 }
  0xf0   : > { %v1478_v15 = vpop.f32.mrf.mxu0 }
  0xf1   : > { %v1558_v17 = vpop.f32.mrf.mxu1  ;;  %v1479_v19 = vadd.f32 %v1478_v15, %v1477_v52 }
  0xf2   : > { %v1559_v27 = vadd.f32 %v1558_v17, %v1557_v4  ;;  %v1480_v34 = vpop.f32.mrf.mxu0 }
  0xf3   : > { %v1560_v36 = vpop.f32.mrf.mxu1  ;;  %v592_v40 = vadd.f32 %v1479_v19, %v2798_v14 }
  0xf4   : > { %v1481_v47 = vpop.f32.mrf.mxu0 }
  0xf5   : > { %v1561_v48 = vpop.f32.mrf.mxu1  ;;  %v2801_v58 = vadd.f32 %v1559_v27, %v592_v40  ;;  %v1482_v59 = vadd.f32 %v1481_v47, %v1480_v34 }
  0xf6   : > { %v1562_v63 = vadd.f32 %v1561_v48, %v1560_v36  ;;  %v1483_v0 = vpop.f32.mrf.mxu0 }
  0xf7   : > { %v1563_v1 = vpop.f32.mrf.mxu1  ;;  %v597_v3 = vadd.f32 %v1482_v59, %v2798_v14 }
  0xf8   : > { %v1484_v6 = vpop.f32.mrf.mxu0 }
  0xf9   : > { %v1564_v7 = vpop.f32.mrf.mxu1  ;;  %v2804_v18 = vadd.f32 %v1562_v63, %v597_v3  ;;  %v1485_v22 = vadd.f32 %v1484_v6, %v1483_v0 }
  0xfa   : > { %v1565_v37 = vadd.f32 %v1564_v7, %v1563_v1  ;;  %v1486_v39 = vpop.f32.mrf.mxu0 }
  0xfb   : > { %v1566_v43 = vpop.f32.mrf.mxu1  ;;  %v602_v44 = vadd.f32 %v1485_v22, %v2798_v14 }
  0xfc   : > { %v1487_v56 = vpop.f32.mrf.mxu0 }
  0xfd   : > { %v1567_v5 = vpop.f32.mrf.mxu1  ;;  %v2807_v24 = vadd.f32 %v1565_v37, %v602_v44  ;;  %v1488_v26 = vadd.f32 %v1487_v56, %v1486_v39 }
  0xfe   : > { %v1568_v23 = vadd.f32 %v1567_v5, %v1566_v43  ;;  %v1489_v33 = vpop.f32.mrf.mxu0 }
  0xff   : > { %v1569_v51 = vpop.f32.mrf.mxu1  ;;  %v607_v60 = vadd.f32 %v1488_v26, %v2798_v14 }
 0x100   : > { %v1490_v21 = vpop.f32.mrf.mxu0 }
 0x101   : > { %v1570_v30 = vpop.f32.mrf.mxu1  ;;  %v2810_v25 = vadd.f32 %v1568_v23, %v607_v60  ;;  %v1491_v35 = vadd.f32 %v1490_v21, %v1489_v33 }
 0x102   : > { %v1571_v42 = vadd.f32 %v1570_v30, %v1569_v51  ;;  %v1492_v45 = vpop.f32.mrf.mxu0 }
 0x103   : > { %v1572_v46 = vpop.f32.mrf.mxu1  ;;  %v612_v54 = vadd.f32 %v1491_v35, %v2798_v14 }
 0x104   : > { %v1493_v8 = vpop.f32.mrf.mxu0 }
 0x105   : > { %v1573_v11 = vpop.f32.mrf.mxu1  ;;  %v2813_v61 = vadd.f32 %v1571_v42, %v612_v54  ;;  %v1494_v12 = vadd.f32 %v1493_v8, %v1492_v45 }
 0x106   : > { %v1574_v55 = vadd.f32 %v1573_v11, %v1572_v46  ;;  %v1495_v10 = vpop.f32.mrf.mxu0 }
 0x107   : > { %v1575_v9 = vpop.f32.mrf.mxu1  ;;  %v617_v20 = vadd.f32 %v1494_v12, %v2798_v14 }
 0x108   : > { %v1496_v28 = vpop.f32.mrf.mxu0 }
 0x109   : > { %v1576_v29 = vpop.f32.mrf.mxu1  ;;  %v2816_v31 = vadd.f32 %v1574_v55, %v617_v20  ;;  %v1497_v32 = vadd.f32 %v1496_v28, %v1495_v10 }
 0x10a   : > { %v1577_v38 = vadd.f32 %v1576_v29, %v1575_v9  ;;  %v1498_v41 = vpop.f32.mrf.mxu0 }
 0x10b   : > { %v1578_v49 = vpop.f32.mrf.mxu1  ;;  %v622_v50 = vadd.f32 %v1497_v32, %v2798_v14 }
 0x10c   : > { %v1499_v53 = vpop.f32.mrf.mxu0 }
 0x10d   : > { %v1579_v62 = vpop.f32.mrf.mxu1  ;;  %v2819_v13 = vadd.f32 %v1577_v38, %v622_v50  ;;  %v1500_v16 = vadd.f32 %v1499_v53, %v1498_v41 }
 0x10e   : > { %v1580_v57 = vadd.f32 %v1579_v62, %v1578_v49  ;;  %v1501_v2 = vpop.f32.mrf.mxu0 }
 0x10f   : > { %v1581_v52 = vpop.f32.mrf.mxu1  ;;  %v627_v4 = vadd.f32 %v1500_v16, %v2798_v14 }
 0x110   : > { %v1502_v15 = vpop.f32.mrf.mxu0 }
 0x111   : > { %v1582_v17 = vpop.f32.mrf.mxu1  ;;  %v2822_v19 = vadd.f32 %v1580_v57, %v627_v4  ;;  %v1503_v27 = vadd.f32 %v1502_v15, %v1501_v2 }
 0x112   : > { %v1583_v34 = vadd.f32 %v1582_v17, %v1581_v52  ;;  %v1504_v36 = vpop.f32.mrf.mxu0 }
 0x113   : > { %v1584_v40 = vpop.f32.mrf.mxu1  ;;  %v632_v47 = vadd.f32 %v1503_v27, %v2798_v14 }
 0x114   : > { %v1505_v48 = vpop.f32.mrf.mxu0 }
 0x115   : > { %v1585_v59 = vpop.f32.mrf.mxu1  ;;  %v2825_v63 = vadd.f32 %v1583_v34, %v632_v47  ;;  %v1506_v0 = vadd.f32 %v1505_v48, %v1504_v36 }
 0x116   : > { %v1586_v1 = vadd.f32 %v1585_v59, %v1584_v40  ;;  %v1507_v3 = vpop.f32.mrf.mxu0 }
 0x117   : > { %v1587_v6 = vpop.f32.mrf.mxu1  ;;  %v637_v7 = vadd.f32 %v1506_v0, %v2798_v14 }
 0x118   : > { %v1508_v22 = vpop.f32.mrf.mxu0 }
 0x119   : > { %v1588_v37 = vpop.f32.mrf.mxu1  ;;  %v2828_v39 = vadd.f32 %v1586_v1, %v637_v7  ;;  %v1509_v43 = vadd.f32 %v1508_v22, %v1507_v3 }
 0x11a   : > { %v1589_v44 = vadd.f32 %v1588_v37, %v1587_v6  ;;  %v1510_v56 = vpop.f32.mrf.mxu0 }
 0x11b   : > { %v1590_v5 = vpop.f32.mrf.mxu1  ;;  %v642_v26 = vadd.f32 %v1509_v43, %v2798_v14 }
 0x11c   : > { %v1511_v23 = vpop.f32.mrf.mxu0 }
 0x11d   : > { %v1591_v33 = vpop.f32.mrf.mxu1  ;;  %v2831_v51 = vadd.f32 %v1589_v44, %v642_v26  ;;  %v1512_v60 = vadd.f32 %v1511_v23, %v1510_v56 }
 0x11e   : > { %v1592_v21 = vadd.f32 %v1591_v33, %v1590_v5  ;;  %v1513_v30 = vpop.f32.mrf.mxu0 }
 0x11f   : > { %3017 = vst [vmem:[#allocation2_spill] sm:$0xff] %v2831_v51  ;;  %v1593_v35 = vpop.f32.mrf.mxu1  ;;  %v647_v42 = vadd.f32 %v1512_v60, %v2798_v14 }
 0x120   : > { %v1514_v45 = vpop.f32.mrf.mxu0 }
 0x121   : > { %v1594_v46 = vpop.f32.mrf.mxu1  ;;  %v2834_v54 = vadd.f32 %v1592_v21, %v647_v42  ;;  %v1515_v8 = vadd.f32 %v1514_v45, %v1513_v30 }
 0x122   : > { %v1595_v11 = vadd.f32 %v1594_v46, %v1593_v35  ;;  %v1516_v12 = vpop.f32.mrf.mxu0 }
 0x123   : > { %3018 = vst [vmem:[#allocation3_spill] sm:$0xff] %v2834_v54  ;;  %v1596_v55 = vpop.f32.mrf.mxu1  ;;  %v652_v10 = vadd.f32 %v1515_v8, %v2798_v14 }
 0x124   : > { %v1517_v9 = vpop.f32.mrf.mxu0 }
 0x125   : > { %v1597_v20 = vpop.f32.mrf.mxu1  ;;  %v2837_v28 = vadd.f32 %v1595_v11, %v652_v10  ;;  %v1518_v29 = vadd.f32 %v1517_v9, %v1516_v12 }
 0x126   : > { %v1598_v32 = vadd.f32 %v1597_v20, %v1596_v55  ;;  %v1519_v38 = vpop.f32.mrf.mxu0 }
 0x127   : > { %3019 = vst [vmem:[#allocation4_spill] sm:$0xff] %v2837_v28  ;;  %v1599_v41 = vpop.f32.mrf.mxu1  ;;  %v657_v49 = vadd.f32 %v1518_v29, %v2798_v14 }
 0x128   : > { %v1520_v50 = vpop.f32.mrf.mxu0 }
 0x129   : > { %v1600_v53 = vpop.f32.mrf.mxu1  ;;  %v2840_v62 = vadd.f32 %v1598_v32, %v657_v49  ;;  %v1521_v16 = vadd.f32 %v1520_v50, %v1519_v38 }
 0x12a   : > { %v1601_v57 = vadd.f32 %v1600_v53, %v1599_v41  ;;  %v1522_v2 = vpop.f32.mrf.mxu0 }
 0x12b   : > { %3020 = vst [vmem:[#allocation5_spill] sm:$0xff] %v2840_v62  ;;  %v1602_v52 = vpop.f32.mrf.mxu1  ;;  %v662_v4 = vadd.f32 %v1521_v16, %v2798_v14 }
 0x12c   : > { %v1523_v15 = vpop.f32.mrf.mxu0 }
 0x12d   : > { %v1603_v17 = vpop.f32.mrf.mxu1  ;;  %v2843_v27 = vadd.f32 %v1601_v57, %v662_v4  ;;  %v1524_v34 = vadd.f32 %v1523_v15, %v1522_v2 }
 0x12e   : > { %v1604_v36 = vadd.f32 %v1603_v17, %v1602_v52  ;;  %v1637_v40 = vpop.f32.mrf.mxu0 }
 0x12f   : > { %3021 = vst [vmem:[#allocation6_spill] sm:$0xff] %v2843_v27  ;;  %v2845_v47 = vpop.f32.mrf.mxu1  ;;  %v667_v48 = vadd.f32 %v1524_v34, %v2798_v14 }
 0x130   : > { %v1638_v59 = vpop.f32.mrf.mxu0 }
 0x131   : > { %v1718_v0 = vpop.f32.mrf.mxu1  ;;  %v2848_v1 = vadd.f32 %v1604_v36, %v667_v48  ;;  %v1639_v62 = vadd.f32 %v1638_v59, %v1637_v40 }
 0x132   : > { %v1640_v3 = vpop.f32.mrf.mxu0 }
 0x133   : > { %3022 = vst [vmem:[#allocation7_spill] sm:$0xff] %v2848_v1  ;;  %v1720_v6 = vpop.f32.mrf.mxu1 }
 0x134   : > { %v1641_v7 = vpop.f32.mrf.mxu0 }
 0x135   : > { %v1721_v22 = vpop.f32.mrf.mxu1  ;;  %v1642_v28 = vadd.f32 %v1641_v7, %v1640_v3 }
 0x136   : > { %v1643_v37 = vpop.f32.mrf.mxu0 }
 0x137   : > { %v1723_v43 = vpop.f32.mrf.mxu1 }
 0x138   : > { %v1644_v44 = vpop.f32.mrf.mxu0 }
 0x139   : > { %v1724_v56 = vpop.f32.mrf.mxu1  ;;  %v1645_v54 = vadd.f32 %v1644_v44, %v1643_v37 }
 0x13a   : > { %v1646_v5 = vpop.f32.mrf.mxu0  ;;  %v1725_v37 = vadd.f32 %v1724_v56, %v1723_v43 }
 0x13b   : > { %v1726_v26 = vpop.f32.mrf.mxu1 }
 0x13c   : > { %v1647_v23 = vpop.f32.mrf.mxu0 }
 0x13d   : > { %v1727_v33 = vpop.f32.mrf.mxu1 }
 0x13e   : > { %v1649_v60 = vpop.f32.mrf.mxu0 }
 0x13f   : > { %v2850_v21 = vpop.f32.mrf.mxu1 }
 0x140   : > { %v1650_v14 = vpop.f32.mrf.mxu0 }
 0x141   : > { %v1730_v30 = vpop.f32.mrf.mxu1 }
 0x142   : > { %v1652_v35 = vpop.f32.mrf.mxu0 }
 0x143   : > { %v2852_v42 = vpop.f32.mrf.mxu1 }
 0x144   : > { %v1653_v45 = vpop.f32.mrf.mxu0 }
 0x145   : > { %v2854_v46 = vpop.f32.mrf.mxu1  ;;  %v1654_v59 = vadd.f32 %v1653_v45, %v1652_v35 }
 0x146   : > { %v1655_v8 = vpop.f32.mrf.mxu0 }
 0x147   : > { %v2856_v11 = vpop.f32.mrf.mxu1 }
 0x148   : > { %3023 = vst [vmem:[#allocation8_spill] sm:$0xff] %v2856_v11  ;;  %v1656_v12 = vpop.f32.mrf.mxu0  ;;  %v1722_v11 = vadd.f32 %v1721_v22, %v1720_v6 }
 0x149   : > { %v2858_v55 = vpop.f32.mrf.mxu1  ;;  %v1657_v44 = vadd.f32 %v1656_v12, %v1655_v8 }
 0x14a   : > { %3024 = vst [vmem:[#allocation9_spill] sm:$0xff] %v2858_v55  ;;  %v1658_v10 = vpop.f32.mrf.mxu0  ;;  %v892_v55 = vadd.f32 %v1645_v54, %v2807_v24 }
 0x14b   : > { %v2860_v9 = vpop.f32.mrf.mxu1 }
 0x14c   : > { %3025 = vst [vmem:[#allocation10_spill] sm:$0xff] %v2860_v9  ;;  %v1659_v20 = vpop.f32.mrf.mxu0 }
 0x14d   : > { %v2862_v29 = vpop.f32.mrf.mxu1 }
 0x14e   : > { %3026 = vst [vmem:[#allocation11_spill] sm:$0xff] %v2862_v29  ;;  %v1661_v32 = vpop.f32.mrf.mxu0  ;;  %v1651_v29 = vadd.f32 %v1650_v14, %v1649_v60  ;;  %v1728_v60 = vadd.f32 %v1727_v33, %v1726_v26  ;;  %v1734_v26 = vadd.f32 %v2854_v46, %v2852_v42 }
 0x14f   : > { %v2864_v38 = vpop.f32.mrf.mxu1  ;;  %v3033_v12 = vld [vmem:[#allocation8_spill] sm:$0xff] }
 0x150   : > { %3027 = vst [vmem:[#allocation12_spill] sm:$0xff] %v2864_v38  ;;  %v1662_v41 = vpop.f32.mrf.mxu0  ;;  %v902_v14 = vadd.f32 %v1651_v29, %v2813_v61  ;;  %v912_v61 = vadd.f32 %v1657_v44, %v2819_v13  ;;  %v3037_v13 = vld [vmem:[#allocation2_spill] sm:$0xff] }
 0x151   : > { %v2866_v49 = vpop.f32.mrf.mxu1 }
 0x152   : > { %3028 = vst [vmem:[#allocation13_spill] sm:$0xff] %v2866_v49  ;;  %v1664_v50 = vpop.f32.mrf.mxu0  ;;  %v1648_v49 = vadd.f32 %v1647_v23, %v1646_v5  ;;  %v1660_v5 = vadd.f32 %v1659_v20, %v1658_v10 }
 0x153   : > { %v1744_v53 = vpop.f32.mrf.mxu1  ;;  %v3035_v20 = vld [vmem:[#allocation10_spill] sm:$0xff] }
 0x154   : > { %v1665_v16 = vpop.f32.mrf.mxu0  ;;  %v897_v40 = vadd.f32 %v1648_v49, %v2810_v25  ;;  %v1731_v25 = vadd.f32 %v1730_v30, %v2850_v21  ;;  %v917_v33 = vadd.f32 %v1660_v5, %v2822_v19  ;;  %v3040_v49 = vld [vmem:[#allocation3_spill] sm:$0xff] }
 0x155   : > { %v1745_v57 = vpop.f32.mrf.mxu1  ;;  %v1666_v23 = vadd.f32 %v1665_v16, %v1664_v50  ;;  %v3036_v29 = vld [vmem:[#allocation11_spill] sm:$0xff] }
 0x156   : > { %v1667_v2 = vpop.f32.mrf.mxu0  ;;  %v1042_v56 = vadd.f32 %v1728_v60, %v897_v40  ;;  %v1740_v42 = vadd.f32 %v3036_v29, %v3035_v20  ;;  %v1746_v46 = vadd.f32 %v1745_v57, %v1744_v53 }
 0x157   : > { %v2868_v52 = vpop.f32.mrf.mxu1  ;;  %v927_v35 = vadd.f32 %v1666_v23, %v2828_v39  ;;  %v3038_v19 = vld [vmem:[#allocation12_spill] sm:$0xff] }
 0x158   : > { %3029 = vst [vmem:[#allocation14_spill] sm:$0xff] %v2868_v52  ;;  %v1668_v4 = vpop.f32.mrf.mxu0 }
 0x159   : > { %v2870_v15 = vpop.f32.mrf.mxu1 }
 0x15a   : > { %3030 = vst [vmem:[#allocation15_spill] sm:$0xff] %v2870_v15  ;;  %v1670_v17 = vpop.f32.mrf.mxu0  ;;  %v882_v15 = vadd.f32 %v1639_v62, %v2801_v58  ;;  %v1663_v58 = vadd.f32 %v1662_v41, %v1661_v32  ;;  %v3039_v41 = vld [vmem:[#allocation13_spill] sm:$0xff] }
 0x15b   : > { %v2872_v34 = vpop.f32.mrf.mxu1  ;;  %v1743_v39 = vadd.f32 %v3039_v41, %v3038_v19 }
 0x15c   : > { %3031 = vst [vmem:[#allocation16_spill] sm:$0xff] %v2872_v34  ;;  %v1671_v36 = vpop.f32.mrf.mxu0  ;;  %v887_v34 = vadd.f32 %v1642_v28, %v2804_v18  ;;  %v1669_v28 = vadd.f32 %v1668_v4, %v1667_v2  ;;  %v922_v45 = vadd.f32 %v1663_v58, %v2825_v63 }
 0x15d   : > { %v2874_v48 = vpop.f32.mrf.mxu1  ;;  %v1672_v6 = vadd.f32 %v1671_v36, %v1670_v17  ;;  %v2908_v17 = vadd.f32 %v1740_v42, %v917_v33 }
 0x15e   : > { %3032 = vst [vmem:[#allocation17_spill] sm:$0xff] %v2874_v48  ;;  %v1673_v1 = vpop.f32.mrf.mxu0  ;;  %v1719_v48 = vadd.f32 %v1718_v0, %v2845_v47  ;;  %v1032_v24 = vadd.f32 %v1722_v11, %v887_v34  ;;  %v2886_v47 = vadd.f32 %v1725_v37, %v892_v55  ;;  %v907_v0 = vadd.f32 %v1654_v59, %v2816_v31  ;;  %v3034_v55 = vld [vmem:[#allocation9_spill] sm:$0xff] }
 0x15f   : > { %v2876_v27 = vpop.f32.mrf.mxu1  ;;  %v2896_v31 = vadd.f32 %v1731_v25, %v902_v14  ;;  %v1737_v10 = vadd.f32 %v3034_v55, %v3033_v12  ;;  %v932_v32 = vadd.f32 %v1669_v28, %v3037_v13  ;;  %v937_v63 = vadd.f32 %v1672_v6, %v3040_v49  ;;  %v3041_v2 = vld [vmem:[#allocation14_spill] sm:$0xff]  ;;  %v3046_v59 = vld [vmem:[#allocation5_spill] sm:$0xff] }
 0x160   : > { %v1674_v38 = vpop.f32.mrf.mxu0  ;;  %v1027_v54 = vadd.f32 %v1719_v48, %v882_v15  ;;  %v1052_v16 = vadd.f32 %v1734_v26, %v907_v0  ;;  %v1072_v15 = vadd.f32 %v1746_v46, %v927_v35  ;;  %v3045_v48 = vld [vmem:[#allocation4_spill] sm:$0xff]  ;;  %v1067_v5 = vadd.f32 %v1743_v39, %v922_v45  ;;  %v3047_v28 = vld [vmem:[#allocation6_spill] sm:$0xff] }
 0x161   : > { %v1754_v51 = vpop.f32.mrf.mxu1  ;;  %v1675_v8 = vadd.f32 %v1674_v38, %v1673_v1  ;;  %v2910_v34 = vadd.f32 %v1737_v10, %v912_v61  ;;  %v3048_v10 = vld [vmem:[#allocation7_spill] sm:$0xff] }
 0x162   : > { %v1676_v52 = vpop.f32.mrf.mxu0  ;;  %v1755_v23 = vadd.f32 %v1754_v51, %v2876_v27 }
 0x163   : > { %v2878_v9 = vpop.f32.mrf.mxu1  ;;  %v3043_v53 = vld [vmem:[#allocation16_spill] sm:$0xff]  ;;  %v942_v40 = vadd.f32 %v1675_v8, %v3045_v48 }
 0x164   : > { %v1677_v3 = vpop.f32.mrf.mxu0 }
 0x165   : > { %v1757_v7 = vpop.f32.mrf.mxu1  ;;  %v1678_v11 = vadd.f32 %v1677_v3, %v1676_v52  ;;  %v3042_v52 = vld [vmem:[#allocation15_spill] sm:$0xff]  ;;  %v3044_v57 = vld [vmem:[#allocation17_spill] sm:$0xff] }
 0x166   : > { %v1679_v62 = vpop.f32.mrf.mxu0  ;;  %v1749_v4 = vadd.f32 %v3042_v52, %v3041_v2  ;;  %v1752_v36 = vadd.f32 %v3044_v57, %v3043_v53 }
 0x167   : > { %v1759_v18 = vpop.f32.mrf.mxu1  ;;  %v947_v3 = vadd.f32 %v1678_v11, %v3046_v59 }
 0x168   : > { %v1680_v22 = vpop.f32.mrf.mxu0  ;;  %v1077_v58 = vadd.f32 %v1749_v4, %v932_v32  ;;  %v1082_v26 = vadd.f32 %v1752_v36, %v937_v63 }
 0x169   : > { %v1760_v43 = vpop.f32.mrf.mxu1  ;;  %v1681_v1 = vadd.f32 %v1680_v22, %v1679_v62  ;;  %v1758_v62 = vadd.f32 %v1757_v7, %v2878_v9  ;;  %v1087_v9 = vadd.f32 %v1755_v23, %v942_v40 }
 0x16a   : > { %v1682_v21 = vpop.f32.mrf.mxu0  ;;  %v1761_v27 = vadd.f32 %v1760_v43, %v1759_v18 }
 0x16b   : > { %v1762_v30 = vpop.f32.mrf.mxu1  ;;  %v952_v25 = vadd.f32 %v1681_v1, %v3047_v28  ;;  %v1092_v11 = vadd.f32 %v1758_v62, %v947_v3 }
 0x16c   : > { %v1683_v38 = vpop.f32.mrf.mxu0 }
 0x16d   : > { %v1763_v50 = vpop.f32.mrf.mxu1  ;;  %v1684_v0 = vadd.f32 %v1683_v38, %v1682_v21  ;;  %v1097_v18 = vadd.f32 %v1761_v27, %v952_v25 }
 0x16e   : > { %v1831_v37 = vpop.f32.mrf.mxu0 }
 0x16f   : > { %v1843_v44 = vpop.f32.mrf.mxu1  ;;  %v2917_v60 = vadd.f32 %v1831_v37, %v1032_v24  ;;  %v1764_v24 = vadd.f32 %v1763_v50, %v1762_v30  ;;  %v957_v20 = vadd.f32 %v1684_v0, %v3048_v10 }
 0x170   : > { %v2919_v14 = vadd.f32 %v1843_v44, %v1072_v15  ;;  %v1171_v6 = vpop.f32.mrf.mxu0 }
 0x171   : > { %v1211_v22 = vpop.f32.mrf.mxu1  ;;  %v1251_v61 = vsub.f32 0.0, %v2917_v60  ;;  %v2925_v35 = vadd.f32 %v1171_v6, %v1027_v54  ;;  %v1102_v40 = vadd.f32 %v1764_v24, %v957_v20 }
 0x172   : > { %v1259_v33 = vsub.f32 0.0, %v2919_v14  ;;  %v2927_v51 = vadd.f32 %v1211_v22, %v1067_v5  ;;  %v1834_v45 = vpop.f32.mrf.mxu0 }
 0x173   : > { %v1846_v8 = vpop.f32.mrf.mxu1  ;;  %v1268_v7 = vmul.f32 1.442695, %v1251_v61  ;;  %v1250_v21 = vsub.f32 0.0, %v2925_v35  ;;  %v2932_v29 = vadd.f32 %v1834_v45, %v1042_v56 }
 0x174   : > { %v1284_v12 = vmul.f32 1.442695, %v1259_v33  ;;  %v1258_v55 = vsub.f32 0.0, %v2927_v51  ;;  %v2934_v54 = vadd.f32 %v1846_v8, %v1082_v26  ;;  %v1181_v42 = vpop.f32.mrf.mxu0 }
 0x175   : > { %v1221_v46 = vpop.f32.mrf.mxu1  ;;  %1894 = vpow2.f32 %v1268_v7  ;;  %v1266_v43 = vmul.f32 1.442695, %v1250_v21  ;;  %v2937_v13 = vadd.f32 %v1181_v42, %v2886_v47  ;;  %v1253_v32 = vsub.f32 0.0, %v2932_v29 }
 0x176   : > { %v1282_v30 = vmul.f32 1.442695, %v1258_v55  ;;  %1896 = vpow2.f32 %v1284_v12  ;;  %v1261_v19 = vsub.f32 0.0, %v2934_v54  ;;  %v2941_v41 = vadd.f32 %v1221_v46, %v1077_v58  ;;  %v1837_v56 = vpop.f32.mrf.mxu0 }
 0x177   : > { %v1849_v39 = vpop.f32.mrf.mxu1  ;;  %1898 = vpow2.f32 %v1266_v43  ;;  %v1252_v49 = vsub.f32 0.0, %v2937_v13  ;;  %v2944_v63 = vadd.f32 %v1837_v56, %v1052_v16  ;;  %v1272_v38 = vmul.f32 1.442695, %v1253_v32 }
 0x178   : > { %v2946_v1 = vadd.f32 %v1849_v39, %v1092_v11  ;;  %1900 = vpow2.f32 %v1282_v30  ;;  %v1288_v47 = vmul.f32 1.442695, %v1261_v19  ;;  %v1260_v50 = vsub.f32 0.0, %v2941_v41  ;;  %v1191_v2 = vpop.f32.mrf.mxu0 }
 0x179   : > { %v1231_v52 = vpop.f32.mrf.mxu1  ;;  %v1270_v4 = vmul.f32 1.442695, %v1252_v49  ;;  %v1255_v15 = vsub.f32 0.0, %v2944_v63  ;;  %v2952_v57 = vadd.f32 %v1191_v2, %v2896_v31  ;;  %1902 = vpow2.f32 %v1272_v38 }
 0x17a   : > { %v1263_v53 = vsub.f32 0.0, %v2946_v1  ;;  %v1286_v16 = vmul.f32 1.442695, %v1260_v50  ;;  %v2954_v36 = vadd.f32 %v1231_v52, %v1087_v9  ;;  %v1840_v48 = vpop.f32.mrf.mxu0  ;;  %1904 = vpow2.f32 %v1288_v47 }
 0x17b   : > { %v1852_v59 = vpop.f32.mrf.mxu1  ;;  %v1276_v3 = vmul.f32 1.442695, %v1255_v15  ;;  %v1254_v44 = vsub.f32 0.0, %v2952_v57  ;;  %1906 = vpow2.f32 %v1270_v4  ;;  %v2959_v23 = vadd.f32 %v1840_v48, %v2908_v17 }
 0x17c   : > { %v1292_v37 = vmul.f32 1.442695, %v1263_v53  ;;  %v1262_v5 = vsub.f32 0.0, %v2954_v36  ;;  %v2961_v31 = vadd.f32 %v1852_v59, %v1102_v40  ;;  %v1201_v58 = vpop.f32.mrf.mxu0  ;;  %1908 = vpow2.f32 %v1286_v16 }
 0x17d   : > { %v1241_v62 = vpop.f32.mrf.mxu1  ;;  %v1274_v28 = vmul.f32 1.442695, %v1254_v44  ;;  %v2964_v25 = vadd.f32 %v1201_v58, %v2910_v34  ;;  %1910 = vpow2.f32 %v1276_v3  ;;  %v1257_v22 = vsub.f32 0.0, %v2959_v23 }
 0x17e   : > { %v2966_v0 = vadd.f32 %v1241_v62, %v1097_v18  ;;  %v1290_v6 = vmul.f32 1.442695, %v1262_v5  ;;  %v1265_v26 = vsub.f32 0.0, %v2961_v31  ;;  %1912 = vpow2.f32 %v1292_v37 }
 0x17f   : > { %v1256_v17 = vsub.f32 0.0, %v2964_v25  ;;  %1914 = vpow2.f32 %v1274_v28  ;;  %v1280_v61 = vmul.f32 1.442695, %v1257_v22 }
 0x180   : > { %v1296_v33 = vmul.f32 1.442695, %v1265_v26  ;;  %1916 = vpow2.f32 %v1290_v6  ;;  %v1264_v34 = vsub.f32 0.0, %v2966_v0 }
 0x181   : > { %v1278_v27 = vmul.f32 1.442695, %v1256_v17  ;;  %1918 = vpow2.f32 %v1280_v61 }
 0x182   : > { %v1895_v24 = vpop.eup %1894  ;;  %1920 = vpow2.f32 %v1296_v33  ;;  %v1294_v21 = vmul.f32 1.442695, %v1264_v34 }
 0x183   : > { %v1897_v45 = vpop.eup %1896  ;;  %v1299_v8 = vadd.f32 1.0, %v1895_v24  ;;  %1922 = vpow2.f32 %v1278_v27 }
 0x184   : > { %v1899_v11 = vpop.eup %1898  ;;  %v1307_v9 = vadd.f32 1.0, %v1897_v45 }
 0x185   : > { %v1901_v7 = vpop.eup %1900  ;;  %1924 = vrcp.f32 %v1299_v8  ;;  %v1298_v12 = vadd.f32 1.0, %v1899_v11 }
 0x186   : > { %1926 = vrcp.f32 %v1307_v9  ;;  %v1306_v55 = vadd.f32 1.0, %v1901_v7  ;;  %v1903_v10 = vpop.eup %1902 }
 0x187   : > { %1928 = vrcp.f32 %v1298_v12  ;;  %v1905_v20 = vpop.eup %1904  ;;  %v1301_v42 = vadd.f32 1.0, %v1903_v10 }
 0x188   : > { %1930 = vrcp.f32 %v1306_v55  ;;  %v1907_v46 = vpop.eup %1906  ;;  %v1309_v18 = vadd.f32 1.0, %v1905_v20 }
 0x189   : > { %1932 = vpow2.f32 %v1294_v21  ;;  %v1909_v43 = vpop.eup %1908  ;;  %v1300_v30 = vadd.f32 1.0, %v1907_v46 }
 0x18a   : > { %1934 = vrcp.f32 %v1301_v42  ;;  %v1911_v32 = vpop.eup %1910  ;;  %v1308_v19 = vadd.f32 1.0, %v1909_v43 }
 0x18b   : > { %1936 = vrcp.f32 %v1309_v18  ;;  %v1913_v56 = vpop.eup %1912  ;;  %v1303_v39 = vadd.f32 1.0, %v1911_v32 }
 0x18c   : > { %1938 = vrcp.f32 %v1300_v30  ;;  %v1915_v49 = vpop.eup %1914  ;;  %v1311_v38 = vadd.f32 1.0, %v1913_v56 }
 0x18d   : > { %1940 = vrcp.f32 %v1308_v19  ;;  %v1917_v47 = vpop.eup %1916  ;;  %v1302_v50 = vadd.f32 1.0, %v1915_v49 }
 0x18e   : > { %1942 = vrcp.f32 %v1303_v39  ;;  %v1919_v2 = vpop.eup %1918  ;;  %v1310_v52 = vadd.f32 1.0, %v1917_v47 }
 0x18f   : > { %1944 = vrcp.f32 %v1311_v38  ;;  %v1921_v4 = vpop.eup %1920  ;;  %v1305_v15 = vadd.f32 1.0, %v1919_v2 }
 0x190   : > { %1946 = vrcp.f32 %v1302_v50  ;;  %v1923_v53 = vpop.eup %1922  ;;  %v1313_v16 = vadd.f32 1.0, %v1921_v4 }
 0x191   : > { %1948 = vrcp.f32 %v1310_v52  ;;  %v1304_v40 = vadd.f32 1.0, %v1923_v53 }
 0x192   : > { %v1925_v48 = vpop.eup %1924  ;;  %1950 = vrcp.f32 %v1305_v15 }
 0x193   : > { %v1927_v59 = vpop.eup %1926  ;;  %v1347_v3 = vmul.f32 %v1925_v48, %v2917_v60  ;;  %1952 = vrcp.f32 %v1313_v16 }
 0x194   : > { %v1929_v37 = vpop.eup %1928  ;;  %v1355_v44 = vmul.f32 %v1927_v59, %v2919_v14  ;;  %1954 = vrcp.f32 %v1304_v40 }
 0x195   : > { %v1931_v5 = vpop.eup %1930  ;;  %1363 = vst [vmem:[%s2976_s17 + $0x8] sm:$0xff] %v1347_v3  ;;  %v1346_v58 = vmul.f32 %v1929_v37, %v2925_v35 }
 0x196   : > { %v1933_v62 = vpop.eup %1932  ;;  %1371 = vst [vmem:[%s2976_s17 + $0x48] sm:$0xff] %v1355_v44  ;;  %v1354_v28 = vmul.f32 %v1931_v5, %v2927_v51 }
 0x197   : > { %v1935_v6 = vpop.eup %1934  ;;  %1362 = vst [vmem:[%s2976_s17] sm:$0xff] %v1346_v58  ;;  %v1312_v22 = vadd.f32 1.0, %v1933_v62 }
 0x198   : > { %v1937_v60 = vpop.eup %1936  ;;  %1370 = vst [vmem:[%s2976_s17 + $0x40] sm:$0xff] %v1354_v28  ;;  %v1349_v14 = vmul.f32 %v1935_v6, %v2932_v29 }
 0x199   : > { %v1939_v26 = vpop.eup %1938  ;;  %v1357_v17 = vmul.f32 %v1937_v60, %v2934_v54  ;;  %1956 = vrcp.f32 %v1312_v22 }
 0x19a   : > { %v1941_v35 = vpop.eup %1940  ;;  %1365 = vst [vmem:[%s2976_s17 + $0x18] sm:$0xff] %v1349_v14  ;;  %v1348_v61 = vmul.f32 %v1939_v26, %v2937_v13 }
 0x19b   : > { %v1943_v51 = vpop.eup %1942  ;;  %1373 = vst [vmem:[%s2976_s17 + $0x58] sm:$0xff] %v1357_v17  ;;  %v1356_v33 = vmul.f32 %v1941_v35, %v2941_v41 }
 0x19c   : > { %v1945_v27 = vpop.eup %1944  ;;  %1364 = vst [vmem:[%s2976_s17 + $0x10] sm:$0xff] %v1348_v61  ;;  %v1351_v29 = vmul.f32 %v1943_v51, %v2944_v63 }
 0x19d   : > { %v1947_v34 = vpop.eup %1946  ;;  %1372 = vst [vmem:[%s2976_s17 + $0x50] sm:$0xff] %v1356_v33  ;;  %v1359_v54 = vmul.f32 %v1945_v27, %v2946_v1 }
 0x19e   : > { %v1949_v24 = vpop.eup %1948  ;;  %1367 = vst [vmem:[%s2976_s17 + $0x28] sm:$0xff] %v1351_v29  ;;  %v1350_v13 = vmul.f32 %v1947_v34, %v2952_v57 }
 0x19f   : > { %v1951_v45 = vpop.eup %1950  ;;  %1375 = vst [vmem:[%s2976_s17 + $0x68] sm:$0xff] %v1359_v54  ;;  %v1358_v41 = vmul.f32 %v1949_v24, %v2954_v36 }
 0x1a0   : > { %v1953_v8 = vpop.eup %1952  ;;  %1366 = vst [vmem:[%s2976_s17 + $0x20] sm:$0xff] %v1350_v13  ;;  %v1353_v63 = vmul.f32 %v1951_v45, %v2959_v23 }
 0x1a1   : > { %v1955_v11 = vpop.eup %1954  ;;  %1374 = vst [vmem:[%s2976_s17 + $0x60] sm:$0xff] %v1358_v41  ;;  %v1361_v9 = vmul.f32 %v1953_v8, %v2961_v31 }
 0x1a2   : > { %1369 = vst [vmem:[%s2976_s17 + $0x38] sm:$0xff] %v1353_v63  ;;  %v1352_v1 = vmul.f32 %v1955_v11, %v2964_v25 }
 0x1a3   : > { %1377 = vst [vmem:[%s2976_s17 + $0x78] sm:$0xff] %v1361_v9 }
 0x1a4   : > { %1368 = vst [vmem:[%s2976_s17 + $0x30] sm:$0xff] %v1352_v1 }
 0x1a6   : > { %v1957_v7 = vpop.eup %1956 }
 0x1a7   : > { %v1360_v57 = vmul.f32 %v1957_v7, %v2966_v0 }
 0x1a9   : > { %1376 = vst [vmem:[%s2976_s17 + $0x70] sm:$0xff] %v1360_v57 }
 0x1aa PF: > { %s13_s12 = sadd.s32 1, %s1964_s12  }
 0x1ab   : > { %p10_p5 = scmp.ge.s32.totalorder %s13_s12, 6  }
 0x1ad   :  { %12 = sbr.rel (!%p10_p5) target bundleno = 1 (0x1), region = 62 }

// kernel: c3k_forward_pallas.7
= control target key start
LH: loop header
LB: loop body
LE: loop exit
PB: predicated region body
PF: predicated region fallthrough
CT: control target
= control target key end

     0   :  { %s3243_s3 = inlined_call_operand.vmem [shape: f32[128,128], index: 3, kind: input, shape index: {}]   ;;  %s3244_s2 = inlined_call_operand.vmem [shape: f32[128,128], index: 2, kind: input, shape index: {}]   ;;  %s3245_s1 = inlined_call_operand.vmem [shape: f32[512,128], index: 1, kind: input, shape index: {}]   ;;  %s3246_s0 = inlined_call_operand.vmem [shape: f32[512,128], index: 0, kind: input, shape index: {}]   ;;  %s3247_s4 = inlined_call_operand.vmem [shape: f32[1,128], index: 4, kind: input, shape index: {}]   ;;  %s3248_s5 = inlined_call_operand.vmem [shape: f32[512,128], index: 5, kind: output, shape index: {}]  }
   0x1   :  { %v179_v0 = vld [vmem:[%s3243_s3 + $0x78] sm:$0xff]  ;;  %v178_v2 = vld [vmem:[%s3243_s3 + $0x70] sm:$0xff]  ;;  %v177_v4 = vld [vmem:[%s3243_s3 + $0x68] sm:$0xff] }
   0x2   :  { %v99_v1 = vld [vmem:[%s3244_s2 + $0x78] sm:$0xff]  ;;  %1698 = vmatprep.subr.mxu0 %v179_v0  ;;  %v98_v3 = vld [vmem:[%s3244_s2 + $0x70] sm:$0xff]  ;;  %v97_v5 = vld [vmem:[%s3244_s2 + $0x68] sm:$0xff] }
   0x3   :  { %1826 = vmatprep.subr.mxu1 %v99_v1  ;;  %1699 = vmatpush3.msra.mxu0 %v179_v0  ;;  %v176_v6 = vld [vmem:[%s3243_s3 + $0x60] sm:$0xff]  ;;  %v175_v8 = vld [vmem:[%s3243_s3 + $0x58] sm:$0xff]  ;;  %v174_v10 = vld [vmem:[%s3243_s3 + $0x50] sm:$0xff] }
   0x4   :  { %1827 = vmatpush3.msra.mxu1 %v99_v1  ;;  %1700 = vmatprep.subr.mxu0 %v178_v2  ;;  %v96_v7 = vld [vmem:[%s3244_s2 + $0x60] sm:$0xff]  ;;  %v95_v9 = vld [vmem:[%s3244_s2 + $0x58] sm:$0xff]  ;;  %v94_v11 = vld [vmem:[%s3244_s2 + $0x50] sm:$0xff] }
   0x5   :  { %1828 = vmatprep.subr.mxu1 %v98_v3  ;;  %1701 = vmatpush3.msra.mxu0 %v178_v2  ;;  %v173_v12 = vld [vmem:[%s3243_s3 + $0x48] sm:$0xff]  ;;  %v172_v14 = vld [vmem:[%s3243_s3 + $0x40] sm:$0xff]  ;;  %v171_v16 = vld [vmem:[%s3243_s3 + $0x38] sm:$0xff] }
   0x6   :  { %1829 = vmatpush3.msra.mxu1 %v98_v3  ;;  %1702 = vmatprep.subr.mxu0 %v177_v4  ;;  %v93_v13 = vld [vmem:[%s3244_s2 + $0x48] sm:$0xff]  ;;  %v92_v15 = vld [vmem:[%s3244_s2 + $0x40] sm:$0xff]  ;;  %v91_v17 = vld [vmem:[%s3244_s2 + $0x38] sm:$0xff] }
   0x7   :  { %1830 = vmatprep.subr.mxu1 %v97_v5  ;;  %1703 = vmatpush3.msra.mxu0 %v177_v4  ;;  %v170_v18 = vld [vmem:[%s3243_s3 + $0x30] sm:$0xff]  ;;  %v169_v20 = vld [vmem:[%s3243_s3 + $0x28] sm:$0xff]  ;;  %v168_v22 = vld [vmem:[%s3243_s3 + $0x20] sm:$0xff] }
   0x8   :  { %1831 = vmatpush3.msra.mxu1 %v97_v5  ;;  %1704 = vmatprep.subr.mxu0 %v176_v6  ;;  %v90_v19 = vld [vmem:[%s3244_s2 + $0x30] sm:$0xff]  ;;  %v89_v21 = vld [vmem:[%s3244_s2 + $0x28] sm:$0xff]  ;;  %v88_v23 = vld [vmem:[%s3244_s2 + $0x20] sm:$0xff] }
   0x9   :  { %1832 = vmatprep.subr.mxu1 %v96_v7  ;;  %1705 = vmatpush3.msra.mxu0 %v176_v6  ;;  %v167_v24 = vld [vmem:[%s3243_s3 + $0x18] sm:$0xff]  ;;  %v166_v26 = vld [vmem:[%s3243_s3 + $0x10] sm:$0xff]  ;;  %v165_v28 = vld [vmem:[%s3243_s3 + $0x8] sm:$0xff] }
   0xa   :  { %1833 = vmatpush3.msra.mxu1 %v96_v7  ;;  %1706 = vmatprep.subr.mxu0 %v175_v8  ;;  %v87_v25 = vld [vmem:[%s3244_s2 + $0x18] sm:$0xff]  ;;  %v86_v27 = vld [vmem:[%s3244_s2 + $0x10] sm:$0xff]  ;;  %v85_v29 = vld [vmem:[%s3244_s2 + $0x8] sm:$0xff] }
   0xb   :  { %1834 = vmatprep.subr.mxu1 %v95_v9  ;;  %1707 = vmatpush3.msra.mxu0 %v175_v8  ;;  %v164_v30 = vld [vmem:[%s3243_s3] sm:$0xff]  ;;  %v101_v34 = vld [vmem:[%s3245_s1 + $0x8] sm:$0xff]  ;;  %v102_v36 = vld [vmem:[%s3245_s1 + $0x10] sm:$0xff] }
   0xc   :  { %1835 = vmatpush3.msra.mxu1 %v95_v9  ;;  %1708 = vmatprep.subr.mxu0 %v174_v10  ;;  %v84_v31 = vld [vmem:[%s3244_s2] sm:$0xff]  ;;  %v21_v35 = vld [vmem:[%s3246_s0 + $0x8] sm:$0xff]  ;;  %v22_v37 = vld [vmem:[%s3246_s0 + $0x10] sm:$0xff] }
   0xd   :  { %1836 = vmatprep.subr.mxu1 %v94_v11  ;;  %1709 = vmatpush3.msra.mxu0 %v174_v10  ;;  %v100_v32 = vld [vmem:[%s3245_s1] sm:$0xff]  ;;  %v103_v38 = vld [vmem:[%s3245_s1 + $0x18] sm:$0xff]  ;;  %v105_v42 = vld [vmem:[%s3245_s1 + $0x28] sm:$0xff] }
   0xe   :  { %1837 = vmatpush3.msra.mxu1 %v94_v11  ;;  %1710 = vmatprep.subr.mxu0 %v173_v12  ;;  %v20_v33 = vld [vmem:[%s3246_s0] sm:$0xff]  ;;  %v23_v39 = vld [vmem:[%s3246_s0 + $0x18] sm:$0xff]  ;;  %v25_v43 = vld [vmem:[%s3246_s0 + $0x28] sm:$0xff] }
   0xf   :  { %1838 = vmatprep.subr.mxu1 %v93_v13  ;;  %1711 = vmatpush3.msra.mxu0 %v173_v12  ;;  %v104_v40 = vld [vmem:[%s3245_s1 + $0x20] sm:$0xff]  ;;  %v106_v44 = vld [vmem:[%s3245_s1 + $0x30] sm:$0xff]  ;;  %v107_v46 = vld [vmem:[%s3245_s1 + $0x38] sm:$0xff] }
  0x10   :  { %1839 = vmatpush3.msra.mxu1 %v93_v13  ;;  %1712 = vmatprep.subr.mxu0 %v172_v14  ;;  %v24_v41 = vld [vmem:[%s3246_s0 + $0x20] sm:$0xff]  ;;  %v26_v45 = vld [vmem:[%s3246_s0 + $0x30] sm:$0xff]  ;;  %v27_v47 = vld [vmem:[%s3246_s0 + $0x38] sm:$0xff] }
  0x11   :  { %1840 = vmatprep.subr.mxu1 %v92_v15  ;;  %1713 = vmatpush3.msra.mxu0 %v172_v14  ;;  %v108_v48 = vld [vmem:[%s3245_s1 + $0x40] sm:$0xff]  ;;  %v109_v50 = vld [vmem:[%s3245_s1 + $0x48] sm:$0xff]  ;;  %v110_v52 = vld [vmem:[%s3245_s1 + $0x50] sm:$0xff] }
  0x12   :  { %1841 = vmatpush3.msra.mxu1 %v92_v15  ;;  %1714 = vmatprep.subr.mxu0 %v171_v16  ;;  %v28_v49 = vld [vmem:[%s3246_s0 + $0x40] sm:$0xff]  ;;  %v29_v51 = vld [vmem:[%s3246_s0 + $0x48] sm:$0xff]  ;;  %v30_v53 = vld [vmem:[%s3246_s0 + $0x50] sm:$0xff] }
  0x13   :  { %1842 = vmatprep.subr.mxu1 %v91_v17  ;;  %1715 = vmatpush3.msra.mxu0 %v171_v16  ;;  %v111_v54 = vld [vmem:[%s3245_s1 + $0x58] sm:$0xff]  ;;  %v112_v56 = vld [vmem:[%s3245_s1 + $0x60] sm:$0xff]  ;;  %v113_v58 = vld [vmem:[%s3245_s1 + $0x68] sm:$0xff] }
  0x14   :  { %1843 = vmatpush3.msra.mxu1 %v91_v17  ;;  %1716 = vmatprep.subr.mxu0 %v170_v18  ;;  %v31_v55 = vld [vmem:[%s3246_s0 + $0x58] sm:$0xff]  ;;  %v32_v57 = vld [vmem:[%s3246_s0 + $0x60] sm:$0xff]  ;;  %v33_v59 = vld [vmem:[%s3246_s0 + $0x68] sm:$0xff] }
  0x15   :  { %1844 = vmatprep.subr.mxu1 %v90_v19  ;;  %1717 = vmatpush3.msra.mxu0 %v170_v18  ;;  %v114_v60 = vld [vmem:[%s3245_s1 + $0x70] sm:$0xff]  ;;  %v115_v62 = vld [vmem:[%s3245_s1 + $0x78] sm:$0xff]  ;;  %v116_v0 = vld [vmem:[%s3245_s1 + $0x80] sm:$0xff] }
  0x16   :  { %1845 = vmatpush3.msra.mxu1 %v90_v19  ;;  %1718 = vmatprep.subr.mxu0 %v169_v20  ;;  %v34_v61 = vld [vmem:[%s3246_s0 + $0x70] sm:$0xff]  ;;  %v35_v63 = vld [vmem:[%s3246_s0 + $0x78] sm:$0xff]  ;;  %v36_v1 = vld [vmem:[%s3246_s0 + $0x80] sm:$0xff] }
  0x17   :  { %1846 = vmatprep.subr.mxu1 %v89_v21  ;;  %1719 = vmatpush3.msra.mxu0 %v169_v20  ;;  %v117_v2 = vld [vmem:[%s3245_s1 + $0x88] sm:$0xff]  ;;  %v118_v4 = vld [vmem:[%s3245_s1 + $0x90] sm:$0xff]  ;;  %v119_v6 = vld [vmem:[%s3245_s1 + $0x98] sm:$0xff] }
  0x18   :  { %1847 = vmatpush3.msra.mxu1 %v89_v21  ;;  %1720 = vmatprep.subr.mxu0 %v168_v22  ;;  %v37_v3 = vld [vmem:[%s3246_s0 + $0x88] sm:$0xff]  ;;  %v38_v5 = vld [vmem:[%s3246_s0 + $0x90] sm:$0xff]  ;;  %v39_v7 = vld [vmem:[%s3246_s0 + $0x98] sm:$0xff] }
  0x19   :  { %1848 = vmatprep.subr.mxu1 %v88_v23  ;;  %1721 = vmatpush3.msra.mxu0 %v168_v22  ;;  %v120_v8 = vld [vmem:[%s3245_s1 + $0xa0] sm:$0xff]  ;;  %v121_v10 = vld [vmem:[%s3245_s1 + $0xa8] sm:$0xff]  ;;  %v122_v12 = vld [vmem:[%s3245_s1 + $0xb0] sm:$0xff] }
  0x1a   :  { %1849 = vmatpush3.msra.mxu1 %v88_v23  ;;  %1722 = vmatprep.subr.mxu0 %v167_v24  ;;  %v40_v9 = vld [vmem:[%s3246_s0 + $0xa0] sm:$0xff]  ;;  %v41_v11 = vld [vmem:[%s3246_s0 + $0xa8] sm:$0xff]  ;;  %v42_v13 = vld [vmem:[%s3246_s0 + $0xb0] sm:$0xff] }
  0x1b   :  { %1850 = vmatprep.subr.mxu1 %v87_v25  ;;  %1723 = vmatpush3.msra.mxu0 %v167_v24  ;;  %v123_v14 = vld [vmem:[%s3245_s1 + $0xb8] sm:$0xff]  ;;  %v124_v16 = vld [vmem:[%s3245_s1 + $0xc0] sm:$0xff]  ;;  %v125_v18 = vld [vmem:[%s3245_s1 + $0xc8] sm:$0xff] }
  0x1c   :  { %1851 = vmatpush3.msra.mxu1 %v87_v25  ;;  %1724 = vmatprep.subr.mxu0 %v166_v26  ;;  %v43_v15 = vld [vmem:[%s3246_s0 + $0xb8] sm:$0xff]  ;;  %v44_v17 = vld [vmem:[%s3246_s0 + $0xc0] sm:$0xff]  ;;  %v45_v19 = vld [vmem:[%s3246_s0 + $0xc8] sm:$0xff] }
  0x1d   :  { %1852 = vmatprep.subr.mxu1 %v86_v27  ;;  %1725 = vmatpush3.msra.mxu0 %v166_v26  ;;  %v126_v20 = vld [vmem:[%s3245_s1 + $0xd0] sm:$0xff]  ;;  %v127_v22 = vld [vmem:[%s3245_s1 + $0xd8] sm:$0xff]  ;;  %v128_v24 = vld [vmem:[%s3245_s1 + $0xe0] sm:$0xff] }
  0x1e   :  { %1853 = vmatpush3.msra.mxu1 %v86_v27  ;;  %1726 = vmatprep.subr.mxu0 %v165_v28  ;;  %v46_v21 = vld [vmem:[%s3246_s0 + $0xd0] sm:$0xff]  ;;  %v47_v23 = vld [vmem:[%s3246_s0 + $0xd8] sm:$0xff]  ;;  %v48_v25 = vld [vmem:[%s3246_s0 + $0xe0] sm:$0xff] }
  0x1f   :  { %1854 = vmatprep.subr.mxu1 %v85_v29  ;;  %1727 = vmatpush3.msra.mxu0 %v165_v28  ;;  %v129_v26 = vld [vmem:[%s3245_s1 + $0xe8] sm:$0xff]  ;;  %v130_v28 = vld [vmem:[%s3245_s1 + $0xf0] sm:$0xff] }
  0x20   :  { %1855 = vmatpush3.msra.mxu1 %v85_v29  ;;  %1728 = vmatprep.subr.mxu0 %v164_v30  ;;  %v49_v27 = vld [vmem:[%s3246_s0 + $0xe8] sm:$0xff]  ;;  %v50_v29 = vld [vmem:[%s3246_s0 + $0xf0] sm:$0xff] }
  0x21   :  { %1856 = vmatprep.subr.mxu1 %v84_v31  ;;  %1729 = vmatpush3.msra.mxu0 %v164_v30  ;;  %v131_v30 = vld [vmem:[%s3245_s1 + $0xf8] sm:$0xff] }
  0x22   :  { %1730 = vmatprep.mubr.f32.mxu0 %v100_v32  ;;  %1857 = vmatpush3.msra.mxu1 %v84_v31  ;;  %v51_v31 = vld [vmem:[%s3246_s0 + $0xf8] sm:$0xff]  ;;  %v132_v32 = vld [vmem:[%s3245_s1 + $0x100] sm:$0xff] }
  0x23   :  { %1858 = vmatprep.mubr.f32.mxu1 %v20_v33  ;;  %1731 = vmatmul.mubr.f32.vlgmr.msra.gmra.mxu0 %v101_v34  ;;  %v52_v33 = vld [vmem:[%s3246_s0 + $0x100] sm:$0xff]  ;;  %v133_v34 = vld [vmem:[%s3245_s1 + $0x108] sm:$0xff] }
  0x24   :  { %1859 = vmatmul.mubr.f32.vlgmr.msra.gmra.mxu1 %v21_v35  ;;  %1733 = vmatprep.mubr.f32.mxu0 %v102_v36  ;;  %v53_v35 = vld [vmem:[%s3246_s0 + $0x108] sm:$0xff]  ;;  %v134_v36 = vld [vmem:[%s3245_s1 + $0x110] sm:$0xff] }
  0x25   :  { %1861 = vmatprep.mubr.f32.mxu1 %v22_v37  ;;  %v54_v37 = vld [vmem:[%s3246_s0 + $0x110] sm:$0xff] }
  0x27   :  { %1734 = vmatmul.mubr.f32.gmra.mxu0 %v103_v38  ;;  %v135_v38 = vld [vmem:[%s3245_s1 + $0x118] sm:$0xff] }
  0x28   :  { %1862 = vmatmul.mubr.f32.gmra.mxu1 %v23_v39  ;;  %1736 = vmatprep.mubr.f32.mxu0 %v104_v40  ;;  %v55_v39 = vld [vmem:[%s3246_s0 + $0x118] sm:$0xff]  ;;  %v136_v40 = vld [vmem:[%s3245_s1 + $0x120] sm:$0xff] }
  0x29   :  { %1864 = vmatprep.mubr.f32.mxu1 %v24_v41  ;;  %v56_v41 = vld [vmem:[%s3246_s0 + $0x120] sm:$0xff] }
  0x2b   :  { %1737 = vmatmul.mubr.f32.gmra.mxu0 %v105_v42  ;;  %v137_v42 = vld [vmem:[%s3245_s1 + $0x128] sm:$0xff] }
  0x2c   :  { %1865 = vmatmul.mubr.f32.gmra.mxu1 %v25_v43  ;;  %1739 = vmatprep.mubr.f32.mxu0 %v106_v44  ;;  %v57_v43 = vld [vmem:[%s3246_s0 + $0x128] sm:$0xff]  ;;  %v138_v44 = vld [vmem:[%s3245_s1 + $0x130] sm:$0xff] }
  0x2d   :  { %1867 = vmatprep.mubr.f32.mxu1 %v26_v45  ;;  %v58_v45 = vld [vmem:[%s3246_s0 + $0x130] sm:$0xff] }
  0x2f   :  { %1740 = vmatmul.mubr.f32.gmra.mxu0 %v107_v46  ;;  %v139_v46 = vld [vmem:[%s3245_s1 + $0x138] sm:$0xff] }
  0x30   :  { %1868 = vmatmul.mubr.f32.gmra.mxu1 %v27_v47  ;;  %1742 = vmatprep.mubr.f32.mxu0 %v108_v48  ;;  %v59_v47 = vld [vmem:[%s3246_s0 + $0x138] sm:$0xff]  ;;  %v140_v48 = vld [vmem:[%s3245_s1 + $0x140] sm:$0xff] }
  0x31   :  { %1870 = vmatprep.mubr.f32.mxu1 %v28_v49  ;;  %v60_v49 = vld [vmem:[%s3246_s0 + $0x140] sm:$0xff] }
  0x33   :  { %1743 = vmatmul.mubr.f32.gmra.mxu0 %v109_v50  ;;  %v141_v50 = vld [vmem:[%s3245_s1 + $0x148] sm:$0xff] }
  0x34   :  { %1871 = vmatmul.mubr.f32.gmra.mxu1 %v29_v51  ;;  %1745 = vmatprep.mubr.f32.mxu0 %v110_v52  ;;  %v61_v51 = vld [vmem:[%s3246_s0 + $0x148] sm:$0xff]  ;;  %v142_v52 = vld [vmem:[%s3245_s1 + $0x150] sm:$0xff] }
  0x35   :  { %1873 = vmatprep.mubr.f32.mxu1 %v30_v53  ;;  %v62_v53 = vld [vmem:[%s3246_s0 + $0x150] sm:$0xff] }
  0x37   :  { %1746 = vmatmul.mubr.f32.gmra.mxu0 %v111_v54  ;;  %v143_v54 = vld [vmem:[%s3245_s1 + $0x158] sm:$0xff] }
  0x38   :  { %1874 = vmatmul.mubr.f32.gmra.mxu1 %v31_v55  ;;  %1748 = vmatprep.mubr.f32.mxu0 %v112_v56  ;;  %v63_v55 = vld [vmem:[%s3246_s0 + $0x158] sm:$0xff]  ;;  %v144_v56 = vld [vmem:[%s3245_s1 + $0x160] sm:$0xff] }
  0x39   :  { %1876 = vmatprep.mubr.f32.mxu1 %v32_v57  ;;  %v64_v57 = vld [vmem:[%s3246_s0 + $0x160] sm:$0xff] }
  0x3b   :  { %1749 = vmatmul.mubr.f32.gmra.mxu0 %v113_v58  ;;  %v145_v58 = vld [vmem:[%s3245_s1 + $0x168] sm:$0xff] }
  0x3c   :  { %1877 = vmatmul.mubr.f32.gmra.mxu1 %v33_v59  ;;  %1751 = vmatprep.mubr.f32.mxu0 %v114_v60  ;;  %v65_v59 = vld [vmem:[%s3246_s0 + $0x168] sm:$0xff]  ;;  %v146_v60 = vld [vmem:[%s3245_s1 + $0x170] sm:$0xff] }
  0x3d   :  { %1879 = vmatprep.mubr.f32.mxu1 %v34_v61  ;;  %v66_v61 = vld [vmem:[%s3246_s0 + $0x170] sm:$0xff] }
  0x3f   :  { %1752 = vmatmul.mubr.f32.gmra.mxu0 %v115_v62  ;;  %v147_v62 = vld [vmem:[%s3245_s1 + $0x178] sm:$0xff] }
  0x40   :  { %1880 = vmatmul.mubr.f32.gmra.mxu1 %v35_v63  ;;  %1754 = vmatprep.mubr.f32.mxu0 %v116_v0  ;;  %v67_v63 = vld [vmem:[%s3246_s0 + $0x178] sm:$0xff]  ;;  %v148_v0 = vld [vmem:[%s3245_s1 + $0x180] sm:$0xff] }
  0x41   :  { %1882 = vmatprep.mubr.f32.mxu1 %v36_v1  ;;  %v68_v1 = vld [vmem:[%s3246_s0 + $0x180] sm:$0xff] }
  0x43   :  { %1755 = vmatmul.mubr.f32.gmra.mxu0 %v117_v2  ;;  %v149_v2 = vld [vmem:[%s3245_s1 + $0x188] sm:$0xff] }
  0x44   :  { %1883 = vmatmul.mubr.f32.gmra.mxu1 %v37_v3  ;;  %1757 = vmatprep.mubr.f32.mxu0 %v118_v4  ;;  %v69_v3 = vld [vmem:[%s3246_s0 + $0x188] sm:$0xff]  ;;  %v150_v4 = vld [vmem:[%s3245_s1 + $0x190] sm:$0xff] }
  0x45   :  { %1885 = vmatprep.mubr.f32.mxu1 %v38_v5  ;;  %v70_v5 = vld [vmem:[%s3246_s0 + $0x190] sm:$0xff] }
  0x47   :  { %1758 = vmatmul.mubr.f32.gmra.mxu0 %v119_v6  ;;  %v151_v6 = vld [vmem:[%s3245_s1 + $0x198] sm:$0xff] }
  0x48   :  { %1886 = vmatmul.mubr.f32.gmra.mxu1 %v39_v7  ;;  %1760 = vmatprep.mubr.f32.mxu0 %v120_v8  ;;  %v71_v7 = vld [vmem:[%s3246_s0 + $0x198] sm:$0xff]  ;;  %v152_v8 = vld [vmem:[%s3245_s1 + $0x1a0] sm:$0xff] }
  0x49   :  { %1888 = vmatprep.mubr.f32.mxu1 %v40_v9  ;;  %v72_v9 = vld [vmem:[%s3246_s0 + $0x1a0] sm:$0xff] }
  0x4b   :  { %1761 = vmatmul.mubr.f32.gmra.mxu0 %v121_v10  ;;  %v153_v10 = vld [vmem:[%s3245_s1 + $0x1a8] sm:$0xff] }
  0x4c   :  { %1889 = vmatmul.mubr.f32.gmra.mxu1 %v41_v11  ;;  %1763 = vmatprep.mubr.f32.mxu0 %v122_v12  ;;  %v73_v11 = vld [vmem:[%s3246_s0 + $0x1a8] sm:$0xff]  ;;  %v154_v12 = vld [vmem:[%s3245_s1 + $0x1b0] sm:$0xff] }
  0x4d   :  { %1891 = vmatprep.mubr.f32.mxu1 %v42_v13  ;;  %v74_v13 = vld [vmem:[%s3246_s0 + $0x1b0] sm:$0xff] }
  0x4f   :  { %1764 = vmatmul.mubr.f32.gmra.mxu0 %v123_v14  ;;  %v155_v14 = vld [vmem:[%s3245_s1 + $0x1b8] sm:$0xff] }
  0x50   :  { %1892 = vmatmul.mubr.f32.gmra.mxu1 %v43_v15  ;;  %1766 = vmatprep.mubr.f32.mxu0 %v124_v16  ;;  %v75_v15 = vld [vmem:[%s3246_s0 + $0x1b8] sm:$0xff]  ;;  %v156_v16 = vld [vmem:[%s3245_s1 + $0x1c0] sm:$0xff] }
  0x51   :  { %1894 = vmatprep.mubr.f32.mxu1 %v44_v17  ;;  %v76_v17 = vld [vmem:[%s3246_s0 + $0x1c0] sm:$0xff] }
  0x53   :  { %1767 = vmatmul.mubr.f32.gmra.mxu0 %v125_v18  ;;  %v157_v18 = vld [vmem:[%s3245_s1 + $0x1c8] sm:$0xff] }
  0x54   :  { %1895 = vmatmul.mubr.f32.gmra.mxu1 %v45_v19  ;;  %1769 = vmatprep.mubr.f32.mxu0 %v126_v20  ;;  %v77_v19 = vld [vmem:[%s3246_s0 + $0x1c8] sm:$0xff]  ;;  %v158_v20 = vld [vmem:[%s3245_s1 + $0x1d0] sm:$0xff] }
  0x55   :  { %1897 = vmatprep.mubr.f32.mxu1 %v46_v21  ;;  %v78_v21 = vld [vmem:[%s3246_s0 + $0x1d0] sm:$0xff] }
  0x57   :  { %1770 = vmatmul.mubr.f32.gmra.mxu0 %v127_v22  ;;  %v159_v22 = vld [vmem:[%s3245_s1 + $0x1d8] sm:$0xff] }
  0x58   :  { %1898 = vmatmul.mubr.f32.gmra.mxu1 %v47_v23  ;;  %1772 = vmatprep.mubr.f32.mxu0 %v128_v24  ;;  %v79_v23 = vld [vmem:[%s3246_s0 + $0x1d8] sm:$0xff]  ;;  %v160_v24 = vld [vmem:[%s3245_s1 + $0x1e0] sm:$0xff] }
  0x59   :  { %1900 = vmatprep.mubr.f32.mxu1 %v48_v25  ;;  %v80_v25 = vld [vmem:[%s3246_s0 + $0x1e0] sm:$0xff] }
  0x5b   :  { %1773 = vmatmul.mubr.f32.gmra.mxu0 %v129_v26  ;;  %v161_v26 = vld [vmem:[%s3245_s1 + $0x1e8] sm:$0xff] }
  0x5c   :  { %1901 = vmatmul.mubr.f32.gmra.mxu1 %v49_v27  ;;  %1775 = vmatprep.mubr.f32.mxu0 %v130_v28  ;;  %v81_v27 = vld [vmem:[%s3246_s0 + $0x1e8] sm:$0xff]  ;;  %v162_v28 = vld [vmem:[%s3245_s1 + $0x1f0] sm:$0xff] }
  0x5d   :  { %1903 = vmatprep.mubr.f32.mxu1 %v50_v29  ;;  %v82_v29 = vld [vmem:[%s3246_s0 + $0x1f0] sm:$0xff] }
  0x5f   :  { %1776 = vmatmul.mubr.f32.gmra.mxu0 %v131_v30  ;;  %v163_v30 = vld [vmem:[%s3245_s1 + $0x1f8] sm:$0xff] }
  0x60   :  { %1904 = vmatmul.mubr.f32.gmra.mxu1 %v51_v31  ;;  %1778 = vmatprep.mubr.f32.mxu0 %v132_v32  ;;  %v83_v31 = vld [vmem:[%s3246_s0 + $0x1f8] sm:$0xff] }
  0x61   :  { %1906 = vmatprep.mubr.f32.mxu1 %v52_v33 }
  0x63   :  { %1779 = vmatmul.mubr.f32.gmra.mxu0 %v133_v34  ;;  %v2724_v34 = vld [vmem:[%s3247_s4] ss:$0 sm:$0xff] }
  0x64   :  { %1907 = vmatmul.mubr.f32.gmra.mxu1 %v53_v35  ;;  %1781 = vmatprep.mubr.f32.mxu0 %v134_v36 }
  0x65   :  { %1909 = vmatprep.mubr.f32.mxu1 %v54_v37 }
  0x67   :  { %1782 = vmatmul.mubr.f32.gmra.mxu0 %v135_v38 }
  0x68   :  { %1910 = vmatmul.mubr.f32.gmra.mxu1 %v55_v39  ;;  %1784 = vmatprep.mubr.f32.mxu0 %v136_v40 }
  0x69   :  { %1912 = vmatprep.mubr.f32.mxu1 %v56_v41 }
  0x6b   :  { %1785 = vmatmul.mubr.f32.gmra.mxu0 %v137_v42 }
  0x6c   :  { %1913 = vmatmul.mubr.f32.gmra.mxu1 %v57_v43  ;;  %1787 = vmatprep.mubr.f32.mxu0 %v138_v44 }
  0x6d   :  { %1915 = vmatprep.mubr.f32.mxu1 %v58_v45 }
  0x6f   :  { %1788 = vmatmul.mubr.f32.gmra.mxu0 %v139_v46 }
  0x70   :  { %1916 = vmatmul.mubr.f32.gmra.mxu1 %v59_v47  ;;  %1790 = vmatprep.mubr.f32.mxu0 %v140_v48 }
  0x71   :  { %1918 = vmatprep.mubr.f32.mxu1 %v60_v49 }
  0x73   :  { %1791 = vmatmul.mubr.f32.gmra.mxu0 %v141_v50 }
  0x74   :  { %1919 = vmatmul.mubr.f32.gmra.mxu1 %v61_v51  ;;  %1793 = vmatprep.mubr.f32.mxu0 %v142_v52 }
  0x75   :  { %1921 = vmatprep.mubr.f32.mxu1 %v62_v53 }
  0x77   :  { %1794 = vmatmul.mubr.f32.gmra.mxu0 %v143_v54 }
  0x78   :  { %1922 = vmatmul.mubr.f32.gmra.mxu1 %v63_v55  ;;  %1796 = vmatprep.mubr.f32.mxu0 %v144_v56 }
  0x79   :  { %1924 = vmatprep.mubr.f32.mxu1 %v64_v57 }
  0x7b   :  { %1797 = vmatmul.mubr.f32.gmra.mxu0 %v145_v58 }
  0x7c   :  { %1925 = vmatmul.mubr.f32.gmra.mxu1 %v65_v59  ;;  %1799 = vmatprep.mubr.f32.mxu0 %v146_v60 }
  0x7d   :  { %1927 = vmatprep.mubr.f32.mxu1 %v66_v61 }
  0x7f   :  { %1800 = vmatmul.mubr.f32.gmra.mxu0 %v147_v62 }
  0x80   :  { %1928 = vmatmul.mubr.f32.gmra.mxu1 %v67_v63  ;;  %1802 = vmatprep.mubr.f32.mxu0 %v148_v0 }
  0x81   :  { %1930 = vmatprep.mubr.f32.mxu1 %v68_v1 }
  0x83   :  { %1803 = vmatmul.mubr.f32.gmra.mxu0 %v149_v2 }
  0x84   :  { %1931 = vmatmul.mubr.f32.gmra.mxu1 %v69_v3  ;;  %1805 = vmatprep.mubr.f32.mxu0 %v150_v4 }
  0x85   :  { %1933 = vmatprep.mubr.f32.mxu1 %v70_v5 }
  0x87   :  { %1806 = vmatmul.mubr.f32.gmra.mxu0 %v151_v6 }
  0x88   :  { %1934 = vmatmul.mubr.f32.gmra.mxu1 %v71_v7  ;;  %1808 = vmatprep.mubr.f32.mxu0 %v152_v8 }
  0x89   :  { %1936 = vmatprep.mubr.f32.mxu1 %v72_v9 }
  0x8b   :  { %1809 = vmatmul.mubr.f32.gmra.mxu0 %v153_v10 }
  0x8c   :  { %1937 = vmatmul.mubr.f32.gmra.mxu1 %v73_v11  ;;  %1811 = vmatprep.mubr.f32.mxu0 %v154_v12 }
  0x8d   :  { %1939 = vmatprep.mubr.f32.mxu1 %v74_v13 }
  0x8f   :  { %1812 = vmatmul.mubr.f32.gmra.mxu0 %v155_v14 }
  0x90   :  { %1940 = vmatmul.mubr.f32.gmra.mxu1 %v75_v15  ;;  %1814 = vmatprep.mubr.f32.mxu0 %v156_v16 }
  0x91   :  { %1942 = vmatprep.mubr.f32.mxu1 %v76_v17 }
  0x93   :  { %1815 = vmatmul.mubr.f32.gmra.mxu0 %v157_v18 }
  0x94   :  { %1943 = vmatmul.mubr.f32.gmra.mxu1 %v77_v19  ;;  %1817 = vmatprep.mubr.f32.mxu0 %v158_v20 }
  0x95   :  { %1945 = vmatprep.mubr.f32.mxu1 %v78_v21 }
  0x97   :  { %1818 = vmatmul.mubr.f32.gmra.mxu0 %v159_v22 }
  0x98   :  { %1946 = vmatmul.mubr.f32.gmra.mxu1 %v79_v23  ;;  %1820 = vmatprep.mubr.f32.mxu0 %v160_v24 }
  0x99   :  { %1948 = vmatprep.mubr.f32.mxu1 %v80_v25 }
  0x9b   :  { %1821 = vmatmul.mubr.f32.gmra.mxu0 %v161_v26 }
  0x9c   :  { %1949 = vmatmul.mubr.f32.gmra.mxu1 %v81_v27  ;;  %1823 = vmatprep.mubr.f32.mxu0 %v162_v28 }
  0x9d   :  { %1951 = vmatprep.mubr.f32.mxu1 %v82_v29 }
  0x9f   :  { %1824 = vmatmul.mubr.f32.gmra.mxu0 %v163_v30 }
  0xa0   :  { %1952 = vmatmul.mubr.f32.gmra.mxu1 %v83_v31 }
  0xe3   :  { %v1732_v32 = vpop.f32.mrf.mxu0 }
  0xe4   :  { %v1860_v33 = vpop.f32.mrf.mxu1 }
  0xe5   :  { %v637_v35 = vadd.f32 %v1860_v33, %v1732_v32  ;;  %v246_v36 = vpop.f32.mrf.mxu0 }
  0xe6   :  { %v631_v37 = vpop.f32.mrf.mxu1 }
  0xe7   :  { %v2727_v38 = vadd.f32 %v2724_v34, %v637_v35  ;;  %v632_v39 = vadd.f32 %v631_v37, %v246_v36  ;;  %v1735_v40 = vpop.f32.mrf.mxu0 }
  0xe8   :  { %v1863_v41 = vpop.f32.mrf.mxu1 }
  0xe9   :  { %v1022_v42 = vsub.f32 0.0, %v2727_v38  ;;  %v2731_v43 = vadd.f32 %v2724_v34, %v632_v39  ;;  %v647_v44 = vadd.f32 %v1863_v41, %v1735_v40  ;;  %v256_v45 = vpop.f32.mrf.mxu0 }
  0xea   :  { %v641_v46 = vpop.f32.mrf.mxu1 }
  0xeb   :  { %v1087_v47 = vmul.f32 1.442695, %v1022_v42  ;;  %v1021_v48 = vsub.f32 0.0, %v2731_v43  ;;  %v2735_v49 = vadd.f32 %v2724_v34, %v647_v44  ;;  %v642_v50 = vadd.f32 %v641_v46, %v256_v45  ;;  %v1738_v51 = vpop.f32.mrf.mxu0 }
  0xec   :  { %v1866_v52 = vpop.f32.mrf.mxu1 }
  0xed   :  { %1954 = vpow2.f32 %v1087_v47  ;;  %v1085_v53 = vmul.f32 1.442695, %v1021_v48  ;;  %v1024_v54 = vsub.f32 0.0, %v2735_v49  ;;  %v2739_v55 = vadd.f32 %v2724_v34, %v642_v50  ;;  %v266_v57 = vpop.f32.mrf.mxu0 }
  0xee   :  { %v657_v56 = vadd.f32 %v1866_v52, %v1738_v51  ;;  %v651_v58 = vpop.f32.mrf.mxu1 }
  0xef   :  { %1956 = vpow2.f32 %v1085_v53  ;;  %v1091_v59 = vmul.f32 1.442695, %v1024_v54  ;;  %v1023_v60 = vsub.f32 0.0, %v2739_v55  ;;  %v652_v61 = vadd.f32 %v651_v58, %v266_v57  ;;  %v1741_v63 = vpop.f32.mrf.mxu0 }
  0xf0   :  { %v2743_v62 = vadd.f32 %v2724_v34, %v657_v56  ;;  %v1869_v0 = vpop.f32.mrf.mxu1 }
  0xf1   :  { %1958 = vpow2.f32 %v1091_v59  ;;  %v1089_v1 = vmul.f32 1.442695, %v1023_v60  ;;  %v2746_v2 = vadd.f32 %v2724_v34, %v652_v61  ;;  %v667_v3 = vadd.f32 %v1869_v0, %v1741_v63  ;;  %v276_v5 = vpop.f32.mrf.mxu0 }
  0xf2   :  { %v1026_v4 = vsub.f32 0.0, %v2743_v62  ;;  %v661_v6 = vpop.f32.mrf.mxu1 }
  0xf3   :  { %1960 = vpow2.f32 %v1089_v1  ;;  %v1025_v7 = vsub.f32 0.0, %v2746_v2  ;;  %v2751_v8 = vadd.f32 %v2724_v34, %v667_v3  ;;  %v662_v9 = vadd.f32 %v661_v6, %v276_v5  ;;  %v1744_v11 = vpop.f32.mrf.mxu0 }
  0xf4   :  { %v1095_v10 = vmul.f32 1.442695, %v1026_v4  ;;  %v1872_v12 = vpop.f32.mrf.mxu1 }
  0xf5   :  { %v1093_v13 = vmul.f32 1.442695, %v1025_v7  ;;  %v1028_v14 = vsub.f32 0.0, %v2751_v8  ;;  %v2755_v15 = vadd.f32 %v2724_v34, %v662_v9  ;;  %v677_v16 = vadd.f32 %v1872_v12, %v1744_v11  ;;  %v286_v17 = vpop.f32.mrf.mxu0 }
  0xf6   :  { %1962 = vpow2.f32 %v1095_v10  ;;  %v671_v18 = vpop.f32.mrf.mxu1 }
  0xf7   :  { %1964 = vpow2.f32 %v1093_v13  ;;  %v1099_v19 = vmul.f32 1.442695, %v1028_v14  ;;  %v1027_v20 = vsub.f32 0.0, %v2755_v15  ;;  %v2759_v21 = vadd.f32 %v2724_v34, %v677_v16  ;;  %v1747_v23 = vpop.f32.mrf.mxu0 }
  0xf8   :  { %v672_v22 = vadd.f32 %v671_v18, %v286_v17  ;;  %v1875_v24 = vpop.f32.mrf.mxu1 }
  0xf9   :  { %1966 = vpow2.f32 %v1099_v19  ;;  %v1097_v25 = vmul.f32 1.442695, %v1027_v20  ;;  %v1030_v26 = vsub.f32 0.0, %v2759_v21  ;;  %v687_v27 = vadd.f32 %v1875_v24, %v1747_v23  ;;  %v296_v30 = vpop.f32.mrf.mxu0 }
  0xfa   :  { %v1955_v28 = vpop.eup %1954  ;;  %v2763_v29 = vadd.f32 %v2724_v34, %v672_v22  ;;  %v681_v31 = vpop.f32.mrf.mxu1 }
  0xfb   :  { %v1214_v32 = vadd.f32 1.0, %v1955_v28  ;;  %1968 = vpow2.f32 %v1097_v25  ;;  %v1103_v33 = vmul.f32 1.442695, %v1030_v26  ;;  %v2766_v35 = vadd.f32 %v2724_v34, %v687_v27  ;;  %v1750_v40 = vpop.f32.mrf.mxu0 }
  0xfc   :  { %v1957_v36 = vpop.eup %1956  ;;  %v1029_v37 = vsub.f32 0.0, %v2763_v29  ;;  %v682_v39 = vadd.f32 %v681_v31, %v296_v30  ;;  %v1878_v41 = vpop.f32.mrf.mxu1 }
  0xfd   :  { %1970 = vrcp.f32 %v1214_v32  ;;  %v1213_v42 = vadd.f32 1.0, %v1957_v36  ;;  %v1032_v44 = vsub.f32 0.0, %v2766_v35  ;;  %v697_v45 = vadd.f32 %v1878_v41, %v1750_v40  ;;  %v306_v50 = vpop.f32.mrf.mxu0 }
  0xfe   :  { %v1959_v46 = vpop.eup %1958  ;;  %1972 = vpow2.f32 %v1103_v33  ;;  %v1101_v47 = vmul.f32 1.442695, %v1029_v37  ;;  %v2771_v48 = vadd.f32 %v2724_v34, %v682_v39  ;;  %v691_v51 = vpop.f32.mrf.mxu1 }
  0xff   :  { %1974 = vrcp.f32 %v1213_v42  ;;  %v1216_v52 = vadd.f32 1.0, %v1959_v46  ;;  %v1107_v53 = vmul.f32 1.442695, %v1032_v44  ;;  %v2774_v54 = vadd.f32 %v2724_v34, %v697_v45  ;;  %v1753_v59 = vpop.f32.mrf.mxu0 }
 0x100   :  { %v1961_v56 = vpop.eup %1960  ;;  %1976 = vpow2.f32 %v1101_v47  ;;  %v1031_v57 = vsub.f32 0.0, %v2771_v48  ;;  %v692_v58 = vadd.f32 %v691_v51, %v306_v50  ;;  %v1881_v60 = vpop.f32.mrf.mxu1 }
 0x101   :  { %1978 = vrcp.f32 %v1216_v52  ;;  %v1215_v61 = vadd.f32 1.0, %v1961_v56  ;;  %v1034_v63 = vsub.f32 0.0, %v2774_v54  ;;  %v707_v0 = vadd.f32 %v1881_v60, %v1753_v59  ;;  %v316_v4 = vpop.f32.mrf.mxu0 }
 0x102   :  { %1980 = vpow2.f32 %v1107_v53  ;;  %v1105_v1 = vmul.f32 1.442695, %v1031_v57  ;;  %v2779_v3 = vadd.f32 %v2724_v34, %v692_v58  ;;  %v701_v5 = vpop.f32.mrf.mxu1 }
 0x103   :  { %v1963_v6 = vpop.eup %1962  ;;  %1982 = vrcp.f32 %v1215_v61  ;;  %v1111_v7 = vmul.f32 1.442695, %v1034_v63  ;;  %v2782_v9 = vadd.f32 %v2724_v34, %v707_v0  ;;  %v702_v10 = vadd.f32 %v701_v5, %v316_v4  ;;  %v1756_v14 = vpop.f32.mrf.mxu0 }
 0x104   :  { %v1965_v11 = vpop.eup %1964  ;;  %v1218_v12 = vadd.f32 1.0, %v1963_v6  ;;  %1984 = vpow2.f32 %v1105_v1  ;;  %v1033_v13 = vsub.f32 0.0, %v2779_v3  ;;  %v1884_v16 = vpop.f32.mrf.mxu1 }
 0x105   :  { %v1217_v17 = vadd.f32 1.0, %v1965_v11  ;;  %1986 = vpow2.f32 %v1111_v7  ;;  %v1036_v18 = vsub.f32 0.0, %v2782_v9  ;;  %v2787_v19 = vadd.f32 %v2724_v34, %v702_v10  ;;  %v326_v24 = vpop.f32.mrf.mxu0 }
 0x106   :  { %v1967_v20 = vpop.eup %1966  ;;  %1988 = vrcp.f32 %v1218_v12  ;;  %v1109_v22 = vmul.f32 1.442695, %v1033_v13  ;;  %v717_v23 = vadd.f32 %v1884_v16, %v1756_v14  ;;  %v711_v25 = vpop.f32.mrf.mxu1 }
 0x107   :  { %1990 = vrcp.f32 %v1217_v17  ;;  %v1220_v26 = vadd.f32 1.0, %v1967_v20  ;;  %v1115_v27 = vmul.f32 1.442695, %v1036_v18  ;;  %v1035_v28 = vsub.f32 0.0, %v2787_v19  ;;  %v1759_v33 = vpop.f32.mrf.mxu0 }
 0x108   :  { %v1969_v30 = vpop.eup %1968  ;;  %1992 = vpow2.f32 %v1109_v22  ;;  %v2791_v31 = vadd.f32 %v2724_v34, %v717_v23  ;;  %v712_v32 = vadd.f32 %v711_v25, %v326_v24  ;;  %v1887_v36 = vpop.f32.mrf.mxu1 }
 0x109   :  { %1994 = vrcp.f32 %v1220_v26  ;;  %v1219_v37 = vadd.f32 1.0, %v1969_v30  ;;  %v1113_v39 = vmul.f32 1.442695, %v1035_v28  ;;  %v727_v40 = vadd.f32 %v1887_v36, %v1759_v33  ;;  %v336_v45 = vpop.f32.mrf.mxu0 }
 0x10a   :  { %v1971_v41 = vpop.eup %1970  ;;  %1996 = vpow2.f32 %v1115_v27  ;;  %v1038_v42 = vsub.f32 0.0, %v2791_v31  ;;  %v2795_v44 = vadd.f32 %v2724_v34, %v712_v32  ;;  %v721_v46 = vpop.f32.mrf.mxu1 }
 0x10b   :  { %v1973_v47 = vpop.eup %1972  ;;  %v1406_v50 = vmul.f32 %v1971_v41, %v2727_v38  ;;  %1998 = vrcp.f32 %v1219_v37  ;;  %v2799_v51 = vadd.f32 %v2724_v34, %v727_v40  ;;  %v722_v52 = vadd.f32 %v721_v46, %v336_v45  ;;  %v1762_v59 = vpop.f32.mrf.mxu0 }
 0x10c   :  { %v1975_v53 = vpop.eup %1974  ;;  %v1222_v56 = vadd.f32 1.0, %v1973_v47  ;;  %2000 = vpow2.f32 %v1113_v39  ;;  %v1119_v57 = vmul.f32 1.442695, %v1038_v42  ;;  %v1037_v58 = vsub.f32 0.0, %v2795_v44  ;;  %v1890_v60 = vpop.f32.mrf.mxu1 }
 0x10d   :  { %v1977_v61 = vpop.eup %1976  ;;  %1470 = vst [vmem:[%s3248_s5 + $0x8] sm:$0xff] %v1406_v50  ;;  %v1405_v38 = vmul.f32 %v1975_v53, %v2731_v43  ;;  %v1040_v63 = vsub.f32 0.0, %v2799_v51  ;;  %v2808_v0 = vadd.f32 %v2724_v34, %v722_v52  ;;  %v737_v1 = vadd.f32 %v1890_v60, %v1762_v59  ;;  %v346_v7 = vpop.f32.mrf.mxu0 }
 0x10e   :  { %v1979_v4 = vpop.eup %1978  ;;  %2002 = vrcp.f32 %v1222_v56  ;;  %v1221_v5 = vadd.f32 1.0, %v1977_v61  ;;  %v1117_v6 = vmul.f32 1.442695, %v1037_v58  ;;  %v731_v10 = vpop.f32.mrf.mxu1 }
 0x10f   :  { %v1981_v11 = vpop.eup %1980  ;;  %1469 = vst [vmem:[%s3248_s5] sm:$0xff] %v1405_v38  ;;  %v1408_v12 = vmul.f32 %v1979_v4, %v2735_v49  ;;  %2004 = vpow2.f32 %v1119_v57  ;;  %v1123_v43 = vmul.f32 1.442695, %v1040_v63  ;;  %v1039_v13 = vsub.f32 0.0, %v2808_v0  ;;  %v1765_v20 = vpop.f32.mrf.mxu0 }
 0x110   :  { %v1983_v14 = vpop.eup %1982  ;;  %2006 = vrcp.f32 %v1221_v5  ;;  %v1224_v16 = vadd.f32 1.0, %v1981_v11  ;;  %v2816_v17 = vadd.f32 %v2724_v34, %v737_v1  ;;  %v732_v18 = vadd.f32 %v731_v10, %v346_v7  ;;  %v1893_v22 = vpop.f32.mrf.mxu1 }
 0x111   :  { %v1985_v23 = vpop.eup %1984  ;;  %1472 = vst [vmem:[%s3248_s5 + $0x18] sm:$0xff] %v1408_v12  ;;  %v1407_v49 = vmul.f32 %v1983_v14, %v2739_v55  ;;  %2008 = vpow2.f32 %v1117_v6  ;;  %v1121_v24 = vmul.f32 1.442695, %v1039_v13  ;;  %v747_v25 = vadd.f32 %v1893_v22, %v1765_v20  ;;  %v356_v32 = vpop.f32.mrf.mxu0 }
 0x112   :  { %v1987_v26 = vpop.eup %1986  ;;  %2010 = vrcp.f32 %v1224_v16  ;;  %v1223_v27 = vadd.f32 1.0, %v1985_v23  ;;  %v1042_v28 = vsub.f32 0.0, %v2816_v17  ;;  %v2824_v30 = vadd.f32 %v2724_v34, %v732_v18  ;;  %v741_v33 = vpop.f32.mrf.mxu1 }
 0x113   :  { %v1989_v36 = vpop.eup %1988  ;;  %1471 = vst [vmem:[%s3248_s5 + $0x10] sm:$0xff] %v1407_v49  ;;  %v1226_v37 = vadd.f32 1.0, %v1987_v26  ;;  %2012 = vpow2.f32 %v1123_v43  ;;  %v2830_v55 = vadd.f32 %v2724_v34, %v747_v25  ;;  %v742_v39 = vadd.f32 %v741_v33, %v356_v32  ;;  %v1768_v46 = vpop.f32.mrf.mxu0 }
 0x114   :  { %v1991_v40 = vpop.eup %1990  ;;  %v1410_v41 = vmul.f32 %v1989_v36, %v2743_v62  ;;  %2014 = vrcp.f32 %v1223_v27  ;;  %v1127_v42 = vmul.f32 1.442695, %v1042_v28  ;;  %v1041_v45 = vsub.f32 0.0, %v2824_v30  ;;  %v1896_v47 = vpop.f32.mrf.mxu1 }
 0x115   :  { %v1993_v50 = vpop.eup %1992  ;;  %v1409_v52 = vmul.f32 %v1991_v40, %v2746_v2  ;;  %2016 = vrcp.f32 %v1226_v37  ;;  %v1044_v53 = vsub.f32 0.0, %v2830_v55  ;;  %v2837_v56 = vadd.f32 %v2724_v34, %v742_v39  ;;  %v366_v60 = vpop.f32.mrf.mxu0 }
 0x116   :  { %v1995_v57 = vpop.eup %1994  ;;  %1474 = vst [vmem:[%s3248_s5 + $0x28] sm:$0xff] %v1410_v41  ;;  %v1225_v62 = vadd.f32 1.0, %v1993_v50  ;;  %2018 = vpow2.f32 %v1121_v24  ;;  %v1125_v58 = vmul.f32 1.442695, %v1041_v45  ;;  %v757_v59 = vadd.f32 %v1896_v47, %v1768_v46  ;;  %v751_v61 = vpop.f32.mrf.mxu1 }
 0x117   :  { %v1997_v38 = vpop.eup %1996  ;;  %1473 = vst [vmem:[%s3248_s5 + $0x20] sm:$0xff] %v1409_v52  ;;  %v1412_v2 = vmul.f32 %v1995_v57, %v2751_v8  ;;  %2020 = vpow2.f32 %v1127_v42  ;;  %v1131_v63 = vmul.f32 1.442695, %v1044_v53  ;;  %v1043_v1 = vsub.f32 0.0, %v2837_v56  ;;  %v1771_v10 = vpop.f32.mrf.mxu0 }
 0x118   :  { %v1999_v4 = vpop.eup %1998  ;;  %2022 = vrcp.f32 %v1225_v62  ;;  %v1228_v5 = vadd.f32 1.0, %v1997_v38  ;;  %v2848_v6 = vadd.f32 %v2724_v34, %v757_v59  ;;  %v752_v7 = vadd.f32 %v751_v61, %v366_v60  ;;  %v1899_v11 = vpop.f32.mrf.mxu1 }
 0x119   :  { %v2001_v12 = vpop.eup %2000  ;;  %1476 = vst [vmem:[%s3248_s5 + $0x38] sm:$0xff] %v1412_v2  ;;  %v1411_v8 = vmul.f32 %v1999_v4, %v2755_v15  ;;  %2024 = vpow2.f32 %v1125_v58  ;;  %v1129_v43 = vmul.f32 1.442695, %v1043_v1  ;;  %v767_v13 = vadd.f32 %v1899_v11, %v1771_v10  ;;  %v376_v20 = vpop.f32.mrf.mxu0 }
 0x11a   :  { %2026 = vrcp.f32 %v1228_v5  ;;  %v1227_v14 = vadd.f32 1.0, %v2001_v12  ;;  %v1046_v16 = vsub.f32 0.0, %v2848_v6  ;;  %v2856_v18 = vadd.f32 %v2724_v34, %v752_v7  ;;  %v761_v22 = vpop.f32.mrf.mxu1 }
 0x11b   :  { %v2003_v23 = vpop.eup %2002  ;;  %1475 = vst [vmem:[%s3248_s5 + $0x30] sm:$0xff] %v1411_v8  ;;  %2028 = vpow2.f32 %v1131_v63  ;;  %v2862_v15 = vadd.f32 %v2724_v34, %v767_v13  ;;  %v762_v49 = vadd.f32 %v761_v22, %v376_v20  ;;  %v1774_v28 = vpop.f32.mrf.mxu0 }
 0x11c   :  { %v2005_v24 = vpop.eup %2004  ;;  %v1414_v25 = vmul.f32 %v2003_v23, %v2759_v21  ;;  %2030 = vrcp.f32 %v1227_v14  ;;  %v1135_v26 = vmul.f32 1.442695, %v1046_v16  ;;  %v1045_v27 = vsub.f32 0.0, %v2856_v18  ;;  %v1902_v32 = vpop.f32.mrf.mxu1 }
 0x11d   :  { %v2007_v33 = vpop.eup %2006  ;;  %v1230_v36 = vadd.f32 1.0, %v2005_v24  ;;  %2032 = vpow2.f32 %v1129_v43  ;;  %v1048_v37 = vsub.f32 0.0, %v2862_v15  ;;  %v2868_v39 = vadd.f32 %v2724_v34, %v762_v49  ;;  %v386_v45 = vpop.f32.mrf.mxu0 }
 0x11e   :  { %v2009_v40 = vpop.eup %2008  ;;  %1478 = vst [vmem:[%s3248_s5 + $0x48] sm:$0xff] %v1414_v25  ;;  %v1413_v21 = vmul.f32 %v2007_v33, %v2763_v29  ;;  %2034 = vpow2.f32 %v1135_v26  ;;  %v1133_v41 = vmul.f32 1.442695, %v1045_v27  ;;  %v777_v42 = vadd.f32 %v1902_v32, %v1774_v28  ;;  %v771_v46 = vpop.f32.mrf.mxu1 }
 0x11f   :  { %v2011_v47 = vpop.eup %2010  ;;  %2036 = vrcp.f32 %v1230_v36  ;;  %v1229_v50 = vadd.f32 1.0, %v2009_v40  ;;  %v1139_v52 = vmul.f32 1.442695, %v1048_v37  ;;  %v1047_v53 = vsub.f32 0.0, %v2868_v39  ;;  %v1777_v59 = vpop.f32.mrf.mxu0 }
 0x120   :  { %v2013_v57 = vpop.eup %2012  ;;  %1477 = vst [vmem:[%s3248_s5 + $0x40] sm:$0xff] %v1413_v21  ;;  %v1416_v62 = vmul.f32 %v2011_v47, %v2766_v35  ;;  %2038 = vpow2.f32 %v1133_v41  ;;  %v2880_v29 = vadd.f32 %v2724_v34, %v777_v42  ;;  %v772_v58 = vadd.f32 %v771_v46, %v386_v45  ;;  %v1905_v60 = vpop.f32.mrf.mxu1 }
 0x121   :  { %v2015_v61 = vpop.eup %2014  ;;  %2040 = vrcp.f32 %v1229_v50  ;;  %v1232_v38 = vadd.f32 1.0, %v2013_v57  ;;  %v1137_v2 = vmul.f32 1.442695, %v1047_v53  ;;  %v787_v63 = vadd.f32 %v1905_v60, %v1777_v59  ;;  %v396_v7 = vpop.f32.mrf.mxu0 }
 0x122   :  { %v2017_v1 = vpop.eup %2016  ;;  %1480 = vst [vmem:[%s3248_s5 + $0x58] sm:$0xff] %v1416_v62  ;;  %v1415_v4 = vmul.f32 %v2015_v61, %v2771_v48  ;;  %2042 = vpow2.f32 %v1139_v52  ;;  %v1050_v35 = vsub.f32 0.0, %v2880_v29  ;;  %v2888_v5 = vadd.f32 %v2724_v34, %v772_v58  ;;  %v781_v10 = vpop.f32.mrf.mxu1 }
 0x123   :  { %v2019_v11 = vpop.eup %2018  ;;  %v1418_v12 = vmul.f32 %v2017_v1, %v2774_v54  ;;  %2044 = vrcp.f32 %v1232_v38  ;;  %v2892_v8 = vadd.f32 %v2724_v34, %v787_v63  ;;  %v782_v43 = vadd.f32 %v781_v10, %v396_v7  ;;  %v1780_v20 = vpop.f32.mrf.mxu0 }
 0x124   :  { %v2021_v13 = vpop.eup %2020  ;;  %1479 = vst [vmem:[%s3248_s5 + $0x50] sm:$0xff] %v1415_v4  ;;  %v1231_v48 = vadd.f32 1.0, %v2019_v11  ;;  %2046 = vpow2.f32 %v1137_v2  ;;  %v1143_v14 = vmul.f32 1.442695, %v1050_v35  ;;  %v1049_v16 = vsub.f32 0.0, %v2888_v5  ;;  %v1908_v22 = vpop.f32.mrf.mxu1 }
 0x125   :  { %v2023_v23 = vpop.eup %2022  ;;  %1482 = vst [vmem:[%s3248_s5 + $0x68] sm:$0xff] %v1418_v12  ;;  %v1234_v54 = vadd.f32 1.0, %v2021_v13  ;;  %v1052_v49 = vsub.f32 0.0, %v2892_v8  ;;  %v2903_v24 = vadd.f32 %v2724_v34, %v782_v43  ;;  %v797_v25 = vadd.f32 %v1908_v22, %v1780_v20  ;;  %v406_v32 = vpop.f32.mrf.mxu0 }
 0x126   :  { %v2025_v26 = vpop.eup %2024  ;;  %v1417_v27 = vmul.f32 %v2023_v23, %v2779_v3  ;;  %2048 = vrcp.f32 %v1231_v48  ;;  %v1141_v28 = vmul.f32 1.442695, %v1049_v16  ;;  %v791_v33 = vpop.f32.mrf.mxu1 }
 0x127   :  { %v2027_v36 = vpop.eup %2026  ;;  %2050 = vrcp.f32 %v1234_v54  ;;  %v1233_v37 = vadd.f32 1.0, %v2025_v26  ;;  %v1147_v40 = vmul.f32 1.442695, %v1052_v49  ;;  %v1051_v21 = vsub.f32 0.0, %v2903_v24  ;;  %v1783_v46 = vpop.f32.mrf.mxu0 }
 0x128   :  { %v2029_v41 = vpop.eup %2028  ;;  %1481 = vst [vmem:[%s3248_s5 + $0x60] sm:$0xff] %v1417_v27  ;;  %v1420_v42 = vmul.f32 %v2027_v36, %v2782_v9  ;;  %2052 = vpow2.f32 %v1143_v14  ;;  %v2912_v3 = vadd.f32 %v2724_v34, %v797_v25  ;;  %v792_v45 = vadd.f32 %v791_v33, %v406_v32  ;;  %v1911_v47 = vpop.f32.mrf.mxu1 }
 0x129   :  { %v2031_v50 = vpop.eup %2030  ;;  %2054 = vrcp.f32 %v1233_v37  ;;  %v1236_v52 = vadd.f32 1.0, %v2029_v41  ;;  %v1145_v53 = vmul.f32 1.442695, %v1051_v21  ;;  %v807_v57 = vadd.f32 %v1911_v47, %v1783_v46  ;;  %v416_v60 = vpop.f32.mrf.mxu0 }
 0x12a   :  { %v2033_v62 = vpop.eup %2032  ;;  %1484 = vst [vmem:[%s3248_s5 + $0x78] sm:$0xff] %v1420_v42  ;;  %v1419_v58 = vmul.f32 %v2031_v50, %v2787_v19  ;;  %2056 = vpow2.f32 %v1141_v28  ;;  %v1054_v9 = vsub.f32 0.0, %v2912_v3  ;;  %v2920_v59 = vadd.f32 %v2724_v34, %v792_v45  ;;  %v801_v61 = vpop.f32.mrf.mxu1 }
 0x12b   :  { %v2035_v38 = vpop.eup %2034  ;;  %2058 = vrcp.f32 %v1236_v52  ;;  %v1235_v2 = vadd.f32 1.0, %v2033_v62  ;;  %v2923_v63 = vadd.f32 %v2724_v34, %v807_v57  ;;  %v802_v1 = vadd.f32 %v801_v61, %v416_v60  ;;  %v1786_v10 = vpop.f32.mrf.mxu0 }
 0x12c   :  { %v2037_v4 = vpop.eup %2036  ;;  %1483 = vst [vmem:[%s3248_s5 + $0x70] sm:$0xff] %v1419_v58  ;;  %v1238_v19 = vadd.f32 1.0, %v2035_v38  ;;  %2060 = vpow2.f32 %v1147_v40  ;;  %v1151_v35 = vmul.f32 1.442695, %v1054_v9  ;;  %v1053_v7 = vsub.f32 0.0, %v2920_v59  ;;  %v1914_v11 = vpop.f32.mrf.mxu1 }
 0x12d   :  { %v2039_v12 = vpop.eup %2038  ;;  %v1422_v43 = vmul.f32 %v2037_v4, %v2791_v31  ;;  %2062 = vrcp.f32 %v1235_v2  ;;  %v1056_v13 = vsub.f32 0.0, %v2923_v63  ;;  %v2932_v48 = vadd.f32 %v2724_v34, %v802_v1  ;;  %v426_v23 = vpop.f32.mrf.mxu0 }
 0x12e   :  { %v2041_v14 = vpop.eup %2040  ;;  %2064 = vrcp.f32 %v1238_v19  ;;  %v1237_v16 = vadd.f32 1.0, %v2039_v12  ;;  %v1149_v20 = vmul.f32 1.442695, %v1053_v7  ;;  %v817_v22 = vadd.f32 %v1914_v11, %v1786_v10  ;;  %v811_v54 = vpop.f32.mrf.mxu1 }
 0x12f   :  { %v2043_v49 = vpop.eup %2042  ;;  %1486 = vst [vmem:[%s3248_s5 + $0x88] sm:$0xff] %v1422_v43  ;;  %v1421_v31 = vmul.f32 %v2041_v14, %v2795_v44  ;;  %2066 = vpow2.f32 %v1145_v53  ;;  %v1155_v25 = vmul.f32 1.442695, %v1056_v13  ;;  %v1055_v26 = vsub.f32 0.0, %v2932_v48  ;;  %v1789_v36 = vpop.f32.mrf.mxu0 }
 0x130   :  { %v2045_v27 = vpop.eup %2044  ;;  %2068 = vrcp.f32 %v1237_v16  ;;  %v1240_v28 = vadd.f32 1.0, %v2043_v49  ;;  %v2940_v32 = vadd.f32 %v2724_v34, %v817_v22  ;;  %v812_v33 = vadd.f32 %v811_v54, %v426_v23  ;;  %v1917_v37 = vpop.f32.mrf.mxu1 }
 0x131   :  { %v2047_v40 = vpop.eup %2046  ;;  %1485 = vst [vmem:[%s3248_s5 + $0x80] sm:$0xff] %v1421_v31  ;;  %v1424_v44 = vmul.f32 %v2045_v27, %v2799_v51  ;;  %2070 = vpow2.f32 %v1151_v35  ;;  %v1153_v21 = vmul.f32 1.442695, %v1055_v26  ;;  %v827_v41 = vadd.f32 %v1917_v37, %v1789_v36  ;;  %v436_v47 = vpop.f32.mrf.mxu0 }
 0x132   :  { %2072 = vrcp.f32 %v1240_v28  ;;  %v1239_v42 = vadd.f32 1.0, %v2047_v40  ;;  %v1058_v45 = vsub.f32 0.0, %v2940_v32  ;;  %v2948_v46 = vadd.f32 %v2724_v34, %v812_v33  ;;  %v821_v50 = vpop.f32.mrf.mxu1 }
 0x133   :  { %v2049_v52 = vpop.eup %2048  ;;  %1488 = vst [vmem:[%s3248_s5 + $0x98] sm:$0xff] %v1424_v44  ;;  %2074 = vpow2.f32 %v1149_v20  ;;  %v2954_v51 = vadd.f32 %v2724_v34, %v827_v41  ;;  %v822_v53 = vadd.f32 %v821_v50, %v436_v47  ;;  %v1792_v60 = vpop.f32.mrf.mxu0 }
 0x134   :  { %v2051_v57 = vpop.eup %2050  ;;  %v1423_v62 = vmul.f32 %v2049_v52, %v2808_v0  ;;  %2076 = vrcp.f32 %v1239_v42  ;;  %v1159_v58 = vmul.f32 1.442695, %v1058_v45  ;;  %v1057_v9 = vsub.f32 0.0, %v2948_v46  ;;  %v1920_v61 = vpop.f32.mrf.mxu1 }
 0x135   :  { %v2053_v38 = vpop.eup %2052  ;;  %v1426_v2 = vmul.f32 %v2051_v57, %v2816_v17  ;;  %2078 = vpow2.f32 %v1155_v25  ;;  %v1060_v1 = vsub.f32 0.0, %v2954_v51  ;;  %v2961_v4 = vadd.f32 %v2724_v34, %v822_v53  ;;  %v446_v10 = vpop.f32.mrf.mxu0 }
 0x136   :  { %v2055_v19 = vpop.eup %2054  ;;  %1487 = vst [vmem:[%s3248_s5 + $0x90] sm:$0xff] %v1423_v62  ;;  %v1242_v0 = vadd.f32 1.0, %v2053_v38  ;;  %2080 = vpow2.f32 %v1153_v21  ;;  %v1157_v35 = vmul.f32 1.442695, %v1057_v9  ;;  %v837_v7 = vadd.f32 %v1920_v61, %v1792_v60  ;;  %v831_v11 = vpop.f32.mrf.mxu1 }
 0x137   :  { %v2057_v12 = vpop.eup %2056  ;;  %1490 = vst [vmem:[%s3248_s5 + $0xa8] sm:$0xff] %v1426_v2  ;;  %v1425_v17 = vmul.f32 %v2055_v19, %v2824_v30  ;;  %2082 = vpow2.f32 %v1159_v58  ;;  %v1163_v43 = vmul.f32 1.442695, %v1060_v1  ;;  %v1059_v13 = vsub.f32 0.0, %v2961_v4  ;;  %v1795_v23 = vpop.f32.mrf.mxu0 }
 0x138   :  { %v2059_v14 = vpop.eup %2058  ;;  %2084 = vrcp.f32 %v1242_v0  ;;  %v1241_v16 = vadd.f32 1.0, %v2057_v12  ;;  %v2972_v20 = vadd.f32 %v2724_v34, %v837_v7  ;;  %v832_v22 = vadd.f32 %v831_v11, %v446_v10  ;;  %v1923_v54 = vpop.f32.mrf.mxu1 }
 0x139   :  { %v2061_v49 = vpop.eup %2060  ;;  %1489 = vst [vmem:[%s3248_s5 + $0xa0] sm:$0xff] %v1425_v17  ;;  %v1428_v30 = vmul.f32 %v2059_v14, %v2830_v55  ;;  %2086 = vpow2.f32 %v1157_v35  ;;  %v1161_v31 = vmul.f32 1.442695, %v1059_v13  ;;  %v847_v25 = vadd.f32 %v1923_v54, %v1795_v23  ;;  %v456_v36 = vpop.f32.mrf.mxu0 }
 0x13a   :  { %v2063_v26 = vpop.eup %2062  ;;  %2088 = vrcp.f32 %v1241_v16  ;;  %v1244_v27 = vadd.f32 1.0, %v2061_v49  ;;  %v1062_v28 = vsub.f32 0.0, %v2972_v20  ;;  %v2980_v33 = vadd.f32 %v2724_v34, %v832_v22  ;;  %v841_v37 = vpop.f32.mrf.mxu1 }
 0x13b   :  { %v2065_v40 = vpop.eup %2064  ;;  %1492 = vst [vmem:[%s3248_s5 + $0xb8] sm:$0xff] %v1428_v30  ;;  %v1427_v55 = vmul.f32 %v2063_v26, %v2837_v56  ;;  %2090 = vpow2.f32 %v1163_v43  ;;  %v2987_v44 = vadd.f32 %v2724_v34, %v847_v25  ;;  %v842_v21 = vadd.f32 %v841_v37, %v456_v36  ;;  %v1798_v50 = vpop.f32.mrf.mxu0 }
 0x13c   :  { %v2067_v41 = vpop.eup %2066  ;;  %v1430_v42 = vmul.f32 %v2065_v40, %v2848_v6  ;;  %2092 = vrcp.f32 %v1244_v27  ;;  %v1167_v45 = vmul.f32 1.442695, %v1062_v28  ;;  %v1061_v47 = vsub.f32 0.0, %v2980_v33  ;;  %v1926_v52 = vpop.f32.mrf.mxu1 }
 0x13d   :  { %v2069_v53 = vpop.eup %2068  ;;  %1491 = vst [vmem:[%s3248_s5 + $0xb0] sm:$0xff] %v1427_v55  ;;  %v1243_v56 = vadd.f32 1.0, %v2067_v41  ;;  %2094 = vpow2.f32 %v1161_v31  ;;  %v1064_v57 = vsub.f32 0.0, %v2987_v44  ;;  %v2996_v62 = vadd.f32 %v2724_v34, %v842_v21  ;;  %v466_v61 = vpop.f32.mrf.mxu0 }
 0x13e   :  { %v2071_v58 = vpop.eup %2070  ;;  %1494 = vst [vmem:[%s3248_s5 + $0xc8] sm:$0xff] %v1430_v42  ;;  %v1429_v6 = vmul.f32 %v2069_v53, %v2856_v18  ;;  %2096 = vpow2.f32 %v1167_v45  ;;  %v1165_v9 = vmul.f32 1.442695, %v1061_v47  ;;  %v857_v60 = vadd.f32 %v1926_v52, %v1798_v50  ;;  %v851_v38 = vpop.f32.mrf.mxu1 }
 0x13f   :  { %v2073_v2 = vpop.eup %2072  ;;  %2098 = vrcp.f32 %v1243_v56  ;;  %v1246_v1 = vadd.f32 1.0, %v2071_v58  ;;  %v1171_v19 = vmul.f32 1.442695, %v1064_v57  ;;  %v1063_v0 = vsub.f32 0.0, %v2996_v62  ;;  %v1801_v11 = vpop.f32.mrf.mxu0 }
 0x140   :  { %v2075_v35 = vpop.eup %2074  ;;  %1493 = vst [vmem:[%s3248_s5 + $0xc0] sm:$0xff] %v1429_v6  ;;  %v1432_v7 = vmul.f32 %v2073_v2, %v2862_v15  ;;  %2100 = vpow2.f32 %v1165_v9  ;;  %v3008_v18 = vadd.f32 %v2724_v34, %v857_v60  ;;  %v852_v10 = vadd.f32 %v851_v38, %v466_v61  ;;  %v1929_v12 = vpop.f32.mrf.mxu1 }
 0x141   :  { %v2077_v17 = vpop.eup %2076  ;;  %2102 = vrcp.f32 %v1246_v1  ;;  %v1245_v43 = vadd.f32 1.0, %v2075_v35  ;;  %v1169_v13 = vmul.f32 1.442695, %v1063_v0  ;;  %v867_v14 = vadd.f32 %v1929_v12, %v1801_v11  ;;  %v476_v54 = vpop.f32.mrf.mxu0 }
 0x142   :  { %v2079_v16 = vpop.eup %2078  ;;  %1496 = vst [vmem:[%s3248_s5 + $0xd8] sm:$0xff] %v1432_v7  ;;  %v1431_v22 = vmul.f32 %v2077_v17, %v2868_v39  ;;  %2104 = vpow2.f32 %v1171_v19  ;;  %v1066_v15 = vsub.f32 0.0, %v3008_v18  ;;  %v3016_v23 = vadd.f32 %v2724_v34, %v852_v10  ;;  %v861_v49 = vpop.f32.mrf.mxu1 }
 0x143   :  { %v2081_v30 = vpop.eup %2080  ;;  %2106 = vrcp.f32 %v1245_v43  ;;  %v1248_v31 = vadd.f32 1.0, %v2079_v16  ;;  %v3019_v25 = vadd.f32 %v2724_v34, %v867_v14  ;;  %v862_v26 = vadd.f32 %v861_v49, %v476_v54  ;;  %v1804_v37 = vpop.f32.mrf.mxu0  ;;  %v3029_v34 = vld [vmem:[%s3247_s4] ss:$0 sm:$0xff] }
 0x144   :  { %v2083_v27 = vpop.eup %2082  ;;  %1495 = vst [vmem:[%s3248_s5 + $0xd0] sm:$0xff] %v1431_v22  ;;  %v1247_v39 = vadd.f32 1.0, %v2081_v30  ;;  %2108 = vpow2.f32 %v1169_v13  ;;  %v1175_v28 = vmul.f32 1.442695, %v1066_v15  ;;  %v1065_v36 = vsub.f32 0.0, %v3016_v23  ;;  %v1932_v40 = vpop.f32.mrf.mxu1 }
 0x145   :  { %v2085_v55 = vpop.eup %2084  ;;  %2110 = vrcp.f32 %v1248_v31  ;;  %v1250_v21 = vadd.f32 1.0, %v2083_v27  ;;  %v1068_v41 = vsub.f32 0.0, %v3019_v25  ;;  %v3032_v42 = vadd.f32 %v3029_v34, %v862_v26  ;;  %v486_v53 = vpop.f32.mrf.mxu0 }
 0x146   :  { %v2087_v45 = vpop.eup %2086  ;;  %v1434_v47 = vmul.f32 %v2085_v55, %v2880_v29  ;;  %2112 = vrcp.f32 %v1247_v39  ;;  %v1173_v50 = vmul.f32 1.442695, %v1065_v36  ;;  %v877_v52 = vadd.f32 %v1932_v40, %v1804_v37  ;;  %v871_v56 = vpop.f32.mrf.mxu1 }
 0x147   :  { %v2089_v57 = vpop.eup %2088  ;;  %2114 = vrcp.f32 %v1250_v21  ;;  %v1249_v58 = vadd.f32 1.0, %v2087_v45  ;;  %v1179_v6 = vmul.f32 1.442695, %v1068_v41  ;;  %v1067_v9 = vsub.f32 0.0, %v3032_v42  ;;  %v1807_v2 = vpop.f32.mrf.mxu0 }
 0x148   :  { %v2091_v60 = vpop.eup %2090  ;;  %1498 = vst [vmem:[%s3248_s5 + $0xe8] sm:$0xff] %v1434_v47  ;;  %v1433_v61 = vmul.f32 %v2089_v57, %v2888_v5  ;;  %2116 = vpow2.f32 %v1175_v28  ;;  %v3041_v29 = vadd.f32 %v3029_v34, %v877_v52  ;;  %v872_v38 = vadd.f32 %v871_v56, %v486_v53  ;;  %v1935_v1 = vpop.f32.mrf.mxu1 }
 0x149   :  { %v2093_v19 = vpop.eup %2092  ;;  %2118 = vrcp.f32 %v1249_v58  ;;  %v1252_v0 = vadd.f32 1.0, %v2091_v60  ;;  %v1177_v35 = vmul.f32 1.442695, %v1067_v9  ;;  %v887_v7 = vadd.f32 %v1935_v1, %v1807_v2  ;;  %v496_v17 = vpop.f32.mrf.mxu0 }
 0x14a   :  { %v2095_v10 = vpop.eup %2094  ;;  %1497 = vst [vmem:[%s3248_s5 + $0xe0] sm:$0xff] %v1433_v61  ;;  %v1436_v11 = vmul.f32 %v2093_v19, %v2892_v8  ;;  %2120 = vpow2.f32 %v1173_v50  ;;  %v1070_v5 = vsub.f32 0.0, %v3041_v29  ;;  %v3049_v12 = vadd.f32 %v3029_v34, %v872_v38  ;;  %v881_v43 = vpop.f32.mrf.mxu1 }
 0x14b   :  { %v2097_v13 = vpop.eup %2096  ;;  %2122 = vrcp.f32 %v1252_v0  ;;  %v1251_v14 = vadd.f32 1.0, %v2095_v10  ;;  %v3052_v16 = vadd.f32 %v3029_v34, %v887_v7  ;;  %v882_v22 = vadd.f32 %v881_v43, %v496_v17  ;;  %v1810_v30 = vpop.f32.mrf.mxu0 }
 0x14c   :  { %v2099_v15 = vpop.eup %2098  ;;  %1500 = vst [vmem:[%s3248_s5 + $0xf8] sm:$0xff] %v1436_v11  ;;  %v1254_v8 = vadd.f32 1.0, %v2097_v13  ;;  %2124 = vpow2.f32 %v1179_v6  ;;  %v1183_v54 = vmul.f32 1.442695, %v1070_v5  ;;  %v1069_v49 = vsub.f32 0.0, %v3049_v12  ;;  %v1938_v31 = vpop.f32.mrf.mxu1 }
 0x14d   :  { %v2101_v26 = vpop.eup %2100  ;;  %v1435_v27 = vmul.f32 %v2099_v15, %v2903_v24  ;;  %2126 = vrcp.f32 %v1251_v14  ;;  %v1072_v39 = vsub.f32 0.0, %v3052_v16  ;;  %v3061_v28 = vadd.f32 %v3029_v34, %v882_v22  ;;  %v506_v21 = vpop.f32.mrf.mxu0 }
 0x14e   :  { %v2103_v36 = vpop.eup %2102  ;;  %2128 = vrcp.f32 %v1254_v8  ;;  %v1253_v37 = vadd.f32 1.0, %v2101_v26  ;;  %v1181_v40 = vmul.f32 1.442695, %v1069_v49  ;;  %v897_v55 = vadd.f32 %v1938_v31, %v1810_v30  ;;  %v891_v41 = vpop.f32.mrf.mxu1 }
 0x14f   :  { %v2105_v45 = vpop.eup %2104  ;;  %1499 = vst [vmem:[%s3248_s5 + $0xf0] sm:$0xff] %v1435_v27  ;;  %v1438_v24 = vmul.f32 %v2103_v36, %v2912_v3  ;;  %2130 = vpow2.f32 %v1177_v35  ;;  %v1187_v47 = vmul.f32 1.442695, %v1072_v39  ;;  %v1071_v50 = vsub.f32 0.0, %v3061_v28  ;;  %v1813_v58 = vpop.f32.mrf.mxu0 }
 0x150   :  { %v2107_v52 = vpop.eup %2106  ;;  %2132 = vrcp.f32 %v1253_v37  ;;  %v1256_v53 = vadd.f32 1.0, %v2105_v45  ;;  %v3069_v56 = vadd.f32 %v3029_v34, %v897_v55  ;;  %v892_v57 = vadd.f32 %v891_v41, %v506_v21  ;;  %v1941_v6 = vpop.f32.mrf.mxu1 }
 0x151   :  { %v2109_v9 = vpop.eup %2108  ;;  %1502 = vst [vmem:[%s3248_s5 + $0x108] sm:$0xff] %v1438_v24  ;;  %v1437_v3 = vmul.f32 %v2107_v52, %v2920_v59  ;;  %2134 = vpow2.f32 %v1183_v54  ;;  %v1185_v60 = vmul.f32 1.442695, %v1071_v50  ;;  %v907_v61 = vadd.f32 %v1941_v6, %v1813_v58  ;;  %v516_v0 = vpop.f32.mrf.mxu0 }
 0x152   :  { %v2111_v38 = vpop.eup %2110  ;;  %2136 = vrcp.f32 %v1256_v53  ;;  %v1255_v2 = vadd.f32 1.0, %v2109_v9  ;;  %v1074_v1 = vsub.f32 0.0, %v3069_v56  ;;  %v3077_v19 = vadd.f32 %v3029_v34, %v892_v57  ;;  %v901_v35 = vpop.f32.mrf.mxu1 }
 0x153   :  { %v2113_v7 = vpop.eup %2112  ;;  %1501 = vst [vmem:[%s3248_s5 + $0x100] sm:$0xff] %v1437_v3  ;;  %v1440_v59 = vmul.f32 %v2111_v38, %v2923_v63  ;;  %2138 = vpow2.f32 %v1181_v40  ;;  %v3084_v10 = vadd.f32 %v3029_v34, %v907_v61  ;;  %v902_v11 = vadd.f32 %v901_v35, %v516_v0  ;;  %v1816_v14 = vpop.f32.mrf.mxu0 }
 0x154   :  { %v2115_v5 = vpop.eup %2114  ;;  %v1439_v17 = vmul.f32 %v2113_v7, %v2932_v48  ;;  %2140 = vrcp.f32 %v1255_v2  ;;  %v1191_v43 = vmul.f32 1.442695, %v1074_v1  ;;  %v1073_v13 = vsub.f32 0.0, %v3077_v19  ;;  %v1944_v22 = vpop.f32.mrf.mxu1 }
 0x155   :  { %v2117_v15 = vpop.eup %2116  ;;  %1504 = vst [vmem:[%s3248_s5 + $0x118] sm:$0xff] %v1440_v59  ;;  %v1442_v63 = vmul.f32 %v2115_v5, %v2940_v32  ;;  %2142 = vpow2.f32 %v1187_v47  ;;  %v1076_v8 = vsub.f32 0.0, %v3084_v10  ;;  %v3094_v54 = vadd.f32 %v3029_v34, %v902_v11  ;;  %v526_v26 = vpop.f32.mrf.mxu0 }
 0x156   :  { %v2119_v48 = vpop.eup %2118  ;;  %1503 = vst [vmem:[%s3248_s5 + $0x110] sm:$0xff] %v1439_v17  ;;  %v1258_v49 = vadd.f32 1.0, %v2117_v15  ;;  %2144 = vpow2.f32 %v1185_v60  ;;  %v1189_v30 = vmul.f32 1.442695, %v1073_v13  ;;  %v917_v31 = vadd.f32 %v1944_v22, %v1816_v14  ;;  %v911_v27 = vpop.f32.mrf.mxu1 }
 0x157   :  { %v2121_v39 = vpop.eup %2120  ;;  %1506 = vst [vmem:[%s3248_s5 + $0x128] sm:$0xff] %v1442_v63  ;;  %v1441_v32 = vmul.f32 %v2119_v48, %v2948_v46  ;;  %2146 = vpow2.f32 %v1191_v43  ;;  %v1195_v36 = vmul.f32 1.442695, %v1076_v8  ;;  %v1075_v37 = vsub.f32 0.0, %v3094_v54  ;;  %v1819_v45 = vpop.f32.mrf.mxu0 }
 0x158   :  { %v2123_v40 = vpop.eup %2122  ;;  %2148 = vrcp.f32 %v1258_v49  ;;  %v1257_v55 = vadd.f32 1.0, %v2121_v39  ;;  %v3105_v21 = vadd.f32 %v3029_v34, %v917_v31  ;;  %v912_v41 = vadd.f32 %v911_v27, %v526_v26  ;;  %v1947_v24 = vpop.f32.mrf.mxu1 }
 0x159   :  { %v2125_v47 = vpop.eup %2124  ;;  %1505 = vst [vmem:[%s3248_s5 + $0x120] sm:$0xff] %v1441_v32  ;;  %v1444_v46 = vmul.f32 %v2123_v40, %v2954_v51  ;;  %2150 = vpow2.f32 %v1189_v30  ;;  %v1193_v50 = vmul.f32 1.442695, %v1075_v37  ;;  %v927_v52 = vadd.f32 %v1947_v24, %v1819_v45  ;;  %v536_v9 = vpop.f32.mrf.mxu0 }
 0x15a   :  { %v2127_v53 = vpop.eup %2126  ;;  %2152 = vrcp.f32 %v1257_v55  ;;  %v1260_v57 = vadd.f32 1.0, %v2125_v47  ;;  %v1078_v58 = vsub.f32 0.0, %v3105_v21  ;;  %v3113_v6 = vadd.f32 %v3029_v34, %v912_v41  ;;  %v921_v3 = vpop.f32.mrf.mxu1 }
 0x15b   :  { %v2129_v60 = vpop.eup %2128  ;;  %1508 = vst [vmem:[%s3248_s5 + $0x138] sm:$0xff] %v1444_v46  ;;  %v1443_v51 = vmul.f32 %v2127_v53, %v2961_v4  ;;  %2154 = vpow2.f32 %v1195_v36  ;;  %v3120_v61 = vadd.f32 %v3029_v34, %v927_v52  ;;  %v922_v38 = vadd.f32 %v921_v3, %v536_v9  ;;  %v1822_v7 = vpop.f32.mrf.mxu0 }
 0x15c   :  { %v2131_v2 = vpop.eup %2130  ;;  %v1446_v1 = vmul.f32 %v2129_v60, %v2972_v20  ;;  %2156 = vrcp.f32 %v1260_v57  ;;  %v1199_v0 = vmul.f32 1.442695, %v1078_v58  ;;  %v1077_v35 = vsub.f32 0.0, %v3113_v6  ;;  %v1950_v59 = vpop.f32.mrf.mxu1 }
 0x15d   :  { %v2133_v11 = vpop.eup %2132  ;;  %1507 = vst [vmem:[%s3248_s5 + $0x130] sm:$0xff] %v1443_v51  ;;  %v1259_v4 = vadd.f32 1.0, %v2131_v2  ;;  %2158 = vpow2.f32 %v1193_v50  ;;  %v1080_v5 = vsub.f32 0.0, %v3120_v61  ;;  %v3129_v17 = vadd.f32 %v3029_v34, %v922_v38  ;;  %v546_v22 = vpop.f32.mrf.mxu0 }
 0x15e   :  { %v2135_v43 = vpop.eup %2134  ;;  %1510 = vst [vmem:[%s3248_s5 + $0x148] sm:$0xff] %v1446_v1  ;;  %v1445_v20 = vmul.f32 %v2133_v11, %v2980_v33  ;;  %2160 = vpow2.f32 %v1199_v0  ;;  %v1197_v13 = vmul.f32 1.442695, %v1077_v35  ;;  %v937_v14 = vadd.f32 %v1950_v59, %v1822_v7  ;;  %v931_v15 = vpop.f32.mrf.mxu1 }
 0x15f   :  { %v2137_v63 = vpop.eup %2136  ;;  %2162 = vrcp.f32 %v1259_v4  ;;  %v1262_v8 = vadd.f32 1.0, %v2135_v43  ;;  %v1203_v48 = vmul.f32 1.442695, %v1080_v5  ;;  %v1079_v49 = vsub.f32 0.0, %v3129_v17  ;;  %v1825_v27 = vpop.f32.mrf.mxu0 }
 0x160   :  { %v2139_v30 = vpop.eup %2138  ;;  %1509 = vst [vmem:[%s3248_s5 + $0x140] sm:$0xff] %v1445_v20  ;;  %v1448_v31 = vmul.f32 %v2137_v63, %v2987_v44  ;;  %2164 = vpow2.f32 %v1197_v13  ;;  %v3141_v33 = vadd.f32 %v3029_v34, %v937_v14  ;;  %v932_v26 = vadd.f32 %v931_v15, %v546_v22  ;;  %v1953_v39 = vpop.f32.mrf.mxu1 }
 0x161   :  { %v2141_v32 = vpop.eup %2140  ;;  %2166 = vrcp.f32 %v1262_v8  ;;  %v1261_v36 = vadd.f32 1.0, %v2139_v30  ;;  %v1201_v37 = vmul.f32 1.442695, %v1079_v49  ;;  %v947_v40 = vadd.f32 %v1953_v39, %v1825_v27  ;;  %v556_v24 = vpop.f32.mrf.mxu0 }
 0x162   :  { %v2143_v55 = vpop.eup %2142  ;;  %1512 = vst [vmem:[%s3248_s5 + $0x158] sm:$0xff] %v1448_v31  ;;  %v1447_v41 = vmul.f32 %v2141_v32, %v2996_v62  ;;  %2168 = vpow2.f32 %v1203_v48  ;;  %v1082_v44 = vsub.f32 0.0, %v3141_v33  ;;  %v3149_v45 = vadd.f32 %v3029_v34, %v932_v26  ;;  %v941_v47 = vpop.f32.mrf.mxu1 }
 0x163   :  { %v2145_v46 = vpop.eup %2144  ;;  %2170 = vrcp.f32 %v1261_v36  ;;  %v1264_v50 = vadd.f32 1.0, %v2143_v55  ;;  %v3152_v52 = vadd.f32 %v3029_v34, %v947_v40  ;;  %v942_v53 = vadd.f32 %v941_v47, %v556_v24 }
 0x164   :  { %v2147_v57 = vpop.eup %2146  ;;  %1511 = vst [vmem:[%s3248_s5 + $0x150] sm:$0xff] %v1447_v41  ;;  %v1263_v62 = vadd.f32 1.0, %v2145_v46  ;;  %2172 = vpow2.f32 %v1201_v37  ;;  %v1207_v58 = vmul.f32 1.442695, %v1082_v44  ;;  %v1081_v9 = vsub.f32 0.0, %v3149_v45 }
 0x165   :  { %v2149_v3 = vpop.eup %2148  ;;  %2174 = vrcp.f32 %v1264_v50  ;;  %v1266_v60 = vadd.f32 1.0, %v2147_v57  ;;  %v1084_v51 = vsub.f32 0.0, %v3152_v52  ;;  %v3160_v38 = vadd.f32 %v3029_v34, %v942_v53 }
 0x166   :  { %v2151_v2 = vpop.eup %2150  ;;  %v1450_v1 = vmul.f32 %v2149_v3, %v3008_v18  ;;  %2176 = vrcp.f32 %v1263_v62  ;;  %v1205_v0 = vmul.f32 1.442695, %v1081_v9 }
 0x167   :  { %v2153_v35 = vpop.eup %2152  ;;  %2178 = vrcp.f32 %v1266_v60  ;;  %v1265_v7 = vadd.f32 1.0, %v2151_v2  ;;  %v1083_v59 = vsub.f32 0.0, %v3160_v38  ;;  %v1211_v34 = vmul.f32 1.442695, %v1084_v51 }
 0x168   :  { %v2155_v11 = vpop.eup %2154  ;;  %1514 = vst [vmem:[%s3248_s5 + $0x168] sm:$0xff] %v1450_v1  ;;  %v1449_v4 = vmul.f32 %v2153_v35, %v3016_v23  ;;  %2180 = vpow2.f32 %v1207_v58 }
 0x169   :  { %v2157_v5 = vpop.eup %2156  ;;  %2182 = vrcp.f32 %v1265_v7  ;;  %v1268_v43 = vadd.f32 1.0, %v2155_v11  ;;  %v1209_v22 = vmul.f32 1.442695, %v1083_v59 }
 0x16a   :  { %v2159_v18 = vpop.eup %2158  ;;  %1513 = vst [vmem:[%s3248_s5 + $0x160] sm:$0xff] %v1449_v4  ;;  %v1452_v20 = vmul.f32 %v2157_v5, %v3019_v25  ;;  %2184 = vpow2.f32 %v1205_v0 }
 0x16b   :  { %v2161_v13 = vpop.eup %2160  ;;  %2186 = vrcp.f32 %v1268_v43  ;;  %v1267_v14 = vadd.f32 1.0, %v2159_v18 }
 0x16c   :  { %v2163_v15 = vpop.eup %2162  ;;  %1516 = vst [vmem:[%s3248_s5 + $0x178] sm:$0xff] %v1452_v20  ;;  %v1270_v23 = vadd.f32 1.0, %v2161_v13  ;;  %2188 = vpow2.f32 %v1211_v34 }
 0x16d   :  { %v2165_v63 = vpop.eup %2164  ;;  %v1451_v8 = vmul.f32 %v2163_v15, %v3032_v42  ;;  %2190 = vrcp.f32 %v1267_v14 }
 0x16e   :  { %v2167_v48 = vpop.eup %2166  ;;  %2192 = vrcp.f32 %v1270_v23  ;;  %v1269_v49 = vadd.f32 1.0, %v2165_v63 }
 0x16f   :  { %v2169_v25 = vpop.eup %2168  ;;  %1515 = vst [vmem:[%s3248_s5 + $0x170] sm:$0xff] %v1451_v8  ;;  %v1454_v30 = vmul.f32 %v2167_v48, %v3041_v29  ;;  %2194 = vpow2.f32 %v1209_v22 }
 0x170   :  { %v2171_v31 = vpop.eup %2170  ;;  %2196 = vrcp.f32 %v1269_v49  ;;  %v1272_v26 = vadd.f32 1.0, %v2169_v25 }
 0x171   :  { %v2173_v27 = vpop.eup %2172  ;;  %1518 = vst [vmem:[%s3248_s5 + $0x188] sm:$0xff] %v1454_v30  ;;  %v1453_v42 = vmul.f32 %v2171_v31, %v3049_v12 }
 0x172   :  { %v2175_v39 = vpop.eup %2174  ;;  %2198 = vrcp.f32 %v1272_v26  ;;  %v1271_v32 = vadd.f32 1.0, %v2173_v27 }
 0x173   :  { %v2177_v36 = vpop.eup %2176  ;;  %1517 = vst [vmem:[%s3248_s5 + $0x180] sm:$0xff] %v1453_v42  ;;  %v1456_v29 = vmul.f32 %v2175_v39, %v3052_v16 }
 0x174   :  { %v2179_v37 = vpop.eup %2178  ;;  %v1455_v40 = vmul.f32 %v2177_v36, %v3061_v28  ;;  %2200 = vrcp.f32 %v1271_v32 }
 0x175   :  { %v2181_v55 = vpop.eup %2180  ;;  %1520 = vst [vmem:[%s3248_s5 + $0x198] sm:$0xff] %v1456_v29  ;;  %v1458_v12 = vmul.f32 %v2179_v37, %v3069_v56 }
 0x176   :  { %v2183_v41 = vpop.eup %2182  ;;  %1519 = vst [vmem:[%s3248_s5 + $0x190] sm:$0xff] %v1455_v40  ;;  %v1274_v44 = vadd.f32 1.0, %v2181_v55 }
 0x177   :  { %v2185_v24 = vpop.eup %2184  ;;  %1522 = vst [vmem:[%s3248_s5 + $0x1a8] sm:$0xff] %v1458_v12  ;;  %v1457_v16 = vmul.f32 %v2183_v41, %v3077_v19 }
 0x178   :  { %v2187_v28 = vpop.eup %2186  ;;  %2202 = vrcp.f32 %v1274_v44  ;;  %v1273_v47 = vadd.f32 1.0, %v2185_v24 }
 0x179   :  { %v2189_v46 = vpop.eup %2188  ;;  %1521 = vst [vmem:[%s3248_s5 + $0x1a0] sm:$0xff] %v1457_v16  ;;  %v1460_v56 = vmul.f32 %v2187_v28, %v3084_v10 }
 0x17a   :  { %v2191_v50 = vpop.eup %2190  ;;  %2204 = vrcp.f32 %v1273_v47  ;;  %v1276_v53 = vadd.f32 1.0, %v2189_v46 }
 0x17b   :  { %v2193_v57 = vpop.eup %2192  ;;  %1524 = vst [vmem:[%s3248_s5 + $0x1b8] sm:$0xff] %v1460_v56  ;;  %v1459_v19 = vmul.f32 %v2191_v50, %v3094_v54 }
 0x17c   :  { %v2195_v62 = vpop.eup %2194  ;;  %v1462_v58 = vmul.f32 %v2193_v57, %v3105_v21  ;;  %2206 = vrcp.f32 %v1276_v53 }
 0x17d   :  { %v2197_v9 = vpop.eup %2196  ;;  %1523 = vst [vmem:[%s3248_s5 + $0x1b0] sm:$0xff] %v1459_v19  ;;  %v1275_v10 = vadd.f32 1.0, %v2195_v62 }
 0x17e   :  { %1526 = vst [vmem:[%s3248_s5 + $0x1c8] sm:$0xff] %v1462_v58  ;;  %v1461_v3 = vmul.f32 %v2197_v9, %v3113_v6 }
 0x17f   :  { %v2199_v60 = vpop.eup %2198  ;;  %2208 = vrcp.f32 %v1275_v10 }
 0x180   :  { %1525 = vst [vmem:[%s3248_s5 + $0x1c0] sm:$0xff] %v1461_v3  ;;  %v1464_v54 = vmul.f32 %v2199_v60, %v3120_v61 }
 0x181   :  { %v2201_v21 = vpop.eup %2200 }
 0x182   :  { %1528 = vst [vmem:[%s3248_s5 + $0x1d8] sm:$0xff] %v1464_v54  ;;  %v1463_v51 = vmul.f32 %v2201_v21, %v3129_v17 }
 0x184   :  { %1527 = vst [vmem:[%s3248_s5 + $0x1d0] sm:$0xff] %v1463_v51 }
 0x185   :  { %v2203_v6 = vpop.eup %2202 }
 0x186   :  { %v1466_v2 = vmul.f32 %v2203_v6, %v3141_v33 }
 0x187   :  { %v2205_v1 = vpop.eup %2204 }
 0x188   :  { %1530 = vst [vmem:[%s3248_s5 + $0x1e8] sm:$0xff] %v1466_v2  ;;  %v1465_v61 = vmul.f32 %v2205_v1, %v3149_v45 }
 0x189   :  { %v2207_v0 = vpop.eup %2206 }
 0x18a   :  { %1529 = vst [vmem:[%s3248_s5 + $0x1e0] sm:$0xff] %v1465_v61  ;;  %v1468_v17 = vmul.f32 %v2207_v0, %v3152_v52 }
 0x18c   :  { %v2209_v35 = vpop.eup %2208  ;;  %1532 = vst [vmem:[%s3248_s5 + $0x1f8] sm:$0xff] %v1468_v17 }
 0x18d   :  { %v1467_v33 = vmul.f32 %v2209_v35, %v3160_v38 }
 0x18f   :  { %1531 = vst [vmem:[%s3248_s5 + $0x1f0] sm:$0xff] %v1467_v33 }

</bundles_post_ra>
